<compile_context>
chip_gen: v7x
topology: tpu7x:2x2x1
jax: 0.10.0
libtpu: 0.0.40
codegen_flags: <defaults>
</compile_context>

<pallas_src>
import functools

import numpy as np

import jax
import jax.numpy as jnp
from jax.experimental import pallas as pl
from jax.experimental.pallas import tpu as pltpu

_LANE = 128


# ------------------------------ Pallas kernel ------------------------------ #
def _disc_fused_kernel(*refs, n_layers, apply_acts):
    """Full discriminator forward for ONE image (grid axis = batch).

    refs layout:
      refs[0]                : x      (1, Hp0, Wp0*C0)        bf16
      refs[1+3l], l=0..L-1   : G_l    (k_l, WpIn*Cin, WpOut*Cout)  bf16
      refs[2+3l]             : R_l    (k_l, HpOut, HpIn)           bf16
      refs[3+3l]             : S_l    (HpOut, WpOut*Cout)          f32 (shift plane)
      refs[1+3L]             : out    (1, HoL, out_cols)           f32
    """
    x_ref = refs[0]
    out_ref = refs[1 + 3 * n_layers]

    cur = x_ref[0]                                  # (Hp0, Wp0*C0) bf16 value
    for l in range(n_layers):
        g_ref = refs[1 + 3 * l]
        r_ref = refs[2 + 3 * l]
        s_ref = refs[3 + 3 * l]
        k = r_ref.shape[0]

        acc = None
        for ki in range(k):
            # Row selection (stride + vertical tap); values are exact copies.
            rows = jnp.dot(r_ref[ki], cur,
                           preferred_element_type=jnp.float32).astype(jnp.bfloat16)
            # Banded matmul: horizontal taps + channel contraction + BN scale,
            # producing the already-zero-padded next activation map.
            part = jnp.dot(rows, g_ref[ki], preferred_element_type=jnp.float32)
            acc = part if acc is None else acc + part

        y = acc + s_ref[...]                        # conv bias + folded BN shift
        if apply_acts[l]:
            y = jnp.maximum(y, 0.2 * y)             # LeakyReLU(0.2) (one VPU op)

        if l < n_layers - 1:
            cur = y.astype(jnp.bfloat16)            # stays resident, no HBM
        else:
            out_ref[0] = y


# --------------------------- operand preprocessing ------------------------- #
def _fold_scale_shift(layer, eps=1e-5):
    """Fold conv bias + eval-mode BatchNorm into (scaled weight, shift). numpy."""
    w = np.asarray(layer["weight"], np.float32)         # (Cout, Cin, k, k)
    b = np.asarray(layer["bias"], np.float32)
    if layer["bn"]:
        gamma = np.asarray(layer["gamma"], np.float32)
        beta = np.asarray(layer["beta"], np.float32)
        mean = np.asarray(layer["running_mean"], np.float32)
        var = np.asarray(layer["running_var"], np.float32)
        scale = gamma / np.sqrt(var + eps)
        shift = (b - mean) * scale + beta
        w = w * scale[:, None, None, None]
    else:
        shift = b
    return w, shift


def build_fused_operands(params, height, width):
    """One-time (per weight set) construction of the banded matmul operands."""
    n_layers = len(params)
    pad0 = params[0]["pad"]
    hp = height + 2 * pad0
    wp = width + 2 * pad0

    ops = []
    apply_acts = []
    out_h = out_cols = logit_cols = 1
    for l, layer in enumerate(params):
        k, s = layer["k"], layer["stride"]
        cout, cin = layer["weight"].shape[0], layer["weight"].shape[1]
        ho = (hp - k) // s + 1
        wo = (wp - k) // s + 1
        pad_next = params[l + 1]["pad"] if l + 1 < n_layers else 0
        hpo, wpo = ho + 2 * pad_next, wo + 2 * pad_next

        wf, shift = _fold_scale_shift(layer)

        # G_ki[(wp_in, ci), (wq_out, co)] = W[co, ci, ki, wp_in - s*wo]  (banded),
        # with zero columns on the next layer's padding ring.
        g = np.zeros((k, wp, cin, wpo, cout), np.float32)
        for ki in range(k):
            for kj in range(k):
                for j in range(wo):
                    g[ki, s * j + kj, :, pad_next + j, :] = wf[:, :, ki, kj].T
        g = g.reshape(k, wp * cin, wpo * cout)

        # R_ki[r, hp_in] = 1 iff r is an interior output row and hp_in = s*ho + ki.
        r = np.zeros((k, hpo, hp), np.float32)
        for ki in range(k):
            for i in range(ho):
                r[ki, pad_next + i, s * i + ki] = 1.0

        # Shift plane: bias/BN shift on the interior, exact zeros on the border.
        sp = np.zeros((hpo, wpo, cout), np.float32)
        sp[pad_next:pad_next + ho, pad_next:pad_next + wo, :] = shift[None, None, :]
        sp = sp.reshape(hpo, wpo * cout)

        if l == n_layers - 1:
            # Pad the final (logit) layer's output columns to a full lane width.
            logit_cols = wpo * cout
            out_cols = -(-logit_cols // _LANE) * _LANE
            if out_cols > logit_cols:
                g = np.pad(g, ((0, 0), (0, 0), (0, out_cols - logit_cols)))
                sp = np.pad(sp, ((0, 0), (0, out_cols - logit_cols)))
            out_h = hpo

        ops.append((jnp.asarray(g, dtype=jnp.bfloat16),
                    jnp.asarray(r, dtype=jnp.bfloat16),
                    jnp.asarray(sp, dtype=jnp.float32)))
        apply_acts.append(bool(layer["act"]))
        hp, wp = hpo, wpo

    meta = (pad0, out_h, out_cols, logit_cols, tuple(apply_acts))
    return ops, meta


# --------------------------------- forward --------------------------------- #
def discriminator_forward(ops, meta, x_nchw):
    """x_nchw: (N, C, H, W) f32 -> (N,) f32 (matches .view(-1, 1).squeeze(1))."""
    pad0, out_h, out_cols, logit_cols, apply_acts = meta
    n = x_nchw.shape[0]

    # Minimal XLA-side layout prep: NCHW -> padded NHWC, (Wp, C) merged on lanes.
    x = jnp.transpose(x_nchw, (0, 2, 3, 1))
    if pad0:
        x = jnp.pad(x, ((0, 0), (pad0, pad0), (pad0, pad0), (0, 0)))
    _, hp, wp, c = x.shape
    x = x.reshape(n, hp, wp * c).astype(jnp.bfloat16)

    inputs = [x]
    in_specs = [pl.BlockSpec((1, hp, wp * c), lambda i: (i, 0, 0))]
    for g, r, s in ops:
        inputs += [g, r, s]
        in_specs += [pl.BlockSpec(g.shape, lambda i: (0, 0, 0)),
                     pl.BlockSpec(r.shape, lambda i: (0, 0, 0)),
                     pl.BlockSpec(s.shape, lambda i: (0, 0))]

    kernel = functools.partial(_disc_fused_kernel,
                               n_layers=len(ops), apply_acts=apply_acts)
    out = pl.pallas_call(
        kernel,
        out_shape=jax.ShapeDtypeStruct((n, out_h, out_cols), jnp.float32),
        grid=(n,),
        in_specs=in_specs,
        out_specs=pl.BlockSpec((1, out_h, out_cols), lambda i: (i, 0, 0)),
        compiler_params=pltpu.CompilerParams(
            dimension_semantics=("parallel",)),       # one image per core on v7x
    )(*inputs)
    return out[:, :, :logit_cols].reshape(-1)


# ------------------------------- parameters --------------------------------- #
def init_discriminator_params(key, nch_img, nch_dis):
    """Deterministic parameter init matching the PyTorch module's shapes."""
    # (Cin, Cout, k, stride, pad, has_bn, has_act)
    layer_cfg = [
        (nch_img,       nch_dis // 16, 3, 1, 1, False, True),
        (nch_dis // 16, nch_dis // 8,  4, 2, 1, True,  True),
        (nch_dis // 8,  nch_dis // 4,  4, 2, 1, True,  True),
        (nch_dis // 4,  nch_dis // 2,  4, 2, 1, True,  True),
        (nch_dis // 2,  nch_dis,       4, 2, 1, True,  True),
        (nch_dis,       1,             4, 1, 0, False, False),
    ]
    params = []
    for (cin, cout, k, s, p, bn, act) in layer_cfg:
        key, kw_, kb_ = jax.random.split(key, 3)
        weight = 0.02 * jax.random.normal(kw_, (cout, cin, k, k), jnp.float32)
        bias = 0.02 * jax.random.normal(kb_, (cout,), jnp.float32)
        layer = {
            "weight": weight, "bias": bias,
            "k": k, "stride": s, "pad": p, "bn": bn, "act": act,
        }
        if bn:
            # fresh nn.BatchNorm2d: gamma=1, beta=0, running_mean=0, running_var=1
            layer["gamma"] = jnp.ones((cout,), jnp.float32)
            layer["beta"] = jnp.zeros((cout,), jnp.float32)
            layer["running_mean"] = jnp.zeros((cout,), jnp.float32)
            layer["running_var"] = jnp.ones((cout,), jnp.float32)
        params.append(layer)
    return params


# ----------------------------------- main ----------------------------------- #
if __name__ == "__main__":
    key = jax.random.PRNGKey(0)
    k_params, k_input = jax.random.split(key)

    nch_img = 4        # input channels
    nch_dis = 64       # channel chain: 4 -> 8 -> 16 -> 32 -> 64 -> 1
    batch = 2
    spatial = 64       # DCGAN geometry: final 4x4 'valid' conv needs a 4x4 map

    x = jax.random.normal(k_input, (batch, nch_img, spatial, spatial), jnp.float32)
    params = init_discriminator_params(k_params, nch_img, nch_dis)
    ops, meta = build_fused_operands(params, spatial, spatial)

    fwd = jax.jit(discriminator_forward, static_argnums=(1,))
    out = jax.block_until_ready(fwd(ops, meta, x))
    assert out.shape == (batch,), out.shape
    print("KERNEL_OK")
</pallas_src>

<mosaic_0001>
module attributes {stable_mosaic.version = 11 : i64} {
  func.func @_disc_fused_kernel(%arg0: i32, %arg1: memref<1x66x264xbf16, #tpu.memory_space<vmem>>, %arg2: memref<3x264x264xbf16, #tpu.memory_space<vmem>>, %arg3: memref<3x66x66xbf16, #tpu.memory_space<vmem>>, %arg4: memref<66x264xf32, #tpu.memory_space<vmem>>, %arg5: memref<4x264x272xbf16, #tpu.memory_space<vmem>>, %arg6: memref<4x34x66xbf16, #tpu.memory_space<vmem>>, %arg7: memref<34x272xf32, #tpu.memory_space<vmem>>, %arg8: memref<4x272x288xbf16, #tpu.memory_space<vmem>>, %arg9: memref<4x18x34xbf16, #tpu.memory_space<vmem>>, %arg10: memref<18x288xf32, #tpu.memory_space<vmem>>, %arg11: memref<4x288x320xbf16, #tpu.memory_space<vmem>>, %arg12: memref<4x10x18xbf16, #tpu.memory_space<vmem>>, %arg13: memref<10x320xf32, #tpu.memory_space<vmem>>, %arg14: memref<4x320x256xbf16, #tpu.memory_space<vmem>>, %arg15: memref<4x4x10xbf16, #tpu.memory_space<vmem>>, %arg16: memref<4x256xf32, #tpu.memory_space<vmem>>, %arg17: memref<4x256x128xbf16, #tpu.memory_space<vmem>>, %arg18: memref<4x1x4xbf16, #tpu.memory_space<vmem>>, %arg19: memref<1x128xf32, #tpu.memory_space<vmem>>, %arg20: memref<1x1x128xf32, #tpu.memory_space<vmem>>) attributes {dimension_semantics = [#tpu.dimension_semantics<parallel>], iteration_bounds = array<i64: 2>, scalar_prefetch = 0 : i64, scratch_operands = 0 : i64, tpu.core_type = #tpu.core_type<tc>, window_params = [{transform_indices = @transform_0, window_bounds = array<i64: 1, 66, 264>}, {pipeline_mode = #tpu.pipeline_mode<synchronous>, transform_indices = @transform_1, window_bounds = array<i64: 3, 264, 264>}, {pipeline_mode = #tpu.pipeline_mode<synchronous>, transform_indices = @transform_2, window_bounds = array<i64: 3, 66, 66>}, {pipeline_mode = #tpu.pipeline_mode<synchronous>, transform_indices = @transform_3, window_bounds = array<i64: 66, 264>}, {pipeline_mode = #tpu.pipeline_mode<synchronous>, transform_indices = @transform_4, window_bounds = array<i64: 4, 264, 272>}, {pipeline_mode = #tpu.pipeline_mode<synchronous>, transform_indices = @transform_5, window_bounds = array<i64: 4, 34, 66>}, {pipeline_mode = #tpu.pipeline_mode<synchronous>, transform_indices = @transform_6, window_bounds = array<i64: 34, 272>}, {pipeline_mode = #tpu.pipeline_mode<synchronous>, transform_indices = @transform_7, window_bounds = array<i64: 4, 272, 288>}, {pipeline_mode = #tpu.pipeline_mode<synchronous>, transform_indices = @transform_8, window_bounds = array<i64: 4, 18, 34>}, {pipeline_mode = #tpu.pipeline_mode<synchronous>, transform_indices = @transform_9, window_bounds = array<i64: 18, 288>}, {pipeline_mode = #tpu.pipeline_mode<synchronous>, transform_indices = @transform_10, window_bounds = array<i64: 4, 288, 320>}, {pipeline_mode = #tpu.pipeline_mode<synchronous>, transform_indices = @transform_11, window_bounds = array<i64: 4, 10, 18>}, {pipeline_mode = #tpu.pipeline_mode<synchronous>, transform_indices = @transform_12, window_bounds = array<i64: 10, 320>}, {pipeline_mode = #tpu.pipeline_mode<synchronous>, transform_indices = @transform_13, window_bounds = array<i64: 4, 320, 256>}, {pipeline_mode = #tpu.pipeline_mode<synchronous>, transform_indices = @transform_14, window_bounds = array<i64: 4, 4, 10>}, {pipeline_mode = #tpu.pipeline_mode<synchronous>, transform_indices = @transform_15, window_bounds = array<i64: 4, 256>}, {pipeline_mode = #tpu.pipeline_mode<synchronous>, transform_indices = @transform_16, window_bounds = array<i64: 4, 256, 128>}, {pipeline_mode = #tpu.pipeline_mode<synchronous>, transform_indices = @transform_17, window_bounds = array<i64: 4, 1, 4>}, {pipeline_mode = #tpu.pipeline_mode<synchronous>, transform_indices = @transform_18, window_bounds = array<i64: 1, 128>}, {transform_indices = @transform_19, window_bounds = array<i64: 1, 1, 128>}]} {
    %c0 = arith.constant 0 : index
    %c0_0 = arith.constant 0 : index
    %c0_1 = arith.constant 0 : index
    %0 = vector.load %arg1[%c0, %c0_0, %c0_1] : memref<1x66x264xbf16, #tpu.memory_space<vmem>>, vector<1x66x264xbf16>
    %1 = vector.shape_cast %0 : vector<1x66x264xbf16> to vector<66x264xbf16>
    %c0_2 = arith.constant 0 : index
    %c0_3 = arith.constant 0 : index
    %c0_4 = arith.constant 0 : index
    %2 = vector.load %arg3[%c0_2, %c0_3, %c0_4] : memref<3x66x66xbf16, #tpu.memory_space<vmem>>, vector<1x66x66xbf16>
    %3 = vector.shape_cast %2 : vector<1x66x66xbf16> to vector<66x66xbf16>
    %cst = arith.constant dense<0.000000e+00> : vector<66x264xf32>
    %4 = tpu.matmul %3, %1, %cst {dimension_numbers = #tpu.dot_dimension_numbers<[1], [0], [0], [1], [0, 0, 1, 1], [], []>} : vector<66x66xbf16>, vector<66x264xbf16>, vector<66x264xf32> -> vector<66x264xf32>
    %5 = arith.truncf %4 : vector<66x264xf32> to vector<66x264xbf16>
    %c0_5 = arith.constant 0 : index
    %c0_6 = arith.constant 0 : index
    %c0_7 = arith.constant 0 : index
    %6 = vector.load %arg2[%c0_5, %c0_6, %c0_7] : memref<3x264x264xbf16, #tpu.memory_space<vmem>>, vector<1x264x264xbf16>
    %7 = vector.shape_cast %6 : vector<1x264x264xbf16> to vector<264x264xbf16>
    %cst_8 = arith.constant dense<0.000000e+00> : vector<66x264xf32>
    %8 = tpu.matmul %5, %7, %cst_8 {dimension_numbers = #tpu.dot_dimension_numbers<[1], [0], [0], [1], [0, 0, 1, 1], [], []>} : vector<66x264xbf16>, vector<264x264xbf16>, vector<66x264xf32> -> vector<66x264xf32>
    %c1 = arith.constant 1 : index
    %c0_9 = arith.constant 0 : index
    %c0_10 = arith.constant 0 : index
    %9 = vector.load %arg3[%c1, %c0_9, %c0_10] : memref<3x66x66xbf16, #tpu.memory_space<vmem>>, vector<1x66x66xbf16>
    %10 = vector.shape_cast %9 : vector<1x66x66xbf16> to vector<66x66xbf16>
    %cst_11 = arith.constant dense<0.000000e+00> : vector<66x264xf32>
    %11 = tpu.matmul %10, %1, %cst_11 {dimension_numbers = #tpu.dot_dimension_numbers<[1], [0], [0], [1], [0, 0, 1, 1], [], []>} : vector<66x66xbf16>, vector<66x264xbf16>, vector<66x264xf32> -> vector<66x264xf32>
    %12 = arith.truncf %11 : vector<66x264xf32> to vector<66x264xbf16>
    %c1_12 = arith.constant 1 : index
    %c0_13 = arith.constant 0 : index
    %c0_14 = arith.constant 0 : index
    %13 = vector.load %arg2[%c1_12, %c0_13, %c0_14] : memref<3x264x264xbf16, #tpu.memory_space<vmem>>, vector<1x264x264xbf16>
    %14 = vector.shape_cast %13 : vector<1x264x264xbf16> to vector<264x264xbf16>
    %cst_15 = arith.constant dense<0.000000e+00> : vector<66x264xf32>
    %15 = tpu.matmul %12, %14, %cst_15 {dimension_numbers = #tpu.dot_dimension_numbers<[1], [0], [0], [1], [0, 0, 1, 1], [], []>} : vector<66x264xbf16>, vector<264x264xbf16>, vector<66x264xf32> -> vector<66x264xf32>
    %16 = arith.addf %8, %15 : vector<66x264xf32>
    %c2 = arith.constant 2 : index
    %c0_16 = arith.constant 0 : index
    %c0_17 = arith.constant 0 : index
    %17 = vector.load %arg3[%c2, %c0_16, %c0_17] : memref<3x66x66xbf16, #tpu.memory_space<vmem>>, vector<1x66x66xbf16>
    %18 = vector.shape_cast %17 : vector<1x66x66xbf16> to vector<66x66xbf16>
    %cst_18 = arith.constant dense<0.000000e+00> : vector<66x264xf32>
    %19 = tpu.matmul %18, %1, %cst_18 {dimension_numbers = #tpu.dot_dimension_numbers<[1], [0], [0], [1], [0, 0, 1, 1], [], []>} : vector<66x66xbf16>, vector<66x264xbf16>, vector<66x264xf32> -> vector<66x264xf32>
    %20 = arith.truncf %19 : vector<66x264xf32> to vector<66x264xbf16>
    %c2_19 = arith.constant 2 : index
    %c0_20 = arith.constant 0 : index
    %c0_21 = arith.constant 0 : index
    %21 = vector.load %arg2[%c2_19, %c0_20, %c0_21] : memref<3x264x264xbf16, #tpu.memory_space<vmem>>, vector<1x264x264xbf16>
    %22 = vector.shape_cast %21 : vector<1x264x264xbf16> to vector<264x264xbf16>
    %cst_22 = arith.constant dense<0.000000e+00> : vector<66x264xf32>
    %23 = tpu.matmul %20, %22, %cst_22 {dimension_numbers = #tpu.dot_dimension_numbers<[1], [0], [0], [1], [0, 0, 1, 1], [], []>} : vector<66x264xbf16>, vector<264x264xbf16>, vector<66x264xf32> -> vector<66x264xf32>
    %24 = arith.addf %16, %23 : vector<66x264xf32>
    %c0_23 = arith.constant 0 : index
    %c0_24 = arith.constant 0 : index
    %25 = vector.load %arg4[%c0_23, %c0_24] : memref<66x264xf32, #tpu.memory_space<vmem>>, vector<66x264xf32>
    %26 = arith.addf %24, %25 : vector<66x264xf32>
    %cst_25 = arith.constant 2.000000e-01 : f32
    %27 = vector.broadcast %cst_25 : f32 to vector<66x264xf32>
    %28 = arith.mulf %27, %26 : vector<66x264xf32>
    %29 = arith.maximumf %26, %28 : vector<66x264xf32>
    %30 = arith.truncf %29 : vector<66x264xf32> to vector<66x264xbf16>
    %c0_26 = arith.constant 0 : index
    %c0_27 = arith.constant 0 : index
    %c0_28 = arith.constant 0 : index
    %31 = vector.load %arg6[%c0_26, %c0_27, %c0_28] : memref<4x34x66xbf16, #tpu.memory_space<vmem>>, vector<1x34x66xbf16>
    %32 = vector.shape_cast %31 : vector<1x34x66xbf16> to vector<34x66xbf16>
    %cst_29 = arith.constant dense<0.000000e+00> : vector<34x264xf32>
    %33 = tpu.matmul %32, %30, %cst_29 {dimension_numbers = #tpu.dot_dimension_numbers<[1], [0], [0], [1], [0, 0, 1, 1], [], []>} : vector<34x66xbf16>, vector<66x264xbf16>, vector<34x264xf32> -> vector<34x264xf32>
    %34 = arith.truncf %33 : vector<34x264xf32> to vector<34x264xbf16>
    %c0_30 = arith.constant 0 : index
    %c0_31 = arith.constant 0 : index
    %c0_32 = arith.constant 0 : index
    %35 = vector.load %arg5[%c0_30, %c0_31, %c0_32] : memref<4x264x272xbf16, #tpu.memory_space<vmem>>, vector<1x264x272xbf16>
    %36 = vector.shape_cast %35 : vector<1x264x272xbf16> to vector<264x272xbf16>
    %cst_33 = arith.constant dense<0.000000e+00> : vector<34x272xf32>
    %37 = tpu.matmul %34, %36, %cst_33 {dimension_numbers = #tpu.dot_dimension_numbers<[1], [0], [0], [1], [0, 0, 1, 1], [], []>} : vector<34x264xbf16>, vector<264x272xbf16>, vector<34x272xf32> -> vector<34x272xf32>
    %c1_34 = arith.constant 1 : index
    %c0_35 = arith.constant 0 : index
    %c0_36 = arith.constant 0 : index
    %38 = vector.load %arg6[%c1_34, %c0_35, %c0_36] : memref<4x34x66xbf16, #tpu.memory_space<vmem>>, vector<1x34x66xbf16>
    %39 = vector.shape_cast %38 : vector<1x34x66xbf16> to vector<34x66xbf16>
    %cst_37 = arith.constant dense<0.000000e+00> : vector<34x264xf32>
    %40 = tpu.matmul %39, %30, %cst_37 {dimension_numbers = #tpu.dot_dimension_numbers<[1], [0], [0], [1], [0, 0, 1, 1], [], []>} : vector<34x66xbf16>, vector<66x264xbf16>, vector<34x264xf32> -> vector<34x264xf32>
    %41 = arith.truncf %40 : vector<34x264xf32> to vector<34x264xbf16>
    %c1_38 = arith.constant 1 : index
    %c0_39 = arith.constant 0 : index
    %c0_40 = arith.constant 0 : index
    %42 = vector.load %arg5[%c1_38, %c0_39, %c0_40] : memref<4x264x272xbf16, #tpu.memory_space<vmem>>, vector<1x264x272xbf16>
    %43 = vector.shape_cast %42 : vector<1x264x272xbf16> to vector<264x272xbf16>
    %cst_41 = arith.constant dense<0.000000e+00> : vector<34x272xf32>
    %44 = tpu.matmul %41, %43, %cst_41 {dimension_numbers = #tpu.dot_dimension_numbers<[1], [0], [0], [1], [0, 0, 1, 1], [], []>} : vector<34x264xbf16>, vector<264x272xbf16>, vector<34x272xf32> -> vector<34x272xf32>
    %45 = arith.addf %37, %44 : vector<34x272xf32>
    %c2_42 = arith.constant 2 : index
    %c0_43 = arith.constant 0 : index
    %c0_44 = arith.constant 0 : index
    %46 = vector.load %arg6[%c2_42, %c0_43, %c0_44] : memref<4x34x66xbf16, #tpu.memory_space<vmem>>, vector<1x34x66xbf16>
    %47 = vector.shape_cast %46 : vector<1x34x66xbf16> to vector<34x66xbf16>
    %cst_45 = arith.constant dense<0.000000e+00> : vector<34x264xf32>
    %48 = tpu.matmul %47, %30, %cst_45 {dimension_numbers = #tpu.dot_dimension_numbers<[1], [0], [0], [1], [0, 0, 1, 1], [], []>} : vector<34x66xbf16>, vector<66x264xbf16>, vector<34x264xf32> -> vector<34x264xf32>
    %49 = arith.truncf %48 : vector<34x264xf32> to vector<34x264xbf16>
    %c2_46 = arith.constant 2 : index
    %c0_47 = arith.constant 0 : index
    %c0_48 = arith.constant 0 : index
    %50 = vector.load %arg5[%c2_46, %c0_47, %c0_48] : memref<4x264x272xbf16, #tpu.memory_space<vmem>>, vector<1x264x272xbf16>
    %51 = vector.shape_cast %50 : vector<1x264x272xbf16> to vector<264x272xbf16>
    %cst_49 = arith.constant dense<0.000000e+00> : vector<34x272xf32>
    %52 = tpu.matmul %49, %51, %cst_49 {dimension_numbers = #tpu.dot_dimension_numbers<[1], [0], [0], [1], [0, 0, 1, 1], [], []>} : vector<34x264xbf16>, vector<264x272xbf16>, vector<34x272xf32> -> vector<34x272xf32>
    %53 = arith.addf %45, %52 : vector<34x272xf32>
    %c3 = arith.constant 3 : index
    %c0_50 = arith.constant 0 : index
    %c0_51 = arith.constant 0 : index
    %54 = vector.load %arg6[%c3, %c0_50, %c0_51] : memref<4x34x66xbf16, #tpu.memory_space<vmem>>, vector<1x34x66xbf16>
    %55 = vector.shape_cast %54 : vector<1x34x66xbf16> to vector<34x66xbf16>
    %cst_52 = arith.constant dense<0.000000e+00> : vector<34x264xf32>
    %56 = tpu.matmul %55, %30, %cst_52 {dimension_numbers = #tpu.dot_dimension_numbers<[1], [0], [0], [1], [0, 0, 1, 1], [], []>} : vector<34x66xbf16>, vector<66x264xbf16>, vector<34x264xf32> -> vector<34x264xf32>
    %57 = arith.truncf %56 : vector<34x264xf32> to vector<34x264xbf16>
    %c3_53 = arith.constant 3 : index
    %c0_54 = arith.constant 0 : index
    %c0_55 = arith.constant 0 : index
    %58 = vector.load %arg5[%c3_53, %c0_54, %c0_55] : memref<4x264x272xbf16, #tpu.memory_space<vmem>>, vector<1x264x272xbf16>
    %59 = vector.shape_cast %58 : vector<1x264x272xbf16> to vector<264x272xbf16>
    %cst_56 = arith.constant dense<0.000000e+00> : vector<34x272xf32>
    %60 = tpu.matmul %57, %59, %cst_56 {dimension_numbers = #tpu.dot_dimension_numbers<[1], [0], [0], [1], [0, 0, 1, 1], [], []>} : vector<34x264xbf16>, vector<264x272xbf16>, vector<34x272xf32> -> vector<34x272xf32>
    %61 = arith.addf %53, %60 : vector<34x272xf32>
    %c0_57 = arith.constant 0 : index
    %c0_58 = arith.constant 0 : index
    %62 = vector.load %arg7[%c0_57, %c0_58] : memref<34x272xf32, #tpu.memory_space<vmem>>, vector<34x272xf32>
    %63 = arith.addf %61, %62 : vector<34x272xf32>
    %cst_59 = arith.constant 2.000000e-01 : f32
    %64 = vector.broadcast %cst_59 : f32 to vector<34x272xf32>
    %65 = arith.mulf %64, %63 : vector<34x272xf32>
    %66 = arith.maximumf %63, %65 : vector<34x272xf32>
    %67 = arith.truncf %66 : vector<34x272xf32> to vector<34x272xbf16>
    %c0_60 = arith.constant 0 : index
    %c0_61 = arith.constant 0 : index
    %c0_62 = arith.constant 0 : index
    %68 = vector.load %arg9[%c0_60, %c0_61, %c0_62] : memref<4x18x34xbf16, #tpu.memory_space<vmem>>, vector<1x18x34xbf16>
    %69 = vector.shape_cast %68 : vector<1x18x34xbf16> to vector<18x34xbf16>
    %cst_63 = arith.constant dense<0.000000e+00> : vector<18x272xf32>
    %70 = tpu.matmul %69, %67, %cst_63 {dimension_numbers = #tpu.dot_dimension_numbers<[1], [0], [0], [1], [0, 0, 1, 1], [], []>} : vector<18x34xbf16>, vector<34x272xbf16>, vector<18x272xf32> -> vector<18x272xf32>
    %71 = arith.truncf %70 : vector<18x272xf32> to vector<18x272xbf16>
    %c0_64 = arith.constant 0 : index
    %c0_65 = arith.constant 0 : index
    %c0_66 = arith.constant 0 : index
    %72 = vector.load %arg8[%c0_64, %c0_65, %c0_66] : memref<4x272x288xbf16, #tpu.memory_space<vmem>>, vector<1x272x288xbf16>
    %73 = vector.shape_cast %72 : vector<1x272x288xbf16> to vector<272x288xbf16>
    %cst_67 = arith.constant dense<0.000000e+00> : vector<18x288xf32>
    %74 = tpu.matmul %71, %73, %cst_67 {dimension_numbers = #tpu.dot_dimension_numbers<[1], [0], [0], [1], [0, 0, 1, 1], [], []>} : vector<18x272xbf16>, vector<272x288xbf16>, vector<18x288xf32> -> vector<18x288xf32>
    %c1_68 = arith.constant 1 : index
    %c0_69 = arith.constant 0 : index
    %c0_70 = arith.constant 0 : index
    %75 = vector.load %arg9[%c1_68, %c0_69, %c0_70] : memref<4x18x34xbf16, #tpu.memory_space<vmem>>, vector<1x18x34xbf16>
    %76 = vector.shape_cast %75 : vector<1x18x34xbf16> to vector<18x34xbf16>
    %cst_71 = arith.constant dense<0.000000e+00> : vector<18x272xf32>
    %77 = tpu.matmul %76, %67, %cst_71 {dimension_numbers = #tpu.dot_dimension_numbers<[1], [0], [0], [1], [0, 0, 1, 1], [], []>} : vector<18x34xbf16>, vector<34x272xbf16>, vector<18x272xf32> -> vector<18x272xf32>
    %78 = arith.truncf %77 : vector<18x272xf32> to vector<18x272xbf16>
    %c1_72 = arith.constant 1 : index
    %c0_73 = arith.constant 0 : index
    %c0_74 = arith.constant 0 : index
    %79 = vector.load %arg8[%c1_72, %c0_73, %c0_74] : memref<4x272x288xbf16, #tpu.memory_space<vmem>>, vector<1x272x288xbf16>
    %80 = vector.shape_cast %79 : vector<1x272x288xbf16> to vector<272x288xbf16>
    %cst_75 = arith.constant dense<0.000000e+00> : vector<18x288xf32>
    %81 = tpu.matmul %78, %80, %cst_75 {dimension_numbers = #tpu.dot_dimension_numbers<[1], [0], [0], [1], [0, 0, 1, 1], [], []>} : vector<18x272xbf16>, vector<272x288xbf16>, vector<18x288xf32> -> vector<18x288xf32>
    %82 = arith.addf %74, %81 : vector<18x288xf32>
    %c2_76 = arith.constant 2 : index
    %c0_77 = arith.constant 0 : index
    %c0_78 = arith.constant 0 : index
    %83 = vector.load %arg9[%c2_76, %c0_77, %c0_78] : memref<4x18x34xbf16, #tpu.memory_space<vmem>>, vector<1x18x34xbf16>
    %84 = vector.shape_cast %83 : vector<1x18x34xbf16> to vector<18x34xbf16>
    %cst_79 = arith.constant dense<0.000000e+00> : vector<18x272xf32>
    %85 = tpu.matmul %84, %67, %cst_79 {dimension_numbers = #tpu.dot_dimension_numbers<[1], [0], [0], [1], [0, 0, 1, 1], [], []>} : vector<18x34xbf16>, vector<34x272xbf16>, vector<18x272xf32> -> vector<18x272xf32>
    %86 = arith.truncf %85 : vector<18x272xf32> to vector<18x272xbf16>
    %c2_80 = arith.constant 2 : index
    %c0_81 = arith.constant 0 : index
    %c0_82 = arith.constant 0 : index
    %87 = vector.load %arg8[%c2_80, %c0_81, %c0_82] : memref<4x272x288xbf16, #tpu.memory_space<vmem>>, vector<1x272x288xbf16>
    %88 = vector.shape_cast %87 : vector<1x272x288xbf16> to vector<272x288xbf16>
    %cst_83 = arith.constant dense<0.000000e+00> : vector<18x288xf32>
    %89 = tpu.matmul %86, %88, %cst_83 {dimension_numbers = #tpu.dot_dimension_numbers<[1], [0], [0], [1], [0, 0, 1, 1], [], []>} : vector<18x272xbf16>, vector<272x288xbf16>, vector<18x288xf32> -> vector<18x288xf32>
    %90 = arith.addf %82, %89 : vector<18x288xf32>
    %c3_84 = arith.constant 3 : index
    %c0_85 = arith.constant 0 : index
    %c0_86 = arith.constant 0 : index
    %91 = vector.load %arg9[%c3_84, %c0_85, %c0_86] : memref<4x18x34xbf16, #tpu.memory_space<vmem>>, vector<1x18x34xbf16>
    %92 = vector.shape_cast %91 : vector<1x18x34xbf16> to vector<18x34xbf16>
    %cst_87 = arith.constant dense<0.000000e+00> : vector<18x272xf32>
    %93 = tpu.matmul %92, %67, %cst_87 {dimension_numbers = #tpu.dot_dimension_numbers<[1], [0], [0], [1], [0, 0, 1, 1], [], []>} : vector<18x34xbf16>, vector<34x272xbf16>, vector<18x272xf32> -> vector<18x272xf32>
    %94 = arith.truncf %93 : vector<18x272xf32> to vector<18x272xbf16>
    %c3_88 = arith.constant 3 : index
    %c0_89 = arith.constant 0 : index
    %c0_90 = arith.constant 0 : index
    %95 = vector.load %arg8[%c3_88, %c0_89, %c0_90] : memref<4x272x288xbf16, #tpu.memory_space<vmem>>, vector<1x272x288xbf16>
    %96 = vector.shape_cast %95 : vector<1x272x288xbf16> to vector<272x288xbf16>
    %cst_91 = arith.constant dense<0.000000e+00> : vector<18x288xf32>
    %97 = tpu.matmul %94, %96, %cst_91 {dimension_numbers = #tpu.dot_dimension_numbers<[1], [0], [0], [1], [0, 0, 1, 1], [], []>} : vector<18x272xbf16>, vector<272x288xbf16>, vector<18x288xf32> -> vector<18x288xf32>
    %98 = arith.addf %90, %97 : vector<18x288xf32>
    %c0_92 = arith.constant 0 : index
    %c0_93 = arith.constant 0 : index
    %99 = vector.load %arg10[%c0_92, %c0_93] : memref<18x288xf32, #tpu.memory_space<vmem>>, vector<18x288xf32>
    %100 = arith.addf %98, %99 : vector<18x288xf32>
    %cst_94 = arith.constant 2.000000e-01 : f32
    %101 = vector.broadcast %cst_94 : f32 to vector<18x288xf32>
    %102 = arith.mulf %101, %100 : vector<18x288xf32>
    %103 = arith.maximumf %100, %102 : vector<18x288xf32>
    %104 = arith.truncf %103 : vector<18x288xf32> to vector<18x288xbf16>
    %c0_95 = arith.constant 0 : index
    %c0_96 = arith.constant 0 : index
    %c0_97 = arith.constant 0 : index
    %105 = vector.load %arg12[%c0_95, %c0_96, %c0_97] : memref<4x10x18xbf16, #tpu.memory_space<vmem>>, vector<1x10x18xbf16>
    %106 = vector.shape_cast %105 : vector<1x10x18xbf16> to vector<10x18xbf16>
    %cst_98 = arith.constant dense<0.000000e+00> : vector<10x288xf32>
    %107 = tpu.matmul %106, %104, %cst_98 {dimension_numbers = #tpu.dot_dimension_numbers<[1], [0], [0], [1], [0, 0, 1, 1], [], []>} : vector<10x18xbf16>, vector<18x288xbf16>, vector<10x288xf32> -> vector<10x288xf32>
    %108 = arith.truncf %107 : vector<10x288xf32> to vector<10x288xbf16>
    %c0_99 = arith.constant 0 : index
    %c0_100 = arith.constant 0 : index
    %c0_101 = arith.constant 0 : index
    %109 = vector.load %arg11[%c0_99, %c0_100, %c0_101] : memref<4x288x320xbf16, #tpu.memory_space<vmem>>, vector<1x288x320xbf16>
    %110 = vector.shape_cast %109 : vector<1x288x320xbf16> to vector<288x320xbf16>
    %cst_102 = arith.constant dense<0.000000e+00> : vector<10x320xf32>
    %111 = tpu.matmul %108, %110, %cst_102 {dimension_numbers = #tpu.dot_dimension_numbers<[1], [0], [0], [1], [0, 0, 1, 1], [], []>} : vector<10x288xbf16>, vector<288x320xbf16>, vector<10x320xf32> -> vector<10x320xf32>
    %c1_103 = arith.constant 1 : index
    %c0_104 = arith.constant 0 : index
    %c0_105 = arith.constant 0 : index
    %112 = vector.load %arg12[%c1_103, %c0_104, %c0_105] : memref<4x10x18xbf16, #tpu.memory_space<vmem>>, vector<1x10x18xbf16>
    %113 = vector.shape_cast %112 : vector<1x10x18xbf16> to vector<10x18xbf16>
    %cst_106 = arith.constant dense<0.000000e+00> : vector<10x288xf32>
    %114 = tpu.matmul %113, %104, %cst_106 {dimension_numbers = #tpu.dot_dimension_numbers<[1], [0], [0], [1], [0, 0, 1, 1], [], []>} : vector<10x18xbf16>, vector<18x288xbf16>, vector<10x288xf32> -> vector<10x288xf32>
    %115 = arith.truncf %114 : vector<10x288xf32> to vector<10x288xbf16>
    %c1_107 = arith.constant 1 : index
    %c0_108 = arith.constant 0 : index
    %c0_109 = arith.constant 0 : index
    %116 = vector.load %arg11[%c1_107, %c0_108, %c0_109] : memref<4x288x320xbf16, #tpu.memory_space<vmem>>, vector<1x288x320xbf16>
    %117 = vector.shape_cast %116 : vector<1x288x320xbf16> to vector<288x320xbf16>
    %cst_110 = arith.constant dense<0.000000e+00> : vector<10x320xf32>
    %118 = tpu.matmul %115, %117, %cst_110 {dimension_numbers = #tpu.dot_dimension_numbers<[1], [0], [0], [1], [0, 0, 1, 1], [], []>} : vector<10x288xbf16>, vector<288x320xbf16>, vector<10x320xf32> -> vector<10x320xf32>
    %119 = arith.addf %111, %118 : vector<10x320xf32>
    %c2_111 = arith.constant 2 : index
    %c0_112 = arith.constant 0 : index
    %c0_113 = arith.constant 0 : index
    %120 = vector.load %arg12[%c2_111, %c0_112, %c0_113] : memref<4x10x18xbf16, #tpu.memory_space<vmem>>, vector<1x10x18xbf16>
    %121 = vector.shape_cast %120 : vector<1x10x18xbf16> to vector<10x18xbf16>
    %cst_114 = arith.constant dense<0.000000e+00> : vector<10x288xf32>
    %122 = tpu.matmul %121, %104, %cst_114 {dimension_numbers = #tpu.dot_dimension_numbers<[1], [0], [0], [1], [0, 0, 1, 1], [], []>} : vector<10x18xbf16>, vector<18x288xbf16>, vector<10x288xf32> -> vector<10x288xf32>
    %123 = arith.truncf %122 : vector<10x288xf32> to vector<10x288xbf16>
    %c2_115 = arith.constant 2 : index
    %c0_116 = arith.constant 0 : index
    %c0_117 = arith.constant 0 : index
    %124 = vector.load %arg11[%c2_115, %c0_116, %c0_117] : memref<4x288x320xbf16, #tpu.memory_space<vmem>>, vector<1x288x320xbf16>
    %125 = vector.shape_cast %124 : vector<1x288x320xbf16> to vector<288x320xbf16>
    %cst_118 = arith.constant dense<0.000000e+00> : vector<10x320xf32>
    %126 = tpu.matmul %123, %125, %cst_118 {dimension_numbers = #tpu.dot_dimension_numbers<[1], [0], [0], [1], [0, 0, 1, 1], [], []>} : vector<10x288xbf16>, vector<288x320xbf16>, vector<10x320xf32> -> vector<10x320xf32>
    %127 = arith.addf %119, %126 : vector<10x320xf32>
    %c3_119 = arith.constant 3 : index
    %c0_120 = arith.constant 0 : index
    %c0_121 = arith.constant 0 : index
    %128 = vector.load %arg12[%c3_119, %c0_120, %c0_121] : memref<4x10x18xbf16, #tpu.memory_space<vmem>>, vector<1x10x18xbf16>
    %129 = vector.shape_cast %128 : vector<1x10x18xbf16> to vector<10x18xbf16>
    %cst_122 = arith.constant dense<0.000000e+00> : vector<10x288xf32>
    %130 = tpu.matmul %129, %104, %cst_122 {dimension_numbers = #tpu.dot_dimension_numbers<[1], [0], [0], [1], [0, 0, 1, 1], [], []>} : vector<10x18xbf16>, vector<18x288xbf16>, vector<10x288xf32> -> vector<10x288xf32>
    %131 = arith.truncf %130 : vector<10x288xf32> to vector<10x288xbf16>
    %c3_123 = arith.constant 3 : index
    %c0_124 = arith.constant 0 : index
    %c0_125 = arith.constant 0 : index
    %132 = vector.load %arg11[%c3_123, %c0_124, %c0_125] : memref<4x288x320xbf16, #tpu.memory_space<vmem>>, vector<1x288x320xbf16>
    %133 = vector.shape_cast %132 : vector<1x288x320xbf16> to vector<288x320xbf16>
    %cst_126 = arith.constant dense<0.000000e+00> : vector<10x320xf32>
    %134 = tpu.matmul %131, %133, %cst_126 {dimension_numbers = #tpu.dot_dimension_numbers<[1], [0], [0], [1], [0, 0, 1, 1], [], []>} : vector<10x288xbf16>, vector<288x320xbf16>, vector<10x320xf32> -> vector<10x320xf32>
    %135 = arith.addf %127, %134 : vector<10x320xf32>
    %c0_127 = arith.constant 0 : index
    %c0_128 = arith.constant 0 : index
    %136 = vector.load %arg13[%c0_127, %c0_128] : memref<10x320xf32, #tpu.memory_space<vmem>>, vector<10x320xf32>
    %137 = arith.addf %135, %136 : vector<10x320xf32>
    %cst_129 = arith.constant 2.000000e-01 : f32
    %138 = vector.broadcast %cst_129 : f32 to vector<10x320xf32>
    %139 = arith.mulf %138, %137 : vector<10x320xf32>
    %140 = arith.maximumf %137, %139 : vector<10x320xf32>
    %141 = arith.truncf %140 : vector<10x320xf32> to vector<10x320xbf16>
    %c0_130 = arith.constant 0 : index
    %c0_131 = arith.constant 0 : index
    %c0_132 = arith.constant 0 : index
    %142 = vector.load %arg15[%c0_130, %c0_131, %c0_132] : memref<4x4x10xbf16, #tpu.memory_space<vmem>>, vector<1x4x10xbf16>
    %143 = vector.shape_cast %142 : vector<1x4x10xbf16> to vector<4x10xbf16>
    %cst_133 = arith.constant dense<0.000000e+00> : vector<4x320xf32>
    %144 = tpu.matmul %143, %141, %cst_133 {dimension_numbers = #tpu.dot_dimension_numbers<[1], [0], [0], [1], [0, 0, 1, 1], [], []>} : vector<4x10xbf16>, vector<10x320xbf16>, vector<4x320xf32> -> vector<4x320xf32>
    %145 = arith.truncf %144 : vector<4x320xf32> to vector<4x320xbf16>
    %c0_134 = arith.constant 0 : index
    %c0_135 = arith.constant 0 : index
    %c0_136 = arith.constant 0 : index
    %146 = vector.load %arg14[%c0_134, %c0_135, %c0_136] : memref<4x320x256xbf16, #tpu.memory_space<vmem>>, vector<1x320x256xbf16>
    %147 = vector.shape_cast %146 : vector<1x320x256xbf16> to vector<320x256xbf16>
    %cst_137 = arith.constant dense<0.000000e+00> : vector<4x256xf32>
    %148 = tpu.matmul %145, %147, %cst_137 {dimension_numbers = #tpu.dot_dimension_numbers<[1], [0], [0], [1], [0, 0, 1, 1], [], []>} : vector<4x320xbf16>, vector<320x256xbf16>, vector<4x256xf32> -> vector<4x256xf32>
    %c1_138 = arith.constant 1 : index
    %c0_139 = arith.constant 0 : index
    %c0_140 = arith.constant 0 : index
    %149 = vector.load %arg15[%c1_138, %c0_139, %c0_140] : memref<4x4x10xbf16, #tpu.memory_space<vmem>>, vector<1x4x10xbf16>
    %150 = vector.shape_cast %149 : vector<1x4x10xbf16> to vector<4x10xbf16>
    %cst_141 = arith.constant dense<0.000000e+00> : vector<4x320xf32>
    %151 = tpu.matmul %150, %141, %cst_141 {dimension_numbers = #tpu.dot_dimension_numbers<[1], [0], [0], [1], [0, 0, 1, 1], [], []>} : vector<4x10xbf16>, vector<10x320xbf16>, vector<4x320xf32> -> vector<4x320xf32>
    %152 = arith.truncf %151 : vector<4x320xf32> to vector<4x320xbf16>
    %c1_142 = arith.constant 1 : index
    %c0_143 = arith.constant 0 : index
    %c0_144 = arith.constant 0 : index
    %153 = vector.load %arg14[%c1_142, %c0_143, %c0_144] : memref<4x320x256xbf16, #tpu.memory_space<vmem>>, vector<1x320x256xbf16>
    %154 = vector.shape_cast %153 : vector<1x320x256xbf16> to vector<320x256xbf16>
    %cst_145 = arith.constant dense<0.000000e+00> : vector<4x256xf32>
    %155 = tpu.matmul %152, %154, %cst_145 {dimension_numbers = #tpu.dot_dimension_numbers<[1], [0], [0], [1], [0, 0, 1, 1], [], []>} : vector<4x320xbf16>, vector<320x256xbf16>, vector<4x256xf32> -> vector<4x256xf32>
    %156 = arith.addf %148, %155 : vector<4x256xf32>
    %c2_146 = arith.constant 2 : index
    %c0_147 = arith.constant 0 : index
    %c0_148 = arith.constant 0 : index
    %157 = vector.load %arg15[%c2_146, %c0_147, %c0_148] : memref<4x4x10xbf16, #tpu.memory_space<vmem>>, vector<1x4x10xbf16>
    %158 = vector.shape_cast %157 : vector<1x4x10xbf16> to vector<4x10xbf16>
    %cst_149 = arith.constant dense<0.000000e+00> : vector<4x320xf32>
    %159 = tpu.matmul %158, %141, %cst_149 {dimension_numbers = #tpu.dot_dimension_numbers<[1], [0], [0], [1], [0, 0, 1, 1], [], []>} : vector<4x10xbf16>, vector<10x320xbf16>, vector<4x320xf32> -> vector<4x320xf32>
    %160 = arith.truncf %159 : vector<4x320xf32> to vector<4x320xbf16>
    %c2_150 = arith.constant 2 : index
    %c0_151 = arith.constant 0 : index
    %c0_152 = arith.constant 0 : index
    %161 = vector.load %arg14[%c2_150, %c0_151, %c0_152] : memref<4x320x256xbf16, #tpu.memory_space<vmem>>, vector<1x320x256xbf16>
    %162 = vector.shape_cast %161 : vector<1x320x256xbf16> to vector<320x256xbf16>
    %cst_153 = arith.constant dense<0.000000e+00> : vector<4x256xf32>
    %163 = tpu.matmul %160, %162, %cst_153 {dimension_numbers = #tpu.dot_dimension_numbers<[1], [0], [0], [1], [0, 0, 1, 1], [], []>} : vector<4x320xbf16>, vector<320x256xbf16>, vector<4x256xf32> -> vector<4x256xf32>
    %164 = arith.addf %156, %163 : vector<4x256xf32>
    %c3_154 = arith.constant 3 : index
    %c0_155 = arith.constant 0 : index
    %c0_156 = arith.constant 0 : index
    %165 = vector.load %arg15[%c3_154, %c0_155, %c0_156] : memref<4x4x10xbf16, #tpu.memory_space<vmem>>, vector<1x4x10xbf16>
    %166 = vector.shape_cast %165 : vector<1x4x10xbf16> to vector<4x10xbf16>
    %cst_157 = arith.constant dense<0.000000e+00> : vector<4x320xf32>
    %167 = tpu.matmul %166, %141, %cst_157 {dimension_numbers = #tpu.dot_dimension_numbers<[1], [0], [0], [1], [0, 0, 1, 1], [], []>} : vector<4x10xbf16>, vector<10x320xbf16>, vector<4x320xf32> -> vector<4x320xf32>
    %168 = arith.truncf %167 : vector<4x320xf32> to vector<4x320xbf16>
    %c3_158 = arith.constant 3 : index
    %c0_159 = arith.constant 0 : index
    %c0_160 = arith.constant 0 : index
    %169 = vector.load %arg14[%c3_158, %c0_159, %c0_160] : memref<4x320x256xbf16, #tpu.memory_space<vmem>>, vector<1x320x256xbf16>
    %170 = vector.shape_cast %169 : vector<1x320x256xbf16> to vector<320x256xbf16>
    %cst_161 = arith.constant dense<0.000000e+00> : vector<4x256xf32>
    %171 = tpu.matmul %168, %170, %cst_161 {dimension_numbers = #tpu.dot_dimension_numbers<[1], [0], [0], [1], [0, 0, 1, 1], [], []>} : vector<4x320xbf16>, vector<320x256xbf16>, vector<4x256xf32> -> vector<4x256xf32>
    %172 = arith.addf %164, %171 : vector<4x256xf32>
    %c0_162 = arith.constant 0 : index
    %c0_163 = arith.constant 0 : index
    %173 = vector.load %arg16[%c0_162, %c0_163] : memref<4x256xf32, #tpu.memory_space<vmem>>, vector<4x256xf32>
    %174 = arith.addf %172, %173 : vector<4x256xf32>
    %cst_164 = arith.constant 2.000000e-01 : f32
    %175 = vector.broadcast %cst_164 : f32 to vector<4x256xf32>
    %176 = arith.mulf %175, %174 : vector<4x256xf32>
    %177 = arith.maximumf %174, %176 : vector<4x256xf32>
    %178 = arith.truncf %177 : vector<4x256xf32> to vector<4x256xbf16>
    %c0_165 = arith.constant 0 : index
    %c0_166 = arith.constant 0 : index
    %c0_167 = arith.constant 0 : index
    %179 = vector.load %arg18[%c0_165, %c0_166, %c0_167] : memref<4x1x4xbf16, #tpu.memory_space<vmem>>, vector<1x1x4xbf16>
    %180 = vector.shape_cast %179 : vector<1x1x4xbf16> to vector<1x4xbf16>
    %cst_168 = arith.constant dense<0.000000e+00> : vector<1x256xf32>
    %181 = tpu.matmul %180, %178, %cst_168 {dimension_numbers = #tpu.dot_dimension_numbers<[1], [0], [0], [1], [0, 0, 1, 1], [], []>} : vector<1x4xbf16>, vector<4x256xbf16>, vector<1x256xf32> -> vector<1x256xf32>
    %182 = arith.truncf %181 : vector<1x256xf32> to vector<1x256xbf16>
    %c0_169 = arith.constant 0 : index
    %c0_170 = arith.constant 0 : index
    %c0_171 = arith.constant 0 : index
    %183 = vector.load %arg17[%c0_169, %c0_170, %c0_171] : memref<4x256x128xbf16, #tpu.memory_space<vmem>>, vector<1x256x128xbf16>
    %184 = vector.shape_cast %183 : vector<1x256x128xbf16> to vector<256x128xbf16>
    %cst_172 = arith.constant dense<0.000000e+00> : vector<1x128xf32>
    %185 = tpu.matmul %182, %184, %cst_172 {dimension_numbers = #tpu.dot_dimension_numbers<[1], [0], [0], [1], [0, 0, 1, 1], [], []>} : vector<1x256xbf16>, vector<256x128xbf16>, vector<1x128xf32> -> vector<1x128xf32>
    %c1_173 = arith.constant 1 : index
    %c0_174 = arith.constant 0 : index
    %c0_175 = arith.constant 0 : index
    %186 = vector.load %arg18[%c1_173, %c0_174, %c0_175] : memref<4x1x4xbf16, #tpu.memory_space<vmem>>, vector<1x1x4xbf16>
    %187 = vector.shape_cast %186 : vector<1x1x4xbf16> to vector<1x4xbf16>
    %cst_176 = arith.constant dense<0.000000e+00> : vector<1x256xf32>
    %188 = tpu.matmul %187, %178, %cst_176 {dimension_numbers = #tpu.dot_dimension_numbers<[1], [0], [0], [1], [0, 0, 1, 1], [], []>} : vector<1x4xbf16>, vector<4x256xbf16>, vector<1x256xf32> -> vector<1x256xf32>
    %189 = arith.truncf %188 : vector<1x256xf32> to vector<1x256xbf16>
    %c1_177 = arith.constant 1 : index
    %c0_178 = arith.constant 0 : index
    %c0_179 = arith.constant 0 : index
    %190 = vector.load %arg17[%c1_177, %c0_178, %c0_179] : memref<4x256x128xbf16, #tpu.memory_space<vmem>>, vector<1x256x128xbf16>
    %191 = vector.shape_cast %190 : vector<1x256x128xbf16> to vector<256x128xbf16>
    %cst_180 = arith.constant dense<0.000000e+00> : vector<1x128xf32>
    %192 = tpu.matmul %189, %191, %cst_180 {dimension_numbers = #tpu.dot_dimension_numbers<[1], [0], [0], [1], [0, 0, 1, 1], [], []>} : vector<1x256xbf16>, vector<256x128xbf16>, vector<1x128xf32> -> vector<1x128xf32>
    %193 = arith.addf %185, %192 : vector<1x128xf32>
    %c2_181 = arith.constant 2 : index
    %c0_182 = arith.constant 0 : index
    %c0_183 = arith.constant 0 : index
    %194 = vector.load %arg18[%c2_181, %c0_182, %c0_183] : memref<4x1x4xbf16, #tpu.memory_space<vmem>>, vector<1x1x4xbf16>
    %195 = vector.shape_cast %194 : vector<1x1x4xbf16> to vector<1x4xbf16>
    %cst_184 = arith.constant dense<0.000000e+00> : vector<1x256xf32>
    %196 = tpu.matmul %195, %178, %cst_184 {dimension_numbers = #tpu.dot_dimension_numbers<[1], [0], [0], [1], [0, 0, 1, 1], [], []>} : vector<1x4xbf16>, vector<4x256xbf16>, vector<1x256xf32> -> vector<1x256xf32>
    %197 = arith.truncf %196 : vector<1x256xf32> to vector<1x256xbf16>
    %c2_185 = arith.constant 2 : index
    %c0_186 = arith.constant 0 : index
    %c0_187 = arith.constant 0 : index
    %198 = vector.load %arg17[%c2_185, %c0_186, %c0_187] : memref<4x256x128xbf16, #tpu.memory_space<vmem>>, vector<1x256x128xbf16>
    %199 = vector.shape_cast %198 : vector<1x256x128xbf16> to vector<256x128xbf16>
    %cst_188 = arith.constant dense<0.000000e+00> : vector<1x128xf32>
    %200 = tpu.matmul %197, %199, %cst_188 {dimension_numbers = #tpu.dot_dimension_numbers<[1], [0], [0], [1], [0, 0, 1, 1], [], []>} : vector<1x256xbf16>, vector<256x128xbf16>, vector<1x128xf32> -> vector<1x128xf32>
    %201 = arith.addf %193, %200 : vector<1x128xf32>
    %c3_189 = arith.constant 3 : index
    %c0_190 = arith.constant 0 : index
    %c0_191 = arith.constant 0 : index
    %202 = vector.load %arg18[%c3_189, %c0_190, %c0_191] : memref<4x1x4xbf16, #tpu.memory_space<vmem>>, vector<1x1x4xbf16>
    %203 = vector.shape_cast %202 : vector<1x1x4xbf16> to vector<1x4xbf16>
    %cst_192 = arith.constant dense<0.000000e+00> : vector<1x256xf32>
    %204 = tpu.matmul %203, %178, %cst_192 {dimension_numbers = #tpu.dot_dimension_numbers<[1], [0], [0], [1], [0, 0, 1, 1], [], []>} : vector<1x4xbf16>, vector<4x256xbf16>, vector<1x256xf32> -> vector<1x256xf32>
    %205 = arith.truncf %204 : vector<1x256xf32> to vector<1x256xbf16>
    %c3_193 = arith.constant 3 : index
    %c0_194 = arith.constant 0 : index
    %c0_195 = arith.constant 0 : index
    %206 = vector.load %arg17[%c3_193, %c0_194, %c0_195] : memref<4x256x128xbf16, #tpu.memory_space<vmem>>, vector<1x256x128xbf16>
    %207 = vector.shape_cast %206 : vector<1x256x128xbf16> to vector<256x128xbf16>
    %cst_196 = arith.constant dense<0.000000e+00> : vector<1x128xf32>
    %208 = tpu.matmul %205, %207, %cst_196 {dimension_numbers = #tpu.dot_dimension_numbers<[1], [0], [0], [1], [0, 0, 1, 1], [], []>} : vector<1x256xbf16>, vector<256x128xbf16>, vector<1x128xf32> -> vector<1x128xf32>
    %209 = arith.addf %201, %208 : vector<1x128xf32>
    %c0_197 = arith.constant 0 : index
    %c0_198 = arith.constant 0 : index
    %210 = vector.load %arg19[%c0_197, %c0_198] : memref<1x128xf32, #tpu.memory_space<vmem>>, vector<1x128xf32>
    %211 = arith.addf %209, %210 : vector<1x128xf32>
    %c0_199 = arith.constant 0 : index
    %c0_200 = arith.constant 0 : index
    %c0_201 = arith.constant 0 : index
    %212 = vector.load %arg20[%c0_199, %c0_200, %c0_201] : memref<1x1x128xf32, #tpu.memory_space<vmem>>, vector<1x1x128xf32>
    %213 = vector.shape_cast %212 : vector<1x1x128xf32> to vector<1x128xf32>
    %214 = vector.shape_cast %211 : vector<1x128xf32> to vector<1x1x128xf32>
    tpu.vector_store %arg20[%c0_199, %c0_200, %c0_201], %214 {strides = array<i32>} : memref<1x1x128xf32, #tpu.memory_space<vmem>>, vector<1x1x128xf32>,
    return
  }
  func.func @transform_0(%arg0: i32) -> (i32, i32, i32) {
    %c0_i32 = arith.constant 0 : i32
    %c0_i32_0 = arith.constant 0 : i32
    %c0_i32_1 = arith.constant 0 : i32
    return %arg0, %c0_i32, %c0_i32_0 : i32, i32, i32
  }
  func.func @transform_1(%arg0: i32) -> (i32, i32, i32) {
    %c0_i32 = arith.constant 0 : i32
    %c0_i32_0 = arith.constant 0 : i32
    %c0_i32_1 = arith.constant 0 : i32
    %c0_i32_2 = arith.constant 0 : i32
    return %c0_i32, %c0_i32_0, %c0_i32_1 : i32, i32, i32
  }
  func.func @transform_2(%arg0: i32) -> (i32, i32, i32) {
    %c0_i32 = arith.constant 0 : i32
    %c0_i32_0 = arith.constant 0 : i32
    %c0_i32_1 = arith.constant 0 : i32
    %c0_i32_2 = arith.constant 0 : i32
    return %c0_i32, %c0_i32_0, %c0_i32_1 : i32, i32, i32
  }
  func.func @transform_3(%arg0: i32) -> (i32, i32) {
    %c0_i32 = arith.constant 0 : i32
    %c0_i32_0 = arith.constant 0 : i32
    %c0_i32_1 = arith.constant 0 : i32
    return %c0_i32, %c0_i32_0 : i32, i32
  }
  func.func @transform_4(%arg0: i32) -> (i32, i32, i32) {
    %c0_i32 = arith.constant 0 : i32
    %c0_i32_0 = arith.constant 0 : i32
    %c0_i32_1 = arith.constant 0 : i32
    %c0_i32_2 = arith.constant 0 : i32
    return %c0_i32, %c0_i32_0, %c0_i32_1 : i32, i32, i32
  }
  func.func @transform_5(%arg0: i32) -> (i32, i32, i32) {
    %c0_i32 = arith.constant 0 : i32
    %c0_i32_0 = arith.constant 0 : i32
    %c0_i32_1 = arith.constant 0 : i32
    %c0_i32_2 = arith.constant 0 : i32
    return %c0_i32, %c0_i32_0, %c0_i32_1 : i32, i32, i32
  }
  func.func @transform_6(%arg0: i32) -> (i32, i32) {
    %c0_i32 = arith.constant 0 : i32
    %c0_i32_0 = arith.constant 0 : i32
    %c0_i32_1 = arith.constant 0 : i32
    return %c0_i32, %c0_i32_0 : i32, i32
  }
  func.func @transform_7(%arg0: i32) -> (i32, i32, i32) {
    %c0_i32 = arith.constant 0 : i32
    %c0_i32_0 = arith.constant 0 : i32
    %c0_i32_1 = arith.constant 0 : i32
    %c0_i32_2 = arith.constant 0 : i32
    return %c0_i32, %c0_i32_0, %c0_i32_1 : i32, i32, i32
  }
  func.func @transform_8(%arg0: i32) -> (i32, i32, i32) {
    %c0_i32 = arith.constant 0 : i32
    %c0_i32_0 = arith.constant 0 : i32
    %c0_i32_1 = arith.constant 0 : i32
    %c0_i32_2 = arith.constant 0 : i32
    return %c0_i32, %c0_i32_0, %c0_i32_1 : i32, i32, i32
  }
  func.func @transform_9(%arg0: i32) -> (i32, i32) {
    %c0_i32 = arith.constant 0 : i32
    %c0_i32_0 = arith.constant 0 : i32
    %c0_i32_1 = arith.constant 0 : i32
    return %c0_i32, %c0_i32_0 : i32, i32
  }
  func.func @transform_10(%arg0: i32) -> (i32, i32, i32) {
    %c0_i32 = arith.constant 0 : i32
    %c0_i32_0 = arith.constant 0 : i32
    %c0_i32_1 = arith.constant 0 : i32
    %c0_i32_2 = arith.constant 0 : i32
    return %c0_i32, %c0_i32_0, %c0_i32_1 : i32, i32, i32
  }
  func.func @transform_11(%arg0: i32) -> (i32, i32, i32) {
    %c0_i32 = arith.constant 0 : i32
    %c0_i32_0 = arith.constant 0 : i32
    %c0_i32_1 = arith.constant 0 : i32
    %c0_i32_2 = arith.constant 0 : i32
    return %c0_i32, %c0_i32_0, %c0_i32_1 : i32, i32, i32
  }
  func.func @transform_12(%arg0: i32) -> (i32, i32) {
    %c0_i32 = arith.constant 0 : i32
    %c0_i32_0 = arith.constant 0 : i32
    %c0_i32_1 = arith.constant 0 : i32
    return %c0_i32, %c0_i32_0 : i32, i32
  }
  func.func @transform_13(%arg0: i32) -> (i32, i32, i32) {
    %c0_i32 = arith.constant 0 : i32
    %c0_i32_0 = arith.constant 0 : i32
    %c0_i32_1 = arith.constant 0 : i32
    %c0_i32_2 = arith.constant 0 : i32
    return %c0_i32, %c0_i32_0, %c0_i32_1 : i32, i32, i32
  }
  func.func @transform_14(%arg0: i32) -> (i32, i32, i32) {
    %c0_i32 = arith.constant 0 : i32
    %c0_i32_0 = arith.constant 0 : i32
    %c0_i32_1 = arith.constant 0 : i32
    %c0_i32_2 = arith.constant 0 : i32
    return %c0_i32, %c0_i32_0, %c0_i32_1 : i32, i32, i32
  }
  func.func @transform_15(%arg0: i32) -> (i32, i32) {
    %c0_i32 = arith.constant 0 : i32
    %c0_i32_0 = arith.constant 0 : i32
    %c0_i32_1 = arith.constant 0 : i32
    return %c0_i32, %c0_i32_0 : i32, i32
  }
  func.func @transform_16(%arg0: i32) -> (i32, i32, i32) {
    %c0_i32 = arith.constant 0 : i32
    %c0_i32_0 = arith.constant 0 : i32
    %c0_i32_1 = arith.constant 0 : i32
    %c0_i32_2 = arith.constant 0 : i32
    return %c0_i32, %c0_i32_0, %c0_i32_1 : i32, i32, i32
  }
  func.func @transform_17(%arg0: i32) -> (i32, i32, i32) {
    %c0_i32 = arith.constant 0 : i32
    %c0_i32_0 = arith.constant 0 : i32
    %c0_i32_1 = arith.constant 0 : i32
    %c0_i32_2 = arith.constant 0 : i32
    return %c0_i32, %c0_i32_0, %c0_i32_1 : i32, i32, i32
  }
  func.func @transform_18(%arg0: i32) -> (i32, i32) {
    %c0_i32 = arith.constant 0 : i32
    %c0_i32_0 = arith.constant 0 : i32
    %c0_i32_1 = arith.constant 0 : i32
    return %c0_i32, %c0_i32_0 : i32, i32
  }
  func.func @transform_19(%arg0: i32) -> (i32, i32, i32) {
    %c0_i32 = arith.constant 0 : i32
    %c0_i32_0 = arith.constant 0 : i32
    %c0_i32_1 = arith.constant 0 : i32
    return %arg0, %c0_i32, %c0_i32_0 : i32, i32, i32
  }
}

</mosaic_0001>

<bundles_post_ra>
// kernel: discriminator_forward.1
= control target key start
LH: loop header
LB: loop body
LE: loop exit
PB: predicated region body
PF: predicated region fallthrough
CT: control target
= control target key end

     0   :  { %s21979_s0 = inlined_call_operand.vmem [shape: bf16[2,66,264], index: 0, kind: input, shape index: {}]   ;;  %s21980_s1 = inlined_call_operand.hbm [shape: bf16[3,264,264], index: 1, kind: input, shape index: {}]   ;;  %s21981_s2 = inlined_call_operand.hbm [shape: bf16[3,66,66], index: 2, kind: input, shape index: {}]   ;;  %s21982_s3 = inlined_call_operand.vmem [shape: f32[66,264], index: 3, kind: input, shape index: {}]   ;;  %s21983_s4 = inlined_call_operand.hbm [shape: bf16[4,264,272], index: 4, kind: input, shape index: {}]   ;;  %s21984_s5 = inlined_call_operand.vmem [shape: bf16[4,34,66], index: 5, kind: input, shape index: {}]   ;;  %s21985_s6 = inlined_call_operand.vmem [shape: f32[34,272], index: 6, kind: input, shape index: {}]   ;;  %s21986_s7 = inlined_call_operand.hbm [shape: bf16[4,272,288], index: 7, kind: input, shape index: {}]   ;;  %s21987_s8 = inlined_call_operand.vmem [shape: bf16[4,18,34], index: 8, kind: input, shape index: {}]   ;;  %s21988_s9 = inlined_call_operand.hbm [shape: f32[18,288], index: 9, kind: input, shape index: {}]   ;;  %s21989_s10 = inlined_call_operand.vmem [shape: bf16[4,288,320], index: 10, kind: input, shape index: {}]   ;;  %s21990_s11 = inlined_call_operand.vmem [shape: bf16[4,10,18], index: 11, kind: input, shape index: {}]   ;;  %s21991_s12 = inlined_call_operand.hbm [shape: f32[10,320], index: 12, kind: input, shape index: {}]   ;;  %s21992_s13 = inlined_call_operand.hbm [shape: bf16[4,320,256], index: 13, kind: input, shape index: {}]   ;;  %s21993_s14 = inlined_call_operand.vmem [shape: bf16[4,4,10], index: 14, kind: input, shape index: {}]   ;;  %s21994_s15 = inlined_call_operand.hbm [shape: f32[4,256], index: 15, kind: input, shape index: {}]   ;;  %s21995_s16 = inlined_call_operand.vmem [shape: bf16[4,256,128], index: 16, kind: input, shape index: {}]   ;;  %s21996_s17 = inlined_call_operand.vmem [shape: bf16[4,1,4], index: 17, kind: input, shape index: {}]   ;;  %s21997_s18 = inlined_call_operand.vmem [shape: f32[1,128], index: 18, kind: input, shape index: {}]   ;;  %s21998_s19 = inlined_call_operand.vmem [shape: f32[2,1,128], index: 19, kind: output, shape index: {}]  }
   0x1   :  { %22011 = sst [smem:[#allocation21_spill]] %s21979_s0 }
   0x2   :  { %22012 = sst [smem:[#allocation22_spill]] %s21980_s1 }
   0x3   :  { %22013 = sst [smem:[#allocation23_spill]] %s21981_s2 }
   0x4   :  { %22014 = sst [smem:[#allocation24_spill]] %s21982_s3 }
   0x5   :  { %22015 = sst [smem:[#allocation25_spill]] %s21993_s14 }
   0x6   :  { %22016 = sst [smem:[#allocation26_spill]] %s21995_s16 }
   0x7   :  { %22017 = sst [smem:[#allocation27_spill]] %s21996_s17 }
   0x8   :  { %22018 = sst [smem:[#allocation28_spill]] %s21997_s18 }
   0x9   :  { %22019 = sst [smem:[#allocation29_spill]] %s21998_s19 }
   0xa   :  { %24 = vsyncpa [#allocation3], 0 }
   0xb   :  { %25 = vsyncpa [#allocation5], 0 }
   0xc   :  { %26 = vsyncpa [#allocation8], 0 }
   0xd   :  { %27 = vsyncpa [#allocation11], 0 }
   0xe   :  { %28 = vsyncpa [#allocation14], 0  ;;  %s19526_s0 = smov 0  }
   0xf LB: > { %22020 = sst [smem:[#allocation20_spill]] %s19405_s0  ;;  %s19407_s30 = smov [#allocation4]   ;;  %s19405_s0 = sphi %s19526_s0, %s34_s0  }
  0x10   : > { %s494_s20 = sshll.u32 %s19407_s30, 4  ;;  %s19532_s21 = sadd.s32 4294967295, %s19405_s0   ;;  %s19537_s20 = int_to_ptr.vmem [resolvable:$true] %s494_s20 }
  0x11   : > { %p14653_p0 = scmp.ge.s32.totalorder %s19405_s0, 1  ;;  %p469_p1 = scmp.lt.s32.totalorder %s19405_s0, 3 }
  0x12   : > { %p22007_p2 = scmp.eq.s32.totalorder %s19532_s21, 0  ;;  %s19408_s2 = smov [#allocation7]  }
  0x13   : > { %p19539_p3 = pnand %p14653_p0, %p469_p1  ;;  %s529_s23 = sshll.u32 %s19408_s2, 4  ;;  %s19551_s23 = int_to_ptr.vmem [resolvable:$true] %s529_s23 }
  0x14   : > { %s22023_s3 = sld [smem:[#allocation23_spill]] }
  0x15   : > { %s22021_s1 = scalar_select %p19539_p3, 1, 0 }
  0x16   : > { %p17683_p4 = pneg %p19539_p3 }
  0x18   : > { %p19547_p5 = pnand %p22007_p2, %p17683_p4 }
  0x1a   : > { %s19155_s26 = scalar_lea.hbm %s22023_s3, 1728  ;;  %p19561_p7 = pneg %p19547_p5 }
  0x1b   : > { %p19156_p6 = scmp.ne.s32.totalorder %s22023_s3, %s19155_s26  ;;  %p19162_p10 = scmp.lt.u32.totalorder %s19155_s26, %s22023_s3 }
  0x1d   : > { %p19158_p8 = pnand %p19561_p7, %p19156_p6 }
  0x1f   : > { %p19159_p9 = pneg %p19158_p8 }
  0x21   : > { %p19164_p11 = pnand %p19162_p10, %p19159_p9 }
  0x23   : > { %19167 = shalt.err (!%p19164_p11)
}
  0x24   : > { %s19168_s24 = scalar_lea.vmem %s19537_s20, 1728  ;;  %p19176_p1 = scmp.lt.s32.totalorder %s19537_s20, %s19537_s20 }
  0x25   : > { %p19169_p12 = scmp.ne.s32.totalorder %s19537_s20, %s19168_s24  ;;  %p19177_p4 = scmp.lt.s32.totalorder %s19168_s24, %s19168_s24 }
  0x27   : > { %p19171_p13 = pnand %p19169_p12, %p19561_p7  ;;  %p19178_p6 = por %p19177_p4, %p19176_p1 }
  0x29   : > { %p19172_p0 = pneg %p19171_p13 }
  0x2b   : > { %p19179_p8 = pnand %p19178_p6, %p19172_p0 }
  0x2d   : > { %19182 = shalt.err (!%p19179_p8)
}
  0x2e   : > { %s19409_s25 = smov 64   ;;  %s19410_s26 = smov 4  }
  0x2f   : > { %17689 = dma.hbm_to_vmem [thread:$0]  (!%p19547_p5), %s22023_s3, 1728, %s19537_s20, [#allocation5], %s19409_s25, %s19409_s25, %s19410_s26  }
  0x30   : > { %s19183_s0 = scalar_lea.hbm %s21986_s7, 26112 }
  0x31   : > { %p19184_p9 = scmp.ne.s32.totalorder %s21986_s7, %s19183_s0  ;;  %p19190_p12 = scmp.lt.u32.totalorder %s19183_s0, %s21986_s7 }
  0x33   : > { %p19186_p10 = pnand %p19184_p9, %p19561_p7 }
  0x35   : > { %p19187_p11 = pneg %p19186_p10 }
  0x37   : > { %p19192_p13 = pnand %p19190_p12, %p19187_p11 }
  0x39   : > { %19195 = shalt.err (!%p19192_p13)
}
  0x3a   : > { %s19196_s20 = scalar_lea.vmem %s19551_s23, 26112  ;;  %p19204_p6 = scmp.lt.s32.totalorder %s19551_s23, %s19551_s23 }
  0x3b   : > { %p19197_p0 = scmp.ne.s32.totalorder %s19551_s23, %s19196_s20  ;;  %p19205_p8 = scmp.lt.s32.totalorder %s19196_s20, %s19196_s20 }
  0x3d   : > { %p19199_p1 = pnand %p19197_p0, %p19561_p7  ;;  %p19206_p9 = por %p19205_p8, %p19204_p6 }
  0x3f   : > { %p19200_p4 = pneg %p19199_p1 }
  0x41   : > { %p19207_p10 = pnand %p19206_p9, %p19200_p4 }
  0x43   : > { %19210 = shalt.err (!%p19207_p10)
}
  0x44   : > { %s19411_s18 = smov 192   ;;  %s19412_s17 = smov 12  }
  0x45   : > { %17695 = dma.hbm_to_vmem [thread:$0]  (!%p19547_p5), %s21986_s7, 26112, %s19551_s23, [#allocation8], %s19411_s18, %s19411_s18, %s19412_s17  }
  0x46   : > { %s19413_s25 = smov [#allocation10]   ;;  %s19414_s27 = smov [#allocation2]  }
  0x47   : > { %s564_s26 = sshll.u32 %s19413_s25, 4  ;;  %s481_s28 = sshll.u32 %s19414_s27, 4  ;;  %s565_s26 = int_to_ptr.vmem [resolvable:$true] %s564_s26  ;;  %s482_s28 = int_to_ptr.vmem [resolvable:$true] %s481_s28 }
  0x48   : > { %s19211_s24 = scalar_lea.hbm %s21991_s12, 768 }
  0x49   : > { %p19212_p11 = scmp.ne.s32.totalorder %s21991_s12, %s19211_s24  ;;  %p19218_p0 = scmp.lt.u32.totalorder %s19211_s24, %s21991_s12 }
  0x4b   : > { %p19214_p12 = pnand %p19212_p11, %p19561_p7 }
  0x4d   : > { %p19215_p13 = pneg %p19214_p12 }
  0x4f   : > { %p19220_p1 = pnand %p19218_p0, %p19215_p13 }
  0x51   : > { %19223 = shalt.err (!%p19220_p1)
}
  0x52   : > { %s19224_s23 = scalar_lea.vmem %s565_s26, 768  ;;  %p19232_p9 = scmp.lt.s32.totalorder %s565_s26, %s565_s26 }
  0x53   : > { %p19225_p4 = scmp.ne.s32.totalorder %s565_s26, %s19224_s23  ;;  %p19233_p10 = scmp.lt.s32.totalorder %s19224_s23, %s19224_s23 }
  0x55   : > { %p19227_p6 = pnand %p19225_p4, %p19561_p7  ;;  %p19234_p2 = por %p19233_p10, %p19232_p9 }
  0x57   : > { %p19228_p8 = pneg %p19227_p6 }
  0x59   : > { %p19235_p3 = pnand %p19234_p2, %p19228_p8 }
  0x5b   : > { %19238 = shalt.err (!%p19235_p3)
}
  0x5c   : > { %s22009_s3 = smov 384   ;;  %s22010_s19 = smov 24  }
  0x5d   : > { %17701 = dma.hbm_to_vmem [thread:$0]  (!%p19547_p5), %s21991_s12, 768, %s565_s26, [#allocation11], %s22009_s3, %s22009_s3, %s22010_s19  }
  0x5e   : > { %s22025_s27 = sld [smem:[#allocation22_spill]] }
  0x64   : > { %s19239_s30 = scalar_lea.hbm %s22025_s27, 19008 }
  0x65   : > { %p19240_p2 = scmp.ne.s32.totalorder %s22025_s27, %s19239_s30  ;;  %p19246_p12 = scmp.lt.u32.totalorder %s19239_s30, %s22025_s27 }
  0x67   : > { %p19242_p3 = pnand %p19240_p2, %p19561_p7 }
  0x69   : > { %p19243_p11 = pneg %p19242_p3 }
  0x6b   : > { %p19248_p13 = pnand %p19246_p12, %p19243_p11 }
  0x6d   : > { %19251 = shalt.err (!%p19248_p13)
}
  0x6e   : > { %s19252_s14 = scalar_lea.vmem %s482_s28, 19008  ;;  %p19260_p6 = scmp.lt.s32.totalorder %s482_s28, %s482_s28 }
  0x6f   : > { %p19253_p0 = scmp.ne.s32.totalorder %s482_s28, %s19252_s14  ;;  %p19261_p8 = scmp.lt.s32.totalorder %s19252_s14, %s19252_s14 }
  0x71   : > { %p19255_p1 = pnand %p19253_p0, %p19561_p7  ;;  %p19262_p9 = por %p19261_p8, %p19260_p6 }
  0x73   : > { %p19256_p4 = pneg %p19255_p1 }
  0x75   : > { %p19263_p10 = pnand %p19262_p9, %p19256_p4 }
  0x77   : > { %19266 = shalt.err (!%p19263_p10)
}
  0x78   : > { %17686 = dma.hbm_to_vmem [thread:$0]  (!%p19547_p5), %s22025_s27, 19008, %s482_s28, [#allocation3], %s19411_s18, %s19411_s18, %s19412_s17  }
  0x79   : > { %s19417_s0 = smov [#allocation6]   ;;  %s19418_s30 = smov [#allocation9]  }
  0x7a   : > { %s510_s25 = sshll.u32 %s19417_s0, 4  ;;  %s545_s2 = sshll.u32 %s19418_s30, 4  ;;  %s511_s25 = int_to_ptr.vmem [resolvable:$true] %s510_s25  ;;  %s546_s2 = int_to_ptr.vmem [resolvable:$true] %s545_s2 }
  0x7b   : > { %s19267_s23 = scalar_lea.hbm %s21983_s4, 25344 }
  0x7c   : > { %p19268_p2 = scmp.ne.s32.totalorder %s21983_s4, %s19267_s23  ;;  %p19274_p12 = scmp.lt.u32.totalorder %s19267_s23, %s21983_s4 }
  0x7e   : > { %p19270_p3 = pnand %p19268_p2, %p19561_p7 }
  0x80   : > { %p19271_p11 = pneg %p19270_p3 }
  0x82   : > { %p19276_p13 = pnand %p19274_p12, %p19271_p11 }
  0x84   : > { %19279 = shalt.err (!%p19276_p13)
}
  0x85   : > { %s19280_s28 = scalar_lea.vmem %s511_s25, 25344  ;;  %p19288_p6 = scmp.lt.s32.totalorder %s511_s25, %s511_s25 }
  0x86   : > { %p19281_p0 = scmp.ne.s32.totalorder %s511_s25, %s19280_s28  ;;  %p19289_p8 = scmp.lt.s32.totalorder %s19280_s28, %s19280_s28 }
  0x88   : > { %p19283_p1 = pnand %p19281_p0, %p19561_p7  ;;  %p19290_p9 = por %p19289_p8, %p19288_p6 }
  0x8a   : > { %p19284_p4 = pneg %p19283_p1 }
  0x8c   : > { %p19291_p10 = pnand %p19290_p9, %p19284_p4 }
  0x8e   : > { %19294 = shalt.err (!%p19291_p10)
}
  0x8f   : > { %17692 = dma.hbm_to_vmem [thread:$0]  (!%p19547_p5), %s21983_s4, 25344, %s511_s25, [#allocation5], %s19411_s18, %s19411_s18, %s19412_s17  }
  0x90   : > { %s19295_s30 = scalar_lea.hbm %s21988_s9, 1152 }
  0x91   : > { %p19296_p2 = scmp.ne.s32.totalorder %s21988_s9, %s19295_s30  ;;  %p19302_p12 = scmp.lt.u32.totalorder %s19295_s30, %s21988_s9 }
  0x93   : > { %p19298_p3 = pnand %p19296_p2, %p19561_p7 }
  0x95   : > { %p19299_p11 = pneg %p19298_p3 }
  0x97   : > { %p19304_p13 = pnand %p19302_p12, %p19299_p11 }
  0x99   : > { %19307 = shalt.err (!%p19304_p13)
}
  0x9a   : > { %s19308_s26 = scalar_lea.vmem %s546_s2, 1152  ;;  %p19316_p6 = scmp.lt.s32.totalorder %s546_s2, %s546_s2 }
  0x9b   : > { %p19309_p0 = scmp.ne.s32.totalorder %s546_s2, %s19308_s26  ;;  %p19317_p8 = scmp.lt.s32.totalorder %s19308_s26, %s19308_s26 }
  0x9d   : > { %p19311_p1 = pnand %p19309_p0, %p19561_p7  ;;  %p19318_p9 = por %p19317_p8, %p19316_p6 }
  0x9f   : > { %p19312_p4 = pneg %p19311_p1 }
  0xa1   : > { %p19319_p10 = pnand %p19318_p9, %p19312_p4 }
  0xa3   : > { %19322 = shalt.err (!%p19319_p10)
}
  0xa4   : > { %s22026_s18 = smov 24   ;;  %s22027_s17 = smov 384  }
  0xa5   : > { %17698 = dma.hbm_to_vmem [thread:$0]  (!%p19547_p5), %s21988_s9, 1152, %s546_s2, [#allocation8], %s22027_s17, %s22027_s17, %s22026_s18  }
  0xa6   : > { %s19419_s3 = smov [#allocation12]   ;;  %s19323_s30 = scalar_lea.hbm %s21992_s13, 20480 }
  0xa7   : > { %s577_s19 = sshll.u32 %s19419_s3, 4  ;;  %p19324_p2 = scmp.ne.s32.totalorder %s21992_s13, %s19323_s30  ;;  %s578_s19 = int_to_ptr.vmem [resolvable:$true] %s577_s19 }
  0xa8   : > { %p19330_p12 = scmp.lt.u32.totalorder %s19323_s30, %s21992_s13 }
  0xa9   : > { %p19326_p3 = pnand %p19324_p2, %p19561_p7 }
  0xab   : > { %p19327_p11 = pneg %p19326_p3 }
  0xad   : > { %p19332_p13 = pnand %p19330_p12, %p19327_p11 }
  0xaf   : > { %19335 = shalt.err (!%p19332_p13)
}
  0xb0   : > { %s19336_s2 = scalar_lea.vmem %s578_s19, 20480  ;;  %p19344_p6 = scmp.lt.s32.totalorder %s578_s19, %s578_s19 }
  0xb1   : > { %p19337_p0 = scmp.ne.s32.totalorder %s578_s19, %s19336_s2  ;;  %p19345_p8 = scmp.lt.s32.totalorder %s19336_s2, %s19336_s2 }
  0xb3   : > { %p19339_p1 = pnand %p19337_p0, %p19561_p7  ;;  %p19346_p9 = por %p19345_p8, %p19344_p6 }
  0xb5   : > { %p19340_p4 = pneg %p19339_p1 }
  0xb7   : > { %p19347_p10 = pnand %p19346_p9, %p19340_p4 }
  0xb9   : > { %19350 = shalt.err (!%p19347_p10)
}
  0xba   : > { %s19420_s26 = smov 128   ;;  %s19421_s18 = smov 8  }
  0xbb   : > { %17704 = dma.hbm_to_vmem [thread:$0]  (!%p19547_p5), %s21992_s13, 20480, %s578_s19, [#allocation11], %s19420_s26, %s19420_s26, %s19421_s18  }
  0xbc   : > { %s19422_s28 = smov [#allocation13]   ;;  %s19351_s30 = scalar_lea.hbm %s21994_s15, 128 }
  0xbd   : > { %s594_s3 = sshll.u32 %s19422_s28, 4  ;;  %p19352_p2 = scmp.ne.s32.totalorder %s21994_s15, %s19351_s30  ;;  %s595_s3 = int_to_ptr.vmem [resolvable:$true] %s594_s3 }
  0xbe   : > { %p19358_p12 = scmp.lt.u32.totalorder %s19351_s30, %s21994_s15 }
  0xbf   : > { %p19354_p3 = pnand %p19352_p2, %p19561_p7 }
  0xc1   : > { %p19355_p11 = pneg %p19354_p3 }
  0xc3   : > { %p19360_p13 = pnand %p19358_p12, %p19355_p11 }
  0xc5   : > { %19363 = shalt.err (!%p19360_p13)
}
  0xc6   : > { %s19364_s19 = scalar_lea.vmem %s595_s3, 128  ;;  %p19372_p6 = scmp.lt.s32.totalorder %s595_s3, %s595_s3 }
  0xc7   : > { %p19365_p0 = scmp.ne.s32.totalorder %s595_s3, %s19364_s19  ;;  %p19373_p8 = scmp.lt.s32.totalorder %s19364_s19, %s19364_s19 }
  0xc9   : > { %p19367_p1 = pnand %p19365_p0, %p19561_p7  ;;  %p19374_p9 = por %p19373_p8, %p19372_p6 }
  0xcb   : > { %p19368_p4 = pneg %p19367_p1 }
  0xcd   : > { %p19375_p10 = pnand %p19374_p9, %p19368_p4 }
  0xcf   : > { %19378 = shalt.err (!%p19375_p10)
}
  0xd0   : > { %17707 = dma.hbm_to_vmem [thread:$0]  (!%p19547_p5), %s21994_s15, 128, %s595_s3, [#allocation14]  }
  0xd1   : > { %p22028_p2 = scmp.ne.s32.totalorder %s22021_s1, 0 }
  0xd2   : > { %p22029_p3 = scmp.eq.s32.totalorder (!%p22028_p2), %s19532_s21, 0 }
  0xd3   : > { %624 = sbr.rel (%p22028_p2) target bundleno = 5916 (0x171c), region = 96 }
  0xda   : > { %19384 = dma.done.wait (%p22029_p3), [#allocation3], 19008   ;;  %p22030_p7 = pmov %p22029_p3 }
  0xdb   : > { %p22031_p11 = pmov %p22029_p3 }
  0xdc   : > { %19386 = vsyncadd (%p22030_p7), [#allocation3], 4294948288 }
  0xdd   : > { %19388 = dma.done.wait (%p22031_p11), [#allocation5], 27072   ;;  %p22032_p12 = pmov %p22029_p3 }
  0xde   : > { %p22033_p13 = pmov %p22029_p3 }
  0xdf   : > { %19390 = vsyncadd (%p22032_p12), [#allocation5], 4294940224 }
  0xe0   : > { %19392 = dma.done.wait (%p22033_p13), [#allocation8], 27264   ;;  %p22034_p5 = pmov %p22029_p3 }
  0xe1   : > { %p22035_p0 = pmov %p22029_p3 }
  0xe2   : > { %19394 = vsyncadd (%p22034_p5), [#allocation8], 4294940032 }
  0xe3   : > { %19396 = dma.done.wait (%p22035_p0), [#allocation11], 21248   ;;  %p22036_p1 = pmov %p22035_p0 }
  0xe4   : > { %p22037_p4 = pmov %p22035_p0 }
  0xe5   : > { %19398 = vsyncadd (%p22036_p1), [#allocation11], 4294946048 }
  0xe6   : > { %19400 = dma.done.wait (%p22037_p4), [#allocation14], 128   ;;  %p22038_p6 = pmov %p22035_p0 }
  0xe7   : > { %p706_p8 = scmp.lt.s32.totalorder %s19532_s21, 1  ;;  %v19423_v0 = vmov 0   ;;  %v19424_v1 = vmov 0.0   ;;  %vm19425_vm0 = vmmov 0   ;;  %s22039_s18 = sld [smem:[#allocation21_spill]]  ;;  %vm853_vm1 = vcmask 1040384  }
  0xe8   : > { %19402 = vsyncadd (%p22038_p6), [#allocation14], 4294967168  ;;  %895 = vmatprep.mubr.bf16.mxu0 %v19423_v0  ;;  %17002 = vmatprep.subr.bf16.mxu1 %v19424_v1  ;;  %v17765_v17 = vld [vmem:[#allocation4] sm:$0xff]   ;;  %vm837_vm2 = vcmask 539648   ;;  %v17766_v21 = vld [vmem:[#allocation4 + $0x8] sm:$0xff]   ;;  %vm1660_vm3 = vcmask 1043456  }
  0xe9   : > { %s22048_s21 = smov (!%p706_p8, %s19532_s21), 1  ;;  %17012 = vmatprep.mubr.msk.bf16.mxu1 %vm19425_vm0, %v19424_v1  ;;  %v17767_v22 = vld [vmem:[#allocation4 + $0x10] sm:$0xff]   ;;  %v17782_v23 = vld [vmem:[#allocation2 + $0x190] ss:$12 sps:$4 sm:$0xff]   ;;  %v17775_v26 = vld [vmem:[#allocation4 + $0x24] sm:$0xff]   ;;  %vm1644_vm4 = vcmask 64512  }
  0xea   : > { %s17650_s1 = smul.u32 108, %s22048_s21  ;;  %v17769_v24 = vld [vmem:[#allocation4 + $0x18] sm:$0xff]   ;;  %v17772_v25 = vld [vmem:[#allocation4 + $0x20] ss:$0 sps:$4 sm:$0x11]   ;;  %v17776_v31 = vld [vmem:[#allocation4 + $0x2c] sm:$0xff]  }
  0xeb   : > { %v17780_v27 = vld [vmem:[#allocation2 + $0x18c] ss:$12 sps:$4 sm:$0xff]   ;;  %v17785_v28 = vld [vmem:[#allocation2 + $0x1a8] ss:$12 sps:$4 sm:$0xff]   ;;  %v17783_v29 = vld [vmem:[#allocation2 + $0x1a4] ss:$12 sps:$4 sm:$0xff]  }
  0xec   : > { %v17788_v30 = vld [vmem:[#allocation2 + $0x1c0] ss:$12 sps:$4 sm:$0xff]   ;;  %v17786_v32 = vld [vmem:[#allocation2 + $0x1bc] ss:$12 sps:$4 sm:$0xff]   ;;  %v17791_v33 = vld [vmem:[#allocation2 + $0x1d8] ss:$12 sps:$4 sm:$0xff]  }
  0xed   : > { %s19762_s17 = scalar_lea.vmem %s22039_s18, %s17650_s1  ;;  %v17789_v34 = vld [vmem:[#allocation2 + $0x1d4] ss:$12 sps:$4 sm:$0xff]   ;;  %v17794_v35 = vld [vmem:[#allocation2 + $0x1f0] ss:$12 sps:$4 sm:$0xff]   ;;  %v17792_v37 = vld [vmem:[#allocation2 + $0x1ec] ss:$12 sps:$4 sm:$0xff]  }
  0xee   : > { %v17751_v2 = vld [vmem:[%s19762_s17 + $0x4] ss:$12 sps:$4 sm:$0xff]   ;;  %v17753_v3 = vld [vmem:[%s19762_s17] ss:$12 sps:$4 sm:$0xff]   ;;  %v17754_v4 = vld [vmem:[%s19762_s17 + $0x1c] ss:$12 sps:$4 sm:$0xff]  }
  0xef   : > { %863 = vmatprep.subr.bf16.mxu0 %v17751_v2  ;;  %v17756_v5 = vld [vmem:[%s19762_s17 + $0x18] ss:$12 sps:$4 sm:$0xff]   ;;  %v17757_v6 = vld [vmem:[%s19762_s17 + $0x34] ss:$12 sps:$4 sm:$0xff]   ;;  %v17759_v7 = vld [vmem:[%s19762_s17 + $0x30] ss:$12 sps:$4 sm:$0xff]  }
  0xf0   : > { %864 = vmatpush1.bf16.msra.mxu0 %v17753_v3  ;;  %v17760_v8 = vld [vmem:[%s19762_s17 + $0x4c] ss:$12 sps:$4 sm:$0xff]   ;;  %v731_v9 = vld [vmem:[%s19762_s17 + $0x60] sm:$0x11]  ;;  %v17768_v10 = vld [vmem:[%s19762_s17 + $0x8] ss:$12 sps:$4 sm:$0xff]  }
  0xf1   : > { %865 = vmatprep.subr.bf16.mxu0 %v17754_v4  ;;  %v17762_v11 = vld [vmem:[%s19762_s17 + $0x48] ss:$12 sps:$4 sm:$0xff]   ;;  %v14690_v12 = vcombine.low %v731_v9, %v731_v9  ;;  %17003 = vmatpush3.bf16.msra.mxu1 %v17768_v10  ;;  %v17770_v13 = vld [vmem:[%s19762_s17 + $0x20] ss:$12 sps:$4 sm:$0xff]   ;;  %v19775_v14 = vcombine.high %v731_v9, %v731_v9  ;;  %v17771_v16 = vld [vmem:[%s19762_s17 + $0x38] ss:$12 sps:$4 sm:$0xff]  }
  0xf2   : > { %17004 = vmatprep.subr.bf16.mxu1 %v19424_v1  ;;  %v17773_v18 = vld [vmem:[%s19762_s17 + $0x50] ss:$12 sps:$4 sm:$0xff]   ;;  %v17774_v19 = vld [vmem:[%s19762_s17 + $0x68] ss:$0 sps:$4 sm:$0x11]   ;;  %v17778_v38 = vld [vmem:[#allocation4 + $0x3c] sm:$0xff]  }
  0xf3   : > { %v19779_v15 = vsel %vm853_vm1, %v14690_v12, 0  ;;  %v19793_v20 = vsel %vm853_vm1, %v17774_v19, 0  ;;  %v17777_v36 = vld [vmem:[#allocation4 + $0x34] sm:$0xff]   ;;  %v17779_v39 = vld [vmem:[#allocation4 + $0x44] ss:$0 sps:$4 sm:$0x11]  }
  0xf4   : > { %866 = vmatpush1.bf16.msra.mxu0 %v17756_v5  ;;  %v17797_v40 = vld [vmem:[#allocation2 + $0x208] ss:$12 sps:$4 sm:$0xff]   ;;  %v17795_v41 = vld [vmem:[#allocation2 + $0x204] ss:$12 sps:$4 sm:$0xff]   ;;  %v17800_v43 = vld [vmem:[#allocation2 + $0x220] ss:$12 sps:$4 sm:$0xff]  }
  0xf5   : > { %867 = vmatprep.subr.bf16.mxu0 %v17757_v6  ;;  %17005 = vmatpush3.bf16.msra.mxu1 %v17770_v13  ;;  %v17798_v42 = vld [vmem:[#allocation2 + $0x21c] ss:$12 sps:$4 sm:$0xff]   ;;  %v17803_v44 = vld [vmem:[#allocation2 + $0x238] ss:$12 sps:$4 sm:$0xff]   ;;  %v17801_v45 = vld [vmem:[#allocation2 + $0x234] ss:$12 sps:$4 sm:$0xff]  }
  0xf6   : > { %17006 = vmatprep.subr.bf16.mxu1 %v19424_v1  ;;  %v17804_v46 = vld [vmem:[#allocation2 + $0x254] ss:$12 sps:$4 sm:$0xff]   ;;  %v17806_v48 = vld [vmem:[#allocation2 + $0x24c] ss:$12 sps:$4 sm:$0xff]   ;;  %v17808_v49 = vld [vmem:[#allocation2 + $0x250] ss:$12 sps:$4 sm:$0xff]  }
  0xf7   : > { %v17805_v47 = vld [vmem:[#allocation2 + $0x194] ss:$12 sps:$4 sm:$0xff]   ;;  %v17809_v50 = vld [vmem:[#allocation2 + $0x26c] ss:$12 sps:$4 sm:$0xff]   ;;  %v17811_v53 = vld [vmem:[#allocation2 + $0x264] ss:$12 sps:$4 sm:$0xff]  }
  0xf8   : > { %868 = vmatpush1.bf16.msra.mxu0 %v17759_v7  ;;  %v17810_v51 = vld [vmem:[#allocation2 + $0x1ac] ss:$12 sps:$4 sm:$0xff]   ;;  %v17813_v52 = vld [vmem:[#allocation2 + $0x268] ss:$12 sps:$4 sm:$0xff]   ;;  %v17814_v54 = vld [vmem:[#allocation2 + $0x284] ss:$12 sps:$4 sm:$0xff]  }
  0xf9   : > { %869 = vmatprep.subr.bf16.mxu0 %v17760_v8  ;;  %17007 = vmatpush3.bf16.msra.mxu1 %v17771_v16  ;;  %v17815_v55 = vld [vmem:[#allocation2 + $0x1c4] ss:$12 sps:$4 sm:$0xff]   ;;  %v17816_v56 = vld [vmem:[#allocation2 + $0x27c] ss:$12 sps:$4 sm:$0xff]   ;;  %v17818_v57 = vld [vmem:[#allocation2 + $0x280] ss:$12 sps:$4 sm:$0xff]  }
  0xfa   : > { %17008 = vmatprep.subr.bf16.mxu1 %v19424_v1  ;;  %v17819_v58 = vld [vmem:[#allocation2 + $0x29c] ss:$12 sps:$4 sm:$0xff]   ;;  %v17822_v59 = vld [vmem:[#allocation2 + $0x298] ss:$12 sps:$4 sm:$0xff]   ;;  %v17820_v60 = vld [vmem:[#allocation2 + $0x294] ss:$12 sps:$4 sm:$0xff]  }
  0xfb   : > { %v17823_v61 = vld [vmem:[#allocation2 + $0x1dc] ss:$12 sps:$4 sm:$0xff]   ;;  %v17824_v62 = vld [vmem:[#allocation2 + $0x2ac] ss:$12 sps:$4 sm:$0xff]   ;;  %s22040_s3 = sld [smem:[#allocation24_spill]]  ;;  %vm6662_vm5 = vcmask 277504  }
  0xfc   : > { %870 = vmatpush1.bf16.msra.mxu0 %v17762_v11  ;;  %v17826_v63 = vld [vmem:[#allocation2 + $0x2b0] ss:$12 sps:$4 sm:$0xff]   ;;  %v17836_v9 = vld [vmem:[#allocation2 + $0x2e0] ss:$12 sps:$4 sm:$0xff]   ;;  %v17841_v12 = vld [vmem:[#allocation2 + $0x2f8] ss:$12 sps:$4 sm:$0xff]  }
  0xfd   : > { %14693 = vmatprep.subr.msk.bf16.mxu0 %vm853_vm1, %v19775_v14  ;;  %17009 = vmatpush3.bf16.msra.mxu1 %v17773_v18  ;;  %vm7315_vm6 = vcmask 130048   ;;  %vm9399_vm7 = vcmask 146432   ;;  %vm10030_vm8 = vcmask 261120   ;;  %vm11965_vm9 = vcmask 1044480   ;;  %s22041_s24 = sld [smem:[#allocation25_spill]]  ;;  %s22042_s29 = sld [smem:[#allocation26_spill]] }
  0xfe   : > { %17010 = vmatprep.subr.bf16.mxu1 %v19424_v1  ;;  %vm11961_vm10 = vcmask 80896   ;;  %vm12429_vm11 = vcmask 523264   ;;  %vm13651_vm12 = vcmask 1041408   ;;  %s22043_s25 = sld [smem:[#allocation27_spill]]  ;;  %vm13647_vm13 = vcmask 31744   ;;  %s22044_s14 = sld [smem:[#allocation28_spill]] }
  0xff   : > { %s22045_s26 = sld [smem:[#allocation29_spill]] }
 0x100   : > { %872 = vmatpush1.bf16.msra.mxu0 %v19779_v15 }
 0x101   : > { %1145 = vmatprep.subr.bf16.mxu0 %v17751_v2  ;;  %17011 = vmatpush3.bf16.msra.mxu1 %v19793_v20  ;;  %v17827_v2 = vld [vmem:[#allocation2 + $0x2b4] ss:$12 sps:$4 sm:$0xff]  }
 0x102   : > { %17032 = vmatprep.subr.bf16.mxu1 %v19424_v1 }
 0x103   : > { %14694 = vmatmul.mubr.msk.bf16.vlgmr.msra.gmra.mrb[0].mxu0 %vm837_vm2, %v17765_v17 }
 0x104   : > { %1146 = vmatpush1.bf16.msra.mxu0 %v17753_v3  ;;  %905 = vmatprep.mubr.bf16.mxu0 %v19423_v0  ;;  %v17828_v3 = vld [vmem:[#allocation2 + $0x1f4] ss:$12 sps:$4 sm:$0xff]  }
 0x105   : > { %1147 = vmatprep.subr.bf16.mxu0 %v17754_v4  ;;  %17013 = vmatmul.mubr.msk.bf16.vlgmr.msra.gmra.mrb[0].mxu1 %vm837_vm2, %v17765_v17  ;;  %v17831_v4 = vld [vmem:[#allocation2 + $0x2c8] ss:$12 sps:$4 sm:$0xff]   ;;  %s713_s1 = scalar_lea.vmem %s22045_s26, %s22048_s21 }
 0x106   : > { %17016 = vmatprep.mubr.msk.bf16.mxu1 %vm19425_vm0, %v19424_v1  ;;  %17033 = vmatpush3.bf16.msra.mxu1 %v17768_v10  ;;  %v17837_v10 = vld [vmem:[#allocation2 + $0x2e4] ss:$12 sps:$4 sm:$0xff]   ;;  %v17843_v17 = vld [vmem:[#allocation2 + $0x23c] ss:$12 sps:$4 sm:$0xff]  }
 0x107   : > { %17034 = vmatprep.subr.bf16.mxu1 %v19424_v1 }
 0x108   : > { %1148 = vmatpush1.bf16.msra.mxu0 %v17756_v5  ;;  %v17832_v5 = vld [vmem:[#allocation2 + $0x2cc] ss:$12 sps:$4 sm:$0xff]  }
 0x109   : > { %1149 = vmatprep.subr.bf16.mxu0 %v17757_v6  ;;  %v17829_v6 = vld [vmem:[#allocation2 + $0x2c4] ss:$12 sps:$4 sm:$0xff]  }
 0x10a   : > { %17035 = vmatpush3.bf16.msra.mxu1 %v17770_v13  ;;  %v17842_v13 = vld [vmem:[#allocation2 + $0x2fc] ss:$12 sps:$4 sm:$0xff]  }
 0x10b   : > { %14695 = vmatmul.mubr.msk.bf16.gmra.mrb[4].mxu0 %vm837_vm2, %v17766_v21  ;;  %17036 = vmatprep.subr.bf16.mxu1 %v19424_v1 }
 0x10c   : > { %915 = vmatprep.mubr.bf16.mxu0 %v19423_v0  ;;  %1150 = vmatpush1.bf16.msra.mxu0 %v17759_v7  ;;  %v17833_v7 = vld [vmem:[#allocation2 + $0x20c] ss:$12 sps:$4 sm:$0xff]  }
 0x10d   : > { %1151 = vmatprep.subr.bf16.mxu0 %v17760_v8  ;;  %17017 = vmatmul.mubr.msk.bf16.gmra.mrb[4].mxu1 %vm837_vm2, %v17766_v21  ;;  %v17834_v8 = vld [vmem:[#allocation2 + $0x2dc] ss:$12 sps:$4 sm:$0xff]  }
 0x10e   : > { %17020 = vmatprep.mubr.msk.bf16.mxu1 %vm19425_vm0, %v19424_v1  ;;  %17037 = vmatpush3.bf16.msra.mxu1 %v17771_v16  ;;  %v17839_v16 = vld [vmem:[#allocation2 + $0x2f4] ss:$12 sps:$4 sm:$0xff]  }
 0x10f   : > { %17038 = vmatprep.subr.bf16.mxu1 %v19424_v1 }
 0x110   : > { %1152 = vmatpush1.bf16.msra.mxu0 %v17762_v11  ;;  %v17838_v11 = vld [vmem:[#allocation2 + $0x224] ss:$12 sps:$4 sm:$0xff]  }
 0x111   : > { %14709 = vmatprep.subr.msk.bf16.mxu0 %vm853_vm1, %v19775_v14 }
 0x112   : > { %17039 = vmatpush3.bf16.msra.mxu1 %v17773_v18  ;;  %v1378_v18 = vld [vmem:[#allocation2 + $0x30c] sm:$0xff] }
 0x113   : > { %14696 = vmatmul.mubr.msk.bf16.gmra.mrb[8].mxu0 %vm837_vm2, %v17767_v22  ;;  %17040 = vmatprep.subr.bf16.mxu1 %v19424_v1  ;;  %v14769_v19 = vcombine.high %v1378_v18, %v1378_v18 }
 0x114   : > { %925 = vmatprep.mubr.bf16.mxu0 %v19423_v0  ;;  %1154 = vmatpush1.bf16.msra.mxu0 %v19779_v15 }
 0x115   : > { %1670 = vmatprep.subr.bf16.mxu0 %v17782_v23  ;;  %17021 = vmatmul.mubr.msk.bf16.gmra.mrb[8].mxu1 %vm837_vm2, %v17767_v22 }
 0x116   : > { %17024 = vmatprep.mubr.msk.bf16.mxu1 %vm19425_vm0, %v19424_v1  ;;  %17041 = vmatpush3.bf16.msra.mxu1 %v19793_v20 }
 0x117   : > { %16300 = vmatprep.subr.bf16.mxu1 %v17804_v46 }
 0x11b   : > { %14697 = vmatmul.mubr.msk.bf16.gmra.mrb[12].mxu0 %vm837_vm2, %v17769_v24 }
 0x11c   : > { %935 = vmatprep.mubr.bf16.mxu0 %v19423_v0 }
 0x11d   : > { %17025 = vmatmul.mubr.msk.bf16.gmra.mrb[12].mxu1 %vm837_vm2, %v17769_v24 }
 0x11e   : > { %17028 = vmatprep.mubr.msk.bf16.mxu1 %vm19425_vm0, %v19424_v1 }
 0x123   : > { %14698 = vmatmul.mubr.msk.bf16.gmra.mrb[16].mxu0 %vm837_vm2, %v17772_v25 }
 0x124   : > { %1177 = vmatprep.mubr.bf16.mxu0 %v19423_v0 }
 0x125   : > { %17029 = vmatmul.mubr.msk.bf16.gmra.mrb[16].mxu1 %vm837_vm2, %v17772_v25 }
 0x126   : > { %17042 = vmatprep.mubr.msk.bf16.mxu1 %vm19425_vm0, %v19424_v1 }
 0x12b   : > { %14710 = vmatmul.mubr.msk.bf16.vlgmr.msra.gmra.mrb[20].mxu0 %vm837_vm2, %v17775_v26 }
 0x12c   : > { %1187 = vmatprep.mubr.bf16.mxu0 %v19423_v0  ;;  %1671 = vmatpush1.bf16.msra.mxu0 %v17780_v27 }
 0x12d   : > { %1672 = vmatprep.subr.bf16.mxu0 %v17785_v28  ;;  %17043 = vmatmul.mubr.msk.bf16.vlgmr.msra.gmra.mrb[20].mxu1 %vm837_vm2, %v17775_v26 }
 0x12e   : > { %17046 = vmatprep.mubr.msk.bf16.mxu1 %vm19425_vm0, %v19424_v1  ;;  %16301 = vmatpush3.bf16.msra.mxu1 %v17805_v47 }
 0x12f   : > { %16302 = vmatprep.subr.bf16.mxu1 %v17809_v50 }
 0x130   : > { %1673 = vmatpush1.bf16.msra.mxu0 %v17783_v29 }
 0x131   : > { %1674 = vmatprep.subr.bf16.mxu0 %v17788_v30 }
 0x132   : > { %16303 = vmatpush3.bf16.msra.mxu1 %v17810_v51 }
 0x133   : > { %14711 = vmatmul.mubr.msk.bf16.gmra.mrb[24].mxu0 %vm837_vm2, %v17776_v31  ;;  %16304 = vmatprep.subr.bf16.mxu1 %v17814_v54 }
 0x134   : > { %1197 = vmatprep.mubr.bf16.mxu0 %v19423_v0  ;;  %1675 = vmatpush1.bf16.msra.mxu0 %v17786_v32 }
 0x135   : > { %1676 = vmatprep.subr.bf16.mxu0 %v17791_v33  ;;  %17047 = vmatmul.mubr.msk.bf16.gmra.mrb[24].mxu1 %vm837_vm2, %v17776_v31 }
 0x136   : > { %17050 = vmatprep.mubr.msk.bf16.mxu1 %vm19425_vm0, %v19424_v1  ;;  %16305 = vmatpush3.bf16.msra.mxu1 %v17815_v55 }
 0x137   : > { %16306 = vmatprep.subr.bf16.mxu1 %v17819_v58 }
 0x138   : > { %1677 = vmatpush1.bf16.msra.mxu0 %v17789_v34 }
 0x139   : > { %1678 = vmatprep.subr.bf16.mxu0 %v17794_v35 }
 0x13a   : > { %16307 = vmatpush3.bf16.msra.mxu1 %v17823_v61  ;;  %v17844_v61 = vld [vmem:[#allocation2 + $0x314] ss:$0 sps:$4 sm:$0xff]  }
 0x13b   : > { %14712 = vmatmul.mubr.msk.bf16.gmra.mrb[28].mxu0 %vm837_vm2, %v17777_v36  ;;  %16308 = vmatprep.subr.bf16.mxu1 %v17827_v2 }
 0x13c   : > { %1207 = vmatprep.mubr.bf16.mxu0 %v19423_v0  ;;  %1679 = vmatpush1.bf16.msra.mxu0 %v17792_v37 }
 0x13d   : > { %17051 = vmatmul.mubr.msk.bf16.gmra.mrb[28].mxu1 %vm837_vm2, %v17777_v36  ;;  %1680 = vmatprep.subr.bf16.mxu0 %v17797_v40 }
 0x13e   : > { %17054 = vmatprep.mubr.msk.bf16.mxu1 %vm19425_vm0, %v19424_v1  ;;  %16309 = vmatpush3.bf16.msra.mxu1 %v17828_v3 }
 0x13f   : > { %16310 = vmatprep.subr.bf16.mxu1 %v17832_v5 }
 0x140   : > { %1681 = vmatpush1.bf16.msra.mxu0 %v17795_v41 }
 0x141   : > { %1682 = vmatprep.subr.bf16.mxu0 %v17800_v43 }
 0x142   : > { %16311 = vmatpush3.bf16.msra.mxu1 %v17833_v7 }
 0x143   : > { %14713 = vmatmul.mubr.msk.bf16.gmra.mrb[32].mxu0 %vm837_vm2, %v17778_v38  ;;  %16312 = vmatprep.subr.bf16.mxu1 %v17837_v10 }
 0x144   : > { %1217 = vmatprep.mubr.bf16.mxu0 %v19423_v0  ;;  %1683 = vmatpush1.bf16.msra.mxu0 %v17798_v42 }
 0x145   : > { %17055 = vmatmul.mubr.msk.bf16.gmra.mrb[32].mxu1 %vm837_vm2, %v17778_v38  ;;  %1684 = vmatprep.subr.bf16.mxu0 %v17803_v44 }
 0x146   : > { %17058 = vmatprep.mubr.msk.bf16.mxu1 %vm19425_vm0, %v19424_v1  ;;  %16313 = vmatpush3.bf16.msra.mxu1 %v17838_v11 }
 0x147   : > { %16314 = vmatprep.subr.bf16.mxu1 %v17842_v13 }
 0x148   : > { %1685 = vmatpush1.bf16.msra.mxu0 %v17801_v45 }
 0x149   : > { %1686 = vmatprep.subr.bf16.mxu0 %v17808_v49 }
 0x14a   : > { %16315 = vmatpush3.bf16.msra.mxu1 %v17843_v17 }
 0x14b   : > { %14714 = vmatmul.mubr.msk.bf16.gmra.mrb[36].mxu0 %vm837_vm2, %v17779_v39  ;;  %17062 = vmatprep.subr.bf16.mxu1 %v19424_v1 }
 0x14c   : > { %1687 = vmatpush1.bf16.msra.mxu0 %v17806_v48 }
 0x14d   : > { %17059 = vmatmul.mubr.msk.bf16.gmra.mrb[36].mxu1 %vm837_vm2, %v17779_v39  ;;  %1688 = vmatprep.subr.bf16.mxu0 %v17813_v52 }
 0x150   : > { %1689 = vmatpush1.bf16.msra.mxu0 %v17811_v53 }
 0x151   : > { %1690 = vmatprep.subr.bf16.mxu0 %v17818_v57 }
 0x154   : > { %1691 = vmatpush1.bf16.msra.mxu0 %v17816_v56 }
 0x155   : > { %1692 = vmatprep.subr.bf16.mxu0 %v17822_v59 }
 0x158   : > { %1693 = vmatpush1.bf16.msra.mxu0 %v17820_v60 }
 0x159   : > { %1694 = vmatprep.subr.bf16.mxu0 %v17826_v63 }
 0x15c   : > { %1695 = vmatpush1.bf16.msra.mxu0 %v17824_v62 }
 0x15d   : > { %1696 = vmatprep.subr.bf16.mxu0 %v17831_v4 }
 0x160   : > { %1697 = vmatpush1.bf16.msra.mxu0 %v17829_v6  ;;  %v14768_v6 = vcombine.low %v1378_v18, %v1378_v18 }
 0x161   : > { %1698 = vmatprep.subr.bf16.mxu0 %v17836_v9  ;;  %v1668_v9 = vsel %vm1660_vm3, %v17844_v61, 0 }
 0x162   : > { %v1662_v11 = vsel %vm1660_vm3, %v14768_v6, 0 }
 0x164   : > { %1699 = vmatpush1.bf16.msra.mxu0 %v17834_v8 }
 0x165   : > { %1700 = vmatprep.subr.bf16.mxu0 %v17841_v12 }
 0x168   : > { %1701 = vmatpush1.bf16.msra.mxu0 %v17839_v16 }
 0x169   : > { %14771 = vmatprep.subr.msk.bf16.mxu0 %vm1660_vm3, %v14769_v19 }
 0x1d6   : > { %v897_v21 = vpop.f32.mrb[0].mxu0 }
 0x1d7   : > { %v899_v22 = vpop.f32.mrb[1].mxu0 }
 0x1d8   : > { %v901_v23 = vpop.f32.mrb[2].mxu0  ;;  %v978_v30 = vpop.f32.mrb[0].mxu1 }
 0x1d9   : > { %v19852_v24 = vpack.c.bf16 %v901_v23, %v897_v21  ;;  %v903_v25 = vpop.f32.mrb[3].mxu0  ;;  %v17014_v33 = vpop.f32.mrb[1].mxu1  ;;  %v17853_v23 = vld [vmem:[#allocation2 + $0xc8] ss:$12 sps:$4 sm:$0xff]  }
 0x1da   : > { %v19854_v26 = vpack.c.bf16 %v903_v25, %v899_v22  ;;  %v981_v35 = vpop.f32.mrb[2].mxu1  ;;  %v17849_v22 = vld [vmem:[#allocation2 + $0x4] ss:$12 sps:$4 sm:$0xff]  }
 0x1db   : > { %v19860_v36 = vpack.c.bf16 %v981_v35, %v978_v30  ;;  %v17015_v37 = vpop.f32.mrb[3].mxu1 }
 0x1de   : > { %v907_v27 = vpop.f32.mrb[4].mxu0 }
 0x1df   : > { %v909_v28 = vpop.f32.mrb[5].mxu0 }
 0x1e0   : > { %v911_v29 = vpop.f32.mrb[6].mxu0  ;;  %v986_v41 = vpop.f32.mrb[4].mxu1 }
 0x1e1   : > { %v19856_v31 = vpack.c.bf16 %v911_v29, %v907_v27  ;;  %v913_v32 = vpop.f32.mrb[7].mxu0  ;;  %v17018_v44 = vpop.f32.mrb[5].mxu1 }
 0x1e2   : > { %v19858_v34 = vpack.c.bf16 %v913_v32, %v909_v28  ;;  %v989_v46 = vpop.f32.mrb[6].mxu1 }
 0x1e3   : > { %v19866_v47 = vpack.c.bf16 %v989_v46, %v986_v41  ;;  %v17019_v48 = vpop.f32.mrb[7].mxu1 }
 0x1e6   : > { %v917_v38 = vpop.f32.mrb[8].mxu0 }
 0x1e7   : > { %v919_v39 = vpop.f32.mrb[9].mxu0 }
 0x1e8   : > { %v921_v40 = vpop.f32.mrb[10].mxu0  ;;  %v994_v52 = vpop.f32.mrb[8].mxu1 }
 0x1e9   : > { %v19862_v42 = vpack.c.bf16 %v921_v40, %v917_v38  ;;  %v923_v43 = vpop.f32.mrb[11].mxu0  ;;  %v17022_v55 = vpop.f32.mrb[9].mxu1 }
 0x1ea   : > { %v19864_v45 = vpack.c.bf16 %v923_v43, %v919_v39  ;;  %v997_v57 = vpop.f32.mrb[10].mxu1 }
 0x1eb   : > { %v19872_v58 = vpack.c.bf16 %v997_v57, %v994_v52  ;;  %v17023_v59 = vpop.f32.mrb[11].mxu1 }
 0x1ee   : > { %v927_v49 = vpop.f32.mrb[12].mxu0 }
 0x1ef   : > { %v929_v50 = vpop.f32.mrb[13].mxu0 }
 0x1f0   : > { %v931_v51 = vpop.f32.mrb[14].mxu0  ;;  %v1002_v2 = vpop.f32.mrb[12].mxu1 }
 0x1f1   : > { %v19868_v53 = vpack.c.bf16 %v931_v51, %v927_v49  ;;  %v933_v54 = vpop.f32.mrb[15].mxu0  ;;  %v17026_v4 = vpop.f32.mrb[13].mxu1 }
 0x1f2   : > { %v19870_v56 = vpack.c.bf16 %v933_v54, %v929_v50  ;;  %v1005_v5 = vpop.f32.mrb[14].mxu1 }
 0x1f3   : > { %v19878_v7 = vpack.c.bf16 %v1005_v5, %v1002_v2  ;;  %v17027_v8 = vpop.f32.mrb[15].mxu1 }
 0x1f6   : > { %v19874_v60 = vpop.f32.mrb[16].mxu0 }
 0x1f7   : > { %v19876_v62 = vpop.f32.mrb[17].mxu0 }
 0x1f8   : > { %v941_v63 = vpop.f32.mrb[18].mxu0  ;;  %v19882_v16 = vpop.f32.mrb[16].mxu1 }
 0x1f9   : > { %v942_v3 = vpop.f32.mrb[19].mxu0  ;;  %v17030_v21 = vpop.f32.mrb[17].mxu1 }
 0x1fa   : > { %v1013_v27 = vpop.f32.mrb[18].mxu1 }
 0x1fb   : > { %v17031_v18 = vpop.f32.mrb[19].mxu1 }
 0x1fe   : > { %v1179_v10 = vpop.f32.mrb[20].mxu0 }
 0x1ff   : > { %v1181_v12 = vpop.f32.mrb[21].mxu0 }
 0x200   : > { %v1183_v13 = vpop.f32.mrb[22].mxu0  ;;  %v1260_v32 = vpop.f32.mrb[20].mxu1 }
 0x201   : > { %v1298_v17 = vpack.c.bf16 %v1183_v13, %v1179_v10  ;;  %v1185_v19 = vpop.f32.mrb[23].mxu0  ;;  %v17044_v37 = vpop.f32.mrb[21].mxu1 }
 0x202   : > { %v1299_v25 = vpack.c.bf16 %v1185_v19, %v1181_v12  ;;  %v1263_v39 = vpop.f32.mrb[22].mxu1 }
 0x203   : > { %v19884_v40 = vpack.c.bf16 %v1263_v39, %v1260_v32  ;;  %v17045_v41 = vpop.f32.mrb[23].mxu1  ;;  %v17852_v32 = vld [vmem:[#allocation2 + $0x1c] ss:$12 sps:$4 sm:$0xff]   ;;  %v17850_v39 = vld [vmem:[#allocation2 + $0x18] ss:$12 sps:$4 sm:$0xff]  }
 0x204   : > { %1702 = vmatprep.mubr.bf16.mxu0 %v1299_v25  ;;  %1864 = vmatprep.mubr.bf16.mxu1 %v1299_v25  ;;  %v17859_v41 = vld [vmem:[#allocation2 + $0x20] ss:$12 sps:$4 sm:$0xff]  }
 0x205   : > { %1703 = vmatmul.mubr.bf16.vlgmr.msra.gmra.mrb[40].mxu0 %v1298_v17  ;;  %1865 = vmatmul.mubr.bf16.vlgmr.msra.gmra.mrb[40].mxu1 %v1298_v17 }
 0x206   : > { %v1189_v28 = vpop.f32.mrb[24].mxu0  ;;  %17063 = vmatpush3.bf16.msra.mxu1 %v1668_v9  ;;  %1752 = vmatpush1.bf16.msra.mxu0 %v1662_v11 }
 0x207   : > { %v1191_v29 = vpop.f32.mrb[25].mxu0  ;;  %2264 = vmatprep.subr.bf16.mxu0 %v17849_v22  ;;  %16352 = vmatprep.subr.bf16.mxu1 %v17853_v23 }
 0x208   : > { %v1193_v30 = vpop.f32.mrb[26].mxu0  ;;  %v1268_v48 = vpop.f32.mrb[24].mxu1 }
 0x209   : > { %v1301_v33 = vpack.c.bf16 %v1193_v30, %v1189_v28  ;;  %v1195_v35 = vpop.f32.mrb[27].mxu0  ;;  %v17048_v51 = vpop.f32.mrb[25].mxu1  ;;  %v17847_v28 = vld [vmem:[#allocation2] ss:$12 sps:$4 sm:$0xff]  }
 0x20a   : > { %v1302_v38 = vpack.c.bf16 %v1195_v35, %v1191_v29  ;;  %v1271_v54 = vpop.f32.mrb[26].mxu1  ;;  %v17854_v29 = vld [vmem:[#allocation2 + $0x8] ss:$12 sps:$4 sm:$0xff]   ;;  %v17858_v35 = vld [vmem:[#allocation2 + $0xe0] ss:$12 sps:$4 sm:$0xff]  }
 0x20b   : > { %v19886_v55 = vpack.c.bf16 %v1271_v54, %v1268_v48  ;;  %v17049_v57 = vpop.f32.mrb[27].mxu1  ;;  %v17862_v48 = vld [vmem:[#allocation2 + $0x4c] ss:$12 sps:$4 sm:$0xff]   ;;  %v17866_v51 = vld [vmem:[#allocation2 + $0x64] ss:$12 sps:$4 sm:$0xff]  }
 0x20c   : > { %1712 = vmatprep.mubr.bf16.mxu0 %v1302_v38  ;;  %1872 = vmatprep.mubr.bf16.mxu1 %v1302_v38  ;;  %v17864_v54 = vld [vmem:[#allocation2 + $0x60] ss:$12 sps:$4 sm:$0xff]   ;;  %v17870_v57 = vld [vmem:[#allocation2 + $0x7c] ss:$12 sps:$4 sm:$0xff]  }
 0x20d   : > { %1713 = vmatmul.mubr.bf16.gmra.mrb[44].mxu0 %v1301_v33  ;;  %1873 = vmatmul.mubr.bf16.gmra.mrb[44].mxu1 %v1301_v33 }
 0x20e   : > { %v1199_v43 = vpop.f32.mrb[28].mxu0 }
 0x20f   : > { %v1201_v44 = vpop.f32.mrb[29].mxu0 }
 0x210   : > { %v1203_v46 = vpop.f32.mrb[30].mxu0  ;;  %v1276_v2 = vpop.f32.mrb[28].mxu1 }
 0x211   : > { %v1304_v49 = vpack.c.bf16 %v1203_v46, %v1199_v43  ;;  %v1205_v50 = vpop.f32.mrb[31].mxu0  ;;  %v17052_v5 = vpop.f32.mrb[29].mxu1  ;;  %v17857_v43 = vld [vmem:[#allocation2 + $0x34] ss:$12 sps:$4 sm:$0xff]   ;;  %v17855_v46 = vld [vmem:[#allocation2 + $0x30] ss:$12 sps:$4 sm:$0xff]  }
 0x212   : > { %v1305_v52 = vpack.c.bf16 %v1205_v50, %v1201_v44  ;;  %v1279_v8 = vpop.f32.mrb[30].mxu1  ;;  %v17863_v44 = vld [vmem:[#allocation2 + $0xf8] ss:$12 sps:$4 sm:$0xff]   ;;  %v17860_v50 = vld [vmem:[#allocation2 + $0x48] ss:$12 sps:$4 sm:$0xff]  }
 0x213   : > { %v19888_v9 = vpack.c.bf16 %v1279_v8, %v1276_v2  ;;  %v17053_v10 = vpop.f32.mrb[31].mxu1  ;;  %v17881_v2 = vld [vmem:[#allocation2 + $0x140] ss:$12 sps:$4 sm:$0xff]   ;;  %v17878_v8 = vld [vmem:[#allocation2 + $0xa8] ss:$12 sps:$4 sm:$0xff]  }
 0x214   : > { %1722 = vmatprep.mubr.bf16.mxu0 %v1305_v52  ;;  %1880 = vmatprep.mubr.bf16.mxu1 %v1305_v52  ;;  %v17872_v52 = vld [vmem:[#allocation2 + $0x50] ss:$12 sps:$4 sm:$0xff]   ;;  %v17880_v5 = vld [vmem:[#allocation2 + $0xac] ss:$12 sps:$4 sm:$0xff]  }
 0x215   : > { %1723 = vmatmul.mubr.bf16.gmra.mrb[48].mxu0 %v1304_v49  ;;  %1881 = vmatmul.mubr.bf16.gmra.mrb[48].mxu1 %v1304_v49  ;;  %v17867_v49 = vld [vmem:[#allocation2 + $0x38] ss:$12 sps:$4 sm:$0xff]  }
 0x216   : > { %v1209_v59 = vpop.f32.mrb[32].mxu0  ;;  %v17885_v10 = vld [vmem:[#allocation2 + $0xc4] ss:$12 sps:$4 sm:$0xff]  }
 0x217   : > { %v1211_v61 = vpop.f32.mrb[33].mxu0 }
 0x218   : > { %v1213_v63 = vpop.f32.mrb[34].mxu0  ;;  %v1284_v19 = vpop.f32.mrb[32].mxu1 }
 0x219   : > { %v1307_v3 = vpack.c.bf16 %v1213_v63, %v1209_v59  ;;  %v1215_v4 = vpop.f32.mrb[35].mxu0  ;;  %v17056_v22 = vpop.f32.mrb[33].mxu1  ;;  %v17876_v59 = vld [vmem:[#allocation2 + $0x128] ss:$12 sps:$4 sm:$0xff]   ;;  %v17868_v63 = vld [vmem:[#allocation2 + $0x78] ss:$12 sps:$4 sm:$0xff]  }
 0x21a   : > { %v1308_v6 = vpack.c.bf16 %v1215_v4, %v1211_v61  ;;  %v1287_v23 = vpop.f32.mrb[34].mxu1  ;;  %v17877_v61 = vld [vmem:[#allocation2 + $0x68] ss:$12 sps:$4 sm:$0xff]   ;;  %v17882_v4 = vld [vmem:[#allocation2 + $0x80] ss:$12 sps:$4 sm:$0xff]  }
 0x21b   : > { %v19890_v27 = vpack.c.bf16 %v1287_v23, %v1284_v19  ;;  %v17057_v18 = vpop.f32.mrb[35].mxu1  ;;  %v17892_v19 = vld [vmem:[#allocation2 + $0xb0] ss:$12 sps:$4 sm:$0xff]   ;;  %v17895_v22 = vld [vmem:[#allocation2 + $0xf4] ss:$12 sps:$4 sm:$0xff]  }
 0x21c   : > { %1732 = vmatprep.mubr.bf16.mxu0 %v1308_v6  ;;  %1888 = vmatprep.mubr.bf16.mxu1 %v1308_v6  ;;  %v17886_v6 = vld [vmem:[#allocation2 + $0x158] ss:$12 sps:$4 sm:$0xff]   ;;  %v17899_v23 = vld [vmem:[#allocation2 + $0x188] ss:$0 sps:$4 sm:$0xff]  }
 0x21d   : > { %1733 = vmatmul.mubr.bf16.gmra.mrb[52].mxu0 %v1307_v3  ;;  %1889 = vmatmul.mubr.bf16.gmra.mrb[52].mxu1 %v1307_v3  ;;  %v17873_v3 = vld [vmem:[#allocation2 + $0x90] ss:$12 sps:$4 sm:$0xff]   ;;  %v17896_v18 = vld [vmem:[#allocation2 + $0x108] ss:$12 sps:$4 sm:$0xff]  }
 0x21e   : > { %v1219_v11 = vpop.f32.mrb[36].mxu0 }
 0x21f   : > { %v1221_v12 = vpop.f32.mrb[37].mxu0  ;;  %v1310_v25 = vpack.c.bf16 %v1219_v11, %v1219_v11  ;;  %v17891_v11 = vld [vmem:[#allocation2 + $0x170] ss:$12 sps:$4 sm:$0xff]  }
 0x220   : > { %v1311_v13 = vpack.c.bf16 %v1221_v12, %v1221_v12  ;;  %v1223_v17 = vpop.f32.mrb[38].mxu0  ;;  %v19895_v30 = vpop.f32.mrb[36].mxu1  ;;  %v17883_v12 = vld [vmem:[#allocation2 + $0xc0] ss:$12 sps:$4 sm:$0xff]  }
 0x221   : > { %v1224_v21 = vpop.f32.mrb[39].mxu0  ;;  %v17060_v33 = vpop.f32.mrb[37].mxu1  ;;  %v17890_v17 = vld [vmem:[#allocation2 + $0xdc] ss:$12 sps:$4 sm:$0xff]  }
 0x222   : > { %1742 = vmatprep.mubr.bf16.mxu0 %v1311_v13  ;;  %1896 = vmatprep.mubr.bf16.mxu1 %v1311_v13  ;;  %v1295_v37 = vpop.f32.mrb[38].mxu1  ;;  %v1312_v13 = vpack.c.bf16 %v19895_v30, %v19895_v30  ;;  %v17888_v21 = vld [vmem:[#allocation2 + $0xd8] ss:$12 sps:$4 sm:$0xff]  }
 0x223   : > { %v17061_v38 = vpop.f32.mrb[39].mxu1  ;;  %v19143_v30 = vld [vmem:[%s19762_s17 + $0x4] ss:$12 sps:$4 sm:$0xff]  }
 0x224   : > { %v17903_v33 = vld [vmem:[#allocation2 + $0x138] ss:$12 sps:$4 sm:$0xff]   ;;  %v17906_v37 = vld [vmem:[#allocation2 + $0x150] ss:$12 sps:$4 sm:$0xff]  }
 0x225   : > { %1743 = vmatmul.mubr.bf16.gmra.mrb[56].mxu0 %v1310_v25  ;;  %1897 = vmatmul.mubr.bf16.gmra.mrb[56].mxu1 %v1310_v25  ;;  %v17893_v25 = vld [vmem:[#allocation2 + $0xf0] ss:$12 sps:$4 sm:$0xff]   ;;  %v17911_v38 = vld [vmem:[#allocation2 + $0x16c] ss:$12 sps:$4 sm:$0xff]  }
 0x226   : > { %1783 = vmatprep.mubr.bf16.mxu0 %v19423_v0  ;;  %17064 = vmatprep.mubr.msk.bf16.mxu1 %vm19425_vm0, %v19424_v1 }
 0x22d   : > { %14772 = vmatmul.mubr.msk.bf16.vlgmr.msra.gmra.mrb[40].mxu0 %vm1644_vm4, %v19884_v40  ;;  %17065 = vmatmul.mubr.msk.bf16.vlgmr.msra.gmra.mrb[60].mxu1 %vm1644_vm4, %v19884_v40  ;;  %v17871_v40 = vld [vmem:[#allocation2 + $0x110] ss:$12 sps:$4 sm:$0xff]  }
 0x22e   : > { %2265 = vmatpush1.bf16.msra.mxu0 %v17847_v28  ;;  %16353 = vmatpush3.bf16.msra.mxu1 %v17854_v29  ;;  %v2262_v28 = vsel %vm1660_vm3, %v17899_v23, 0  ;;  %v17902_v29 = vld [vmem:[#allocation2 + $0x124] ss:$12 sps:$4 sm:$0xff]   ;;  %v17947_v23 = vld [vmem:[#allocation2 + $0x320] ss:$12 sps:$4 sm:$0xff]  }
 0x22f   : > { %2266 = vmatprep.subr.bf16.mxu0 %v17852_v32  ;;  %1793 = vmatprep.mubr.bf16.mxu0 %v19423_v0  ;;  %v17905_v32 = vld [vmem:[#allocation2 + $0x13c] ss:$12 sps:$4 sm:$0xff]  }
 0x230   : > { %17068 = vmatprep.mubr.msk.bf16.mxu1 %vm19425_vm0, %v19424_v1  ;;  %16354 = vmatprep.subr.bf16.mxu1 %v17858_v35  ;;  %v17908_v35 = vld [vmem:[#allocation2 + $0x154] ss:$12 sps:$4 sm:$0xff]  }
 0x232   : > { %2267 = vmatpush1.bf16.msra.mxu0 %v17850_v39  ;;  %16355 = vmatpush3.bf16.msra.mxu1 %v17859_v41  ;;  %v1095_v39 = vld [vmem:[#allocation2 + $0x180] sm:$0xff]  ;;  %v17909_v41 = vld [vmem:[#allocation2 + $0x168] ss:$12 sps:$4 sm:$0xff]  }
 0x233   : > { %2268 = vmatprep.subr.bf16.mxu0 %v17857_v43  ;;  %16356 = vmatprep.subr.bf16.mxu1 %v17863_v44  ;;  %v14831_v43 = vcombine.high %v1095_v39, %v1095_v39  ;;  %v14830_v44 = vcombine.low %v1095_v39, %v1095_v39  ;;  %v17956_v39 = vld [vmem:[#allocation2 + $0x410] ss:$12 sps:$4 sm:$0xff]  }
 0x235   : > { %14773 = vmatmul.mubr.msk.bf16.gmra.mrb[44].mxu0 %vm1644_vm4, %v19886_v55  ;;  %17069 = vmatmul.mubr.msk.bf16.gmra.mrb[64].mxu1 %vm1644_vm4, %v19886_v55  ;;  %v17875_v55 = vld [vmem:[#allocation2 + $0x94] ss:$12 sps:$4 sm:$0xff]  }
 0x236   : > { %2269 = vmatpush1.bf16.msra.mxu0 %v17855_v46  ;;  %1803 = vmatprep.mubr.bf16.mxu0 %v19423_v0  ;;  %v1029_v46 = vpack.c.bf16 %v19876_v62, %v19876_v62  ;;  %v19153_v62 = vld [vmem:[%s19762_s17 + $0x38] ss:$12 sps:$4 sm:$0xff]  }
 0x237   : > { %2270 = vmatprep.subr.bf16.mxu0 %v17862_v48  ;;  %17072 = vmatprep.mubr.msk.bf16.mxu1 %vm19425_vm0, %v19424_v1  ;;  %v2256_v48 = vsel %vm1660_vm3, %v14830_v44, 0 }
 0x238   : > { %16357 = vmatpush3.bf16.msra.mxu1 %v17867_v49  ;;  %v1028_v49 = vpack.c.bf16 %v19874_v60, %v19874_v60  ;;  %v19150_v60 = vld [vmem:[%s19762_s17 + $0x48] ss:$12 sps:$4 sm:$0xff]  }
 0x239   : > { %16358 = vmatprep.subr.bf16.mxu1 %v17871_v40  ;;  %v17921_v40 = vld [vmem:[#allocation2 + $0x31c] ss:$12 sps:$4 sm:$0xff]  }
 0x23a   : > { %2271 = vmatpush1.bf16.msra.mxu0 %v17860_v50  ;;  %v17919_v50 = vld [vmem:[#allocation2 + $0x318] ss:$12 sps:$4 sm:$0xff]  }
 0x23b   : > { %2272 = vmatprep.subr.bf16.mxu0 %v17866_v51  ;;  %v20021_v51 = vld [vmem:[#allocation4 + $0x68] ss:$0 sps:$4 sm:$0x11]  }
 0x23c   : > { %16359 = vmatpush3.bf16.msra.mxu1 %v17872_v52  ;;  %v17924_v52 = vld [vmem:[#allocation2 + $0x334] ss:$12 sps:$4 sm:$0xff]  }
 0x23d   : > { %14774 = vmatmul.mubr.msk.bf16.gmra.mrb[48].mxu0 %vm1644_vm4, %v19888_v9  ;;  %17073 = vmatmul.mubr.msk.bf16.gmra.mrb[68].mxu1 %vm1644_vm4, %v19888_v9  ;;  %v17887_v9 = vld [vmem:[#allocation2 + $0x98] ss:$12 sps:$4 sm:$0xff]  }
 0x23e   : > { %2273 = vmatpush1.bf16.msra.mxu0 %v17864_v54  ;;  %1813 = vmatprep.mubr.bf16.mxu0 %v19423_v0  ;;  %v17922_v54 = vld [vmem:[#allocation2 + $0x330] ss:$12 sps:$4 sm:$0xff]  }
 0x23f   : > { %2274 = vmatprep.subr.bf16.mxu0 %v17870_v57  ;;  %17076 = vmatprep.mubr.msk.bf16.mxu1 %vm19425_vm0, %v19424_v1  ;;  %v17925_v57 = vld [vmem:[#allocation2 + $0x348] ss:$12 sps:$4 sm:$0xff]  }
 0x240   : > { %16360 = vmatprep.subr.bf16.mxu1 %v17876_v59  ;;  %v17927_v59 = vld [vmem:[#allocation2 + $0x34c] ss:$12 sps:$4 sm:$0xff]  }
 0x241   : > { %16361 = vmatpush3.bf16.msra.mxu1 %v17877_v61  ;;  %v17928_v61 = vld [vmem:[#allocation2 + $0x360] ss:$12 sps:$4 sm:$0xff]  }
 0x242   : > { %2275 = vmatpush1.bf16.msra.mxu0 %v17868_v63  ;;  %16362 = vmatprep.subr.bf16.mxu1 %v17881_v2  ;;  %v17931_v63 = vld [vmem:[#allocation2 + $0x378] ss:$12 sps:$4 sm:$0xff]   ;;  %v17936_v2 = vld [vmem:[#allocation2 + $0x394] ss:$12 sps:$4 sm:$0xff]  }
 0x243   : > { %2276 = vmatprep.subr.bf16.mxu0 %v17875_v55  ;;  %v17933_v55 = vld [vmem:[#allocation2 + $0x37c] ss:$12 sps:$4 sm:$0xff]  }
 0x245   : > { %14775 = vmatmul.mubr.msk.bf16.gmra.mrb[52].mxu0 %vm1644_vm4, %v19890_v27  ;;  %17077 = vmatmul.mubr.msk.bf16.gmra.mrb[72].mxu1 %vm1644_vm4, %v19890_v27  ;;  %v17898_v27 = vld [vmem:[#allocation2 + $0x10c] ss:$12 sps:$4 sm:$0xff]  }
 0x246   : > { %2277 = vmatpush1.bf16.msra.mxu0 %v17873_v3  ;;  %16363 = vmatpush3.bf16.msra.mxu1 %v17882_v4  ;;  %v17934_v3 = vld [vmem:[#allocation2 + $0x390] ss:$12 sps:$4 sm:$0xff]   ;;  %v17937_v4 = vld [vmem:[#allocation2 + $0x3a8] ss:$12 sps:$4 sm:$0xff]  }
 0x247   : > { %2278 = vmatprep.subr.bf16.mxu0 %v17880_v5  ;;  %1823 = vmatprep.mubr.bf16.mxu0 %v19423_v0  ;;  %v17939_v5 = vld [vmem:[#allocation2 + $0x3ac] ss:$12 sps:$4 sm:$0xff]  }
 0x248   : > { %17080 = vmatprep.mubr.msk.bf16.mxu1 %vm19425_vm0, %v19424_v1  ;;  %16364 = vmatprep.subr.bf16.mxu1 %v17886_v6 }
 0x24a   : > { %2279 = vmatpush1.bf16.msra.mxu0 %v17878_v8  ;;  %16365 = vmatpush3.bf16.msra.mxu1 %v17887_v9 }
 0x24b   : > { %2280 = vmatprep.subr.bf16.mxu0 %v17885_v10  ;;  %16366 = vmatprep.subr.bf16.mxu1 %v17891_v11  ;;  %v17942_v11 = vld [vmem:[#allocation2 + $0x3c4] ss:$12 sps:$4 sm:$0xff]  }
 0x24d   : > { %14776 = vmatmul.mubr.msk.bf16.gmra.mrb[60].mxu0 %vm1644_vm4, %v1312_v13  ;;  %17081 = vmatmul.mubr.msk.bf16.gmra.mrb[76].mxu1 %vm1644_vm4, %v1312_v13  ;;  %v17940_v13 = vld [vmem:[#allocation2 + $0x3c0] ss:$12 sps:$4 sm:$0xff]  }
 0x24e   : > { %2281 = vmatpush1.bf16.msra.mxu0 %v17883_v12  ;;  %2296 = vmatprep.mubr.bf16.mxu0 %v19854_v26 }
 0x24f   : > { %2458 = vmatprep.mubr.bf16.mxu1 %v19854_v26  ;;  %2282 = vmatprep.subr.bf16.mxu0 %v17890_v17  ;;  %v17900_v26 = vld [vmem:[#allocation2 + $0x120] ss:$12 sps:$4 sm:$0xff]  }
 0x250   : > { %16367 = vmatpush3.bf16.msra.mxu1 %v17892_v19  ;;  %v17945_v19 = vld [vmem:[#allocation2 + $0x3dc] ss:$12 sps:$4 sm:$0xff]  }
 0x251   : > { %17084 = vmatprep.subr.bf16.mxu1 %v19424_v1 }
 0x252   : > { %2283 = vmatpush1.bf16.msra.mxu0 %v17888_v21  ;;  %v17946_v21 = vld [vmem:[#allocation2 + $0x3e0] ss:$12 sps:$4 sm:$0xff]  }
 0x253   : > { %2284 = vmatprep.subr.bf16.mxu0 %v17895_v22  ;;  %v17943_v22 = vld [vmem:[#allocation2 + $0x3d8] ss:$12 sps:$4 sm:$0xff]  }
 0x255   : > { %2459 = vmatmul.mubr.bf16.vlgmr.msra.gmra.mrb[80].mxu1 %v19852_v24 }
 0x256   : > { %2285 = vmatpush1.bf16.msra.mxu0 %v17893_v25  ;;  %2466 = vmatprep.mubr.bf16.mxu1 %v19858_v34 }
 0x257   : > { %2286 = vmatprep.subr.bf16.mxu0 %v17898_v27  ;;  %17085 = vmatpush3.bf16.msra.mxu1 %v2262_v28 }
 0x258   : > { %2618 = vmatprep.subr.bf16.mxu1 %v19143_v30 }
 0x25a   : > { %2287 = vmatpush1.bf16.msra.mxu0 %v17896_v18 }
 0x25b   : > { %2288 = vmatprep.subr.bf16.mxu0 %v17902_v29  ;;  %v17950_v29 = vld [vmem:[#allocation2 + $0x3f4] ss:$12 sps:$4 sm:$0xff]  }
 0x25d   : > { %2467 = vmatmul.mubr.bf16.gmra.mrb[84].mxu1 %v19856_v31 }
 0x25e   : > { %2289 = vmatpush1.bf16.msra.mxu0 %v17900_v26  ;;  %2474 = vmatprep.mubr.bf16.mxu1 %v19864_v45  ;;  %v17951_v26 = vld [vmem:[#allocation2 + $0x3f8] ss:$12 sps:$4 sm:$0xff]  }
 0x25f   : > { %2290 = vmatprep.subr.bf16.mxu0 %v17905_v32  ;;  %v17948_v32 = vld [vmem:[#allocation2 + $0x3f0] ss:$12 sps:$4 sm:$0xff]  }
 0x262   : > { %2291 = vmatpush1.bf16.msra.mxu0 %v17903_v33  ;;  %v17952_v33 = vld [vmem:[#allocation2 + $0x338] ss:$12 sps:$4 sm:$0xff]  }
 0x263   : > { %2292 = vmatprep.subr.bf16.mxu0 %v17908_v35 }
 0x265   : > { %2475 = vmatmul.mubr.bf16.gmra.mrb[88].mxu1 %v19862_v42 }
 0x266   : > { %2293 = vmatpush1.bf16.msra.mxu0 %v17906_v37  ;;  %2482 = vmatprep.mubr.bf16.mxu1 %v19870_v56  ;;  %v17953_v37 = vld [vmem:[#allocation2 + $0x408] ss:$12 sps:$4 sm:$0xff]  }
 0x267   : > { %2294 = vmatprep.subr.bf16.mxu0 %v17911_v38  ;;  %v17955_v38 = vld [vmem:[#allocation2 + $0x40c] ss:$12 sps:$4 sm:$0xff]  }
 0x26a   : > { %2295 = vmatpush1.bf16.msra.mxu0 %v17909_v41  ;;  %v17957_v41 = vld [vmem:[#allocation2 + $0x350] ss:$12 sps:$4 sm:$0xff]  }
 0x26b   : > { %14833 = vmatprep.subr.msk.bf16.mxu0 %vm1660_vm3, %v14831_v43 }
 0x26d   : > { %2297 = vmatmul.mubr.bf16.vlgmr.msra.gmra.mrb[40].mxu0 %v19852_v24  ;;  %2483 = vmatmul.mubr.bf16.gmra.mrb[92].mxu1 %v19868_v53  ;;  %v19144_v24 = vld [vmem:[%s19762_s17] ss:$12 sps:$4 sm:$0xff]  }
 0x26e   : > { %2306 = vmatprep.mubr.bf16.mxu0 %v19858_v34  ;;  %2490 = vmatprep.mubr.bf16.mxu1 %v1029_v46  ;;  %v19146_v34 = vld [vmem:[%s19762_s17 + $0x18] ss:$12 sps:$4 sm:$0xff]  }
 0x26f   : > { %2346 = vmatpush1.bf16.msra.mxu0 %v2256_v48 }
 0x270   : > { %3141 = vmatprep.subr.bf16.mxu0 %v17921_v40  ;;  %v17972_v40 = vld [vmem:[#allocation2 + $0x398] ss:$12 sps:$4 sm:$0xff]  }
 0x275   : > { %2307 = vmatmul.mubr.bf16.gmra.mrb[44].mxu0 %v19856_v31  ;;  %2491 = vmatmul.mubr.bf16.gmra.mrb[96].mxu1 %v1028_v49  ;;  %v19145_v31 = vld [vmem:[%s19762_s17 + $0x1c] ss:$12 sps:$4 sm:$0xff]  }
 0x276   : > { %2316 = vmatprep.mubr.bf16.mxu0 %v19864_v45  ;;  %17086 = vmatprep.mubr.msk.bf16.mxu1 %vm19425_vm0, %v19424_v1  ;;  %v19147_v45 = vld [vmem:[%s19762_s17 + $0x34] ss:$12 sps:$4 sm:$0xff]  }
 0x27d   : > { %2317 = vmatmul.mubr.bf16.gmra.mrb[48].mxu0 %v19862_v42  ;;  %17087 = vmatmul.mubr.msk.bf16.vlgmr.msra.gmra.mrb[100].mxu1 %vm1644_vm4, %v19860_v36  ;;  %v19148_v42 = vld [vmem:[%s19762_s17 + $0x30] ss:$12 sps:$4 sm:$0xff]  }
 0x27e   : > { %2326 = vmatprep.mubr.bf16.mxu0 %v19870_v56  ;;  %2619 = vmatpush1.bf16.msra.mxu1 %v19144_v24  ;;  %v19149_v56 = vld [vmem:[%s19762_s17 + $0x4c] ss:$12 sps:$4 sm:$0xff]   ;;  %v17961_v24 = vld [vmem:[#allocation2 + $0x428] ss:$12 sps:$4 sm:$0xff]  }
 0x27f   : > { %17090 = vmatprep.mubr.msk.bf16.mxu1 %vm19425_vm0, %v19424_v1  ;;  %2620 = vmatprep.subr.bf16.mxu1 %v19145_v31 }
 0x282   : > { %2621 = vmatpush1.bf16.msra.mxu1 %v19146_v34  ;;  %v17958_v34 = vld [vmem:[#allocation2 + $0x420] ss:$12 sps:$4 sm:$0xff]  }
 0x283   : > { %2622 = vmatprep.subr.bf16.mxu1 %v19147_v45  ;;  %v17962_v45 = vld [vmem:[#allocation2 + $0x368] ss:$12 sps:$4 sm:$0xff]  }
 0x285   : > { %2327 = vmatmul.mubr.bf16.gmra.mrb[52].mxu0 %v19868_v53  ;;  %17091 = vmatmul.mubr.msk.bf16.gmra.mrb[104].mxu1 %vm1644_vm4, %v19866_v47  ;;  %v19152_v53 = vld [vmem:[%s19762_s17 + $0x20] ss:$12 sps:$4 sm:$0xff]  }
 0x286   : > { %2336 = vmatprep.mubr.bf16.mxu0 %v1029_v46  ;;  %17094 = vmatprep.mubr.msk.bf16.mxu1 %vm19425_vm0, %v19424_v1 }
 0x287   : > { %2623 = vmatpush1.bf16.msra.mxu1 %v19148_v42 }
 0x288   : > { %2624 = vmatprep.subr.bf16.mxu1 %v19149_v56  ;;  %v17963_v56 = vld [vmem:[#allocation2 + $0x438] ss:$12 sps:$4 sm:$0xff]  }
 0x28b   : > { %2625 = vmatpush1.bf16.msra.mxu1 %v19150_v60  ;;  %v17965_v60 = vld [vmem:[#allocation2 + $0x43c] ss:$12 sps:$4 sm:$0xff]  }
 0x28c   : > { %14849 = vmatprep.subr.msk.bf16.mxu1 %vm853_vm1, %v19775_v14  ;;  %v1030_v14 = vpack.c.bf16 %v19882_v16, %v19882_v16  ;;  %v19154_v16 = vld [vmem:[%s19762_s17 + $0x50] ss:$12 sps:$4 sm:$0xff]  }
 0x28d   : > { %2337 = vmatmul.mubr.bf16.gmra.mrb[64].mxu0 %v1028_v49  ;;  %17095 = vmatmul.mubr.msk.bf16.gmra.mrb[108].mxu1 %vm1644_vm4, %v19872_v58  ;;  %v17960_v49 = vld [vmem:[#allocation2 + $0x424] ss:$12 sps:$4 sm:$0xff]  }
 0x28e   : > { %2377 = vmatprep.mubr.bf16.mxu0 %v19423_v0  ;;  %17098 = vmatprep.mubr.msk.bf16.mxu1 %vm19425_vm0, %v19424_v1 }
 0x28f   : > { %2627 = vmatpush1.bf16.msra.mxu1 %v19779_v15  ;;  %v17914_v15 = vld [vmem:[#allocation4 + $0x48] sm:$0xff]  }
 0x290   : > { %17106 = vmatprep.subr.bf16.mxu1 %v19424_v1 }
 0x295   : > { %14834 = vmatmul.mubr.msk.bf16.vlgmr.msra.gmra.mrb[40].mxu0 %vm1644_vm4, %v19860_v36  ;;  %17099 = vmatmul.mubr.msk.bf16.gmra.mrb[112].mxu1 %vm1644_vm4, %v19878_v7  ;;  %v19151_v36 = vld [vmem:[%s19762_s17 + $0x8] ss:$12 sps:$4 sm:$0xff]  }
 0x296   : > { %2387 = vmatprep.mubr.bf16.mxu0 %v19423_v0  ;;  %17102 = vmatprep.mubr.msk.bf16.mxu1 %vm19425_vm0, %v19424_v1 }
 0x297   : > { %3142 = vmatpush1.bf16.msra.mxu0 %v17919_v50  ;;  %v17968_v50 = vld [vmem:[#allocation2 + $0x450] ss:$12 sps:$4 sm:$0xff]  }
 0x298   : > { %3143 = vmatprep.subr.bf16.mxu0 %v17924_v52 }
 0x29b   : > { %3144 = vmatpush1.bf16.msra.mxu0 %v17922_v54  ;;  %v17975_v54 = vld [vmem:[#allocation2 + $0x46c] ss:$12 sps:$4 sm:$0xff]  }
 0x29c   : > { %3145 = vmatprep.subr.bf16.mxu0 %v17927_v59  ;;  %v17977_v59 = vld [vmem:[#allocation2 + $0x3b0] ss:$12 sps:$4 sm:$0xff]  }
 0x29d   : > { %14835 = vmatmul.mubr.msk.bf16.gmra.mrb[44].mxu0 %vm1644_vm4, %v19866_v47  ;;  %17103 = vmatmul.mubr.msk.bf16.gmra.mrb[116].mxu1 %vm1644_vm4, %v1030_v14  ;;  %v17915_v47 = vld [vmem:[#allocation4 + $0x50] sm:$0xff]  }
 0x29e   : > { %2397 = vmatprep.mubr.bf16.mxu0 %v19423_v0  ;;  %2650 = vmatprep.mubr.bf16.mxu1 %v19423_v0 }
 0x29f   : > { %3146 = vmatpush1.bf16.msra.mxu0 %v17925_v57  ;;  %v17976_v57 = vld [vmem:[#allocation2 + $0x470] ss:$12 sps:$4 sm:$0xff]  }
 0x2a5   : > { %14836 = vmatmul.mubr.msk.bf16.gmra.mrb[48].mxu0 %vm1644_vm4, %v19872_v58  ;;  %14850 = vmatmul.mubr.msk.bf16.vlgmr.msra.gmra.mrb[120].mxu1 %vm837_vm2, %v17914_v15  ;;  %v17916_v58 = vld [vmem:[#allocation4 + $0x58] sm:$0xff]  }
 0x2a6   : > { %2407 = vmatprep.mubr.bf16.mxu0 %v19423_v0  ;;  %2660 = vmatprep.mubr.bf16.mxu1 %v19423_v0 }
 0x2a7   : > { %17107 = vmatpush3.bf16.msra.mxu1 %v19151_v36 }
 0x2a8   : > { %17108 = vmatprep.subr.bf16.mxu1 %v19424_v1 }
 0x2ab   : > { %17109 = vmatpush3.bf16.msra.mxu1 %v19152_v53 }
 0x2ac   : > { %17110 = vmatprep.subr.bf16.mxu1 %v19424_v1 }
 0x2ad   : > { %14837 = vmatmul.mubr.msk.bf16.gmra.mrb[52].mxu0 %vm1644_vm4, %v19878_v7  ;;  %14851 = vmatmul.mubr.msk.bf16.gmra.mrb[124].mxu1 %vm837_vm2, %v17915_v47  ;;  %v20015_v7 = vld [vmem:[#allocation4 + $0x60] sm:$0xff]  }
 0x2ae   : > { %2417 = vmatprep.mubr.bf16.mxu0 %v19423_v0  ;;  %2670 = vmatprep.mubr.bf16.mxu1 %v19423_v0 }
 0x2af   : > { %17111 = vmatpush3.bf16.msra.mxu1 %v19153_v62  ;;  %v17970_v62 = vld [vmem:[#allocation2 + $0x454] ss:$12 sps:$4 sm:$0xff]  }
 0x2b0   : > { %17112 = vmatprep.subr.bf16.mxu1 %v19424_v1 }
 0x2b3   : > { %17113 = vmatpush3.bf16.msra.mxu1 %v19154_v16  ;;  %v17971_v16 = vld [vmem:[#allocation2 + $0x458] ss:$12 sps:$4 sm:$0xff]  }
 0x2b4   : > { %17114 = vmatprep.subr.bf16.mxu1 %v19424_v1 }
 0x2b5   : > { %14838 = vmatmul.mubr.msk.bf16.gmra.mrb[68].mxu0 %vm1644_vm4, %v1030_v14  ;;  %14852 = vmatmul.mubr.msk.bf16.gmra.mrb[128].mxu1 %vm837_vm2, %v17916_v58  ;;  %v17966_v14 = vld [vmem:[#allocation2 + $0x440] ss:$12 sps:$4 sm:$0xff]  }
 0x2b6   : > { %2680 = vmatprep.mubr.bf16.mxu1 %v19423_v0 }
 0x2b7   : > { %17115 = vmatpush3.bf16.msra.mxu1 %v19793_v20  ;;  %v17930_v20 = vld [vmem:[#allocation2 + $0x364] ss:$12 sps:$4 sm:$0xff]  }
 0x2b8   : > { %3147 = vmatprep.subr.bf16.mxu0 %v17930_v20  ;;  %16414 = vmatprep.subr.bf16.mxu1 %v17946_v21 }
 0x2b9   : > { %3148 = vmatpush1.bf16.msra.mxu0 %v17928_v61 }
 0x2ba   : > { %3149 = vmatprep.subr.bf16.mxu0 %v17933_v55 }
 0x2bd   : > { %14853 = vmatmul.mubr.msk.bf16.gmra.mrb[132].mxu1 %vm837_vm2, %v20015_v7  ;;  %3150 = vmatpush1.bf16.msra.mxu0 %v17931_v63 }
 0x2be   : > { %2690 = vmatprep.mubr.bf16.mxu1 %v19423_v0  ;;  %3151 = vmatprep.subr.bf16.mxu0 %v17936_v2 }
 0x2c1   : > { %3152 = vmatpush1.bf16.msra.mxu0 %v17934_v3 }
 0x2c2   : > { %3153 = vmatprep.subr.bf16.mxu0 %v17939_v5  ;;  %v17980_v5 = vld [vmem:[#allocation2 + $0x484] ss:$12 sps:$4 sm:$0xff]  }
 0x2c5   : > { %14854 = vmatmul.mubr.msk.bf16.gmra.mrb[136].mxu1 %vm837_vm2, %v20021_v51  ;;  %3154 = vmatpush1.bf16.msra.mxu0 %v17937_v4 }
 0x2c6   : > { %17116 = vmatprep.mubr.msk.bf16.mxu1 %vm19425_vm0, %v19424_v1  ;;  %3155 = vmatprep.subr.bf16.mxu0 %v17942_v11  ;;  %v17978_v11 = vld [vmem:[#allocation2 + $0x480] ss:$12 sps:$4 sm:$0xff]  }
 0x2c9   : > { %3156 = vmatpush1.bf16.msra.mxu0 %v17940_v13 }
 0x2ca   : > { %3157 = vmatprep.subr.bf16.mxu0 %v17945_v19 }
 0x2cd   : > { %17117 = vmatmul.mubr.msk.bf16.vlgmr.msra.gmra.mrb[140].mxu1 %vm837_vm2, %v17914_v15  ;;  %3158 = vmatpush1.bf16.msra.mxu0 %v17943_v22  ;;  %v17967_v15 = vld [vmem:[#allocation2 + $0x380] ss:$12 sps:$4 sm:$0xff]  }
 0x2ce   : > { %17120 = vmatprep.mubr.msk.bf16.mxu1 %vm19425_vm0, %v19424_v1  ;;  %16415 = vmatpush3.bf16.msra.mxu1 %v17947_v23 }
 0x2cf   : > { %3159 = vmatprep.subr.bf16.mxu0 %v17950_v29  ;;  %16416 = vmatprep.subr.bf16.mxu1 %v17951_v26 }
 0x2d1   : > { %3160 = vmatpush1.bf16.msra.mxu0 %v17948_v32 }
 0x2d2   : > { %16417 = vmatpush3.bf16.msra.mxu1 %v17952_v33  ;;  %3161 = vmatprep.subr.bf16.mxu0 %v17955_v38 }
 0x2d3   : > { %16418 = vmatprep.subr.bf16.mxu1 %v17956_v39 }
 0x2d5   : > { %17121 = vmatmul.mubr.msk.bf16.gmra.mrb[144].mxu1 %vm837_vm2, %v17915_v47  ;;  %3162 = vmatpush1.bf16.msra.mxu0 %v17953_v37 }
 0x2d6   : > { %17124 = vmatprep.mubr.msk.bf16.mxu1 %vm19425_vm0, %v19424_v1  ;;  %16419 = vmatpush3.bf16.msra.mxu1 %v17957_v41 }
 0x2d7   : > { %3163 = vmatprep.subr.bf16.mxu0 %v17960_v49  ;;  %16420 = vmatprep.subr.bf16.mxu1 %v17961_v24 }
 0x2d8   : > { %v16316_v6 = vpop.f32.mrb[40].mxu1 }
 0x2d9   : > { %v16317_v8 = vpop.f32.mrb[41].mxu1  ;;  %3164 = vmatpush1.bf16.msra.mxu0 %v17958_v34 }
 0x2da   : > { %v20033_v9 = vadd.f32 %v16317_v8, %v16316_v6  ;;  %v16319_v10 = vpop.f32.mrb[42].mxu1  ;;  %16421 = vmatpush3.bf16.msra.mxu1 %v17962_v45  ;;  %3165 = vmatprep.subr.bf16.mxu0 %v17965_v60  ;;  %v17981_v6 = vld [vmem:[#allocation2 + $0x488] ss:$12 sps:$4 sm:$0xff]  }
 0x2db   : > { %v16320_v12 = vpop.f32.mrb[43].mxu1  ;;  %16422 = vmatprep.subr.bf16.mxu1 %v17966_v14 }
 0x2dc   : > { %v20035_v17 = vadd.f32 %v16320_v12, %v16319_v10  ;;  %v17982_v12 = vld [vmem:[#allocation2 + $0x3c8] ss:$12 sps:$4 sm:$0xff]  }
 0x2dd   : > { %17125 = vmatmul.mubr.msk.bf16.gmra.mrb[148].mxu1 %vm837_vm2, %v17916_v58  ;;  %3166 = vmatpush1.bf16.msra.mxu0 %v17963_v56 }
 0x2de   : > { %17128 = vmatprep.mubr.msk.bf16.mxu1 %vm19425_vm0, %v19424_v1  ;;  %16423 = vmatpush3.bf16.msra.mxu1 %v17967_v15 }
 0x2df   : > { %3167 = vmatprep.subr.bf16.mxu0 %v17970_v62  ;;  %16424 = vmatprep.subr.bf16.mxu1 %v17971_v16 }
 0x2e0   : > { %v16322_v25 = vpop.f32.mrb[44].mxu1 }
 0x2e1   : > { %v16323_v27 = vpop.f32.mrb[45].mxu1  ;;  %3168 = vmatpush1.bf16.msra.mxu0 %v17968_v50 }
 0x2e2   : > { %v20040_v18 = vadd.f32 %v16323_v27, %v16322_v25  ;;  %v16325_v28 = vpop.f32.mrb[46].mxu1  ;;  %16425 = vmatpush3.bf16.msra.mxu1 %v17972_v40  ;;  %3169 = vmatprep.subr.bf16.mxu0 %v17975_v54  ;;  %v20057_v27 = vld [vmem:[#allocation2 + $0x498] sm:$0xff] }
 0x2e3   : > { %v16326_v30 = vpop.f32.mrb[47].mxu1  ;;  %16426 = vmatprep.subr.bf16.mxu1 %v17976_v57 }
 0x2e4   : > { %v20042_v35 = vadd.f32 %v16326_v30, %v16325_v28  ;;  %v14909_v28 = vcombine.high %v20057_v27, %v20057_v27 }
 0x2e5   : > { %17129 = vmatmul.mubr.msk.bf16.gmra.mrb[152].mxu1 %vm837_vm2, %v20015_v7 }
 0x2e6   : > { %17132 = vmatprep.mubr.msk.bf16.mxu1 %vm19425_vm0, %v19424_v1  ;;  %16427 = vmatpush3.bf16.msra.mxu1 %v17977_v59 }
 0x2e7   : > { %16428 = vmatprep.subr.bf16.mxu1 %v17981_v6 }
 0x2e8   : > { %v16328_v43 = vpop.f32.mrb[48].mxu1 }
 0x2e9   : > { %v16329_v44 = vpop.f32.mrb[49].mxu1 }
 0x2ea   : > { %v20048_v46 = vadd.f32 %v16329_v44, %v16328_v43  ;;  %v16331_v48 = vpop.f32.mrb[50].mxu1  ;;  %16429 = vmatpush3.bf16.msra.mxu1 %v17982_v12 }
 0x2eb   : > { %v16332_v31 = vpop.f32.mrb[51].mxu1  ;;  %17136 = vmatprep.subr.bf16.mxu1 %v19424_v1 }
 0x2ec   : > { %v20050_v42 = vadd.f32 %v16332_v31, %v16331_v48 }
 0x2ed   : > { %17133 = vmatmul.mubr.msk.bf16.gmra.mrb[156].mxu1 %vm837_vm2, %v20021_v51  ;;  %v17973_v51 = vld [vmem:[#allocation2 + $0x468] ss:$12 sps:$4 sm:$0xff]  }
 0x2ee   : > { %3170 = vmatpush1.bf16.msra.mxu0 %v17973_v51 }
 0x2ef   : > { %3171 = vmatprep.subr.bf16.mxu0 %v17980_v5 }
 0x2f0   : > { %v16334_v36 = vpop.f32.mrb[52].mxu1 }
 0x2f1   : > { %v16335_v47 = vpop.f32.mrb[53].mxu1 }
 0x2f2   : > { %v16336_v53 = vadd.f32 %v16335_v47, %v16334_v36  ;;  %v16337_v58 = vpop.f32.mrb[54].mxu1  ;;  %3172 = vmatpush1.bf16.msra.mxu0 %v17978_v11 }
 0x2f3   : > { %v16338_v7 = vpop.f32.mrb[55].mxu1  ;;  %14911 = vmatprep.subr.msk.bf16.mxu0 %vm1660_vm3, %v14909_v28 }
 0x2f4   : > { %v16339_v52 = vadd.f32 %v16338_v7, %v16337_v58 }
 0x2f8   : > { %v1744_v20 = vpop.f32.mrb[56].mxu0  ;;  %v16340_v61 = vpop.f32.mrb[56].mxu1 }
 0x2f9   : > { %v1746_v63 = vpop.f32.mrb[57].mxu0  ;;  %v16341_v55 = vpop.f32.mrb[57].mxu1 }
 0x2fa   : > { %v16342_v2 = vadd.f32 %v16341_v55, %v16340_v61  ;;  %v1748_v3 = vpop.f32.mrb[58].mxu0  ;;  %v16343_v4 = vpop.f32.mrb[58].mxu1 }
 0x2fb   : > { %v1749_v8 = vpop.f32.mrb[59].mxu0  ;;  %v16344_v10 = vpop.f32.mrb[59].mxu1 }
 0x300   : > { %v1938_v13 = vpop.f32.mrb[60].mxu1 }
 0x301   : > { %v1939_v19 = vadd.f32 %v20033_v9, %v1938_v13  ;;  %v17066_v21 = vpop.f32.mrb[61].mxu1 }
 0x302   : > { %v1941_v22 = vpop.f32.mrb[62].mxu1 }
 0x303   : > { %v1942_v23 = vadd.f32 %v20035_v17, %v1941_v22  ;;  %v17067_v25 = vpop.f32.mrb[63].mxu1 }
 0x308   : > { %v1946_v29 = vpop.f32.mrb[64].mxu1 }
 0x309   : > { %v1947_v26 = vadd.f32 %v20040_v18, %v1946_v29  ;;  %v17070_v30 = vpop.f32.mrb[65].mxu1 }
 0x30a   : > { %v1949_v32 = vpop.f32.mrb[66].mxu1 }
 0x30b   : > { %v1950_v33 = vadd.f32 %v20042_v35, %v1949_v32  ;;  %v17071_v9 = vpop.f32.mrb[67].mxu1 }
 0x310   : > { %v1954_v37 = vpop.f32.mrb[68].mxu1 }
 0x311   : > { %v1955_v38 = vadd.f32 %v20048_v46, %v1954_v37  ;;  %v17074_v17 = vpop.f32.mrb[69].mxu1 }
 0x312   : > { %v1957_v39 = vpop.f32.mrb[70].mxu1 }
 0x313   : > { %v1958_v41 = vadd.f32 %v20050_v42, %v1957_v39  ;;  %v17075_v43 = vpop.f32.mrb[71].mxu1 }
 0x318   : > { %v1962_v44 = vpop.f32.mrb[72].mxu1 }
 0x319   : > { %v1963_v48 = vadd.f32 %v16336_v53, %v1962_v44  ;;  %v17078_v49 = vpop.f32.mrb[73].mxu1 }
 0x31a   : > { %v1965_v24 = vpop.f32.mrb[74].mxu1 }
 0x31b   : > { %v1966_v31 = vadd.f32 %v16339_v52, %v1965_v24  ;;  %v17079_v34 = vpop.f32.mrb[75].mxu1 }
 0x320   : > { %v1825_v18 = vpop.f32.mrb[60].mxu0  ;;  %v1970_v45 = vpop.f32.mrb[76].mxu1 }
 0x321   : > { %v1826_v56 = vadd.f32 %v1825_v18, %v1744_v20  ;;  %v1971_v60 = vadd.f32 %v16342_v2, %v1970_v45  ;;  %v1827_v35 = vpop.f32.mrb[61].mxu0  ;;  %v17082_v14 = vpop.f32.mrb[77].mxu1 }
 0x322   : > { %v1828_v15 = vadd.f32 %v1827_v35, %v1746_v63  ;;  %v1829_v36 = vpop.f32.mrb[62].mxu0  ;;  %v1973_v46 = vpop.f32.mrb[78].mxu1 }
 0x323   : > { %v1830_v47 = vpop.f32.mrb[63].mxu0  ;;  %v17083_v58 = vpop.f32.mrb[79].mxu1 }
 0x328   : > { %v16368_v62 = vpop.f32.mrb[80].mxu1 }
 0x329   : > { %v16369_v42 = vpop.f32.mrb[81].mxu1 }
 0x32a   : > { %v16370_v16 = vadd.f32 %v16369_v42, %v16368_v62  ;;  %v16371_v7 = vpop.f32.mrb[82].mxu1 }
 0x32b   : > { %v16372_v53 = vpop.f32.mrb[83].mxu1 }
 0x32c   : > { %v16373_v50 = vadd.f32 %v16372_v53, %v16371_v7  ;;  %v2461_v40 = vadd.f32 %v16370_v16, %v1939_v19 }
 0x32e   : > { %v2464_v52 = vadd.f32 %v16373_v50, %v1942_v23 }
 0x330   : > { %v16374_v51 = vpop.f32.mrb[84].mxu1 }
 0x331   : > { %v16375_v54 = vpop.f32.mrb[85].mxu1 }
 0x332   : > { %v16376_v57 = vadd.f32 %v16375_v54, %v16374_v51  ;;  %v16377_v59 = vpop.f32.mrb[86].mxu1 }
 0x333   : > { %v16378_v20 = vpop.f32.mrb[87].mxu1 }
 0x334   : > { %v16379_v61 = vadd.f32 %v16378_v20, %v16377_v59  ;;  %v2469_v55 = vadd.f32 %v16376_v57, %v1947_v26 }
 0x336   : > { %v2472_v63 = vadd.f32 %v16379_v61, %v1950_v33 }
 0x338   : > { %v16380_v2 = vpop.f32.mrb[88].mxu1 }
 0x339   : > { %v16381_v3 = vpop.f32.mrb[89].mxu1 }
 0x33a   : > { %v16382_v4 = vadd.f32 %v16381_v3, %v16380_v2  ;;  %v16383_v5 = vpop.f32.mrb[90].mxu1 }
 0x33b   : > { %v16384_v6 = vpop.f32.mrb[91].mxu1 }
 0x33c   : > { %v16385_v8 = vadd.f32 %v16384_v6, %v16383_v5  ;;  %v2477_v10 = vadd.f32 %v16382_v4, %v1955_v38 }
 0x33e   : > { %v2480_v11 = vadd.f32 %v16385_v8, %v1958_v41 }
 0x340   : > { %v16386_v12 = vpop.f32.mrb[92].mxu1 }
 0x341   : > { %v16387_v13 = vpop.f32.mrb[93].mxu1 }
 0x342   : > { %v16388_v19 = vadd.f32 %v16387_v13, %v16386_v12  ;;  %v16389_v21 = vpop.f32.mrb[94].mxu1 }
 0x343   : > { %v16390_v22 = vpop.f32.mrb[95].mxu1 }
 0x344   : > { %v16391_v23 = vadd.f32 %v16390_v22, %v16389_v21  ;;  %v2485_v25 = vadd.f32 %v16388_v19, %v1963_v48 }
 0x346   : > { %v2488_v28 = vadd.f32 %v16391_v23, %v1966_v31 }
 0x348   : > { %v16392_v29 = vpop.f32.mrb[96].mxu1 }
 0x349   : > { %v16393_v30 = vpop.f32.mrb[97].mxu1 }
 0x34a   : > { %v16394_v26 = vadd.f32 %v16393_v30, %v16392_v29  ;;  %v16395_v32 = vpop.f32.mrb[98].mxu1 }
 0x34b   : > { %v16396_v33 = vpop.f32.mrb[99].mxu1 }
 0x34c   : > { %v2493_v9 = vadd.f32 %v16394_v26, %v1971_v60 }
 0x350   : > { %v2532_v37 = vpop.f32.mrb[100].mxu1 }
 0x351   : > { %v20066_v17 = vadd.f32 %v2532_v37, %v2461_v40  ;;  %v17088_v39 = vpop.f32.mrb[101].mxu1 }
 0x352   : > { %v2535_v38 = vpop.f32.mrb[102].mxu1 }
 0x353   : > { %v20068_v41 = vadd.f32 %v2535_v38, %v2464_v52  ;;  %v17089_v43 = vpop.f32.mrb[103].mxu1 }
 0x358   : > { %v2540_v44 = vpop.f32.mrb[104].mxu1 }
 0x359   : > { %v20070_v49 = vadd.f32 %v2540_v44, %v2469_v55  ;;  %v17092_v24 = vpop.f32.mrb[105].mxu1  ;;  %v14908_v55 = vcombine.low %v20057_v27, %v20057_v27 }
 0x35a   : > { %v2543_v48 = vpop.f32.mrb[106].mxu1 }
 0x35b   : > { %v20072_v31 = vadd.f32 %v2543_v48, %v2472_v63  ;;  %v17093_v34 = vpop.f32.mrb[107].mxu1  ;;  %v17985_v63 = vld [vmem:[#allocation2 + $0x4a0] ss:$0 sps:$4 sm:$0xff]   ;;  %v3133_v6 = vsel %vm1660_vm3, %v14908_v55, 0 }
 0x35c   : > { %v3139_v8 = vsel %vm1660_vm3, %v17985_v63, 0 }
 0x360   : > { %v2338_v18 = vpop.f32.mrb[64].mxu0  ;;  %v2548_v45 = vpop.f32.mrb[108].mxu1 }
 0x361   : > { %v2339_v35 = vadd.f32 %v2338_v18, %v1826_v56  ;;  %v2340_v60 = vpop.f32.mrb[65].mxu0  ;;  %v20074_v14 = vadd.f32 %v2548_v45, %v2477_v10  ;;  %v17096_v36 = vpop.f32.mrb[109].mxu1 }
 0x362   : > { %v2341_v46 = vadd.f32 %v2340_v60, %v1828_v15  ;;  %v2342_v47 = vpop.f32.mrb[66].mxu0  ;;  %v2551_v58 = vpop.f32.mrb[110].mxu1 }
 0x363   : > { %v2343_v62 = vpop.f32.mrb[67].mxu0  ;;  %v20076_v42 = vadd.f32 %v2551_v58, %v2480_v11  ;;  %v17097_v16 = vpop.f32.mrb[111].mxu1 }
 0x368   : > { %v2556_v7 = vpop.f32.mrb[112].mxu1 }
 0x369   : > { %v20078_v53 = vadd.f32 %v2556_v7, %v2485_v25  ;;  %v17100_v50 = vpop.f32.mrb[113].mxu1 }
 0x36a   : > { %v2559_v40 = vpop.f32.mrb[114].mxu1 }
 0x36b   : > { %v20080_v52 = vadd.f32 %v2559_v40, %v2488_v28  ;;  %v17101_v51 = vpop.f32.mrb[115].mxu1 }
 0x370   : > { %v2564_v56 = vpop.f32.mrb[116].mxu1 }
 0x371   : > { %v20082_v54 = vadd.f32 %v2564_v56, %v2493_v9  ;;  %v17104_v57 = vpop.f32.mrb[117].mxu1 }
 0x372   : > { %v2567_v59 = vpop.f32.mrb[118].mxu1 }
 0x373   : > { %v17105_v15 = vpop.f32.mrb[119].mxu1 }
 0x378   : > { %v2652_v20 = vpop.f32.mrb[120].mxu1 }
 0x379   : > { %v2654_v61 = vpop.f32.mrb[121].mxu1 }
 0x37a   : > { %v2656_v2 = vpop.f32.mrb[122].mxu1 }
 0x37b   : > { %v2771_v3 = vpack.c.bf16 %v2656_v2, %v2652_v20  ;;  %v2658_v4 = vpop.f32.mrb[123].mxu1 }
 0x37c   : > { %v2772_v5 = vpack.c.bf16 %v2658_v4, %v2654_v61 }
 0x37e   : > { %3173 = vmatprep.mubr.bf16.mxu0 %v2772_v5  ;;  %3335 = vmatprep.mubr.bf16.mxu1 %v2772_v5 }
 0x37f   : > { %3174 = vmatmul.mubr.bf16.vlgmr.msra.gmra.mrb[40].mxu0 %v2771_v3  ;;  %3336 = vmatmul.mubr.bf16.vlgmr.msra.gmra.mrb[160].mxu1 %v2771_v3 }
 0x380   : > { %v2662_v10 = vpop.f32.mrb[124].mxu1  ;;  %3223 = vmatpush1.bf16.msra.mxu0 %v3133_v6  ;;  %17137 = vmatpush3.bf16.msra.mxu1 %v3139_v8 }
 0x381   : > { %v2664_v11 = vpop.f32.mrb[125].mxu1  ;;  %17158 = vmatprep.subr.bf16.mxu1 %v19424_v1 }
 0x382   : > { %v2666_v27 = vpop.f32.mrb[126].mxu1 }
 0x383   : > { %v2774_v12 = vpack.c.bf16 %v2666_v27, %v2662_v10  ;;  %v2668_v13 = vpop.f32.mrb[127].mxu1 }
 0x384   : > { %v2775_v19 = vpack.c.bf16 %v2668_v13, %v2664_v11 }
 0x386   : > { %3183 = vmatprep.mubr.bf16.mxu0 %v2775_v19  ;;  %3343 = vmatprep.mubr.bf16.mxu1 %v2775_v19 }
 0x387   : > { %3184 = vmatmul.mubr.bf16.gmra.mrb[44].mxu0 %v2774_v12  ;;  %3344 = vmatmul.mubr.bf16.gmra.mrb[164].mxu1 %v2774_v12 }
 0x388   : > { %v2419_v21 = vpop.f32.mrb[68].mxu0  ;;  %v2672_v22 = vpop.f32.mrb[128].mxu1 }
 0x389   : > { %v20089_v23 = vadd.f32 %v2419_v21, %v2339_v35  ;;  %v2421_v25 = vpop.f32.mrb[69].mxu0  ;;  %v2674_v28 = vpop.f32.mrb[129].mxu1 }
 0x38a   : > { %v20091_v29 = vadd.f32 %v2421_v25, %v2341_v46  ;;  %v2423_v30 = vpop.f32.mrb[70].mxu0  ;;  %v2676_v26 = vpop.f32.mrb[130].mxu1 }
 0x38b   : > { %v2424_v32 = vpop.f32.mrb[71].mxu0  ;;  %v2777_v33 = vpack.c.bf16 %v2676_v26, %v2672_v22  ;;  %v2678_v9 = vpop.f32.mrb[131].mxu1 }
 0x38c   : > { %v2778_v37 = vpack.c.bf16 %v2678_v9, %v2674_v28 }
 0x38e   : > { %3193 = vmatprep.mubr.bf16.mxu0 %v2778_v37  ;;  %3351 = vmatprep.mubr.bf16.mxu1 %v2778_v37 }
 0x38f   : > { %3194 = vmatmul.mubr.bf16.gmra.mrb[48].mxu0 %v2777_v33  ;;  %3352 = vmatmul.mubr.bf16.gmra.mrb[168].mxu1 %v2777_v33 }
 0x390   : > { %v2682_v39 = vpop.f32.mrb[132].mxu1 }
 0x391   : > { %v2684_v38 = vpop.f32.mrb[133].mxu1 }
 0x392   : > { %v2686_v43 = vpop.f32.mrb[134].mxu1 }
 0x393   : > { %v2780_v44 = vpack.c.bf16 %v2686_v43, %v2682_v39  ;;  %v2688_v24 = vpop.f32.mrb[135].mxu1 }
 0x394   : > { %v2781_v48 = vpack.c.bf16 %v2688_v24, %v2684_v38 }
 0x396   : > { %3203 = vmatprep.mubr.bf16.mxu0 %v2781_v48  ;;  %3359 = vmatprep.mubr.bf16.mxu1 %v2781_v48 }
 0x397   : > { %3204 = vmatmul.mubr.bf16.gmra.mrb[52].mxu0 %v2780_v44  ;;  %3360 = vmatmul.mubr.bf16.gmra.mrb[172].mxu1 %v2780_v44 }
 0x398   : > { %v2692_v34 = vpop.f32.mrb[136].mxu1 }
 0x399   : > { %v2694_v18 = vpop.f32.mrb[137].mxu1  ;;  %v2783_v36 = vpack.c.bf16 %v2692_v34, %v2692_v34 }
 0x39a   : > { %v2784_v45 = vpack.c.bf16 %v2694_v18, %v2694_v18  ;;  %v2696_v35 = vpop.f32.mrb[138].mxu1 }
 0x39b   : > { %v2697_v60 = vpop.f32.mrb[139].mxu1 }
 0x39c   : > { %3213 = vmatprep.mubr.bf16.mxu0 %v2784_v45  ;;  %3367 = vmatprep.mubr.bf16.mxu1 %v2784_v45 }
 0x39f   : > { %3214 = vmatmul.mubr.bf16.gmra.mrb[72].mxu0 %v2783_v36  ;;  %3368 = vmatmul.mubr.bf16.gmra.mrb[176].mxu1 %v2783_v36 }
 0x3a0   : > { %v2733_v46 = vpop.f32.mrb[140].mxu1  ;;  %3254 = vmatprep.mubr.bf16.mxu0 %v19423_v0  ;;  %17138 = vmatprep.mubr.msk.bf16.mxu1 %vm19425_vm0, %v19424_v1 }
 0x3a1   : > { %v17118_v47 = vpop.f32.mrb[141].mxu1 }
 0x3a2   : > { %v2736_v58 = vpop.f32.mrb[142].mxu1 }
 0x3a3   : > { %v2773_v62 = vpack.c.bf16 %v2736_v58, %v2733_v46  ;;  %v17119_v16 = vpop.f32.mrb[143].mxu1 }
 0x3a7   : > { %14912 = vmatmul.mubr.msk.bf16.vlgmr.msra.gmra.mrb[40].mxu0 %vm1644_vm4, %v2773_v62  ;;  %17139 = vmatmul.mubr.msk.bf16.vlgmr.msra.gmra.mrb[180].mxu1 %vm1644_vm4, %v2773_v62 }
 0x3a8   : > { %v2741_v7 = vpop.f32.mrb[144].mxu1  ;;  %3264 = vmatprep.mubr.bf16.mxu0 %v19423_v0  ;;  %17142 = vmatprep.mubr.msk.bf16.mxu1 %vm19425_vm0, %v19424_v1 }
 0x3a9   : > { %v17122_v50 = vpop.f32.mrb[145].mxu1 }
 0x3aa   : > { %v2744_v40 = vpop.f32.mrb[146].mxu1 }
 0x3ab   : > { %v2776_v51 = vpack.c.bf16 %v2744_v40, %v2741_v7  ;;  %v17123_v56 = vpop.f32.mrb[147].mxu1  ;;  %v3474_v40 = vld [vmem:[%s22040_s3] sm:$0xff] }
 0x3af   : > { %14913 = vmatmul.mubr.msk.bf16.gmra.mrb[44].mxu0 %vm1644_vm4, %v2776_v51  ;;  %17143 = vmatmul.mubr.msk.bf16.gmra.mrb[184].mxu1 %vm1644_vm4, %v2776_v51  ;;  %v3475_v51 = vld [vmem:[%s22040_s3 + $0x8] sm:$0xff] }
 0x3b0   : > { %v2749_v57 = vpop.f32.mrb[148].mxu1  ;;  %3274 = vmatprep.mubr.bf16.mxu0 %v19423_v0  ;;  %17146 = vmatprep.mubr.msk.bf16.mxu1 %vm19425_vm0, %v19424_v1 }
 0x3b1   : > { %v17126_v59 = vpop.f32.mrb[149].mxu1 }
 0x3b2   : > { %v2752_v15 = vpop.f32.mrb[150].mxu1  ;;  %v3477_v59 = vld [vmem:[%s22040_s3 + $0x18] sm:$0xff] }
 0x3b3   : > { %v2779_v20 = vpack.c.bf16 %v2752_v15, %v2749_v57  ;;  %v17127_v61 = vpop.f32.mrb[151].mxu1 }
 0x3b7   : > { %14914 = vmatmul.mubr.msk.bf16.gmra.mrb[48].mxu0 %vm1644_vm4, %v2779_v20  ;;  %17147 = vmatmul.mubr.msk.bf16.gmra.mrb[188].mxu1 %vm1644_vm4, %v2779_v20 }
 0x3b8   : > { %v2757_v55 = vpop.f32.mrb[152].mxu1  ;;  %3284 = vmatprep.mubr.bf16.mxu0 %v19423_v0  ;;  %17150 = vmatprep.mubr.msk.bf16.mxu1 %vm19425_vm0, %v19424_v1 }
 0x3b9   : > { %v17130_v63 = vpop.f32.mrb[153].mxu1 }
 0x3ba   : > { %v2760_v2 = vpop.f32.mrb[154].mxu1  ;;  %v3478_v63 = vld [vmem:[%s22040_s3 + $0x20] sm:$0xff] }
 0x3bb   : > { %v2782_v3 = vpack.c.bf16 %v2760_v2, %v2757_v55  ;;  %v17131_v4 = vpop.f32.mrb[155].mxu1  ;;  %v3476_v2 = vld [vmem:[%s22040_s3 + $0x10] sm:$0xff] }
 0x3bf   : > { %14915 = vmatmul.mubr.msk.bf16.gmra.mrb[52].mxu0 %vm1644_vm4, %v2782_v3  ;;  %17151 = vmatmul.mubr.msk.bf16.gmra.mrb[192].mxu1 %vm1644_vm4, %v2782_v3 }
 0x3c0   : > { %v2765_v5 = vpop.f32.mrb[156].mxu1  ;;  %3294 = vmatprep.mubr.bf16.mxu0 %v19423_v0  ;;  %17154 = vmatprep.mubr.msk.bf16.mxu1 %vm19425_vm0, %v19424_v1 }
 0x3c1   : > { %v17134_v6 = vpop.f32.mrb[157].mxu1  ;;  %v2785_v10 = vpack.c.bf16 %v2765_v5, %v2765_v5 }
 0x3c2   : > { %v2768_v8 = vpop.f32.mrb[158].mxu1 }
 0x3c3   : > { %v17135_v11 = vpop.f32.mrb[159].mxu1 }
 0x3c7   : > { %14916 = vmatmul.mubr.msk.bf16.gmra.mrb[76].mxu0 %vm1644_vm4, %v2785_v10  ;;  %17155 = vmatmul.mubr.msk.bf16.gmra.mrb[196].mxu1 %vm1644_vm4, %v2785_v10 }
 0x3c8   : > { %3665 = vmatprep.mubr.bf16.mxu0 %v19423_v0  ;;  %17168 = vmatprep.mubr.msk.bf16.mxu1 %vm19425_vm0, %v19424_v1 }
 0x452   : > { %v16430_v27 = vpop.f32.mrb[160].mxu1 }
 0x453   : > { %v16431_v12 = vpop.f32.mrb[161].mxu1 }
 0x454   : > { %v16432_v13 = vadd.f32 %v16431_v12, %v16430_v27  ;;  %v16433_v19 = vpop.f32.mrb[162].mxu1 }
 0x455   : > { %v16434_v21 = vpop.f32.mrb[163].mxu1 }
 0x456   : > { %v16435_v22 = vadd.f32 %v16434_v21, %v16433_v19  ;;  %v3479_v19 = vld [vmem:[%s22040_s3 + $0x28] sm:$0xff] }
 0x45a   : > { %v16436_v25 = vpop.f32.mrb[164].mxu1 }
 0x45b   : > { %v16437_v28 = vpop.f32.mrb[165].mxu1 }
 0x45c   : > { %v20121_v30 = vadd.f32 %v16437_v28, %v16436_v25  ;;  %v16439_v26 = vpop.f32.mrb[166].mxu1 }
 0x45d   : > { %v16440_v32 = vpop.f32.mrb[167].mxu1 }
 0x45e   : > { %v20123_v33 = vadd.f32 %v16440_v32, %v16439_v26 }
 0x462   : > { %v16442_v9 = vpop.f32.mrb[168].mxu1 }
 0x463   : > { %v16443_v37 = vpop.f32.mrb[169].mxu1 }
 0x464   : > { %v20125_v39 = vadd.f32 %v16443_v37, %v16442_v9  ;;  %v16445_v38 = vpop.f32.mrb[170].mxu1  ;;  %v3480_v9 = vld [vmem:[%s22040_s3 + $0x30] sm:$0xff] }
 0x465   : > { %v16446_v43 = vpop.f32.mrb[171].mxu1 }
 0x466   : > { %v20127_v44 = vadd.f32 %v16446_v43, %v16445_v38  ;;  %v3481_v38 = vld [vmem:[%s22040_s3 + $0x38] sm:$0xff] }
 0x46a   : > { %v16448_v24 = vpop.f32.mrb[172].mxu1 }
 0x46b   : > { %v16449_v48 = vpop.f32.mrb[173].mxu1 }
 0x46c   : > { %v20129_v34 = vadd.f32 %v16449_v48, %v16448_v24  ;;  %v16451_v18 = vpop.f32.mrb[174].mxu1 }
 0x46d   : > { %v16452_v45 = vpop.f32.mrb[175].mxu1 }
 0x46e   : > { %v20131_v35 = vadd.f32 %v16452_v45, %v16451_v18 }
 0x472   : > { %v20133_v60 = vpop.f32.mrb[72].mxu0  ;;  %v16454_v36 = vpop.f32.mrb[176].mxu1 }
 0x473   : > { %v20135_v46 = vpop.f32.mrb[73].mxu0  ;;  %v16455_v47 = vpop.f32.mrb[177].mxu1 }
 0x474   : > { %v20137_v58 = vadd.f32 %v16455_v47, %v16454_v36  ;;  %v3219_v62 = vpop.f32.mrb[74].mxu0  ;;  %v16457_v16 = vpop.f32.mrb[178].mxu1 }
 0x475   : > { %v3220_v7 = vpop.f32.mrb[75].mxu0  ;;  %v16458_v50 = vpop.f32.mrb[179].mxu1 }
 0x47a   : > { %v3256_v56 = vpop.f32.mrb[40].mxu0  ;;  %v3409_v57 = vpop.f32.mrb[180].mxu1 }
 0x47b   : > { %v3501_v15 = vadd.f32 %v3474_v40, %v3256_v56  ;;  %v3410_v20 = vadd.f32 %v16432_v13, %v3409_v57  ;;  %v3258_v61 = vpop.f32.mrb[41].mxu0  ;;  %v17140_v55 = vpop.f32.mrb[181].mxu1  ;;  %v3484_v40 = vld [vmem:[%s22040_s3 + $0x50] sm:$0xff]  ;;  %v3482_v56 = vld [vmem:[%s22040_s3 + $0x40] sm:$0xff] }
 0x47c   : > { %v3502_v3 = vadd.f32 %v3475_v51, %v3258_v61  ;;  %v3260_v4 = vpop.f32.mrb[42].mxu0  ;;  %v3412_v5 = vpop.f32.mrb[182].mxu1 }
 0x47d   : > { %v3528_v6 = vmul.f32 0.2, %v3501_v15  ;;  %v3449_v8 = vadd.f32 %v3410_v20, %v20066_v17  ;;  %v3504_v10 = vadd.f32 %v3477_v59, %v3260_v4  ;;  %v3413_v11 = vadd.f32 %v16435_v22, %v3412_v5  ;;  %v3262_v27 = vpop.f32.mrb[43].mxu0  ;;  %v17141_v12 = vpop.f32.mrb[183].mxu1  ;;  %v3485_v4 = vld [vmem:[%s22040_s3 + $0x58] sm:$0xff] }
 0x47e   : > { %v3529_v13 = vmul.f32 0.2, %v3502_v3  ;;  %v3505_v21 = vadd.f32 %v3478_v63, %v3262_v27  ;;  %v3486_v12 = vld [vmem:[%s22040_s3 + $0x60] sm:$0xff] }
 0x47f   : > { %v3503_v25 = vadd.f32 %v3476_v2, %v3449_v8  ;;  %v3531_v28 = vmul.f32 0.2, %v3504_v10  ;;  %v3452_v26 = vadd.f32 %v3413_v11, %v20068_v41  ;;  %v3555_v17 = vmax.f32 %v3501_v15, %v3528_v6  ;;  %v3483_v41 = vld [vmem:[%s22040_s3 + $0x48] sm:$0xff] }
 0x480   : > { %v3532_v32 = vmul.f32 0.2, %v3505_v21  ;;  %v3556_v24 = vmax.f32 %v3502_v3, %v3529_v13 }
 0x481   : > { %v3558_v37 = vmax.f32 %v3504_v10, %v3531_v28  ;;  %v3506_v22 = vadd.f32 %v3479_v19, %v3452_v26  ;;  %v3530_v43 = vmul.f32 0.2, %v3503_v25 }
 0x482   : > { %v3559_v48 = vmax.f32 %v3505_v21, %v3532_v32  ;;  %v3266_v18 = vpop.f32.mrb[44].mxu0  ;;  %v3417_v45 = vpop.f32.mrb[184].mxu1 }
 0x483   : > { %v20168_v36 = vpack.c.bf16 %v3558_v37, %v3555_v17  ;;  %v3533_v47 = vmul.f32 0.2, %v3506_v22  ;;  %v3507_v62 = vadd.f32 %v3480_v9, %v3266_v18  ;;  %v3418_v16 = vadd.f32 %v20121_v30, %v3417_v45  ;;  %v3268_v7 = vpop.f32.mrb[45].mxu0  ;;  %v17144_v50 = vpop.f32.mrb[185].mxu1  ;;  %v3489_v17 = vld [vmem:[%s22040_s3 + $0x78] sm:$0xff]  ;;  %v3490_v18 = vld [vmem:[%s22040_s3 + $0x80] sm:$0xff] }
 0x484   : > { %v20174_v51 = vpack.c.bf16 %v3559_v48, %v3556_v24  ;;  %v3508_v57 = vadd.f32 %v3481_v38, %v3268_v7  ;;  %v3270_v59 = vpop.f32.mrb[46].mxu0  ;;  %v3420_v15 = vpop.f32.mrb[186].mxu1  ;;  %v3557_v6 = vmax.f32 %v3503_v25, %v3530_v43  ;;  %v3487_v25 = vld [vmem:[%s22040_s3 + $0x68] sm:$0xff] }
 0x485   : > { %v3534_v20 = vmul.f32 0.2, %v3507_v62  ;;  %v3455_v61 = vadd.f32 %v3418_v16, %v20070_v49  ;;  %v3510_v55 = vadd.f32 %v3483_v41, %v3270_v59  ;;  %v3421_v30 = vadd.f32 %v20123_v33, %v3420_v15  ;;  %v3272_v63 = vpop.f32.mrb[47].mxu0  ;;  %v17145_v2 = vpop.f32.mrb[187].mxu1  ;;  %v3488_v41 = vld [vmem:[%s22040_s3 + $0x70] sm:$0xff]  ;;  %v3491_v15 = vld [vmem:[%s22040_s3 + $0x88] sm:$0xff] }
 0x486   : > { %v3535_v3 = vmul.f32 0.2, %v3508_v57  ;;  %v3511_v5 = vadd.f32 %v3484_v40, %v3272_v63  ;;  %3633 = vmatprep.subr.bf16.mxu0 %v20174_v51  ;;  %v3560_v8 = vmax.f32 %v3506_v22, %v3533_v47 }
 0x487   : > { %v3509_v10 = vadd.f32 %v3482_v56, %v3455_v61  ;;  %v3537_v11 = vmul.f32 0.2, %v3510_v55  ;;  %v3458_v27 = vadd.f32 %v3421_v30, %v20072_v31  ;;  %3634 = vmatpush1.bf16.msra.mxu0 %v20168_v36  ;;  %v3561_v13 = vmax.f32 %v3507_v62, %v3534_v20 }
 0x488   : > { %v3538_v49 = vmul.f32 0.2, %v3511_v5  ;;  %v20187_v33 = vpack.c.bf16 %v3560_v8, %v3557_v6  ;;  %v3562_v26 = vmax.f32 %v3508_v57, %v3535_v3  ;;  %v3492_v3 = vld [vmem:[%s22040_s3 + $0x90] sm:$0xff]  ;;  %v3493_v8 = vld [vmem:[%s22040_s3 + $0x98] sm:$0xff] }
 0x489   : > { %v3564_v19 = vmax.f32 %v3510_v55, %v3537_v11  ;;  %v3512_v21 = vadd.f32 %v3485_v4, %v3458_v27  ;;  %v3536_v28 = vmul.f32 0.2, %v3509_v10 }
 0x48a   : > { %v3565_v32 = vmax.f32 %v3511_v5, %v3538_v49  ;;  %17159 = vmatpush3.bf16.msra.mxu1 %v20187_v33  ;;  %v3276_v31 = vpop.f32.mrb[48].mxu0  ;;  %v3425_v9 = vpop.f32.mrb[188].mxu1 }
 0x48b   : > { %v20199_v37 = vpack.c.bf16 %v3564_v19, %v3561_v13  ;;  %v3539_v22 = vmul.f32 0.2, %v3512_v21  ;;  %v3513_v38 = vadd.f32 %v3486_v12, %v3276_v31  ;;  %v3426_v43 = vadd.f32 %v20125_v39, %v3425_v9  ;;  %v3278_v24 = vpop.f32.mrb[49].mxu0  ;;  %v17148_v48 = vpop.f32.mrb[189].mxu1  ;;  %17160 = vmatprep.subr.bf16.mxu1 %v19424_v1  ;;  %v3495_v12 = vld [vmem:[%s22040_s3 + $0xa8] sm:$0xff]  ;;  %v3494_v9 = vld [vmem:[%s22040_s3 + $0xa0] sm:$0xff] }
 0x48c   : > { %v20206_v45 = vpack.c.bf16 %v3565_v32, %v3562_v26  ;;  %v3514_v47 = vadd.f32 %v3487_v25, %v3278_v24  ;;  %v3280_v62 = vpop.f32.mrb[50].mxu0  ;;  %v3428_v16 = vpop.f32.mrb[190].mxu1  ;;  %v3563_v61 = vmax.f32 %v3509_v10, %v3536_v28  ;;  %v3496_v32 = vld [vmem:[%s22040_s3 + $0xb0] sm:$0xff] }
 0x48d   : > { %v3540_v7 = vmul.f32 0.2, %v3513_v38  ;;  %v3461_v39 = vadd.f32 %v3426_v43, %v20074_v14  ;;  %v3516_v50 = vadd.f32 %v3489_v17, %v3280_v62  ;;  %v3429_v40 = vadd.f32 %v20127_v44, %v3428_v16  ;;  %v3282_v56 = vpop.f32.mrb[51].mxu0  ;;  %v17149_v57 = vpop.f32.mrb[191].mxu1  ;;  %v3497_v62 = vld [vmem:[%s22040_s3 + $0xb8] sm:$0xff] }
 0x48e   : > { %v3541_v59 = vmul.f32 0.2, %v3514_v47  ;;  %v3517_v20 = vadd.f32 %v3490_v18, %v3282_v56  ;;  %3635 = vmatprep.subr.bf16.mxu0 %v20206_v45  ;;  %v3566_v55 = vmax.f32 %v3512_v21, %v3539_v22 }
 0x48f   : > { %v3515_v30 = vadd.f32 %v3488_v41, %v3461_v39  ;;  %v3543_v63 = vmul.f32 0.2, %v3516_v50  ;;  %v3464_v2 = vadd.f32 %v3429_v40, %v20076_v42  ;;  %3636 = vmatpush1.bf16.msra.mxu0 %v20199_v37  ;;  %v3567_v4 = vmax.f32 %v3513_v38, %v3540_v7 }
 0x490   : > { %v3544_v14 = vmul.f32 0.2, %v3517_v20  ;;  %v20219_v44 = vpack.c.bf16 %v3566_v55, %v3563_v61  ;;  %v3568_v11 = vmax.f32 %v3514_v47, %v3541_v59 }
 0x491   : > { %v3570_v5 = vmax.f32 %v3516_v50, %v3543_v63  ;;  %v3518_v6 = vadd.f32 %v3491_v15, %v3464_v2  ;;  %v3542_v10 = vmul.f32 0.2, %v3515_v30 }
 0x492   : > { %v3571_v27 = vmax.f32 %v3517_v20, %v3544_v14  ;;  %17161 = vmatpush3.bf16.msra.mxu1 %v20219_v44  ;;  %v3286_v42 = vpop.f32.mrb[52].mxu0  ;;  %v3433_v49 = vpop.f32.mrb[192].mxu1 }
 0x493   : > { %v20231_v13 = vpack.c.bf16 %v3570_v5, %v3567_v4  ;;  %v3545_v19 = vmul.f32 0.2, %v3518_v6  ;;  %v3519_v21 = vadd.f32 %v3492_v3, %v3286_v42  ;;  %v3434_v25 = vadd.f32 %v20129_v34, %v3433_v49  ;;  %v3288_v28 = vpop.f32.mrb[53].mxu0  ;;  %v17152_v26 = vpop.f32.mrb[193].mxu1  ;;  %17162 = vmatprep.subr.bf16.mxu1 %v19424_v1  ;;  %v3499_v49 = vld [vmem:[%s22040_s3 + $0xc8] sm:$0x3] }
 0x494   : > { %v20238_v31 = vpack.c.bf16 %v3571_v27, %v3568_v11  ;;  %v3520_v17 = vadd.f32 %v3493_v8, %v3288_v28  ;;  %v3290_v22 = vpop.f32.mrb[54].mxu0  ;;  %v3436_v38 = vpop.f32.mrb[194].mxu1  ;;  %v3569_v7 = vmax.f32 %v3515_v30, %v3542_v10  ;;  %v3498_v8 = vld [vmem:[%s22040_s3 + $0xc0] sm:$0x3]  ;;  %v3500_v10 = vld [vmem:[%s22040_s3 + $0xd0] sm:$0x3] }
 0x495   : > { %v3546_v43 = vmul.f32 0.2, %v3519_v21  ;;  %v3467_v34 = vadd.f32 %v3434_v25, %v20078_v53  ;;  %v3522_v24 = vadd.f32 %v3495_v12, %v3290_v22  ;;  %v3437_v48 = vadd.f32 %v20131_v35, %v3436_v38  ;;  %v3292_v18 = vpop.f32.mrb[55].mxu0  ;;  %v17153_v41 = vpop.f32.mrb[195].mxu1 }
 0x496   : > { %v3547_v47 = vmul.f32 0.2, %v3520_v17  ;;  %v3523_v16 = vadd.f32 %v3496_v32, %v3292_v18  ;;  %3637 = vmatprep.subr.bf16.mxu0 %v20238_v31  ;;  %v3572_v39 = vmax.f32 %v3518_v6, %v3545_v19  ;;  %v17986_v41 = vld [vmem:[%s21984_s5] sm:$0xff]  }
 0x497   : > { %v3521_v50 = vadd.f32 %v3494_v9, %v3467_v34  ;;  %v3549_v40 = vmul.f32 0.2, %v3522_v24  ;;  %v3470_v56 = vadd.f32 %v3437_v48, %v20080_v52  ;;  %3638 = vmatpush1.bf16.msra.mxu0 %v20231_v13  ;;  %v3573_v57 = vmax.f32 %v3519_v21, %v3546_v43 }
 0x498   : > { %v3550_v53 = vmul.f32 0.2, %v3523_v16  ;;  %v20251_v35 = vpack.c.bf16 %v3572_v39, %v3569_v7  ;;  %v3574_v61 = vmax.f32 %v3520_v17, %v3547_v47  ;;  %v17987_v47 = vld [vmem:[%s21984_s5 + $0x8] sm:$0xff]   ;;  %v18019_v7 = vld [vmem:[#allocation6 + $0x254] ss:$12 sps:$4 sm:$0xff]   ;;  %v17989_v39 = vld [vmem:[%s21984_s5 + $0x14] sm:$0xff]  }
 0x499   : > { %v3548_v59 = vmul.f32 0.2, %v3521_v50  ;;  %v3576_v15 = vmax.f32 %v3522_v24, %v3549_v40  ;;  %v3524_v20 = vadd.f32 %v3497_v62, %v3470_v56  ;;  %v17988_v62 = vld [vmem:[%s21984_s5 + $0x10] ss:$0 sps:$4 sm:$0x11]  }
 0x49a   : > { %v3577_v55 = vmax.f32 %v3523_v16, %v3550_v53  ;;  %17163 = vmatpush3.bf16.msra.mxu1 %v20251_v35  ;;  %v3296_v63 = vpop.f32.mrb[76].mxu0  ;;  %v3441_v30 = vpop.f32.mrb[196].mxu1  ;;  %v17994_v16 = vld [vmem:[#allocation6 + $0x190] ss:$12 sps:$4 sm:$0xff]   ;;  %v17997_v40 = vld [vmem:[#allocation6 + $0x1a8] ss:$12 sps:$4 sm:$0xff]  }
 0x49b   : > { %v20254_v2 = vpack.c.bf16 %v3576_v15, %v3573_v57  ;;  %v3551_v14 = vmul.f32 0.2, %v3524_v20  ;;  %v3297_v52 = vadd.f32 %v3296_v63, %v20133_v60  ;;  %v3442_v3 = vadd.f32 %v20137_v58, %v3441_v30  ;;  %v3298_v4 = vpop.f32.mrb[77].mxu0  ;;  %v17156_v5 = vpop.f32.mrb[197].mxu1  ;;  %17164 = vmatprep.subr.bf16.mxu1 %v19424_v1  ;;  %v17995_v56 = vld [vmem:[#allocation6 + $0x1a4] ss:$12 sps:$4 sm:$0xff]  }
 0x49c   : > { %v20259_v6 = vpack.c.bf16 %v3577_v55, %v3574_v61  ;;  %v3299_v11 = vadd.f32 %v3298_v4, %v20135_v46  ;;  %v3300_v27 = vpop.f32.mrb[78].mxu0  ;;  %v3444_v60 = vpop.f32.mrb[198].mxu1  ;;  %v3575_v21 = vmax.f32 %v3521_v50, %v3548_v59  ;;  %v17992_v50 = vld [vmem:[#allocation6 + $0x18c] ss:$12 sps:$4 sm:$0xff]   ;;  %v17998_v59 = vld [vmem:[#allocation6 + $0x1bc] ss:$12 sps:$4 sm:$0xff]  }
 0x49d   : > { %v3471_v58 = vadd.f32 %v3297_v52, %v20089_v23  ;;  %v3473_v42 = vadd.f32 %v3442_v3, %v20082_v54  ;;  %v3301_v12 = vpop.f32.mrb[79].mxu0  ;;  %v17157_v19 = vpop.f32.mrb[199].mxu1  ;;  %v3578_v25 = vmax.f32 %v3524_v20, %v3551_v14  ;;  %v18000_v53 = vld [vmem:[#allocation6 + $0x1c0] ss:$12 sps:$4 sm:$0xff]   ;;  %v18003_v15 = vld [vmem:[#allocation6 + $0x1d8] ss:$12 sps:$4 sm:$0xff]  }
 0x49e   : > { %v3472_v28 = vadd.f32 %v3299_v11, %v20091_v29  ;;  %3639 = vmatprep.subr.bf16.mxu0 %v20259_v6  ;;  %v17990_v57 = vld [vmem:[%s21984_s5 + $0x1c] sm:$0xff]   ;;  %v18001_v20 = vld [vmem:[#allocation6 + $0x1d4] ss:$12 sps:$4 sm:$0xff]   ;;  %v18010_v3 = vld [vmem:[#allocation6 + $0x21c] ss:$12 sps:$4 sm:$0xff]  }
 0x49f   : > { %v3525_v26 = vadd.f32 %v3498_v8, %v3471_v58  ;;  %v3527_v46 = vadd.f32 %v3500_v10, %v3473_v42  ;;  %3640 = vmatpush1.bf16.msra.mxu0 %v20254_v2  ;;  %v20276_v32 = vpack.c.bf16 %v3578_v25, %v3575_v21  ;;  %v18006_v61 = vld [vmem:[#allocation6 + $0x1f0] ss:$12 sps:$4 sm:$0xff]   ;;  %v17991_v55 = vld [vmem:[%s21984_s5 + $0x24] ss:$0 sps:$4 sm:$0x11]  }
 0x4a0   : > { %v3526_v23 = vadd.f32 %v3499_v49, %v3472_v28  ;;  %v18004_v63 = vld [vmem:[#allocation6 + $0x1ec] ss:$12 sps:$4 sm:$0xff]   ;;  %v18009_v30 = vld [vmem:[#allocation6 + $0x208] ss:$12 sps:$4 sm:$0xff]   ;;  %v18007_v14 = vld [vmem:[#allocation6 + $0x204] ss:$12 sps:$4 sm:$0xff]  }
 0x4a1   : > { %v3552_v54 = vmul.f32 0.2, %v3525_v26  ;;  %17165 = vmatpush3.bf16.msra.mxu1 %v20276_v32  ;;  %v3554_v9 = vmul.f32 0.2, %v3527_v46  ;;  %v18012_v52 = vld [vmem:[#allocation6 + $0x220] ss:$12 sps:$4 sm:$0xff]  }
 0x4a2   : > { %v3553_v17 = vmul.f32 0.2, %v3526_v23  ;;  %17166 = vmatprep.subr.bf16.mxu1 %v19424_v1  ;;  %v18015_v4 = vld [vmem:[#allocation6 + $0x238] ss:$12 sps:$4 sm:$0xff]   ;;  %v18013_v5 = vld [vmem:[#allocation6 + $0x234] ss:$12 sps:$4 sm:$0xff]  }
 0x4a3   : > { %v3581_v22 = vmax.f32 %v3527_v46, %v3554_v9  ;;  %v3579_v38 = vmax.f32 %v3525_v26, %v3552_v54  ;;  %v18018_v8 = vld [vmem:[#allocation6 + $0x250] ss:$12 sps:$4 sm:$0xff]   ;;  %v18016_v10 = vld [vmem:[#allocation6 + $0x24c] ss:$12 sps:$4 sm:$0xff]   ;;  %v18020_v11 = vld [vmem:[#allocation6 + $0x194] ss:$12 sps:$4 sm:$0xff]  }
 0x4a4   : > { %v3580_v43 = vmax.f32 %v3526_v23, %v3553_v17  ;;  %v18023_v27 = vld [vmem:[#allocation6 + $0x268] ss:$12 sps:$4 sm:$0xff]   ;;  %v18024_v60 = vld [vmem:[#allocation6 + $0x26c] ss:$12 sps:$4 sm:$0xff]   ;;  %v18021_v58 = vld [vmem:[#allocation6 + $0x264] ss:$12 sps:$4 sm:$0xff]  }
 0x4a5   : > { %v3596_v29 = vpack.c.bf16 %v3581_v22, %v3581_v22  ;;  %v3594_v34 = vpack.c.bf16 %v3579_v38, %v3579_v38  ;;  %v18025_v42 = vld [vmem:[#allocation6 + $0x1ac] ss:$12 sps:$4 sm:$0xff]   ;;  %v18029_v12 = vld [vmem:[#allocation6 + $0x284] ss:$12 sps:$4 sm:$0xff]   ;;  %v18026_v19 = vld [vmem:[#allocation6 + $0x27c] ss:$12 sps:$4 sm:$0xff]  }
 0x4a6   : > { %v20280_v24 = vpack.c.bf16 %v3580_v43, %v3580_v43  ;;  %v18028_v49 = vld [vmem:[#allocation6 + $0x280] ss:$12 sps:$4 sm:$0xff]   ;;  %v18030_v21 = vld [vmem:[#allocation6 + $0x1c4] ss:$12 sps:$4 sm:$0xff]   ;;  %v18034_v28 = vld [vmem:[#allocation6 + $0x29c] ss:$12 sps:$4 sm:$0xff]  }
 0x4a7   : > { %v20283_v48 = vsel %vm853_vm1, %v3596_v29, 0  ;;  %v20286_v18 = vsel %vm853_vm1, %v3594_v34, 0  ;;  %v18033_v25 = vld [vmem:[#allocation6 + $0x298] ss:$12 sps:$4 sm:$0xff]   ;;  %v18031_v26 = vld [vmem:[#allocation6 + $0x294] ss:$12 sps:$4 sm:$0xff]  }
 0x4a8   : > { %14925 = vmatprep.subr.msk.bf16.mxu0 %vm853_vm1, %v20280_v24  ;;  %17167 = vmatpush3.bf16.msra.mxu1 %v20283_v48  ;;  %v18035_v46 = vld [vmem:[#allocation6 + $0x1dc] ss:$12 sps:$4 sm:$0xff]   ;;  %v18039_v54 = vld [vmem:[#allocation6 + $0x2b4] ss:$12 sps:$4 sm:$0xff]   ;;  %v18036_v9 = vld [vmem:[#allocation6 + $0x2ac] ss:$12 sps:$4 sm:$0xff]  }
 0x4a9   : > { %3642 = vmatpush1.bf16.msra.mxu0 %v20286_v18  ;;  %17180 = vmatprep.subr.bf16.mxu1 %v19424_v1  ;;  %v18038_v23 = vld [vmem:[#allocation6 + $0x2b0] ss:$12 sps:$4 sm:$0xff]   ;;  %v18040_v17 = vld [vmem:[#allocation6 + $0x1f4] ss:$12 sps:$4 sm:$0xff]   ;;  %v18044_v38 = vld [vmem:[#allocation6 + $0x2cc] ss:$12 sps:$4 sm:$0xff]  }
 0x4aa   : > { %3853 = vmatprep.subr.bf16.mxu0 %v20174_v51  ;;  %v18043_v22 = vld [vmem:[#allocation6 + $0x2c8] ss:$12 sps:$4 sm:$0xff]   ;;  %v18041_v43 = vld [vmem:[#allocation6 + $0x2c4] ss:$12 sps:$4 sm:$0xff]   ;;  %v18045_v29 = vld [vmem:[#allocation6 + $0x20c] ss:$12 sps:$4 sm:$0xff]  }
 0x4ab   : > { %17169 = vmatmul.mubr.msk.bf16.vlgmr.msra.gmra.mrb[200].mxu1 %vm837_vm2, %v17986_v41  ;;  %v18048_v34 = vld [vmem:[#allocation6 + $0x2e0] ss:$12 sps:$4 sm:$0xff]  }
 0x4ac   : > { %14926 = vmatmul.mubr.msk.bf16.vlgmr.msra.gmra.mrb[80].mxu0 %vm837_vm2, %v17986_v41  ;;  %17181 = vmatpush3.bf16.msra.mxu1 %v20187_v33  ;;  %v18049_v41 = vld [vmem:[#allocation6 + $0x2e4] ss:$12 sps:$4 sm:$0xff]  }
 0x4ad   : > { %3854 = vmatpush1.bf16.msra.mxu0 %v20168_v36  ;;  %17182 = vmatprep.subr.bf16.mxu1 %v19424_v1 }
 0x4ae   : > { %3855 = vmatprep.subr.bf16.mxu0 %v20206_v45  ;;  %3675 = vmatprep.mubr.bf16.mxu0 %v19423_v0 }
 0x4af   : > { %17172 = vmatprep.mubr.msk.bf16.mxu1 %vm19425_vm0, %v19424_v1 }
 0x4b0   : > { %17183 = vmatpush3.bf16.msra.mxu1 %v20219_v44 }
 0x4b1   : > { %3856 = vmatpush1.bf16.msra.mxu0 %v20199_v37  ;;  %17184 = vmatprep.subr.bf16.mxu1 %v19424_v1 }
 0x4b2   : > { %3857 = vmatprep.subr.bf16.mxu0 %v20238_v31 }
 0x4b3   : > { %17173 = vmatmul.mubr.msk.bf16.gmra.mrb[204].mxu1 %vm837_vm2, %v17987_v47 }
 0x4b4   : > { %14927 = vmatmul.mubr.msk.bf16.gmra.mrb[84].mxu0 %vm837_vm2, %v17987_v47  ;;  %17185 = vmatpush3.bf16.msra.mxu1 %v20251_v35  ;;  %v18046_v47 = vld [vmem:[#allocation6 + $0x2dc] ss:$12 sps:$4 sm:$0xff]  }
 0x4b5   : > { %3858 = vmatpush1.bf16.msra.mxu0 %v20231_v13  ;;  %17186 = vmatprep.subr.bf16.mxu1 %v19424_v1 }
 0x4b6   : > { %3859 = vmatprep.subr.bf16.mxu0 %v20259_v6  ;;  %3685 = vmatprep.mubr.bf16.mxu0 %v19423_v0 }
 0x4b7   : > { %17176 = vmatprep.mubr.msk.bf16.mxu1 %vm19425_vm0, %v19424_v1 }
 0x4b8   : > { %17187 = vmatpush3.bf16.msra.mxu1 %v20276_v32 }
 0x4b9   : > { %3860 = vmatpush1.bf16.msra.mxu0 %v20254_v2  ;;  %17188 = vmatprep.subr.bf16.mxu1 %v19424_v1 }
 0x4ba   : > { %14940 = vmatprep.subr.msk.bf16.mxu0 %vm853_vm1, %v20280_v24 }
 0x4bb   : > { %17177 = vmatmul.mubr.msk.bf16.gmra.mrb[208].mxu1 %vm837_vm2, %v17988_v62 }
 0x4bc   : > { %14928 = vmatmul.mubr.msk.bf16.gmra.mrb[88].mxu0 %vm837_vm2, %v17988_v62  ;;  %17189 = vmatpush3.bf16.msra.mxu1 %v20283_v48  ;;  %v18050_v62 = vld [vmem:[#allocation6 + $0x224] ss:$12 sps:$4 sm:$0xff]  }
 0x4bd   : > { %3862 = vmatpush1.bf16.msra.mxu0 %v20286_v18  ;;  %3885 = vmatprep.mubr.bf16.mxu0 %v19423_v0 }
 0x4be   : > { %17190 = vmatprep.mubr.msk.bf16.mxu1 %vm19425_vm0, %v19424_v1  ;;  %4328 = vmatprep.subr.bf16.mxu0 %v17994_v16  ;;  %v18053_v16 = vld [vmem:[#allocation6 + $0x2f8] ss:$12 sps:$4 sm:$0xff]  }
 0x4bf   : > { %16482 = vmatprep.subr.bf16.mxu1 %v18019_v7  ;;  %v18054_v7 = vld [vmem:[#allocation6 + $0x2fc] ss:$12 sps:$4 sm:$0xff]  }
 0x4c3   : > { %17191 = vmatmul.mubr.msk.bf16.vlgmr.msra.gmra.mrb[212].mxu1 %vm837_vm2, %v17989_v39 }
 0x4c4   : > { %14941 = vmatmul.mubr.msk.bf16.vlgmr.msra.gmra.mrb[92].mxu0 %vm837_vm2, %v17989_v39  ;;  %17194 = vmatprep.mubr.msk.bf16.mxu1 %vm19425_vm0, %v19424_v1  ;;  %v18051_v39 = vld [vmem:[#allocation6 + $0x2f4] ss:$12 sps:$4 sm:$0xff]  }
 0x4c5   : > { %3895 = vmatprep.mubr.bf16.mxu0 %v19423_v0  ;;  %4329 = vmatpush1.bf16.msra.mxu0 %v17992_v50  ;;  %v18055_v50 = vld [vmem:[#allocation6 + $0x23c] ss:$12 sps:$4 sm:$0xff]  }
 0x4c6   : > { %4330 = vmatprep.subr.bf16.mxu0 %v17997_v40  ;;  %16483 = vmatpush3.bf16.msra.mxu1 %v18020_v11  ;;  %v4044_v40 = vld [vmem:[#allocation6 + $0x30c] sm:$0xff] }
 0x4c7   : > { %16484 = vmatprep.subr.bf16.mxu1 %v18024_v60 }
 0x4c9   : > { %4331 = vmatpush1.bf16.msra.mxu0 %v17995_v56  ;;  %v14996_v56 = vcombine.high %v4044_v40, %v4044_v40 }
 0x4ca   : > { %4332 = vmatprep.subr.bf16.mxu0 %v18000_v53  ;;  %16485 = vmatpush3.bf16.msra.mxu1 %v18025_v42 }
 0x4cb   : > { %17195 = vmatmul.mubr.msk.bf16.gmra.mrb[216].mxu1 %vm837_vm2, %v17990_v57  ;;  %16486 = vmatprep.subr.bf16.mxu1 %v18029_v12 }
 0x4cc   : > { %14942 = vmatmul.mubr.msk.bf16.gmra.mrb[96].mxu0 %vm837_vm2, %v17990_v57  ;;  %17198 = vmatprep.mubr.msk.bf16.mxu1 %vm19425_vm0, %v19424_v1 }
 0x4cd   : > { %3905 = vmatprep.mubr.bf16.mxu0 %v19423_v0  ;;  %4333 = vmatpush1.bf16.msra.mxu0 %v17998_v59 }
 0x4ce   : > { %4334 = vmatprep.subr.bf16.mxu0 %v18003_v15  ;;  %16487 = vmatpush3.bf16.msra.mxu1 %v18030_v21 }
 0x4cf   : > { %16488 = vmatprep.subr.bf16.mxu1 %v18034_v28 }
 0x4d1   : > { %4335 = vmatpush1.bf16.msra.mxu0 %v18001_v20 }
 0x4d2   : > { %4336 = vmatprep.subr.bf16.mxu0 %v18006_v61  ;;  %16489 = vmatpush3.bf16.msra.mxu1 %v18035_v46 }
 0x4d3   : > { %17199 = vmatmul.mubr.msk.bf16.gmra.mrb[220].mxu1 %vm837_vm2, %v17991_v55  ;;  %16490 = vmatprep.subr.bf16.mxu1 %v18039_v54 }
 0x4d4   : > { %14943 = vmatmul.mubr.msk.bf16.gmra.mrb[100].mxu0 %vm837_vm2, %v17991_v55 }
 0x4d5   : > { %4337 = vmatpush1.bf16.msra.mxu0 %v18004_v63 }
 0x4d6   : > { %4338 = vmatprep.subr.bf16.mxu0 %v18009_v30  ;;  %16491 = vmatpush3.bf16.msra.mxu1 %v18040_v17 }
 0x4d7   : > { %16492 = vmatprep.subr.bf16.mxu1 %v18044_v38  ;;  %v18056_v38 = vld [vmem:[#allocation6 + $0x314] ss:$0 sps:$4 sm:$0xff]  }
 0x4d9   : > { %4339 = vmatpush1.bf16.msra.mxu0 %v18007_v14 }
 0x4da   : > { %4340 = vmatprep.subr.bf16.mxu0 %v18012_v52  ;;  %16493 = vmatpush3.bf16.msra.mxu1 %v18045_v29  ;;  %v14995_v29 = vcombine.low %v4044_v40, %v4044_v40 }
 0x4db   : > { %16494 = vmatprep.subr.bf16.mxu1 %v18049_v41 }
 0x4dd   : > { %4341 = vmatpush1.bf16.msra.mxu0 %v18010_v3 }
 0x4de   : > { %4342 = vmatprep.subr.bf16.mxu0 %v18015_v4  ;;  %16495 = vmatpush3.bf16.msra.mxu1 %v18050_v62 }
 0x4df   : > { %16496 = vmatprep.subr.bf16.mxu1 %v18054_v7 }
 0x4e1   : > { %4343 = vmatpush1.bf16.msra.mxu0 %v18013_v5 }
 0x4e2   : > { %4344 = vmatprep.subr.bf16.mxu0 %v18018_v8  ;;  %16497 = vmatpush3.bf16.msra.mxu1 %v18055_v50  ;;  %v4320_v50 = vsel %vm1660_vm3, %v14995_v29, 0  ;;  %v18071_v29 = vld [vmem:[#allocation6 + $0x34] ss:$12 sps:$4 sm:$0xff]  }
 0x4e3   : > { %17202 = vmatprep.subr.bf16.mxu1 %v19424_v1 }
 0x4e5   : > { %4345 = vmatpush1.bf16.msra.mxu0 %v18016_v10 }
 0x4e6   : > { %4346 = vmatprep.subr.bf16.mxu0 %v18023_v27 }
 0x4e9   : > { %4347 = vmatpush1.bf16.msra.mxu0 %v18021_v58 }
 0x4ea   : > { %4348 = vmatprep.subr.bf16.mxu0 %v18028_v49 }
 0x4ed   : > { %4349 = vmatpush1.bf16.msra.mxu0 %v18026_v19 }
 0x4ee   : > { %4350 = vmatprep.subr.bf16.mxu0 %v18033_v25 }
 0x4f1   : > { %4351 = vmatpush1.bf16.msra.mxu0 %v18031_v26 }
 0x4f2   : > { %4352 = vmatprep.subr.bf16.mxu0 %v18038_v23 }
 0x4f5   : > { %4353 = vmatpush1.bf16.msra.mxu0 %v18036_v9 }
 0x4f6   : > { %4354 = vmatprep.subr.bf16.mxu0 %v18043_v22 }
 0x4f9   : > { %4355 = vmatpush1.bf16.msra.mxu0 %v18041_v43 }
 0x4fa   : > { %4356 = vmatprep.subr.bf16.mxu0 %v18048_v34 }
 0x4fd   : > { %4357 = vmatpush1.bf16.msra.mxu0 %v18046_v47 }
 0x4fe   : > { %4358 = vmatprep.subr.bf16.mxu0 %v18053_v16 }
 0x501   : > { %4359 = vmatpush1.bf16.msra.mxu0 %v18051_v39  ;;  %v4326_v39 = vsel %vm1660_vm3, %v18056_v38, 0  ;;  %v18064_v38 = vld [vmem:[#allocation6 + $0x18] ss:$12 sps:$4 sm:$0xff]  }
 0x502   : > { %14998 = vmatprep.subr.msk.bf16.mxu0 %vm1660_vm3, %v14996_v56  ;;  %v18061_v56 = vld [vmem:[#allocation6 + $0x4] ss:$12 sps:$4 sm:$0xff]  }
 0x57e   : > { %v3728_v53 = vpop.f32.mrb[200].mxu1 }
 0x57f   : > { %v3667_v57 = vpop.f32.mrb[80].mxu0  ;;  %v17170_v59 = vpop.f32.mrb[201].mxu1 }
 0x580   : > { %v3669_v15 = vpop.f32.mrb[81].mxu0  ;;  %v3731_v20 = vpop.f32.mrb[202].mxu1 }
 0x581   : > { %v3671_v61 = vpop.f32.mrb[82].mxu0  ;;  %v20360_v55 = vpack.c.bf16 %v3731_v20, %v3728_v53  ;;  %v17171_v63 = vpop.f32.mrb[203].mxu1  ;;  %v18062_v53 = vld [vmem:[#allocation6 + $0xc8] ss:$12 sps:$4 sm:$0xff]  }
 0x582   : > { %v20362_v30 = vpack.c.bf16 %v3671_v61, %v3667_v57  ;;  %v3673_v14 = vpop.f32.mrb[83].mxu0 }
 0x583   : > { %v20364_v52 = vpack.c.bf16 %v3673_v14, %v3669_v15 }
 0x586   : > { %v3736_v3 = vpop.f32.mrb[204].mxu1 }
 0x587   : > { %v3677_v4 = vpop.f32.mrb[84].mxu0  ;;  %v17174_v5 = vpop.f32.mrb[205].mxu1 }
 0x588   : > { %v3679_v8 = vpop.f32.mrb[85].mxu0  ;;  %v3739_v10 = vpop.f32.mrb[206].mxu1 }
 0x589   : > { %v3681_v11 = vpop.f32.mrb[86].mxu0  ;;  %v20366_v27 = vpack.c.bf16 %v3739_v10, %v3736_v3  ;;  %v17175_v60 = vpop.f32.mrb[207].mxu1 }
 0x58a   : > { %v20368_v58 = vpack.c.bf16 %v3681_v11, %v3677_v4  ;;  %v3683_v42 = vpop.f32.mrb[87].mxu0 }
 0x58b   : > { %v20370_v49 = vpack.c.bf16 %v3683_v42, %v3679_v8 }
 0x58e   : > { %v20372_v12 = vpop.f32.mrb[208].mxu1 }
 0x58f   : > { %v20374_v19 = vpop.f32.mrb[88].mxu0  ;;  %v17178_v21 = vpop.f32.mrb[209].mxu1 }
 0x590   : > { %v20376_v25 = vpop.f32.mrb[89].mxu0  ;;  %v3747_v28 = vpop.f32.mrb[210].mxu1 }
 0x591   : > { %v3691_v26 = vpop.f32.mrb[90].mxu0  ;;  %v17179_v46 = vpop.f32.mrb[211].mxu1 }
 0x592   : > { %v3692_v23 = vpop.f32.mrb[91].mxu0 }
 0x596   : > { %v3948_v54 = vpop.f32.mrb[212].mxu1 }
 0x597   : > { %v3887_v9 = vpop.f32.mrb[92].mxu0  ;;  %v17192_v17 = vpop.f32.mrb[213].mxu1 }
 0x598   : > { %v3889_v22 = vpop.f32.mrb[93].mxu0  ;;  %v3951_v43 = vpop.f32.mrb[214].mxu1  ;;  %v18066_v17 = vld [vmem:[#allocation6 + $0x1c] ss:$12 sps:$4 sm:$0xff]  }
 0x599   : > { %v3891_v34 = vpop.f32.mrb[94].mxu0  ;;  %v3972_v41 = vpack.c.bf16 %v3951_v43, %v3948_v54  ;;  %v17193_v47 = vpop.f32.mrb[215].mxu1  ;;  %v18059_v54 = vld [vmem:[#allocation6] ss:$12 sps:$4 sm:$0xff]  }
 0x59a   : > { %v3970_v62 = vpack.c.bf16 %v3891_v34, %v3887_v9  ;;  %v3893_v16 = vpop.f32.mrb[95].mxu0  ;;  %v18063_v9 = vld [vmem:[#allocation6 + $0x8] ss:$12 sps:$4 sm:$0xff]   ;;  %v18068_v43 = vld [vmem:[#allocation6 + $0x20] ss:$12 sps:$4 sm:$0xff]  }
 0x59b   : > { %v3971_v7 = vpack.c.bf16 %v3893_v16, %v3889_v22  ;;  %v18067_v22 = vld [vmem:[#allocation6 + $0xe0] ss:$12 sps:$4 sm:$0xff]   ;;  %v18072_v34 = vld [vmem:[#allocation6 + $0xf8] ss:$12 sps:$4 sm:$0xff]   ;;  %v18069_v47 = vld [vmem:[#allocation6 + $0x30] ss:$12 sps:$4 sm:$0xff]  }
 0x59c   : > { %v18077_v16 = vld [vmem:[#allocation6 + $0x110] ss:$12 sps:$4 sm:$0xff]  }
 0x59d   : > { %4360 = vmatprep.mubr.bf16.mxu0 %v3971_v7  ;;  %4482 = vmatprep.mubr.bf16.mxu1 %v3971_v7  ;;  %v18074_v7 = vld [vmem:[#allocation6 + $0x48] ss:$12 sps:$4 sm:$0xff]  }
 0x59e   : > { %4361 = vmatmul.mubr.bf16.vlgmr.msra.gmra.mrb[104].mxu0 %v3970_v62  ;;  %4483 = vmatmul.mubr.bf16.vlgmr.msra.gmra.mrb[224].mxu1 %v3970_v62  ;;  %v3956_v57 = vpop.f32.mrb[216].mxu1  ;;  %v18073_v62 = vld [vmem:[#allocation6 + $0x38] ss:$12 sps:$4 sm:$0xff]  }
 0x59f   : > { %v3897_v59 = vpop.f32.mrb[96].mxu0  ;;  %17203 = vmatpush3.bf16.msra.mxu1 %v4326_v39  ;;  %4390 = vmatpush1.bf16.msra.mxu0 %v4320_v50  ;;  %v17196_v40 = vpop.f32.mrb[217].mxu1  ;;  %v18078_v39 = vld [vmem:[#allocation6 + $0x50] ss:$12 sps:$4 sm:$0xff]  }
 0x5a0   : > { %v3899_v15 = vpop.f32.mrb[97].mxu0  ;;  %4844 = vmatprep.subr.bf16.mxu0 %v18061_v56  ;;  %16520 = vmatprep.subr.bf16.mxu1 %v18062_v53  ;;  %v3959_v20 = vpop.f32.mrb[218].mxu1  ;;  %v18081_v50 = vld [vmem:[#allocation6 + $0x64] ss:$12 sps:$4 sm:$0xff]   ;;  %v18082_v56 = vld [vmem:[#allocation6 + $0x128] ss:$12 sps:$4 sm:$0xff]  }
 0x5a1   : > { %v3901_v61 = vpop.f32.mrb[98].mxu0  ;;  %v3975_v63 = vpack.c.bf16 %v3959_v20, %v3956_v57  ;;  %v17197_v14 = vpop.f32.mrb[219].mxu1  ;;  %v18079_v57 = vld [vmem:[#allocation6 + $0x60] ss:$12 sps:$4 sm:$0xff]   ;;  %v18086_v40 = vld [vmem:[#allocation6 + $0x7c] ss:$12 sps:$4 sm:$0xff]  }
 0x5a2   : > { %v3973_v3 = vpack.c.bf16 %v3901_v61, %v3897_v59  ;;  %v3903_v4 = vpop.f32.mrb[99].mxu0  ;;  %v18083_v59 = vld [vmem:[#allocation6 + $0x68] ss:$12 sps:$4 sm:$0xff]   ;;  %v18084_v20 = vld [vmem:[#allocation6 + $0x78] ss:$12 sps:$4 sm:$0xff]  }
 0x5a3   : > { %v3974_v5 = vpack.c.bf16 %v3903_v4, %v3899_v15  ;;  %v18087_v15 = vld [vmem:[#allocation6 + $0x140] ss:$12 sps:$4 sm:$0xff]   ;;  %v18092_v14 = vld [vmem:[#allocation6 + $0x158] ss:$12 sps:$4 sm:$0xff]  }
 0x5a4   : > { %v18088_v61 = vld [vmem:[#allocation6 + $0x80] ss:$12 sps:$4 sm:$0xff]   ;;  %v18093_v4 = vld [vmem:[#allocation6 + $0x98] ss:$12 sps:$4 sm:$0xff]  }
 0x5a5   : > { %4370 = vmatprep.mubr.bf16.mxu0 %v3974_v5  ;;  %4490 = vmatprep.mubr.bf16.mxu1 %v3974_v5  ;;  %v18096_v5 = vld [vmem:[#allocation6 + $0xac] ss:$12 sps:$4 sm:$0xff]  }
 0x5a6   : > { %4371 = vmatmul.mubr.bf16.gmra.mrb[108].mxu0 %v3973_v3  ;;  %4491 = vmatmul.mubr.bf16.gmra.mrb[228].mxu1 %v3973_v3  ;;  %v3964_v8 = vpop.f32.mrb[220].mxu1  ;;  %v18089_v3 = vld [vmem:[#allocation6 + $0x90] ss:$12 sps:$4 sm:$0xff]  }
 0x5a7   : > { %v3907_v10 = vpop.f32.mrb[100].mxu0  ;;  %v17200_v11 = vpop.f32.mrb[221].mxu1  ;;  %v3978_v53 = vpack.c.bf16 %v3964_v8, %v3964_v8  ;;  %v18097_v8 = vld [vmem:[#allocation6 + $0x170] ss:$12 sps:$4 sm:$0xff]  }
 0x5a8   : > { %v3909_v60 = vpop.f32.mrb[101].mxu0  ;;  %v3967_v42 = vpop.f32.mrb[222].mxu1  ;;  %v3976_v23 = vpack.c.bf16 %v3907_v10, %v3907_v10  ;;  %v18094_v10 = vld [vmem:[#allocation6 + $0xa8] ss:$12 sps:$4 sm:$0xff]   ;;  %v18098_v11 = vld [vmem:[#allocation6 + $0xb0] ss:$12 sps:$4 sm:$0xff]  }
 0x5a9   : > { %v3977_v21 = vpack.c.bf16 %v3909_v60, %v3909_v60  ;;  %v3911_v28 = vpop.f32.mrb[102].mxu0  ;;  %v17201_v26 = vpop.f32.mrb[223].mxu1  ;;  %v18101_v60 = vld [vmem:[#allocation6 + $0xc4] ss:$12 sps:$4 sm:$0xff]   ;;  %v18099_v42 = vld [vmem:[#allocation6 + $0xc0] ss:$12 sps:$4 sm:$0xff]  }
 0x5aa   : > { %v3912_v46 = vpop.f32.mrb[103].mxu0  ;;  %v18103_v26 = vld [vmem:[#allocation6 + $0xd8] ss:$12 sps:$4 sm:$0xff]  }
 0x5ab   : > { %4380 = vmatprep.mubr.bf16.mxu0 %v3977_v21  ;;  %4498 = vmatprep.mubr.bf16.mxu1 %v3977_v21  ;;  %v18105_v21 = vld [vmem:[#allocation6 + $0xdc] ss:$12 sps:$4 sm:$0xff]   ;;  %v18108_v46 = vld [vmem:[#allocation6 + $0xf4] ss:$12 sps:$4 sm:$0xff]  }
 0x5ae   : > { %4381 = vmatmul.mubr.bf16.gmra.mrb[112].mxu0 %v3976_v23  ;;  %4499 = vmatmul.mubr.bf16.gmra.mrb[232].mxu1 %v3976_v23  ;;  %v18106_v23 = vld [vmem:[#allocation6 + $0xf0] ss:$12 sps:$4 sm:$0xff]  }
 0x5af   : > { %4421 = vmatprep.mubr.bf16.mxu0 %v19423_v0  ;;  %17204 = vmatprep.mubr.msk.bf16.mxu1 %vm19425_vm0, %v19424_v1 }
 0x5b6   : > { %14999 = vmatmul.mubr.msk.bf16.vlgmr.msra.gmra.mrb[104].mxu0 %vm1644_vm4, %v3972_v41  ;;  %17205 = vmatmul.mubr.msk.bf16.vlgmr.msra.gmra.mrb[236].mxu1 %vm1644_vm4, %v3972_v41  ;;  %v18076_v41 = vld [vmem:[#allocation6 + $0x4c] ss:$12 sps:$4 sm:$0xff]  }
 0x5b7   : > { %4845 = vmatpush1.bf16.msra.mxu0 %v18059_v54  ;;  %16521 = vmatpush3.bf16.msra.mxu1 %v18063_v9  ;;  %v18111_v54 = vld [vmem:[#allocation6 + $0x10c] ss:$12 sps:$4 sm:$0xff]   ;;  %v3757_v9 = vpack.c.bf16 %v20376_v25, %v20376_v25  ;;  %v18120_v25 = vld [vmem:[#allocation6 + $0x154] ss:$12 sps:$4 sm:$0xff]  }
 0x5b8   : > { %4846 = vmatprep.subr.bf16.mxu0 %v18066_v17  ;;  %16522 = vmatprep.subr.bf16.mxu1 %v18067_v22  ;;  %v18109_v17 = vld [vmem:[#allocation6 + $0x108] ss:$12 sps:$4 sm:$0xff]   ;;  %v18114_v22 = vld [vmem:[#allocation6 + $0x124] ss:$12 sps:$4 sm:$0xff]  }
 0x5b9   : > { %4431 = vmatprep.mubr.bf16.mxu0 %v19423_v0  ;;  %17208 = vmatprep.mubr.msk.bf16.mxu1 %vm19425_vm0, %v19424_v1 }
 0x5bb   : > { %4847 = vmatpush1.bf16.msra.mxu0 %v18064_v38  ;;  %16523 = vmatpush3.bf16.msra.mxu1 %v18068_v43  ;;  %v18112_v38 = vld [vmem:[#allocation6 + $0x120] ss:$12 sps:$4 sm:$0xff]   ;;  %v3756_v43 = vpack.c.bf16 %v20374_v19, %v20374_v19  ;;  %v18121_v19 = vld [vmem:[#allocation6 + $0x168] ss:$12 sps:$4 sm:$0xff]  }
 0x5bc   : > { %4848 = vmatprep.subr.bf16.mxu0 %v18071_v29  ;;  %16524 = vmatprep.subr.bf16.mxu1 %v18072_v34  ;;  %v18117_v29 = vld [vmem:[#allocation6 + $0x13c] ss:$12 sps:$4 sm:$0xff]   ;;  %v18115_v34 = vld [vmem:[#allocation6 + $0x138] ss:$12 sps:$4 sm:$0xff]  }
 0x5be   : > { %15000 = vmatmul.mubr.msk.bf16.gmra.mrb[108].mxu0 %vm1644_vm4, %v3975_v63  ;;  %17209 = vmatmul.mubr.msk.bf16.gmra.mrb[240].mxu1 %vm1644_vm4, %v3975_v63  ;;  %v18091_v63 = vld [vmem:[#allocation6 + $0x94] ss:$12 sps:$4 sm:$0xff]  }
 0x5bf   : > { %4849 = vmatpush1.bf16.msra.mxu0 %v18069_v47  ;;  %16525 = vmatpush3.bf16.msra.mxu1 %v18073_v62  ;;  %v18118_v47 = vld [vmem:[#allocation6 + $0x150] ss:$12 sps:$4 sm:$0xff]   ;;  %v18123_v62 = vld [vmem:[#allocation6 + $0x16c] ss:$12 sps:$4 sm:$0xff]  }
 0x5c0   : > { %4850 = vmatprep.subr.bf16.mxu0 %v18076_v41  ;;  %16526 = vmatprep.subr.bf16.mxu1 %v18077_v16  ;;  %v3823_v41 = vld [vmem:[#allocation6 + $0x180] sm:$0xff] }
 0x5c1   : > { %4441 = vmatprep.mubr.bf16.mxu0 %v19423_v0  ;;  %17212 = vmatprep.mubr.msk.bf16.mxu1 %vm19425_vm0, %v19424_v1  ;;  %v15054_v16 = vcombine.high %v3823_v41, %v3823_v41 }
 0x5c3   : > { %4851 = vmatpush1.bf16.msra.mxu0 %v18074_v7  ;;  %16527 = vmatpush3.bf16.msra.mxu1 %v18078_v39  ;;  %v15053_v7 = vcombine.low %v3823_v41, %v3823_v41  ;;  %v18182_v41 = vld [vmem:[#allocation6 + $0x398] ss:$12 sps:$4 sm:$0xff]  }
 0x5c4   : > { %4852 = vmatprep.subr.bf16.mxu0 %v18081_v50  ;;  %16528 = vmatprep.subr.bf16.mxu1 %v18082_v56  ;;  %v18131_v50 = vld [vmem:[#allocation6 + $0x31c] ss:$12 sps:$4 sm:$0xff]   ;;  %v18134_v56 = vld [vmem:[#allocation6 + $0x334] ss:$12 sps:$4 sm:$0xff]  }
 0x5c5   : > { %v4836_v39 = vsel %vm1660_vm3, %v15053_v7, 0  ;;  %v18186_v7 = vld [vmem:[#allocation6 + $0x46c] ss:$12 sps:$4 sm:$0xff]  }
 0x5c6   : > { %15001 = vmatmul.mubr.msk.bf16.gmra.mrb[116].mxu0 %vm1644_vm4, %v3978_v53  ;;  %17213 = vmatmul.mubr.msk.bf16.gmra.mrb[244].mxu1 %vm1644_vm4, %v3978_v53  ;;  %v18137_v53 = vld [vmem:[#allocation6 + $0x34c] ss:$12 sps:$4 sm:$0xff]  }
 0x5c7   : > { %4853 = vmatpush1.bf16.msra.mxu0 %v18079_v57  ;;  %16529 = vmatpush3.bf16.msra.mxu1 %v18083_v59  ;;  %v18135_v57 = vld [vmem:[#allocation6 + $0x348] ss:$12 sps:$4 sm:$0xff]   ;;  %v18140_v59 = vld [vmem:[#allocation6 + $0x364] ss:$12 sps:$4 sm:$0xff]  }
 0x5c8   : > { %4876 = vmatprep.mubr.bf16.mxu0 %v20364_v52  ;;  %4998 = vmatprep.mubr.bf16.mxu1 %v20364_v52  ;;  %v18102_v52 = vld [vmem:[#allocation6 + $0x188] ss:$0 sps:$4 sm:$0xff]  }
 0x5c9   : > { %4854 = vmatprep.subr.bf16.mxu0 %v18086_v40  ;;  %16530 = vmatprep.subr.bf16.mxu1 %v18087_v15  ;;  %v4842_v28 = vsel %vm1660_vm3, %v18102_v52, 0  ;;  %v18138_v40 = vld [vmem:[#allocation6 + $0x360] ss:$12 sps:$4 sm:$0xff]   ;;  %v18143_v15 = vld [vmem:[#allocation6 + $0x37c] ss:$12 sps:$4 sm:$0xff]  }
 0x5ca   : > { %v18158_v52 = vld [vmem:[#allocation6 + $0x3f8] ss:$12 sps:$4 sm:$0xff]  }
 0x5cb   : > { %4855 = vmatpush1.bf16.msra.mxu0 %v18084_v20  ;;  %16531 = vmatpush3.bf16.msra.mxu1 %v18088_v61  ;;  %v18141_v20 = vld [vmem:[#allocation6 + $0x378] ss:$12 sps:$4 sm:$0xff]   ;;  %v18146_v61 = vld [vmem:[#allocation6 + $0x394] ss:$12 sps:$4 sm:$0xff]  }
 0x5cc   : > { %4856 = vmatprep.subr.bf16.mxu0 %v18091_v63  ;;  %16532 = vmatprep.subr.bf16.mxu1 %v18092_v14  ;;  %v18144_v63 = vld [vmem:[#allocation6 + $0x390] ss:$12 sps:$4 sm:$0xff]   ;;  %v18149_v14 = vld [vmem:[#allocation6 + $0x3ac] ss:$12 sps:$4 sm:$0xff]  }
 0x5cf   : > { %4857 = vmatpush1.bf16.msra.mxu0 %v18089_v3  ;;  %16533 = vmatpush3.bf16.msra.mxu1 %v18093_v4  ;;  %v18147_v3 = vld [vmem:[#allocation6 + $0x3a8] ss:$12 sps:$4 sm:$0xff]   ;;  %v18152_v4 = vld [vmem:[#allocation6 + $0x3c4] ss:$12 sps:$4 sm:$0xff]  }
 0x5d0   : > { %4858 = vmatprep.subr.bf16.mxu0 %v18096_v5  ;;  %16534 = vmatprep.subr.bf16.mxu1 %v18097_v8  ;;  %v18150_v5 = vld [vmem:[#allocation6 + $0x3c0] ss:$12 sps:$4 sm:$0xff]  }
 0x5d1   : > { %v18153_v8 = vld [vmem:[#allocation6 + $0x3e0] ss:$12 sps:$4 sm:$0xff]  }
 0x5d3   : > { %4859 = vmatpush1.bf16.msra.mxu0 %v18094_v10  ;;  %16535 = vmatpush3.bf16.msra.mxu1 %v18098_v11  ;;  %v18156_v10 = vld [vmem:[#allocation6 + $0x3dc] ss:$12 sps:$4 sm:$0xff]   ;;  %v18157_v11 = vld [vmem:[#allocation6 + $0x320] ss:$12 sps:$4 sm:$0xff]  }
 0x5d4   : > { %4860 = vmatprep.subr.bf16.mxu0 %v18101_v60  ;;  %17216 = vmatprep.subr.bf16.mxu1 %v19424_v1  ;;  %v18154_v60 = vld [vmem:[#allocation6 + $0x3d8] ss:$12 sps:$4 sm:$0xff]  }
 0x5d6   : > { %4999 = vmatmul.mubr.bf16.vlgmr.msra.gmra.mrb[248].mxu1 %v20362_v30 }
 0x5d7   : > { %4861 = vmatpush1.bf16.msra.mxu0 %v18099_v42  ;;  %5006 = vmatprep.mubr.bf16.mxu1 %v20370_v49  ;;  %v18161_v42 = vld [vmem:[#allocation6 + $0x3f4] ss:$12 sps:$4 sm:$0xff]  }
 0x5d8   : > { %17217 = vmatpush3.bf16.msra.mxu1 %v4842_v28  ;;  %4862 = vmatprep.subr.bf16.mxu0 %v18105_v21  ;;  %v18162_v21 = vld [vmem:[#allocation6 + $0x338] ss:$12 sps:$4 sm:$0xff]   ;;  %v18159_v28 = vld [vmem:[#allocation6 + $0x3f0] ss:$12 sps:$4 sm:$0xff]  }
 0x5d9   : > { %5106 = vmatprep.subr.bf16.mxu1 %v20174_v51 }
 0x5db   : > { %4863 = vmatpush1.bf16.msra.mxu0 %v18103_v26  ;;  %v18163_v26 = vld [vmem:[#allocation6 + $0x410] ss:$12 sps:$4 sm:$0xff]  }
 0x5dc   : > { %4864 = vmatprep.subr.bf16.mxu0 %v18108_v46  ;;  %v18166_v46 = vld [vmem:[#allocation6 + $0x40c] ss:$12 sps:$4 sm:$0xff]  }
 0x5de   : > { %5007 = vmatmul.mubr.bf16.gmra.mrb[252].mxu1 %v20368_v58 }
 0x5df   : > { %4865 = vmatpush1.bf16.msra.mxu0 %v18106_v23  ;;  %5014 = vmatprep.mubr.bf16.mxu1 %v3757_v9  ;;  %v18167_v23 = vld [vmem:[#allocation6 + $0x350] ss:$12 sps:$4 sm:$0xff]  }
 0x5e0   : > { %4866 = vmatprep.subr.bf16.mxu0 %v18111_v54  ;;  %v18164_v54 = vld [vmem:[#allocation6 + $0x408] ss:$12 sps:$4 sm:$0xff]  }
 0x5e3   : > { %4867 = vmatpush1.bf16.msra.mxu0 %v18109_v17  ;;  %v18171_v17 = vld [vmem:[#allocation6 + $0x424] ss:$12 sps:$4 sm:$0xff]  }
 0x5e4   : > { %4868 = vmatprep.subr.bf16.mxu0 %v18114_v22  ;;  %v18172_v22 = vld [vmem:[#allocation6 + $0x368] ss:$12 sps:$4 sm:$0xff]  }
 0x5e6   : > { %5015 = vmatmul.mubr.bf16.gmra.mrb[0].mxu1 %v3756_v43 }
 0x5e7   : > { %4869 = vmatpush1.bf16.msra.mxu0 %v18112_v38  ;;  %17218 = vmatprep.mubr.msk.bf16.mxu1 %vm19425_vm0, %v19424_v1  ;;  %v18169_v38 = vld [vmem:[#allocation6 + $0x420] ss:$12 sps:$4 sm:$0xff]  }
 0x5e8   : > { %4870 = vmatprep.subr.bf16.mxu0 %v18117_v29  ;;  %v18176_v29 = vld [vmem:[#allocation6 + $0x43c] ss:$12 sps:$4 sm:$0xff]  }
 0x5eb   : > { %4871 = vmatpush1.bf16.msra.mxu0 %v18115_v34  ;;  %v18177_v34 = vld [vmem:[#allocation6 + $0x380] ss:$12 sps:$4 sm:$0xff]  }
 0x5ec   : > { %4872 = vmatprep.subr.bf16.mxu0 %v18120_v25  ;;  %v18174_v25 = vld [vmem:[#allocation6 + $0x438] ss:$12 sps:$4 sm:$0xff]  }
 0x5ee   : > { %17219 = vmatmul.mubr.msk.bf16.vlgmr.msra.gmra.mrb[4].mxu1 %vm1644_vm4, %v20360_v55 }
 0x5ef   : > { %5107 = vmatpush1.bf16.msra.mxu1 %v20168_v36  ;;  %4873 = vmatpush1.bf16.msra.mxu0 %v18118_v47  ;;  %v18178_v47 = vld [vmem:[#allocation6 + $0x458] ss:$12 sps:$4 sm:$0xff]  }
 0x5f0   : > { %5108 = vmatprep.subr.bf16.mxu1 %v20206_v45  ;;  %4874 = vmatprep.subr.bf16.mxu0 %v18123_v62  ;;  %v18181_v62 = vld [vmem:[#allocation6 + $0x454] ss:$12 sps:$4 sm:$0xff]  }
 0x5f1   : > { %17222 = vmatprep.mubr.msk.bf16.mxu1 %vm19425_vm0, %v19424_v1 }
 0x5f3   : > { %5109 = vmatpush1.bf16.msra.mxu1 %v20199_v37  ;;  %4875 = vmatpush1.bf16.msra.mxu0 %v18121_v19  ;;  %v18179_v19 = vld [vmem:[#allocation6 + $0x450] ss:$12 sps:$4 sm:$0xff]  }
 0x5f4   : > { %5110 = vmatprep.subr.bf16.mxu1 %v20238_v31  ;;  %15056 = vmatprep.subr.msk.bf16.mxu0 %vm1660_vm3, %v15054_v16  ;;  %v18183_v16 = vld [vmem:[#allocation6 + $0x470] ss:$12 sps:$4 sm:$0xff]  }
 0x5f6   : > { %4877 = vmatmul.mubr.bf16.vlgmr.msra.gmra.mrb[104].mxu0 %v20362_v30  ;;  %17223 = vmatmul.mubr.msk.bf16.gmra.mrb[8].mxu1 %vm1644_vm4, %v20366_v27  ;;  %v3758_v30 = vpack.c.bf16 %v20372_v12, %v20372_v12  ;;  %v18128_v12 = vld [vmem:[%s21984_s5 + $0x38] ss:$0 sps:$4 sm:$0x11]  }
 0x5f7   : > { %5111 = vmatpush1.bf16.msra.mxu1 %v20231_v13  ;;  %4886 = vmatprep.mubr.bf16.mxu0 %v20370_v49  ;;  %v18124_v49 = vld [vmem:[%s21984_s5 + $0x28] sm:$0xff]  }
 0x5f8   : > { %5112 = vmatprep.subr.bf16.mxu1 %v20259_v6  ;;  %17226 = vmatprep.mubr.msk.bf16.mxu1 %vm19425_vm0, %v19424_v1 }
 0x5f9   : > { %4906 = vmatpush1.bf16.msra.mxu0 %v4836_v39  ;;  %v18187_v39 = vld [vmem:[#allocation6 + $0x3b0] ss:$12 sps:$4 sm:$0xff]  }
 0x5fa   : > { %5581 = vmatprep.subr.bf16.mxu0 %v18131_v50 }
 0x5fb   : > { %5113 = vmatpush1.bf16.msra.mxu1 %v20254_v2 }
 0x5fc   : > { %15071 = vmatprep.subr.msk.bf16.mxu1 %vm853_vm1, %v20280_v24 }
 0x5fe   : > { %4887 = vmatmul.mubr.bf16.gmra.mrb[108].mxu0 %v20368_v58  ;;  %17227 = vmatmul.mubr.msk.bf16.gmra.mrb[12].mxu1 %vm1644_vm4, %v3758_v30  ;;  %v18127_v58 = vld [vmem:[%s21984_s5 + $0x30] sm:$0xff]  }
 0x5ff   : > { %5115 = vmatpush1.bf16.msra.mxu1 %v20286_v18  ;;  %4896 = vmatprep.mubr.bf16.mxu0 %v3757_v9  ;;  %v18168_v9 = vld [vmem:[#allocation6 + $0x428] ss:$12 sps:$4 sm:$0xff]  }
 0x600   : > { %5138 = vmatprep.mubr.bf16.mxu1 %v19423_v0  ;;  %17230 = vmatprep.subr.bf16.mxu1 %v19424_v1 }
 0x606   : > { %4897 = vmatmul.mubr.bf16.gmra.mrb[120].mxu0 %v3756_v43  ;;  %15072 = vmatmul.mubr.msk.bf16.vlgmr.msra.gmra.mrb[16].mxu1 %vm837_vm2, %v18124_v49  ;;  %v18173_v43 = vld [vmem:[#allocation6 + $0x440] ss:$12 sps:$4 sm:$0xff]  }
 0x607   : > { %17231 = vmatpush3.bf16.msra.mxu1 %v20187_v33  ;;  %4937 = vmatprep.mubr.bf16.mxu0 %v19423_v0 }
 0x608   : > { %17232 = vmatprep.subr.bf16.mxu1 %v19424_v1  ;;  %5148 = vmatprep.mubr.bf16.mxu1 %v19423_v0 }
 0x60b   : > { %17233 = vmatpush3.bf16.msra.mxu1 %v20219_v44 }
 0x60c   : > { %17234 = vmatprep.subr.bf16.mxu1 %v19424_v1 }
 0x60e   : > { %15057 = vmatmul.mubr.msk.bf16.vlgmr.msra.gmra.mrb[104].mxu0 %vm1644_vm4, %v20360_v55  ;;  %15073 = vmatmul.mubr.msk.bf16.gmra.mrb[20].mxu1 %vm837_vm2, %v18127_v58  ;;  %v18129_v55 = vld [vmem:[#allocation6 + $0x318] ss:$12 sps:$4 sm:$0xff]  }
 0x60f   : > { %17235 = vmatpush3.bf16.msra.mxu1 %v20251_v35  ;;  %4947 = vmatprep.mubr.bf16.mxu0 %v19423_v0 }
 0x610   : > { %17236 = vmatprep.subr.bf16.mxu1 %v19424_v1  ;;  %5158 = vmatprep.mubr.bf16.mxu1 %v19423_v0 }
 0x611   : > { %5582 = vmatpush1.bf16.msra.mxu0 %v18129_v55  ;;  %v18189_v55 = vld [vmem:[#allocation6 + $0x480] ss:$12 sps:$4 sm:$0xff]  }
 0x612   : > { %5583 = vmatprep.subr.bf16.mxu0 %v18134_v56 }
 0x613   : > { %17237 = vmatpush3.bf16.msra.mxu1 %v20276_v32 }
 0x614   : > { %17238 = vmatprep.subr.bf16.mxu1 %v19424_v1 }
 0x616   : > { %15058 = vmatmul.mubr.msk.bf16.gmra.mrb[108].mxu0 %vm1644_vm4, %v20366_v27  ;;  %15074 = vmatmul.mubr.msk.bf16.gmra.mrb[24].mxu1 %vm837_vm2, %v18128_v12  ;;  %v18132_v27 = vld [vmem:[#allocation6 + $0x330] ss:$12 sps:$4 sm:$0xff]  }
 0x617   : > { %17239 = vmatpush3.bf16.msra.mxu1 %v20283_v48  ;;  %4957 = vmatprep.mubr.bf16.mxu0 %v19423_v0 }
 0x618   : > { %17240 = vmatprep.mubr.msk.bf16.mxu1 %vm19425_vm0, %v19424_v1  ;;  %5584 = vmatpush1.bf16.msra.mxu0 %v18132_v27  ;;  %v20478_v27 = vld [vmem:[#allocation6 + $0x498] sm:$0xff] }
 0x619   : > { %5585 = vmatprep.subr.bf16.mxu0 %v18137_v53  ;;  %16566 = vmatprep.subr.bf16.mxu1 %v18153_v8 }
 0x61c   : > { %5586 = vmatpush1.bf16.msra.mxu0 %v18135_v57 }
 0x61d   : > { %5587 = vmatprep.subr.bf16.mxu0 %v18140_v59  ;;  %v15127_v59 = vcombine.high %v20478_v27, %v20478_v27 }
 0x61e   : > { %15059 = vmatmul.mubr.msk.bf16.gmra.mrb[124].mxu0 %vm1644_vm4, %v3758_v30  ;;  %17241 = vmatmul.mubr.msk.bf16.vlgmr.msra.gmra.mrb[28].mxu1 %vm837_vm2, %v18124_v49  ;;  %v18184_v30 = vld [vmem:[#allocation6 + $0x468] ss:$12 sps:$4 sm:$0xff]  }
 0x61f   : > { %17244 = vmatprep.mubr.msk.bf16.mxu1 %vm19425_vm0, %v19424_v1  ;;  %16567 = vmatpush3.bf16.msra.mxu1 %v18157_v11  ;;  %v18188_v49 = vld [vmem:[#allocation6 + $0x488] ss:$12 sps:$4 sm:$0xff]  }
 0x620   : > { %5588 = vmatpush1.bf16.msra.mxu0 %v18138_v40  ;;  %16568 = vmatprep.subr.bf16.mxu1 %v18158_v52 }
 0x621   : > { %5589 = vmatprep.subr.bf16.mxu0 %v18143_v15 }
 0x623   : > { %16569 = vmatpush3.bf16.msra.mxu1 %v18162_v21 }
 0x624   : > { %5590 = vmatpush1.bf16.msra.mxu0 %v18141_v20  ;;  %16570 = vmatprep.subr.bf16.mxu1 %v18163_v26 }
 0x625   : > { %5591 = vmatprep.subr.bf16.mxu0 %v18146_v61 }
 0x626   : > { %17245 = vmatmul.mubr.msk.bf16.gmra.mrb[32].mxu1 %vm837_vm2, %v18127_v58  ;;  %v18191_v58 = vld [vmem:[#allocation6 + $0x484] ss:$12 sps:$4 sm:$0xff]  }
 0x627   : > { %17248 = vmatprep.mubr.msk.bf16.mxu1 %vm19425_vm0, %v19424_v1  ;;  %16571 = vmatpush3.bf16.msra.mxu1 %v18167_v23 }
 0x628   : > { %5592 = vmatpush1.bf16.msra.mxu0 %v18144_v63  ;;  %16572 = vmatprep.subr.bf16.mxu1 %v18168_v9 }
 0x629   : > { %5593 = vmatprep.subr.bf16.mxu0 %v18149_v14 }
 0x62b   : > { %16573 = vmatpush3.bf16.msra.mxu1 %v18172_v22 }
 0x62c   : > { %5594 = vmatpush1.bf16.msra.mxu0 %v18147_v3  ;;  %16574 = vmatprep.subr.bf16.mxu1 %v18173_v43 }
 0x62d   : > { %5595 = vmatprep.subr.bf16.mxu0 %v18152_v4 }
 0x62e   : > { %17249 = vmatmul.mubr.msk.bf16.gmra.mrb[36].mxu1 %vm837_vm2, %v18128_v12  ;;  %v18192_v12 = vld [vmem:[#allocation6 + $0x3c8] ss:$12 sps:$4 sm:$0xff]  }
 0x62f   : > { %16575 = vmatpush3.bf16.msra.mxu1 %v18177_v34 }
 0x630   : > { %5596 = vmatpush1.bf16.msra.mxu0 %v18150_v5  ;;  %16576 = vmatprep.subr.bf16.mxu1 %v18178_v47 }
 0x631   : > { %5597 = vmatprep.subr.bf16.mxu0 %v18156_v10 }
 0x633   : > { %16577 = vmatpush3.bf16.msra.mxu1 %v18182_v41 }
 0x634   : > { %5598 = vmatpush1.bf16.msra.mxu0 %v18154_v60  ;;  %16578 = vmatprep.subr.bf16.mxu1 %v18183_v16 }
 0x635   : > { %5599 = vmatprep.subr.bf16.mxu0 %v18161_v42 }
 0x637   : > { %16579 = vmatpush3.bf16.msra.mxu1 %v18187_v39 }
 0x638   : > { %5600 = vmatpush1.bf16.msra.mxu0 %v18159_v28  ;;  %16580 = vmatprep.subr.bf16.mxu1 %v18188_v49 }
 0x639   : > { %5601 = vmatprep.subr.bf16.mxu0 %v18166_v46 }
 0x63b   : > { %16581 = vmatpush3.bf16.msra.mxu1 %v18192_v12 }
 0x63c   : > { %5602 = vmatpush1.bf16.msra.mxu0 %v18164_v54  ;;  %17252 = vmatprep.subr.bf16.mxu1 %v19424_v1 }
 0x63d   : > { %5603 = vmatprep.subr.bf16.mxu0 %v18171_v17 }
 0x640   : > { %5604 = vmatpush1.bf16.msra.mxu0 %v18169_v38 }
 0x641   : > { %5605 = vmatprep.subr.bf16.mxu0 %v18176_v29 }
 0x644   : > { %5606 = vmatpush1.bf16.msra.mxu0 %v18174_v25 }
 0x645   : > { %5607 = vmatprep.subr.bf16.mxu0 %v18181_v62 }
 0x648   : > { %5608 = vmatpush1.bf16.msra.mxu0 %v18179_v19 }
 0x649   : > { %5609 = vmatprep.subr.bf16.mxu0 %v18186_v7 }
 0x64c   : > { %5610 = vmatpush1.bf16.msra.mxu0 %v18184_v30 }
 0x64d   : > { %5611 = vmatprep.subr.bf16.mxu0 %v18191_v58 }
 0x650   : > { %5612 = vmatpush1.bf16.msra.mxu0 %v18189_v55 }
 0x651   : > { %15129 = vmatprep.subr.msk.bf16.mxu0 %vm1660_vm3, %v15127_v59 }
 0x671   : > { %v16498_v50 = vpop.f32.mrb[224].mxu1 }
 0x672   : > { %v16499_v56 = vpop.f32.mrb[225].mxu1 }
 0x673   : > { %v16500_v53 = vadd.f32 %v16499_v56, %v16498_v50  ;;  %v16501_v57 = vpop.f32.mrb[226].mxu1 }
 0x674   : > { %v16502_v40 = vpop.f32.mrb[227].mxu1 }
 0x675   : > { %v16503_v15 = vadd.f32 %v16502_v40, %v16501_v57 }
 0x679   : > { %v16504_v20 = vpop.f32.mrb[228].mxu1 }
 0x67a   : > { %v16505_v61 = vpop.f32.mrb[229].mxu1 }
 0x67b   : > { %v16506_v63 = vadd.f32 %v16505_v61, %v16504_v20  ;;  %v16507_v14 = vpop.f32.mrb[230].mxu1 }
 0x67c   : > { %v16508_v3 = vpop.f32.mrb[231].mxu1 }
 0x67d   : > { %v16509_v4 = vadd.f32 %v16508_v3, %v16507_v14 }
 0x681   : > { %v4382_v5 = vpop.f32.mrb[112].mxu0  ;;  %v16510_v8 = vpop.f32.mrb[232].mxu1 }
 0x682   : > { %v4384_v10 = vpop.f32.mrb[113].mxu0  ;;  %v16511_v11 = vpop.f32.mrb[233].mxu1 }
 0x683   : > { %v16512_v60 = vadd.f32 %v16511_v11, %v16510_v8  ;;  %v4386_v52 = vpop.f32.mrb[114].mxu0  ;;  %v16513_v42 = vpop.f32.mrb[234].mxu1 }
 0x684   : > { %v4387_v21 = vpop.f32.mrb[115].mxu0  ;;  %v16514_v28 = vpop.f32.mrb[235].mxu1 }
 0x689   : > { %v4540_v26 = vpop.f32.mrb[236].mxu1 }
 0x68a   : > { %v4541_v46 = vadd.f32 %v16500_v53, %v4540_v26  ;;  %v17206_v23 = vpop.f32.mrb[237].mxu1 }
 0x68b   : > { %v4543_v54 = vpop.f32.mrb[238].mxu1 }
 0x68c   : > { %v4544_v9 = vadd.f32 %v16503_v15, %v4543_v54  ;;  %v17207_v17 = vpop.f32.mrb[239].mxu1 }
 0x691   : > { %v4548_v22 = vpop.f32.mrb[240].mxu1 }
 0x692   : > { %v4549_v38 = vadd.f32 %v16506_v63, %v4548_v22  ;;  %v17210_v43 = vpop.f32.mrb[241].mxu1 }
 0x693   : > { %v4551_v29 = vpop.f32.mrb[242].mxu1 }
 0x694   : > { %v4552_v34 = vadd.f32 %v16509_v4, %v4551_v29  ;;  %v17211_v25 = vpop.f32.mrb[243].mxu1 }
 0x699   : > { %v4443_v47 = vpop.f32.mrb[116].mxu0  ;;  %v4556_v62 = vpop.f32.mrb[244].mxu1 }
 0x69a   : > { %v4444_v41 = vadd.f32 %v4443_v47, %v4382_v5  ;;  %v4557_v19 = vadd.f32 %v16512_v60, %v4556_v62  ;;  %v4445_v16 = vpop.f32.mrb[117].mxu0  ;;  %v17214_v7 = vpop.f32.mrb[245].mxu1 }
 0x69b   : > { %v4446_v39 = vadd.f32 %v4445_v16, %v4384_v10  ;;  %v4447_v30 = vpop.f32.mrb[118].mxu0  ;;  %v4559_v49 = vpop.f32.mrb[246].mxu1 }
 0x69c   : > { %v4448_v58 = vpop.f32.mrb[119].mxu0  ;;  %v17215_v12 = vpop.f32.mrb[247].mxu1 }
 0x6a9   : > { %v16536_v55 = vpop.f32.mrb[248].mxu1 }
 0x6aa   : > { %v16537_v50 = vpop.f32.mrb[249].mxu1 }
 0x6ab   : > { %v16538_v56 = vadd.f32 %v16537_v50, %v16536_v55  ;;  %v16539_v53 = vpop.f32.mrb[250].mxu1  ;;  %v18193_v55 = vld [vmem:[#allocation6 + $0x4a0] ss:$0 sps:$4 sm:$0xff]   ;;  %v15126_v50 = vcombine.low %v20478_v27, %v20478_v27 }
 0x6ac   : > { %v16540_v57 = vpop.f32.mrb[251].mxu1 }
 0x6ad   : > { %v16541_v59 = vadd.f32 %v16540_v57, %v16539_v53  ;;  %v5001_v40 = vadd.f32 %v16538_v56, %v4541_v46 }
 0x6af   : > { %v5004_v15 = vadd.f32 %v16541_v59, %v4544_v9 }
 0x6b1   : > { %v16542_v20 = vpop.f32.mrb[252].mxu1 }
 0x6b2   : > { %v16543_v61 = vpop.f32.mrb[253].mxu1 }
 0x6b3   : > { %v16544_v63 = vadd.f32 %v16543_v61, %v16542_v20  ;;  %v16545_v14 = vpop.f32.mrb[254].mxu1  ;;  %v5579_v61 = vsel %vm1660_vm3, %v18193_v55, 0 }
 0x6b4   : > { %v16546_v3 = vpop.f32.mrb[255].mxu1 }
 0x6b5   : > { %v16547_v4 = vadd.f32 %v16546_v3, %v16545_v14  ;;  %v5009_v5 = vadd.f32 %v16544_v63, %v4549_v38  ;;  %v5573_v63 = vsel %vm1660_vm3, %v15126_v50, 0  ;;  %v18201_v14 = vld [vmem:[#allocation6 + $0x4a8] ss:$12 sps:$4 sm:$0xff]  }
 0x6b7   : > { %v5012_v8 = vadd.f32 %v16547_v4, %v4552_v34 }
 0x6b9   : > { %v16548_v10 = vpop.f32.mrb[0].mxu1 }
 0x6ba   : > { %v16549_v11 = vpop.f32.mrb[1].mxu1 }
 0x6bb   : > { %v16550_v60 = vadd.f32 %v16549_v11, %v16548_v10  ;;  %v16551_v52 = vpop.f32.mrb[2].mxu1 }
 0x6bc   : > { %v16552_v42 = vpop.f32.mrb[3].mxu1 }
 0x6bd   : > { %v5017_v21 = vadd.f32 %v16550_v60, %v4557_v19 }
 0x6c1   : > { %v5056_v28 = vpop.f32.mrb[4].mxu1 }
 0x6c2   : > { %v20483_v26 = vadd.f32 %v5056_v28, %v5001_v40  ;;  %v17220_v23 = vpop.f32.mrb[5].mxu1 }
 0x6c3   : > { %v5059_v46 = vpop.f32.mrb[6].mxu1 }
 0x6c4   : > { %v20485_v54 = vadd.f32 %v5059_v46, %v5004_v15  ;;  %v17221_v9 = vpop.f32.mrb[7].mxu1 }
 0x6c9   : > { %v5064_v17 = vpop.f32.mrb[8].mxu1 }
 0x6ca   : > { %v20487_v22 = vadd.f32 %v5064_v17, %v5009_v5  ;;  %v17224_v43 = vpop.f32.mrb[9].mxu1 }
 0x6cb   : > { %v5067_v38 = vpop.f32.mrb[10].mxu1 }
 0x6cc   : > { %v20489_v29 = vadd.f32 %v5067_v38, %v5012_v8  ;;  %v17225_v34 = vpop.f32.mrb[11].mxu1 }
 0x6d1   : > { %v5072_v25 = vpop.f32.mrb[12].mxu1 }
 0x6d2   : > { %v20491_v47 = vadd.f32 %v5072_v25, %v5017_v21  ;;  %v17228_v62 = vpop.f32.mrb[13].mxu1 }
 0x6d3   : > { %v5075_v19 = vpop.f32.mrb[14].mxu1  ;;  %v18199_v62 = vld [vmem:[#allocation6 + $0x4a4] ss:$12 sps:$4 sm:$0xff]  }
 0x6d4   : > { %v17229_v16 = vpop.f32.mrb[15].mxu1  ;;  %v18204_v19 = vld [vmem:[#allocation6 + $0x4c0] ss:$12 sps:$4 sm:$0xff]  }
 0x6d9   : > { %v4898_v7 = vpop.f32.mrb[120].mxu0  ;;  %v5140_v30 = vpop.f32.mrb[16].mxu1 }
 0x6da   : > { %v4899_v49 = vadd.f32 %v4898_v7, %v4444_v41  ;;  %v4900_v58 = vpop.f32.mrb[121].mxu0  ;;  %v5142_v12 = vpop.f32.mrb[17].mxu1 }
 0x6db   : > { %v4901_v56 = vadd.f32 %v4900_v58, %v4446_v39  ;;  %v4902_v53 = vpop.f32.mrb[122].mxu0  ;;  %v5144_v57 = vpop.f32.mrb[18].mxu1 }
 0x6dc   : > { %v5223_v59 = vpack.c.bf16 %v5144_v57, %v5140_v30  ;;  %v4903_v40 = vpop.f32.mrb[123].mxu0  ;;  %v5146_v15 = vpop.f32.mrb[19].mxu1  ;;  %v18217_v53 = vld [vmem:[#allocation6 + $0x534] ss:$12 sps:$4 sm:$0xff]   ;;  %v18222_v57 = vld [vmem:[#allocation6 + $0x550] ss:$12 sps:$4 sm:$0xff]  }
 0x6dd   : > { %v5224_v20 = vpack.c.bf16 %v5146_v15, %v5142_v12  ;;  %v18225_v40 = vld [vmem:[#allocation6 + $0x568] ss:$12 sps:$4 sm:$0xff]   ;;  %v18226_v15 = vld [vmem:[#allocation6 + $0x56c] ss:$12 sps:$4 sm:$0xff]  }
 0x6df   : > { %5613 = vmatprep.mubr.bf16.mxu0 %v5224_v20  ;;  %5735 = vmatprep.mubr.bf16.mxu1 %v5224_v20  ;;  %v18223_v20 = vld [vmem:[#allocation6 + $0x564] ss:$12 sps:$4 sm:$0xff]  }
 0x6e0   : > { %5614 = vmatmul.mubr.bf16.vlgmr.msra.gmra.mrb[104].mxu0 %v5223_v59  ;;  %5736 = vmatmul.mubr.bf16.vlgmr.msra.gmra.mrb[40].mxu1 %v5223_v59  ;;  %v18220_v59 = vld [vmem:[#allocation6 + $0x54c] ss:$12 sps:$4 sm:$0xff]  }
 0x6e1   : > { %17253 = vmatpush3.bf16.msra.mxu1 %v5579_v61  ;;  %v5150_v41 = vpop.f32.mrb[20].mxu1  ;;  %5643 = vmatpush1.bf16.msra.mxu0 %v5573_v63  ;;  %v18227_v61 = vld [vmem:[#allocation6 + $0x4ac] ss:$12 sps:$4 sm:$0xff]  }
 0x6e2   : > { %5858 = vmatprep.subr.bf16.mxu1 %v20174_v51  ;;  %v5152_v27 = vpop.f32.mrb[21].mxu1  ;;  %6333 = vmatprep.subr.bf16.mxu0 %v18201_v14  ;;  %v18230_v63 = vld [vmem:[#allocation6 + $0x580] ss:$12 sps:$4 sm:$0xff]   ;;  %v18231_v14 = vld [vmem:[#allocation6 + $0x584] ss:$12 sps:$4 sm:$0xff]  }
 0x6e3   : > { %v5154_v39 = vpop.f32.mrb[22].mxu1 }
 0x6e4   : > { %v5226_v3 = vpack.c.bf16 %v5154_v39, %v5150_v41  ;;  %v5156_v4 = vpop.f32.mrb[23].mxu1  ;;  %v18228_v41 = vld [vmem:[#allocation6 + $0x57c] ss:$12 sps:$4 sm:$0xff]   ;;  %v18233_v39 = vld [vmem:[#allocation6 + $0x594] ss:$12 sps:$4 sm:$0xff]  }
 0x6e5   : > { %v5227_v5 = vpack.c.bf16 %v5156_v4, %v5152_v27  ;;  %v18232_v27 = vld [vmem:[#allocation6 + $0x4c4] ss:$12 sps:$4 sm:$0xff]   ;;  %v18236_v4 = vld [vmem:[#allocation6 + $0x59c] ss:$12 sps:$4 sm:$0xff]  }
 0x6e7   : > { %5623 = vmatprep.mubr.bf16.mxu0 %v5227_v5  ;;  %5743 = vmatprep.mubr.bf16.mxu1 %v5227_v5  ;;  %v18237_v5 = vld [vmem:[#allocation6 + $0x4dc] ss:$12 sps:$4 sm:$0xff]  }
 0x6e8   : > { %5624 = vmatmul.mubr.bf16.gmra.mrb[108].mxu0 %v5226_v3  ;;  %5744 = vmatmul.mubr.bf16.gmra.mrb[44].mxu1 %v5226_v3  ;;  %v18235_v3 = vld [vmem:[#allocation6 + $0x598] ss:$12 sps:$4 sm:$0xff]  }
 0x6e9   : > { %v5160_v8 = vpop.f32.mrb[24].mxu1 }
 0x6ea   : > { %v5162_v10 = vpop.f32.mrb[25].mxu1  ;;  %v5229_v42 = vpack.c.bf16 %v5160_v8, %v5160_v8  ;;  %v18240_v8 = vld [vmem:[#allocation6 + $0x5b0] ss:$12 sps:$4 sm:$0xff]  }
 0x6eb   : > { %v5230_v11 = vpack.c.bf16 %v5162_v10, %v5162_v10  ;;  %v5164_v60 = vpop.f32.mrb[26].mxu1  ;;  %v18241_v10 = vld [vmem:[#allocation6 + $0x5b4] ss:$12 sps:$4 sm:$0xff]  }
 0x6ec   : > { %v5165_v52 = vpop.f32.mrb[27].mxu1  ;;  %v18242_v60 = vld [vmem:[#allocation6 + $0x4f4] ss:$12 sps:$4 sm:$0xff]  }
 0x6ed   : > { %5633 = vmatprep.mubr.bf16.mxu0 %v5230_v11  ;;  %5751 = vmatprep.mubr.bf16.mxu1 %v5230_v11  ;;  %v18238_v11 = vld [vmem:[#allocation6 + $0x5ac] ss:$12 sps:$4 sm:$0xff]   ;;  %v18243_v52 = vld [vmem:[#allocation6 + $0x5c4] ss:$12 sps:$4 sm:$0xff]  }
 0x6f0   : > { %5634 = vmatmul.mubr.bf16.gmra.mrb[128].mxu0 %v5229_v42  ;;  %5752 = vmatmul.mubr.bf16.gmra.mrb[48].mxu1 %v5229_v42  ;;  %v18245_v42 = vld [vmem:[#allocation6 + $0x5c8] ss:$12 sps:$4 sm:$0xff]  }
 0x6f1   : > { %v4959_v51 = vpop.f32.mrb[124].mxu0  ;;  %v5201_v21 = vpop.f32.mrb[28].mxu1  ;;  %5674 = vmatprep.mubr.bf16.mxu0 %v19423_v0  ;;  %17254 = vmatprep.mubr.msk.bf16.mxu1 %vm19425_vm0, %v19424_v1 }
 0x6f2   : > { %v20501_v28 = vadd.f32 %v4959_v51, %v4899_v49  ;;  %v4961_v23 = vpop.f32.mrb[125].mxu0  ;;  %v17242_v46 = vpop.f32.mrb[29].mxu1  ;;  %v18202_v49 = vld [vmem:[#allocation6 + $0x4bc] ss:$12 sps:$4 sm:$0xff]   ;;  %v18246_v51 = vld [vmem:[#allocation6 + $0x5cc] ss:$12 sps:$4 sm:$0xff]  }
 0x6f3   : > { %v20503_v9 = vadd.f32 %v4961_v23, %v4901_v56  ;;  %v4963_v17 = vpop.f32.mrb[126].mxu0  ;;  %v5204_v43 = vpop.f32.mrb[30].mxu1  ;;  %v18250_v23 = vld [vmem:[#allocation6 + $0x5e0] ss:$12 sps:$4 sm:$0xff]   ;;  %v18251_v46 = vld [vmem:[#allocation6 + $0x5e4] ss:$12 sps:$4 sm:$0xff]  }
 0x6f4   : > { %v5225_v38 = vpack.c.bf16 %v5204_v43, %v5201_v21  ;;  %v4964_v34 = vpop.f32.mrb[127].mxu0  ;;  %v17243_v25 = vpop.f32.mrb[31].mxu1  ;;  %v18247_v21 = vld [vmem:[#allocation6 + $0x50c] ss:$12 sps:$4 sm:$0xff]   ;;  %v18248_v17 = vld [vmem:[#allocation6 + $0x5dc] ss:$12 sps:$4 sm:$0xff]  }
 0x6f5   : > { %v18252_v43 = vld [vmem:[#allocation6 + $0x524] ss:$12 sps:$4 sm:$0xff]   ;;  %v18256_v34 = vld [vmem:[#allocation6 + $0x5fc] ss:$12 sps:$4 sm:$0xff]   ;;  %v18253_v25 = vld [vmem:[#allocation6 + $0x5f4] ss:$12 sps:$4 sm:$0xff]  }
 0x6f8   : > { %15130 = vmatmul.mubr.msk.bf16.vlgmr.msra.gmra.mrb[104].mxu0 %vm1644_vm4, %v5225_v38  ;;  %17255 = vmatmul.mubr.msk.bf16.vlgmr.msra.gmra.mrb[52].mxu1 %vm1644_vm4, %v5225_v38  ;;  %v18255_v38 = vld [vmem:[#allocation6 + $0x5f8] ss:$12 sps:$4 sm:$0xff]  }
 0x6f9   : > { %5859 = vmatpush1.bf16.msra.mxu1 %v20168_v36  ;;  %v5209_v16 = vpop.f32.mrb[32].mxu1  ;;  %5684 = vmatprep.mubr.bf16.mxu0 %v19423_v0  ;;  %v18207_v36 = vld [vmem:[#allocation6 + $0x4d8] ss:$12 sps:$4 sm:$0xff]  }
 0x6fa   : > { %5860 = vmatprep.subr.bf16.mxu1 %v20206_v45  ;;  %v17246_v7 = vpop.f32.mrb[33].mxu1  ;;  %17258 = vmatprep.mubr.msk.bf16.mxu1 %vm19425_vm0, %v19424_v1  ;;  %v18205_v45 = vld [vmem:[#allocation6 + $0x4d4] ss:$12 sps:$4 sm:$0xff]  }
 0x6fb   : > { %v5212_v30 = vpop.f32.mrb[34].mxu1  ;;  %6334 = vmatpush1.bf16.msra.mxu0 %v18199_v62  ;;  %v18257_v62 = vld [vmem:[#allocation6 + $0x53c] ss:$12 sps:$4 sm:$0xff]   ;;  %v18258_v7 = vld [vmem:[#allocation6 + $0x60c] ss:$12 sps:$4 sm:$0xff]  }
 0x6fc   : > { %v5228_v58 = vpack.c.bf16 %v5212_v30, %v5209_v16  ;;  %v17247_v12 = vpop.f32.mrb[35].mxu1  ;;  %6335 = vmatprep.subr.bf16.mxu0 %v18204_v19  ;;  %v18260_v19 = vld [vmem:[#allocation6 + $0x610] ss:$12 sps:$4 sm:$0xff]   ;;  %v18261_v16 = vld [vmem:[#allocation6 + $0x614] ss:$12 sps:$4 sm:$0xff]  }
 0x6fd   : > { %5861 = vmatpush1.bf16.msra.mxu1 %v20199_v37  ;;  %v18262_v30 = vld [vmem:[#allocation6 + $0x554] ss:$12 sps:$4 sm:$0xff]  }
 0x6fe   : > { %5862 = vmatprep.subr.bf16.mxu1 %v20238_v31 }
 0x6ff   : > { %6336 = vmatpush1.bf16.msra.mxu0 %v18202_v49  ;;  %v20562_v49 = vld [vmem:[#allocation6 + $0x624] sm:$0xff] }
 0x700   : > { %15131 = vmatmul.mubr.msk.bf16.gmra.mrb[108].mxu0 %vm1644_vm4, %v5228_v58  ;;  %17259 = vmatmul.mubr.msk.bf16.gmra.mrb[56].mxu1 %vm1644_vm4, %v5228_v58  ;;  %v15200_v58 = vcombine.high %v20562_v49, %v20562_v49 }
 0x701   : > { %5863 = vmatpush1.bf16.msra.mxu1 %v20231_v13  ;;  %v5217_v55 = vpop.f32.mrb[36].mxu1  ;;  %5694 = vmatprep.mubr.bf16.mxu0 %v19423_v0  ;;  %v18196_v13 = vld [vmem:[%s21984_s5 + $0x3c] sm:$0xff]  }
 0x702   : > { %5864 = vmatprep.subr.bf16.mxu1 %v20259_v6  ;;  %v17250_v50 = vpop.f32.mrb[37].mxu1  ;;  %17262 = vmatprep.mubr.msk.bf16.mxu1 %vm19425_vm0, %v19424_v1  ;;  %v5231_v31 = vpack.c.bf16 %v5217_v55, %v5217_v55  ;;  %v18213_v6 = vld [vmem:[#allocation6 + $0x508] ss:$12 sps:$4 sm:$0xff]  }
 0x703   : > { %v5220_v37 = vpop.f32.mrb[38].mxu1  ;;  %6337 = vmatprep.subr.bf16.mxu0 %v18207_v36 }
 0x704   : > { %v17251_v56 = vpop.f32.mrb[39].mxu1  ;;  %6338 = vmatpush1.bf16.msra.mxu0 %v18205_v45 }
 0x705   : > { %5865 = vmatpush1.bf16.msra.mxu1 %v20254_v2  ;;  %v18197_v2 = vld [vmem:[%s21984_s5 + $0x44] sm:$0xff]  }
 0x706   : > { %15144 = vmatprep.subr.msk.bf16.mxu1 %vm853_vm1, %v20280_v24  ;;  %v18216_v24 = vld [vmem:[#allocation6 + $0x520] ss:$12 sps:$4 sm:$0xff]  }
 0x708   : > { %15132 = vmatmul.mubr.msk.bf16.gmra.mrb[132].mxu0 %vm1644_vm4, %v5231_v31  ;;  %17263 = vmatmul.mubr.msk.bf16.gmra.mrb[60].mxu1 %vm1644_vm4, %v5231_v31 }
 0x709   : > { %5867 = vmatpush1.bf16.msra.mxu1 %v20286_v18  ;;  %5890 = vmatprep.mubr.bf16.mxu1 %v19423_v0  ;;  %v18219_v18 = vld [vmem:[#allocation6 + $0x538] ss:$12 sps:$4 sm:$0xff]  }
 0x70a   : > { %17266 = vmatprep.subr.bf16.mxu1 %v19424_v1 }
 0x710   : > { %15145 = vmatmul.mubr.msk.bf16.vlgmr.msra.gmra.mrb[64].mxu1 %vm837_vm2, %v18196_v13 }
 0x711   : > { %17267 = vmatpush3.bf16.msra.mxu1 %v20187_v33  ;;  %5900 = vmatprep.mubr.bf16.mxu1 %v19423_v0  ;;  %v18198_v33 = vld [vmem:[%s21984_s5 + $0x4c] ss:$0 sps:$4 sm:$0x11]  }
 0x712   : > { %17268 = vmatprep.subr.bf16.mxu1 %v19424_v1 }
 0x715   : > { %17269 = vmatpush3.bf16.msra.mxu1 %v20219_v44  ;;  %v18210_v44 = vld [vmem:[#allocation6 + $0x4f0] ss:$12 sps:$4 sm:$0xff]  }
 0x716   : > { %17270 = vmatprep.subr.bf16.mxu1 %v19424_v1  ;;  %6339 = vmatprep.subr.bf16.mxu0 %v18210_v44 }
 0x718   : > { %15146 = vmatmul.mubr.msk.bf16.gmra.mrb[68].mxu1 %vm837_vm2, %v18197_v2 }
 0x719   : > { %17271 = vmatpush3.bf16.msra.mxu1 %v20251_v35  ;;  %5910 = vmatprep.mubr.bf16.mxu1 %v19423_v0  ;;  %v18208_v35 = vld [vmem:[#allocation6 + $0x4ec] ss:$12 sps:$4 sm:$0xff]  }
 0x71a   : > { %17272 = vmatprep.subr.bf16.mxu1 %v19424_v1  ;;  %6340 = vmatpush1.bf16.msra.mxu0 %v18208_v35 }
 0x71b   : > { %6341 = vmatprep.subr.bf16.mxu0 %v18213_v6 }
 0x71d   : > { %17273 = vmatpush3.bf16.msra.mxu1 %v20276_v32  ;;  %v18211_v32 = vld [vmem:[#allocation6 + $0x504] ss:$12 sps:$4 sm:$0xff]  }
 0x71e   : > { %17274 = vmatprep.subr.bf16.mxu1 %v19424_v1  ;;  %6342 = vmatpush1.bf16.msra.mxu0 %v18211_v32 }
 0x71f   : > { %6343 = vmatprep.subr.bf16.mxu0 %v18216_v24 }
 0x720   : > { %15147 = vmatmul.mubr.msk.bf16.gmra.mrb[72].mxu1 %vm837_vm2, %v18198_v33 }
 0x721   : > { %17275 = vmatpush3.bf16.msra.mxu1 %v20283_v48  ;;  %17276 = vmatprep.mubr.msk.bf16.mxu1 %vm19425_vm0, %v19424_v1  ;;  %v18214_v48 = vld [vmem:[#allocation6 + $0x51c] ss:$12 sps:$4 sm:$0xff]  }
 0x722   : > { %6344 = vmatpush1.bf16.msra.mxu0 %v18214_v48  ;;  %16612 = vmatprep.subr.bf16.mxu1 %v18226_v15 }
 0x723   : > { %6345 = vmatprep.subr.bf16.mxu0 %v18219_v18 }
 0x726   : > { %6346 = vmatpush1.bf16.msra.mxu0 %v18217_v53 }
 0x727   : > { %6347 = vmatprep.subr.bf16.mxu0 %v18222_v57 }
 0x728   : > { %17277 = vmatmul.mubr.msk.bf16.vlgmr.msra.gmra.mrb[76].mxu1 %vm837_vm2, %v18196_v13 }
 0x729   : > { %17280 = vmatprep.mubr.msk.bf16.mxu1 %vm19425_vm0, %v19424_v1  ;;  %16613 = vmatpush3.bf16.msra.mxu1 %v18227_v61 }
 0x72a   : > { %6348 = vmatpush1.bf16.msra.mxu0 %v18220_v59  ;;  %16614 = vmatprep.subr.bf16.mxu1 %v18231_v14 }
 0x72b   : > { %6349 = vmatprep.subr.bf16.mxu0 %v18225_v40 }
 0x72d   : > { %16615 = vmatpush3.bf16.msra.mxu1 %v18232_v27 }
 0x72e   : > { %6350 = vmatpush1.bf16.msra.mxu0 %v18223_v20  ;;  %16616 = vmatprep.subr.bf16.mxu1 %v18236_v4 }
 0x72f   : > { %6351 = vmatprep.subr.bf16.mxu0 %v18230_v63 }
 0x730   : > { %17281 = vmatmul.mubr.msk.bf16.gmra.mrb[80].mxu1 %vm837_vm2, %v18197_v2 }
 0x731   : > { %17284 = vmatprep.mubr.msk.bf16.mxu1 %vm19425_vm0, %v19424_v1  ;;  %16617 = vmatpush3.bf16.msra.mxu1 %v18237_v5 }
 0x732   : > { %6352 = vmatpush1.bf16.msra.mxu0 %v18228_v41  ;;  %16618 = vmatprep.subr.bf16.mxu1 %v18241_v10 }
 0x733   : > { %6353 = vmatprep.subr.bf16.mxu0 %v18235_v3 }
 0x735   : > { %16619 = vmatpush3.bf16.msra.mxu1 %v18242_v60 }
 0x736   : > { %6354 = vmatpush1.bf16.msra.mxu0 %v18233_v39  ;;  %16620 = vmatprep.subr.bf16.mxu1 %v18246_v51 }
 0x737   : > { %6355 = vmatprep.subr.bf16.mxu0 %v18240_v8 }
 0x738   : > { %17285 = vmatmul.mubr.msk.bf16.gmra.mrb[84].mxu1 %vm837_vm2, %v18198_v33 }
 0x739   : > { %16621 = vmatpush3.bf16.msra.mxu1 %v18247_v21 }
 0x73a   : > { %6356 = vmatpush1.bf16.msra.mxu0 %v18238_v11  ;;  %16622 = vmatprep.subr.bf16.mxu1 %v18251_v46 }
 0x73b   : > { %6357 = vmatprep.subr.bf16.mxu0 %v18245_v42 }
 0x73d   : > { %16623 = vmatpush3.bf16.msra.mxu1 %v18252_v43 }
 0x73e   : > { %6358 = vmatpush1.bf16.msra.mxu0 %v18243_v52  ;;  %16624 = vmatprep.subr.bf16.mxu1 %v18256_v34 }
 0x73f   : > { %6359 = vmatprep.subr.bf16.mxu0 %v18250_v23 }
 0x741   : > { %16625 = vmatpush3.bf16.msra.mxu1 %v18257_v62 }
 0x742   : > { %6360 = vmatpush1.bf16.msra.mxu0 %v18248_v17  ;;  %16626 = vmatprep.subr.bf16.mxu1 %v18261_v16  ;;  %v18265_v16 = vld [vmem:[#allocation6 + $0x62c] ss:$0 sps:$4 sm:$0xff]  }
 0x743   : > { %6361 = vmatprep.subr.bf16.mxu0 %v18255_v38 }
 0x745   : > { %16627 = vmatpush3.bf16.msra.mxu1 %v18262_v30 }
 0x746   : > { %6362 = vmatpush1.bf16.msra.mxu0 %v18253_v25  ;;  %17288 = vmatprep.subr.bf16.mxu1 %v19424_v1 }
 0x747   : > { %6363 = vmatprep.subr.bf16.mxu0 %v18260_v19  ;;  %v15199_v19 = vcombine.low %v20562_v49, %v20562_v49 }
 0x74a   : > { %6364 = vmatpush1.bf16.msra.mxu0 %v18258_v7 }
 0x74b   : > { %15202 = vmatprep.subr.msk.bf16.mxu0 %vm1660_vm3, %v15200_v58 }
 0x7b3   : > { %v16582_v12 = vpop.f32.mrb[40].mxu1 }
 0x7b4   : > { %v16583_v36 = vpop.f32.mrb[41].mxu1 }
 0x7b5   : > { %v16584_v45 = vadd.f32 %v16583_v36, %v16582_v12  ;;  %v16585_v55 = vpop.f32.mrb[42].mxu1 }
 0x7b6   : > { %v16586_v50 = vpop.f32.mrb[43].mxu1 }
 0x7b7   : > { %v16587_v37 = vadd.f32 %v16586_v50, %v16585_v55 }
 0x7bb   : > { %v16588_v31 = vpop.f32.mrb[44].mxu1 }
 0x7bc   : > { %v16589_v56 = vpop.f32.mrb[45].mxu1 }
 0x7bd   : > { %v16590_v13 = vadd.f32 %v16589_v56, %v16588_v31  ;;  %v16591_v2 = vpop.f32.mrb[46].mxu1 }
 0x7be   : > { %v16592_v33 = vpop.f32.mrb[47].mxu1 }
 0x7bf   : > { %v16593_v44 = vadd.f32 %v16592_v33, %v16591_v2 }
 0x7c3   : > { %v5635_v35 = vpop.f32.mrb[128].mxu0  ;;  %v16594_v6 = vpop.f32.mrb[48].mxu1 }
 0x7c4   : > { %v5637_v32 = vpop.f32.mrb[129].mxu0  ;;  %v16595_v24 = vpop.f32.mrb[49].mxu1 }
 0x7c5   : > { %v16596_v48 = vadd.f32 %v16595_v24, %v16594_v6  ;;  %v5639_v18 = vpop.f32.mrb[130].mxu0  ;;  %v16597_v53 = vpop.f32.mrb[50].mxu1 }
 0x7c6   : > { %v5640_v57 = vpop.f32.mrb[131].mxu0  ;;  %v16598_v59 = vpop.f32.mrb[51].mxu1 }
 0x7cb   : > { %v5793_v40 = vpop.f32.mrb[52].mxu1 }
 0x7cc   : > { %v5794_v15 = vadd.f32 %v16584_v45, %v5793_v40  ;;  %v17256_v20 = vpop.f32.mrb[53].mxu1 }
 0x7cd   : > { %v5796_v61 = vpop.f32.mrb[54].mxu1 }
 0x7ce   : > { %v20568_v63 = vadd.f32 %v5794_v15, %v20483_v26  ;;  %v5797_v14 = vadd.f32 %v16587_v37, %v5796_v61  ;;  %v17257_v41 = vpop.f32.mrb[55].mxu1 }
 0x7d0   : > { %v20571_v27 = vadd.f32 %v5797_v14, %v20485_v54 }
 0x7d3   : > { %v5801_v39 = vpop.f32.mrb[56].mxu1 }
 0x7d4   : > { %v5802_v3 = vadd.f32 %v16590_v13, %v5801_v39  ;;  %v17260_v4 = vpop.f32.mrb[57].mxu1 }
 0x7d5   : > { %v5804_v5 = vpop.f32.mrb[58].mxu1 }
 0x7d6   : > { %v20574_v8 = vadd.f32 %v5802_v3, %v20487_v22  ;;  %v5805_v10 = vadd.f32 %v16593_v44, %v5804_v5  ;;  %v17261_v11 = vpop.f32.mrb[59].mxu1 }
 0x7d8   : > { %v20577_v60 = vadd.f32 %v5805_v10, %v20489_v29 }
 0x7db   : > { %v5696_v52 = vpop.f32.mrb[132].mxu0  ;;  %v5809_v26 = vpop.f32.mrb[60].mxu1 }
 0x7dc   : > { %v5697_v42 = vadd.f32 %v5696_v52, %v5635_v35  ;;  %v5810_v51 = vadd.f32 %v16596_v48, %v5809_v26  ;;  %v5698_v21 = vpop.f32.mrb[133].mxu0  ;;  %v17264_v23 = vpop.f32.mrb[61].mxu1 }
 0x7dd   : > { %v5699_v54 = vadd.f32 %v5698_v21, %v5637_v32  ;;  %v5700_v46 = vpop.f32.mrb[134].mxu0  ;;  %v5812_v17 = vpop.f32.mrb[62].mxu1 }
 0x7de   : > { %v20580_v43 = vadd.f32 %v5697_v42, %v20501_v28  ;;  %v20583_v22 = vadd.f32 %v5810_v51, %v20491_v47  ;;  %v5701_v38 = vpop.f32.mrb[135].mxu0  ;;  %v17265_v34 = vpop.f32.mrb[63].mxu1  ;;  %v6325_v28 = vsel %vm1660_vm3, %v15199_v19, 0  ;;  %v6331_v47 = vsel %vm1660_vm3, %v18265_v16, 0  ;;  %v6582_v16 = vld [vmem:[%s21985_s6] sm:$0xff] }
 0x7df   : > { %v20586_v29 = vadd.f32 %v5699_v54, %v20503_v9 }
 0x7e3   : > { %v5892_v25 = vpop.f32.mrb[64].mxu1 }
 0x7e4   : > { %v5894_v62 = vpop.f32.mrb[65].mxu1 }
 0x7e5   : > { %v5896_v7 = vpop.f32.mrb[66].mxu1 }
 0x7e6   : > { %v5975_v30 = vpack.c.bf16 %v5896_v7, %v5892_v25  ;;  %v5898_v58 = vpop.f32.mrb[67].mxu1  ;;  %v6583_v7 = vld [vmem:[%s21985_s6 + $0x8] sm:$0xff] }
 0x7e7   : > { %v5976_v12 = vpack.c.bf16 %v5898_v58, %v5894_v62 }
 0x7e9   : > { %6365 = vmatprep.mubr.bf16.mxu0 %v5976_v12  ;;  %6487 = vmatprep.mubr.bf16.mxu1 %v5976_v12  ;;  %v6585_v12 = vld [vmem:[%s21985_s6 + $0x18] sm:$0xff] }
 0x7ea   : > { %6366 = vmatmul.mubr.bf16.vlgmr.msra.gmra.mrb[104].mxu0 %v5975_v30  ;;  %6488 = vmatmul.mubr.bf16.vlgmr.msra.gmra.mrb[88].mxu1 %v5975_v30 }
 0x7eb   : > { %v5902_v9 = vpop.f32.mrb[68].mxu1  ;;  %6395 = vmatpush1.bf16.msra.mxu0 %v6325_v28  ;;  %17289 = vmatpush3.bf16.msra.mxu1 %v6331_v47 }
 0x7ec   : > { %v5904_v36 = vpop.f32.mrb[69].mxu1 }
 0x7ed   : > { %v5906_v45 = vpop.f32.mrb[70].mxu1 }
 0x7ee   : > { %v5978_v55 = vpack.c.bf16 %v5906_v45, %v5902_v9  ;;  %v5908_v49 = vpop.f32.mrb[71].mxu1  ;;  %v6586_v45 = vld [vmem:[%s21985_s6 + $0x20] sm:$0xff] }
 0x7ef   : > { %v5979_v50 = vpack.c.bf16 %v5908_v49, %v5904_v36 }
 0x7f1   : > { %6375 = vmatprep.mubr.bf16.mxu0 %v5979_v50  ;;  %6495 = vmatprep.mubr.bf16.mxu1 %v5979_v50 }
 0x7f2   : > { %6376 = vmatmul.mubr.bf16.gmra.mrb[108].mxu0 %v5978_v55  ;;  %6496 = vmatmul.mubr.bf16.gmra.mrb[92].mxu1 %v5978_v55  ;;  %v6584_v55 = vld [vmem:[%s21985_s6 + $0x10] sm:$0xff] }
 0x7f3   : > { %v5912_v37 = vpop.f32.mrb[72].mxu1 }
 0x7f4   : > { %v5914_v31 = vpop.f32.mrb[73].mxu1  ;;  %v5981_v33 = vpack.c.bf16 %v5912_v37, %v5912_v37 }
 0x7f5   : > { %v5982_v56 = vpack.c.bf16 %v5914_v31, %v5914_v31  ;;  %v5916_v13 = vpop.f32.mrb[74].mxu1 }
 0x7f6   : > { %v5917_v2 = vpop.f32.mrb[75].mxu1 }
 0x7f7   : > { %6385 = vmatprep.mubr.bf16.mxu0 %v5982_v56  ;;  %6503 = vmatprep.mubr.bf16.mxu1 %v5982_v56 }
 0x7fa   : > { %6386 = vmatmul.mubr.bf16.gmra.mrb[136].mxu0 %v5981_v33  ;;  %6504 = vmatmul.mubr.bf16.gmra.mrb[96].mxu1 %v5981_v33 }
 0x7fb   : > { %v5953_v44 = vpop.f32.mrb[76].mxu1  ;;  %6426 = vmatprep.mubr.bf16.mxu0 %v19423_v0  ;;  %17290 = vmatprep.mubr.msk.bf16.mxu1 %vm19425_vm0, %v19424_v1 }
 0x7fc   : > { %v17278_v35 = vpop.f32.mrb[77].mxu1 }
 0x7fd   : > { %v5956_v6 = vpop.f32.mrb[78].mxu1 }
 0x7fe   : > { %v5977_v32 = vpack.c.bf16 %v5956_v6, %v5953_v44  ;;  %v17279_v24 = vpop.f32.mrb[79].mxu1  ;;  %v6587_v6 = vld [vmem:[%s21985_s6 + $0x28] sm:$0xff] }
 0x802   : > { %15203 = vmatmul.mubr.msk.bf16.vlgmr.msra.gmra.mrb[104].mxu0 %vm1644_vm4, %v5977_v32  ;;  %17291 = vmatmul.mubr.msk.bf16.vlgmr.msra.gmra.mrb[100].mxu1 %vm1644_vm4, %v5977_v32 }
 0x803   : > { %v5961_v48 = vpop.f32.mrb[80].mxu1  ;;  %6436 = vmatprep.mubr.bf16.mxu0 %v19423_v0  ;;  %17294 = vmatprep.mubr.msk.bf16.mxu1 %vm19425_vm0, %v19424_v1 }
 0x804   : > { %v17282_v18 = vpop.f32.mrb[81].mxu1 }
 0x805   : > { %v5964_v53 = vpop.f32.mrb[82].mxu1 }
 0x806   : > { %v5980_v57 = vpack.c.bf16 %v5964_v53, %v5961_v48  ;;  %v17283_v59 = vpop.f32.mrb[83].mxu1 }
 0x80a   : > { %15204 = vmatmul.mubr.msk.bf16.gmra.mrb[108].mxu0 %vm1644_vm4, %v5980_v57  ;;  %17295 = vmatmul.mubr.msk.bf16.gmra.mrb[104].mxu1 %vm1644_vm4, %v5980_v57  ;;  %v6588_v57 = vld [vmem:[%s21985_s6 + $0x30] sm:$0xff] }
 0x80b   : > { %v5969_v40 = vpop.f32.mrb[84].mxu1  ;;  %6446 = vmatprep.mubr.bf16.mxu0 %v19423_v0  ;;  %17298 = vmatprep.mubr.msk.bf16.mxu1 %vm19425_vm0, %v19424_v1 }
 0x80c   : > { %v17286_v15 = vpop.f32.mrb[85].mxu1  ;;  %v5983_v61 = vpack.c.bf16 %v5969_v40, %v5969_v40 }
 0x80d   : > { %v5972_v20 = vpop.f32.mrb[86].mxu1 }
 0x80e   : > { %v17287_v14 = vpop.f32.mrb[87].mxu1  ;;  %v6589_v20 = vld [vmem:[%s21985_s6 + $0x38] sm:$0xff] }
 0x812   : > { %15205 = vmatmul.mubr.msk.bf16.gmra.mrb[140].mxu0 %vm1644_vm4, %v5983_v61  ;;  %17299 = vmatmul.mubr.msk.bf16.gmra.mrb[108].mxu1 %vm1644_vm4, %v5983_v61 }
 0x813   : > { %6710 = vmatprep.mubr.bf16.mxu1 %v19423_v0  ;;  %6901 = vmatprep.mubr.bf16.mxu0 %v19423_v0 }
 0x8bd   : > { %v16628_v41 = vpop.f32.mrb[88].mxu1 }
 0x8be   : > { %v16629_v39 = vpop.f32.mrb[89].mxu1 }
 0x8bf   : > { %v16630_v3 = vadd.f32 %v16629_v39, %v16628_v41  ;;  %v16631_v4 = vpop.f32.mrb[90].mxu1 }
 0x8c0   : > { %v16632_v5 = vpop.f32.mrb[91].mxu1 }
 0x8c1   : > { %v16633_v10 = vadd.f32 %v16632_v5, %v16631_v4 }
 0x8c5   : > { %v16634_v11 = vpop.f32.mrb[92].mxu1 }
 0x8c6   : > { %v16635_v52 = vpop.f32.mrb[93].mxu1 }
 0x8c7   : > { %v16636_v26 = vadd.f32 %v16635_v52, %v16634_v11  ;;  %v16637_v42 = vpop.f32.mrb[94].mxu1  ;;  %v6592_v52 = vld [vmem:[%s21985_s6 + $0x50] sm:$0xff] }
 0x8c8   : > { %v16638_v51 = vpop.f32.mrb[95].mxu1 }
 0x8c9   : > { %v20609_v21 = vadd.f32 %v16638_v51, %v16637_v42 }
 0x8cd   : > { %v20611_v23 = vpop.f32.mrb[136].mxu0  ;;  %v16640_v54 = vpop.f32.mrb[96].mxu1 }
 0x8ce   : > { %v20613_v46 = vpop.f32.mrb[137].mxu0  ;;  %v16641_v17 = vpop.f32.mrb[97].mxu1 }
 0x8cf   : > { %v20615_v38 = vadd.f32 %v16641_v17, %v16640_v54  ;;  %v6391_v34 = vpop.f32.mrb[138].mxu0  ;;  %v16643_v25 = vpop.f32.mrb[98].mxu1 }
 0x8d0   : > { %v6392_v62 = vpop.f32.mrb[139].mxu0  ;;  %v16644_v19 = vpop.f32.mrb[99].mxu1 }
 0x8d5   : > { %v6428_v30 = vpop.f32.mrb[104].mxu0  ;;  %v6545_v58 = vpop.f32.mrb[100].mxu1 }
 0x8d6   : > { %v6597_v28 = vadd.f32 %v6582_v16, %v6428_v30  ;;  %v6546_v47 = vadd.f32 %v16630_v3, %v6545_v58  ;;  %v6430_v9 = vpop.f32.mrb[105].mxu0  ;;  %v17292_v36 = vpop.f32.mrb[101].mxu1  ;;  %v6590_v16 = vld [vmem:[%s21985_s6 + $0x40] sm:$0xff] }
 0x8d7   : > { %v6598_v49 = vadd.f32 %v6583_v7, %v6430_v9  ;;  %v6432_v50 = vpop.f32.mrb[106].mxu0  ;;  %v6548_v37 = vpop.f32.mrb[102].mxu1 }
 0x8d8   : > { %v6612_v31 = vmul.f32 0.2, %v6597_v28  ;;  %v6569_v56 = vadd.f32 %v6546_v47, %v20568_v63  ;;  %v6600_v13 = vadd.f32 %v6585_v12, %v6432_v50  ;;  %v6549_v2 = vadd.f32 %v16633_v10, %v6548_v37  ;;  %v6434_v33 = vpop.f32.mrb[107].mxu0  ;;  %v17293_v44 = vpop.f32.mrb[103].mxu1 }
 0x8d9   : > { %v6613_v35 = vmul.f32 0.2, %v6598_v49  ;;  %v6601_v32 = vadd.f32 %v6586_v45, %v6434_v33 }
 0x8da   : > { %v6599_v24 = vadd.f32 %v6584_v55, %v6569_v56  ;;  %v6615_v48 = vmul.f32 0.2, %v6600_v13  ;;  %v6572_v18 = vadd.f32 %v6549_v2, %v20571_v27  ;;  %v6627_v63 = vmax.f32 %v6597_v28, %v6612_v31  ;;  %v6591_v27 = vld [vmem:[%s21985_s6 + $0x48] sm:$0xff] }
 0x8db   : > { %v6616_v53 = vmul.f32 0.2, %v6601_v32  ;;  %v6628_v61 = vmax.f32 %v6598_v49, %v6613_v35 }
 0x8dc   : > { %v6614_v59 = vmul.f32 0.2, %v6599_v24  ;;  %v6630_v40 = vmax.f32 %v6600_v13, %v6615_v48  ;;  %v6602_v15 = vadd.f32 %v6587_v6, %v6572_v18  ;;  %v6594_v18 = vld [vmem:[%s21985_s6 + $0x60] sm:$0x3] }
 0x8dd   : > { %v6631_v14 = vmax.f32 %v6601_v32, %v6616_v53  ;;  %v6438_v41 = vpop.f32.mrb[108].mxu0  ;;  %v6553_v39 = vpop.f32.mrb[104].mxu1 }
 0x8de   : > { %v20646_v3 = vpack.c.bf16 %v6630_v40, %v6627_v63  ;;  %v6617_v4 = vmul.f32 0.2, %v6602_v15  ;;  %v6603_v5 = vadd.f32 %v6588_v57, %v6438_v41  ;;  %v6440_v10 = vpop.f32.mrb[109].mxu0  ;;  %v17296_v11 = vpop.f32.mrb[105].mxu1  ;;  %v6629_v42 = vmax.f32 %v6599_v24, %v6614_v59 }
 0x8df   : > { %v20651_v51 = vpack.c.bf16 %v6631_v14, %v6628_v61  ;;  %v6554_v54 = vadd.f32 %v16636_v26, %v6553_v39  ;;  %v6604_v17 = vadd.f32 %v6589_v20, %v6440_v10  ;;  %v6442_v34 = vpop.f32.mrb[110].mxu0  ;;  %v6556_v25 = vpop.f32.mrb[106].mxu1  ;;  %v6593_v26 = vld [vmem:[%s21985_s6 + $0x58] sm:$0xff]  ;;  %v6596_v39 = vld [vmem:[%s21985_s6 + $0x70] sm:$0x3] }
 0x8e0   : > { %v6632_v62 = vmax.f32 %v6602_v15, %v6617_v4  ;;  %v6618_v19 = vmul.f32 0.2, %v6603_v5  ;;  %v6606_v7 = vadd.f32 %v6591_v27, %v6442_v34  ;;  %v6557_v30 = vadd.f32 %v20609_v21, %v6556_v25  ;;  %v6444_v58 = vpop.f32.mrb[111].mxu0  ;;  %v17297_v12 = vpop.f32.mrb[107].mxu1  ;;  %v18267_v34 = vld [vmem:[%s21987_s8 + $0xc] sm:$0xff]  }
 0x8e1   : > { %v6575_v28 = vadd.f32 %v6554_v54, %v20574_v8  ;;  %v6619_v47 = vmul.f32 0.2, %v6604_v17  ;;  %v6607_v9 = vadd.f32 %v6592_v52, %v6444_v58  ;;  %6678 = vmatprep.subr.bf16.mxu1 %v20651_v51  ;;  %6869 = vmatprep.subr.bf16.mxu0 %v20651_v51  ;;  %v18272_v52 = vld [vmem:[#allocation7 + $0x19c] ss:$12 sps:$4 sm:$0xff]   ;;  %v18270_v25 = vld [vmem:[#allocation7 + $0x198] ss:$12 sps:$4 sm:$0xff]  }
 0x8e2   : > { %v20663_v36 = vpack.c.bf16 %v6632_v62, %v6629_v42  ;;  %v6621_v45 = vmul.f32 0.2, %v6606_v7  ;;  %v6578_v55 = vadd.f32 %v6557_v30, %v20577_v60  ;;  %6679 = vmatpush1.bf16.msra.mxu1 %v20646_v3  ;;  %6870 = vmatpush1.bf16.msra.mxu0 %v20646_v3  ;;  %v6633_v49 = vmax.f32 %v6603_v5, %v6618_v19  ;;  %v18275_v19 = vld [vmem:[#allocation7 + $0x1b4] ss:$12 sps:$4 sm:$0xff]   ;;  %v18278_v12 = vld [vmem:[#allocation7 + $0x1cc] ss:$12 sps:$4 sm:$0xff]  }
 0x8e3   : > { %v6605_v8 = vadd.f32 %v6590_v16, %v6575_v28  ;;  %v6622_v21 = vmul.f32 0.2, %v6607_v9  ;;  %v6634_v56 = vmax.f32 %v6604_v17, %v6619_v47  ;;  %v18266_v17 = vld [vmem:[%s21987_s8] sm:$0xff]   ;;  %v18273_v16 = vld [vmem:[#allocation7 + $0x1b0] ss:$12 sps:$4 sm:$0xff]  }
 0x8e4   : > { %v6636_v50 = vmax.f32 %v6606_v7, %v6621_v45  ;;  %v6608_v37 = vadd.f32 %v6593_v26, %v6578_v55  ;;  %v18268_v30 = vld [vmem:[%s21987_s8 + $0x8] ss:$0 sps:$4 sm:$0x11]   ;;  %v18269_v58 = vld [vmem:[%s21987_s8 + $0x14] ss:$0 sps:$4 sm:$0x11]  }
 0x8e5   : > { %v6620_v31 = vmul.f32 0.2, %v6605_v8  ;;  %v6637_v13 = vmax.f32 %v6607_v9, %v6622_v21  ;;  %v6448_v2 = vpop.f32.mrb[140].mxu0  ;;  %v6561_v33 = vpop.f32.mrb[108].mxu1  ;;  %v18276_v28 = vld [vmem:[#allocation7 + $0x1c8] ss:$12 sps:$4 sm:$0xff]  }
 0x8e6   : > { %v20668_v44 = vpack.c.bf16 %v6636_v50, %v6633_v49  ;;  %v6623_v35 = vmul.f32 0.2, %v6608_v37  ;;  %v6449_v6 = vadd.f32 %v6448_v2, %v20611_v23  ;;  %v6562_v60 = vadd.f32 %v20615_v38, %v6561_v33  ;;  %v6450_v32 = vpop.f32.mrb[141].mxu0  ;;  %v17300_v24 = vpop.f32.mrb[109].mxu1  ;;  %v6595_v38 = vld [vmem:[%s21985_s6 + $0x68] sm:$0x3] }
 0x8e7   : > { %v20672_v48 = vpack.c.bf16 %v6637_v13, %v6634_v56  ;;  %v6451_v53 = vadd.f32 %v6450_v32, %v20613_v46  ;;  %v6452_v57 = vpop.f32.mrb[142].mxu0  ;;  %v6564_v63 = vpop.f32.mrb[110].mxu1  ;;  %v6635_v59 = vmax.f32 %v6605_v8, %v6620_v31  ;;  %v18281_v26 = vld [vmem:[#allocation7 + $0x1e4] ss:$12 sps:$4 sm:$0xff]   ;;  %v18279_v9 = vld [vmem:[#allocation7 + $0x1e0] ss:$12 sps:$4 sm:$0xff]  }
 0x8e8   : > { %v6638_v40 = vmax.f32 %v6608_v37, %v6623_v35  ;;  %v6579_v15 = vadd.f32 %v6449_v6, %v20580_v43  ;;  %v6581_v23 = vadd.f32 %v6562_v60, %v20583_v22  ;;  %v6453_v20 = vpop.f32.mrb[143].mxu0  ;;  %v17301_v61 = vpop.f32.mrb[111].mxu1  ;;  %v18284_v45 = vld [vmem:[#allocation7 + $0x1fc] ss:$12 sps:$4 sm:$0xff]   ;;  %v18282_v55 = vld [vmem:[#allocation7 + $0x1f8] ss:$12 sps:$4 sm:$0xff]  }
 0x8e9   : > { %v6580_v14 = vadd.f32 %v6451_v53, %v20586_v29  ;;  %6680 = vmatprep.subr.bf16.mxu1 %v20672_v48  ;;  %6871 = vmatprep.subr.bf16.mxu0 %v20672_v48  ;;  %v18287_v8 = vld [vmem:[#allocation7 + $0x214] ss:$12 sps:$4 sm:$0xff]   ;;  %v18285_v21 = vld [vmem:[#allocation7 + $0x210] ss:$12 sps:$4 sm:$0xff]   ;;  %v18290_v49 = vld [vmem:[#allocation7 + $0x22c] ss:$12 sps:$4 sm:$0xff]  }
 0x8ea   : > { %v20686_v46 = vpack.c.bf16 %v6638_v40, %v6635_v59  ;;  %v6609_v41 = vadd.f32 %v6594_v18, %v6579_v15  ;;  %6681 = vmatpush1.bf16.msra.mxu1 %v20668_v44  ;;  %6872 = vmatpush1.bf16.msra.mxu0 %v20668_v44  ;;  %v6611_v29 = vadd.f32 %v6596_v39, %v6581_v23  ;;  %v18294_v50 = vld [vmem:[#allocation7 + $0x260] ss:$12 sps:$4 sm:$0xff]   ;;  %v18288_v37 = vld [vmem:[#allocation7 + $0x228] ss:$12 sps:$4 sm:$0xff]   ;;  %v18293_v31 = vld [vmem:[#allocation7 + $0x244] ss:$12 sps:$4 sm:$0xff]  }
 0x8eb   : > { %v6610_v43 = vadd.f32 %v6595_v38, %v6580_v14  ;;  %v18295_v56 = vld [vmem:[#allocation7 + $0x1a0] ss:$12 sps:$4 sm:$0xff]   ;;  %v18299_v13 = vld [vmem:[#allocation7 + $0x278] ss:$12 sps:$4 sm:$0xff]   ;;  %v18298_v33 = vld [vmem:[#allocation7 + $0x25c] ss:$12 sps:$4 sm:$0xff]  }
 0x8ec   : > { %v6624_v22 = vmul.f32 0.2, %v6609_v41  ;;  %v6626_v54 = vmul.f32 0.2, %v6611_v29  ;;  %v18291_v2 = vld [vmem:[#allocation7 + $0x240] ss:$12 sps:$4 sm:$0xff]  }
 0x8ed   : > { %v6625_v27 = vmul.f32 0.2, %v6610_v43  ;;  %v18300_v35 = vld [vmem:[#allocation7 + $0x1b8] ss:$12 sps:$4 sm:$0xff]   ;;  %v18304_v6 = vld [vmem:[#allocation7 + $0x290] ss:$12 sps:$4 sm:$0xff]  }
 0x8ee   : > { %v6639_v4 = vmax.f32 %v6609_v41, %v6624_v22  ;;  %v6641_v62 = vmax.f32 %v6611_v29, %v6626_v54  ;;  %v18296_v60 = vld [vmem:[#allocation7 + $0x258] ss:$12 sps:$4 sm:$0xff]   ;;  %v18303_v32 = vld [vmem:[#allocation7 + $0x274] ss:$12 sps:$4 sm:$0xff]   ;;  %v18305_v24 = vld [vmem:[#allocation7 + $0x1d0] ss:$12 sps:$4 sm:$0xff]  }
 0x8ef   : > { %v6640_v5 = vmax.f32 %v6610_v43, %v6625_v27  ;;  %v18309_v18 = vld [vmem:[#allocation7 + $0x2a8] ss:$12 sps:$4 sm:$0xff]   ;;  %v18301_v53 = vld [vmem:[#allocation7 + $0x270] ss:$12 sps:$4 sm:$0xff]   ;;  %v18308_v57 = vld [vmem:[#allocation7 + $0x28c] ss:$12 sps:$4 sm:$0xff]  }
 0x8f0   : > { %v6648_v10 = vpack.c.bf16 %v6639_v4, %v6639_v4  ;;  %v20717_v7 = vpack.c.bf16 %v6641_v62, %v6641_v62  ;;  %v18310_v63 = vld [vmem:[#allocation7 + $0x1e8] ss:$12 sps:$4 sm:$0xff]   ;;  %v18314_v59 = vld [vmem:[#allocation7 + $0x2c0] ss:$12 sps:$4 sm:$0xff]   ;;  %v18313_v15 = vld [vmem:[#allocation7 + $0x2a4] ss:$12 sps:$4 sm:$0xff]  }
 0x8f1   : > { %v20693_v11 = vpack.c.bf16 %v6640_v5, %v6640_v5  ;;  %v18306_v40 = vld [vmem:[#allocation7 + $0x288] ss:$12 sps:$4 sm:$0xff]   ;;  %v18315_v23 = vld [vmem:[#allocation7 + $0x200] ss:$12 sps:$4 sm:$0xff]   ;;  %v18319_v38 = vld [vmem:[#allocation7 + $0x2d8] ss:$12 sps:$4 sm:$0xff]  }
 0x8f2   : > { %v20696_v42 = vsel %vm853_vm1, %v6648_v10, 0  ;;  %v20731_v47 = vsel %vm853_vm1, %v20717_v7, 0  ;;  %v18311_v20 = vld [vmem:[#allocation7 + $0x2a0] ss:$12 sps:$4 sm:$0xff]   ;;  %v18318_v61 = vld [vmem:[#allocation7 + $0x2bc] ss:$12 sps:$4 sm:$0xff]  }
 0x8f3   : > { %15211 = vmatprep.subr.msk.bf16.mxu1 %vm853_vm1, %v20693_v11  ;;  %15221 = vmatprep.subr.msk.bf16.mxu0 %vm853_vm1, %v20693_v11  ;;  %v18316_v14 = vld [vmem:[#allocation7 + $0x2b8] ss:$12 sps:$4 sm:$0xff]   ;;  %v18323_v43 = vld [vmem:[#allocation7 + $0x2d4] ss:$12 sps:$4 sm:$0xff]   ;;  %v18321_v22 = vld [vmem:[#allocation7 + $0x2d0] ss:$12 sps:$4 sm:$0xff]  }
 0x8f4   : > { %6683 = vmatpush1.bf16.msra.mxu1 %v20696_v42  ;;  %6874 = vmatpush1.bf16.msra.mxu0 %v20696_v42  ;;  %v18320_v41 = vld [vmem:[#allocation7 + $0x218] ss:$12 sps:$4 sm:$0xff]   ;;  %v18324_v39 = vld [vmem:[#allocation7 + $0x2f0] ss:$12 sps:$4 sm:$0xff]   ;;  %v18326_v4 = vld [vmem:[#allocation7 + $0x2e8] ss:$12 sps:$4 sm:$0xff]  }
 0x8f5   : > { %17302 = vmatprep.subr.bf16.mxu1 %v20663_v36  ;;  %7322 = vmatprep.subr.bf16.mxu0 %v18272_v52  ;;  %v18325_v27 = vld [vmem:[#allocation7 + $0x230] ss:$12 sps:$4 sm:$0xff]   ;;  %v18328_v29 = vld [vmem:[#allocation7 + $0x2ec] ss:$12 sps:$4 sm:$0xff]   ;;  %v18329_v5 = vld [vmem:[#allocation7 + $0x308] ss:$12 sps:$4 sm:$0xff]  }
 0x8f6   : > { %v18330_v10 = vld [vmem:[#allocation7 + $0x248] ss:$12 sps:$4 sm:$0xff]   ;;  %v18333_v52 = vld [vmem:[#allocation7 + $0x304] ss:$12 sps:$4 sm:$0xff]   ;;  %v18331_v54 = vld [vmem:[#allocation7 + $0x300] ss:$12 sps:$4 sm:$0xff]  }
 0x8f7   : > { %15212 = vmatmul.mubr.msk.bf16.vlgmr.msra.gmra.mrb[112].mxu1 %vm6662_vm5, %v18266_v17  ;;  %15222 = vmatmul.mubr.msk.bf16.vlgmr.msra.gmra.mrb[144].mxu0 %vm6662_vm5, %v18267_v34 }
 0x8f8   : > { %17303 = vmatpush3.bf16.msra.mxu1 %v20663_v36  ;;  %6720 = vmatprep.mubr.bf16.mxu1 %v19423_v0 }
 0x8f9   : > { %17304 = vmatprep.subr.bf16.mxu1 %v20686_v46  ;;  %6911 = vmatprep.mubr.bf16.mxu0 %v19423_v0 }
 0x8fa   : > { %7323 = vmatpush1.bf16.msra.mxu0 %v18270_v25 }
 0x8fb   : > { %7324 = vmatprep.subr.bf16.mxu0 %v18275_v19 }
 0x8fc   : > { %17305 = vmatpush3.bf16.msra.mxu1 %v20686_v46 }
 0x8fd   : > { %17646 = vmatprep.subr.msk.bf16.mxu1 %vm853_vm1, %v20717_v7 }
 0x8fe   : > { %7325 = vmatpush1.bf16.msra.mxu0 %v18273_v16 }
 0x8ff   : > { %15213 = vmatmul.mubr.msk.bf16.gmra.mrb[116].mxu1 %vm6662_vm5, %v18268_v30  ;;  %15223 = vmatmul.mubr.msk.bf16.gmra.mrb[148].mxu0 %vm6662_vm5, %v18269_v58 }
 0x900   : > { %17307 = vmatpush3.bf16.msra.mxu1 %v20731_v47  ;;  %17308 = vmatprep.mubr.msk.bf16.mxu1 %vm6662_vm5, %v18266_v17  ;;  %v18334_v17 = vld [vmem:[#allocation7 + $0x320] ss:$12 sps:$4 sm:$0xff]  }
 0x901   : > { %17312 = vmatprep.subr.bf16.mxu1 %v20663_v36  ;;  %7326 = vmatprep.subr.bf16.mxu0 %v18278_v12 }
 0x902   : > { %7327 = vmatpush1.bf16.msra.mxu0 %v18276_v28 }
 0x903   : > { %7328 = vmatprep.subr.bf16.mxu0 %v18281_v26 }
 0x906   : > { %7329 = vmatpush1.bf16.msra.mxu0 %v18279_v9 }
 0x907   : > { %17309 = vmatmul.mubr.msk.bf16.vlgmr.msra.gmra.mrb[120].mxu1 %vm6662_vm5, %v18268_v30  ;;  %7330 = vmatprep.subr.bf16.mxu0 %v18284_v45 }
 0x908   : > { %17313 = vmatpush3.bf16.msra.mxu1 %v20663_v36  ;;  %17318 = vmatprep.mubr.msk.bf16.mxu1 %vm6662_vm5, %v18267_v34  ;;  %v18337_v34 = vld [vmem:[#allocation7 + $0x31c] ss:$12 sps:$4 sm:$0xff]  }
 0x909   : > { %17314 = vmatprep.subr.bf16.mxu1 %v20686_v46 }
 0x90a   : > { %7331 = vmatpush1.bf16.msra.mxu0 %v18282_v55 }
 0x90b   : > { %7332 = vmatprep.subr.bf16.mxu0 %v18287_v8  ;;  %v18335_v8 = vld [vmem:[#allocation7 + $0x318] ss:$12 sps:$4 sm:$0xff]  }
 0x90c   : > { %17315 = vmatpush3.bf16.msra.mxu1 %v20686_v46 }
 0x90d   : > { %17647 = vmatprep.subr.msk.bf16.mxu1 %vm853_vm1, %v20717_v7 }
 0x90e   : > { %7333 = vmatpush1.bf16.msra.mxu0 %v18285_v21  ;;  %v18340_v21 = vld [vmem:[#allocation7 + $0x4] ss:$12 sps:$4 sm:$0xff]  }
 0x90f   : > { %7334 = vmatprep.subr.bf16.mxu0 %v18290_v49  ;;  %v18341_v49 = vld [vmem:[#allocation7 + $0xc8] ss:$12 sps:$4 sm:$0xff]  }
 0x910   : > { %17317 = vmatpush3.bf16.msra.mxu1 %v20731_v47 }
 0x911   : > { %16660 = vmatprep.subr.bf16.mxu1 %v18294_v50 }
 0x912   : > { %7335 = vmatpush1.bf16.msra.mxu0 %v18288_v37 }
 0x913   : > { %17319 = vmatmul.mubr.msk.bf16.vlgmr.msra.gmra.mrb[124].mxu1 %vm6662_vm5, %v18269_v58  ;;  %7336 = vmatprep.subr.bf16.mxu0 %v18293_v31 }
 0x914   : > { %16661 = vmatpush3.bf16.msra.mxu1 %v18295_v56 }
 0x915   : > { %16662 = vmatprep.subr.bf16.mxu1 %v18299_v13 }
 0x916   : > { %7337 = vmatpush1.bf16.msra.mxu0 %v18291_v2 }
 0x917   : > { %7338 = vmatprep.subr.bf16.mxu0 %v18298_v33 }
 0x918   : > { %16663 = vmatpush3.bf16.msra.mxu1 %v18300_v35 }
 0x919   : > { %16664 = vmatprep.subr.bf16.mxu1 %v18304_v6 }
 0x91a   : > { %7339 = vmatpush1.bf16.msra.mxu0 %v18296_v60 }
 0x91b   : > { %7340 = vmatprep.subr.bf16.mxu0 %v18303_v32 }
 0x91c   : > { %16665 = vmatpush3.bf16.msra.mxu1 %v18305_v24 }
 0x91d   : > { %16666 = vmatprep.subr.bf16.mxu1 %v18309_v18 }
 0x91e   : > { %7341 = vmatpush1.bf16.msra.mxu0 %v18301_v53 }
 0x91f   : > { %7342 = vmatprep.subr.bf16.mxu0 %v18308_v57 }
 0x920   : > { %16667 = vmatpush3.bf16.msra.mxu1 %v18310_v63 }
 0x921   : > { %16668 = vmatprep.subr.bf16.mxu1 %v18314_v59 }
 0x922   : > { %7343 = vmatpush1.bf16.msra.mxu0 %v18306_v40 }
 0x923   : > { %7344 = vmatprep.subr.bf16.mxu0 %v18313_v15 }
 0x924   : > { %16669 = vmatpush3.bf16.msra.mxu1 %v18315_v23  ;;  %v18338_v23 = vld [vmem:[#allocation7] ss:$12 sps:$4 sm:$0xff]  }
 0x925   : > { %16670 = vmatprep.subr.bf16.mxu1 %v18319_v38 }
 0x926   : > { %7345 = vmatpush1.bf16.msra.mxu0 %v18311_v20  ;;  %v18342_v20 = vld [vmem:[#allocation7 + $0x8] ss:$12 sps:$4 sm:$0xff]  }
 0x927   : > { %7346 = vmatprep.subr.bf16.mxu0 %v18318_v61 }
 0x928   : > { %16671 = vmatpush3.bf16.msra.mxu1 %v18320_v41  ;;  %v18346_v41 = vld [vmem:[#allocation7 + $0xe0] ss:$12 sps:$4 sm:$0xff]  }
 0x929   : > { %16672 = vmatprep.subr.bf16.mxu1 %v18324_v39  ;;  %v18350_v39 = vld [vmem:[#allocation7 + $0x34] ss:$12 sps:$4 sm:$0xff]  }
 0x92a   : > { %7347 = vmatpush1.bf16.msra.mxu0 %v18316_v14  ;;  %v18345_v14 = vld [vmem:[#allocation7 + $0x1c] ss:$12 sps:$4 sm:$0xff]  }
 0x92b   : > { %7348 = vmatprep.subr.bf16.mxu0 %v18323_v43  ;;  %v18343_v43 = vld [vmem:[#allocation7 + $0x18] ss:$12 sps:$4 sm:$0xff]  }
 0x92c   : > { %16673 = vmatpush3.bf16.msra.mxu1 %v18325_v27  ;;  %v18351_v27 = vld [vmem:[#allocation7 + $0xf8] ss:$12 sps:$4 sm:$0xff]  }
 0x92d   : > { %16674 = vmatprep.subr.bf16.mxu1 %v18329_v5  ;;  %v18355_v5 = vld [vmem:[#allocation7 + $0x4c] ss:$12 sps:$4 sm:$0xff]  }
 0x92e   : > { %7349 = vmatpush1.bf16.msra.mxu0 %v18321_v22  ;;  %v18347_v22 = vld [vmem:[#allocation7 + $0x20] ss:$12 sps:$4 sm:$0xff]  }
 0x92f   : > { %7350 = vmatprep.subr.bf16.mxu0 %v18328_v29  ;;  %v18352_v29 = vld [vmem:[#allocation7 + $0x38] ss:$12 sps:$4 sm:$0xff]  }
 0x930   : > { %16675 = vmatpush3.bf16.msra.mxu1 %v18330_v10  ;;  %v18356_v10 = vld [vmem:[#allocation7 + $0x110] ss:$12 sps:$4 sm:$0xff]  }
 0x931   : > { %17322 = vmatprep.subr.bf16.mxu1 %v18334_v17 }
 0x932   : > { %7351 = vmatpush1.bf16.msra.mxu0 %v18326_v4  ;;  %v18348_v4 = vld [vmem:[#allocation7 + $0x30] ss:$12 sps:$4 sm:$0xff]  }
 0x933   : > { %7352 = vmatprep.subr.bf16.mxu0 %v18333_v52  ;;  %v18353_v52 = vld [vmem:[#allocation7 + $0x48] ss:$12 sps:$4 sm:$0xff]  }
 0x936   : > { %7353 = vmatpush1.bf16.msra.mxu0 %v18331_v54  ;;  %v18357_v54 = vld [vmem:[#allocation7 + $0x50] ss:$12 sps:$4 sm:$0xff]  }
 0x937   : > { %7373 = vmatprep.subr.bf16.mxu0 %v18337_v34  ;;  %v18361_v34 = vld [vmem:[#allocation7 + $0x128] ss:$12 sps:$4 sm:$0xff]  }
 0x9ca   : > { %v6712_v25 = vpop.f32.mrb[112].mxu1  ;;  %v6903_v62 = vpop.f32.mrb[144].mxu0 }
 0x9cb   : > { %v6714_v19 = vpop.f32.mrb[113].mxu1  ;;  %v6905_v16 = vpop.f32.mrb[145].mxu0 }
 0x9cc   : > { %v6716_v30 = vpop.f32.mrb[114].mxu1  ;;  %v6907_v58 = vpop.f32.mrb[146].mxu0 }
 0x9cd   : > { %v20746_v12 = vpack.c.bf16 %v6716_v30, %v6712_v25  ;;  %v6718_v28 = vpop.f32.mrb[115].mxu1  ;;  %v6968_v26 = vpack.c.bf16 %v6907_v58, %v6903_v62  ;;  %v6909_v9 = vpop.f32.mrb[147].mxu0  ;;  %v18358_v25 = vld [vmem:[#allocation7 + $0x60] ss:$12 sps:$4 sm:$0xff]   ;;  %v18362_v62 = vld [vmem:[#allocation7 + $0x68] ss:$12 sps:$4 sm:$0xff]  }
 0x9ce   : > { %v20748_v45 = vpack.c.bf16 %v6718_v28, %v6714_v19  ;;  %v6969_v55 = vpack.c.bf16 %v6909_v9, %v6905_v16  ;;  %v18365_v19 = vld [vmem:[#allocation7 + $0x7c] ss:$12 sps:$4 sm:$0xff]   ;;  %v18366_v16 = vld [vmem:[#allocation7 + $0x140] ss:$12 sps:$4 sm:$0xff]   ;;  %v18363_v30 = vld [vmem:[#allocation7 + $0x78] ss:$12 sps:$4 sm:$0xff]  }
 0x9cf   : > { %v18367_v58 = vld [vmem:[#allocation7 + $0x80] ss:$12 sps:$4 sm:$0xff]   ;;  %v18368_v9 = vld [vmem:[#allocation7 + $0x90] ss:$12 sps:$4 sm:$0xff]  }
 0x9d0   : > { %7456 = vmatprep.mubr.bf16.mxu1 %v6969_v55  ;;  %7354 = vmatprep.mubr.bf16.mxu0 %v6969_v55  ;;  %v18370_v28 = vld [vmem:[#allocation7 + $0x94] ss:$12 sps:$4 sm:$0xff]   ;;  %v18375_v55 = vld [vmem:[#allocation7 + $0xac] ss:$12 sps:$4 sm:$0xff]  }
 0x9d1   : > { %7457 = vmatmul.mubr.bf16.vlgmr.msra.gmra.mrb[128].mxu1 %v6968_v26  ;;  %7355 = vmatmul.mubr.bf16.vlgmr.msra.gmra.mrb[152].mxu0 %v6968_v26  ;;  %v18371_v26 = vld [vmem:[#allocation7 + $0x158] ss:$12 sps:$4 sm:$0xff]  }
 0x9d2   : > { %v20750_v50 = vpop.f32.mrb[116].mxu1  ;;  %v6913_v37 = vpop.f32.mrb[148].mxu0  ;;  %17323 = vmatpush3.bf16.msra.mxu1 %v18334_v17  ;;  %7374 = vmatpush1.bf16.msra.mxu0 %v18335_v8  ;;  %v18360_v17 = vld [vmem:[#allocation7 + $0x64] ss:$12 sps:$4 sm:$0xff]  }
 0x9d3   : > { %v20752_v31 = vpop.f32.mrb[117].mxu1  ;;  %v6915_v56 = vpop.f32.mrb[149].mxu0  ;;  %7798 = vmatprep.subr.bf16.mxu0 %v18340_v21  ;;  %16691 = vmatprep.subr.bf16.mxu1 %v18341_v49  ;;  %v6971_v6 = vpack.c.bf16 %v6913_v37, %v6913_v37  ;;  %v18376_v8 = vld [vmem:[#allocation7 + $0x170] ss:$12 sps:$4 sm:$0xff]   ;;  %v18373_v21 = vld [vmem:[#allocation7 + $0xa8] ss:$12 sps:$4 sm:$0xff]  }
 0x9d4   : > { %v6726_v13 = vpop.f32.mrb[118].mxu1  ;;  %v6972_v2 = vpack.c.bf16 %v6915_v56, %v6915_v56  ;;  %v6917_v33 = vpop.f32.mrb[150].mxu0  ;;  %v18377_v49 = vld [vmem:[#allocation7 + $0xb0] ss:$12 sps:$4 sm:$0xff]   ;;  %v18381_v56 = vld [vmem:[#allocation7 + $0x188] ss:$12 sps:$4 sm:$0xff]  }
 0x9d5   : > { %v6727_v35 = vpop.f32.mrb[119].mxu1  ;;  %v6918_v60 = vpop.f32.mrb[151].mxu0  ;;  %v18380_v37 = vld [vmem:[#allocation7 + $0xc4] ss:$12 sps:$4 sm:$0xff]   ;;  %v18378_v13 = vld [vmem:[#allocation7 + $0xc0] ss:$12 sps:$4 sm:$0xff]   ;;  %v6781_v33 = vpack.c.bf16 %v20752_v31, %v20752_v31 }
 0x9d6   : > { %7364 = vmatprep.mubr.bf16.mxu0 %v6972_v2  ;;  %7464 = vmatprep.mubr.bf16.mxu1 %v6972_v2  ;;  %v18384_v2 = vld [vmem:[#allocation7 + $0xdc] ss:$12 sps:$4 sm:$0xff]   ;;  %v18382_v35 = vld [vmem:[#allocation7 + $0xd8] ss:$12 sps:$4 sm:$0xff]  }
 0x9d7   : > { %v18385_v60 = vld [vmem:[#allocation7 + $0xf0] ss:$12 sps:$4 sm:$0xff]   ;;  %v18388_v31 = vld [vmem:[#allocation7 + $0x108] ss:$12 sps:$4 sm:$0xff]  }
 0x9d9   : > { %7365 = vmatmul.mubr.bf16.gmra.mrb[156].mxu0 %v6971_v6  ;;  %7465 = vmatmul.mubr.bf16.gmra.mrb[132].mxu1 %v6971_v6  ;;  %v18387_v6 = vld [vmem:[#allocation7 + $0xf4] ss:$12 sps:$4 sm:$0xff]  }
 0x9da   : > { %v20754_v32 = vpop.f32.mrb[120].mxu1  ;;  %7405 = vmatprep.mubr.bf16.mxu0 %v19423_v0 }
 0x9db   : > { %v6763_v24 = vpop.f32.mrb[121].mxu1 }
 0x9dc   : > { %v17311_v18 = vpop.f32.mrb[122].mxu1 }
 0x9dd   : > { %v6766_v53 = vpop.f32.mrb[123].mxu1  ;;  %v6780_v18 = vpack.c.bf16 %v20750_v50, %v20750_v50  ;;  %v18399_v50 = vld [vmem:[#allocation7 + $0x154] ss:$12 sps:$4 sm:$0xff]  }
 0x9de   : > { %v20757_v57 = vpack.c.bf16 %v6766_v53, %v6763_v24  ;;  %v18390_v24 = vld [vmem:[#allocation7 + $0x10c] ss:$12 sps:$4 sm:$0xff]   ;;  %v18393_v53 = vld [vmem:[#allocation7 + $0x124] ss:$12 sps:$4 sm:$0xff]  }
 0x9e6   : > { %v17320_v63 = vpop.f32.mrb[124].mxu1 }
 0x9e7   : > { %v6954_v59 = vpop.f32.mrb[125].mxu1  ;;  %v6973_v61 = vpack.c.bf16 %v17320_v63, %v17320_v63  ;;  %v18391_v63 = vld [vmem:[#allocation7 + $0x120] ss:$12 sps:$4 sm:$0xff]  }
 0x9e8   : > { %v17321_v40 = vpop.f32.mrb[126].mxu1 }
 0x9e9   : > { %v6957_v15 = vpop.f32.mrb[127].mxu1  ;;  %v6782_v40 = vpack.c.bf16 %v20754_v32, %v20754_v32  ;;  %v18400_v32 = vld [vmem:[#allocation7 + $0x168] ss:$12 sps:$4 sm:$0xff]  }
 0x9ea   : > { %v6970_v38 = vpack.c.bf16 %v6957_v15, %v6954_v59  ;;  %v18396_v59 = vld [vmem:[#allocation7 + $0x13c] ss:$12 sps:$4 sm:$0xff]   ;;  %v18394_v15 = vld [vmem:[#allocation7 + $0x138] ss:$12 sps:$4 sm:$0xff]  }
 0x9ec   : > { %15277 = vmatmul.mubr.msk.bf16.vlgmr.msra.gmra.mrb[152].mxu0 %vm7315_vm6, %v6970_v38  ;;  %17324 = vmatprep.mubr.msk.bf16.mxu1 %vm7315_vm6, %v6970_v38  ;;  %v18402_v38 = vld [vmem:[#allocation7 + $0x16c] ss:$12 sps:$4 sm:$0xff]  }
 0x9ed   : > { %7799 = vmatpush1.bf16.msra.mxu0 %v18338_v23  ;;  %17325 = vmatmul.mubr.msk.bf16.vlgmr.msra.gmra.mrb[136].mxu1 %vm7315_vm6, %v6973_v61  ;;  %v18397_v23 = vld [vmem:[#allocation7 + $0x150] ss:$12 sps:$4 sm:$0xff]  }
 0x9ee   : > { %16692 = vmatpush3.bf16.msra.mxu1 %v18342_v20  ;;  %7932 = vmatprep.mubr.bf16.mxu1 %v20748_v45  ;;  %v18403_v20 = vld [vmem:[%s21987_s8 + $0x18] sm:$0xff]  }
 0x9ef   : > { %7800 = vmatprep.subr.bf16.mxu0 %v18345_v14  ;;  %16693 = vmatprep.subr.bf16.mxu1 %v18346_v41  ;;  %v18405_v14 = vld [vmem:[#allocation7 + $0x180] ss:$12 sps:$4 sm:$0xff]  }
 0x9f0   : > { %7415 = vmatprep.mubr.bf16.mxu0 %v19423_v0  ;;  %v18404_v41 = vld [vmem:[%s21987_s8 + $0x20] ss:$0 sps:$4 sm:$0x11]  }
 0x9f1   : > { %7801 = vmatpush1.bf16.msra.mxu0 %v18343_v43  ;;  %v18408_v43 = vld [vmem:[#allocation7 + $0x330] ss:$12 sps:$4 sm:$0xff]  }
 0x9f2   : > { %16694 = vmatpush3.bf16.msra.mxu1 %v18347_v22  ;;  %7802 = vmatprep.subr.bf16.mxu0 %v18350_v39  ;;  %v18413_v22 = vld [vmem:[#allocation7 + $0x34c] ss:$12 sps:$4 sm:$0xff]   ;;  %v18411_v39 = vld [vmem:[#allocation7 + $0x348] ss:$12 sps:$4 sm:$0xff]  }
 0x9f3   : > { %16695 = vmatprep.subr.bf16.mxu1 %v18351_v27  ;;  %v18414_v27 = vld [vmem:[#allocation7 + $0x360] ss:$12 sps:$4 sm:$0xff]  }
 0x9f4   : > { %15278 = vmatmul.mubr.msk.bf16.gmra.mrb[160].mxu0 %vm7315_vm6, %v6973_v61  ;;  %v18407_v61 = vld [vmem:[#allocation7 + $0x184] ss:$12 sps:$4 sm:$0xff]  }
 0x9f5   : > { %7803 = vmatpush1.bf16.msra.mxu0 %v18348_v4  ;;  %7830 = vmatprep.mubr.bf16.mxu0 %v20748_v45  ;;  %v18372_v45 = vld [vmem:[#allocation7 + $0x98] ss:$12 sps:$4 sm:$0xff]  }
 0x9f6   : > { %16696 = vmatpush3.bf16.msra.mxu1 %v18352_v29  ;;  %7804 = vmatprep.subr.bf16.mxu0 %v18355_v5  ;;  %v18416_v4 = vld [vmem:[#allocation7 + $0x364] ss:$12 sps:$4 sm:$0xff]   ;;  %v18419_v29 = vld [vmem:[#allocation7 + $0x37c] ss:$12 sps:$4 sm:$0xff]  }
 0x9f7   : > { %16697 = vmatprep.subr.bf16.mxu1 %v18356_v10  ;;  %v18417_v5 = vld [vmem:[#allocation7 + $0x378] ss:$12 sps:$4 sm:$0xff]   ;;  %v18420_v10 = vld [vmem:[#allocation7 + $0x390] ss:$12 sps:$4 sm:$0xff]  }
 0x9f9   : > { %7805 = vmatpush1.bf16.msra.mxu0 %v18353_v52  ;;  %v18425_v52 = vld [vmem:[#allocation7 + $0x3ac] ss:$12 sps:$4 sm:$0xff]  }
 0x9fa   : > { %16698 = vmatpush3.bf16.msra.mxu1 %v18357_v54  ;;  %7806 = vmatprep.subr.bf16.mxu0 %v18360_v17  ;;  %v18423_v54 = vld [vmem:[#allocation7 + $0x3a8] ss:$12 sps:$4 sm:$0xff]   ;;  %v18428_v17 = vld [vmem:[#allocation7 + $0x3c4] ss:$12 sps:$4 sm:$0xff]  }
 0x9fb   : > { %16699 = vmatprep.subr.bf16.mxu1 %v18361_v34  ;;  %v18426_v34 = vld [vmem:[#allocation7 + $0x3c0] ss:$12 sps:$4 sm:$0xff]  }
 0x9fd   : > { %7807 = vmatpush1.bf16.msra.mxu0 %v18358_v25  ;;  %v18431_v25 = vld [vmem:[#allocation7 + $0x3dc] ss:$12 sps:$4 sm:$0xff]  }
 0x9fe   : > { %16700 = vmatpush3.bf16.msra.mxu1 %v18362_v62  ;;  %7808 = vmatprep.subr.bf16.mxu0 %v18365_v19  ;;  %v18429_v62 = vld [vmem:[#allocation7 + $0x3d8] ss:$12 sps:$4 sm:$0xff]  }
 0x9ff   : > { %16701 = vmatprep.subr.bf16.mxu1 %v18366_v16  ;;  %v18432_v19 = vld [vmem:[#allocation7 + $0x3f8] ss:$12 sps:$4 sm:$0xff]   ;;  %v18435_v16 = vld [vmem:[#allocation7 + $0x3f4] ss:$12 sps:$4 sm:$0xff]  }
 0xa01   : > { %7809 = vmatpush1.bf16.msra.mxu0 %v18363_v30  ;;  %v18436_v30 = vld [vmem:[#allocation7 + $0x338] ss:$12 sps:$4 sm:$0xff]  }
 0xa02   : > { %16702 = vmatpush3.bf16.msra.mxu1 %v18367_v58  ;;  %7810 = vmatprep.subr.bf16.mxu0 %v18370_v28  ;;  %v18433_v58 = vld [vmem:[#allocation7 + $0x3f0] ss:$12 sps:$4 sm:$0xff]  }
 0xa03   : > { %16703 = vmatprep.subr.bf16.mxu1 %v18371_v26  ;;  %v18437_v28 = vld [vmem:[#allocation7 + $0x410] ss:$12 sps:$4 sm:$0xff]   ;;  %v18440_v26 = vld [vmem:[#allocation7 + $0x40c] ss:$12 sps:$4 sm:$0xff]  }
 0xa05   : > { %7811 = vmatpush1.bf16.msra.mxu0 %v18368_v9  ;;  %v18438_v9 = vld [vmem:[#allocation7 + $0x408] ss:$12 sps:$4 sm:$0xff]  }
 0xa06   : > { %16704 = vmatpush3.bf16.msra.mxu1 %v18372_v45  ;;  %7812 = vmatprep.subr.bf16.mxu0 %v18375_v55  ;;  %v18441_v45 = vld [vmem:[#allocation7 + $0x350] ss:$12 sps:$4 sm:$0xff]   ;;  %v18442_v55 = vld [vmem:[#allocation7 + $0x428] ss:$12 sps:$4 sm:$0xff]  }
 0xa07   : > { %16705 = vmatprep.subr.bf16.mxu1 %v18376_v8  ;;  %v18445_v8 = vld [vmem:[#allocation7 + $0x424] ss:$12 sps:$4 sm:$0xff]  }
 0xa09   : > { %7813 = vmatpush1.bf16.msra.mxu0 %v18373_v21  ;;  %v18446_v21 = vld [vmem:[#allocation7 + $0x368] ss:$12 sps:$4 sm:$0xff]  }
 0xa0a   : > { %16706 = vmatpush3.bf16.msra.mxu1 %v18377_v49  ;;  %7814 = vmatprep.subr.bf16.mxu0 %v18380_v37  ;;  %v18443_v49 = vld [vmem:[#allocation7 + $0x420] ss:$12 sps:$4 sm:$0xff]  }
 0xa0b   : > { %17328 = vmatprep.subr.bf16.mxu1 %v18381_v56  ;;  %v18447_v37 = vld [vmem:[#allocation7 + $0x440] ss:$12 sps:$4 sm:$0xff]  }
 0xa0d   : > { %7815 = vmatpush1.bf16.msra.mxu0 %v18378_v13  ;;  %7933 = vmatmul.mubr.bf16.vlgmr.msra.gmra.mrb[140].mxu1 %v20746_v12  ;;  %v18451_v13 = vld [vmem:[#allocation7 + $0x380] ss:$12 sps:$4 sm:$0xff]  }
 0xa0e   : > { %7940 = vmatprep.mubr.bf16.mxu1 %v6781_v33  ;;  %17329 = vmatpush3.bf16.msra.mxu1 %v18381_v56  ;;  %v18450_v56 = vld [vmem:[#allocation7 + $0x43c] ss:$12 sps:$4 sm:$0xff]  }
 0xa0f   : > { %8014 = vmatprep.subr.bf16.mxu1 %v20651_v51  ;;  %7816 = vmatprep.subr.bf16.mxu0 %v18384_v2  ;;  %v18448_v2 = vld [vmem:[#allocation7 + $0x438] ss:$12 sps:$4 sm:$0xff]  }
 0xa11   : > { %7817 = vmatpush1.bf16.msra.mxu0 %v18382_v35  ;;  %v18455_v35 = vld [vmem:[#allocation7 + $0x454] ss:$12 sps:$4 sm:$0xff]  }
 0xa12   : > { %7818 = vmatprep.subr.bf16.mxu0 %v18387_v6  ;;  %v18456_v6 = vld [vmem:[#allocation7 + $0x398] ss:$12 sps:$4 sm:$0xff]  }
 0xa15   : > { %7819 = vmatpush1.bf16.msra.mxu0 %v18385_v60  ;;  %7941 = vmatmul.mubr.bf16.gmra.mrb[144].mxu1 %v6780_v18  ;;  %v18453_v60 = vld [vmem:[#allocation7 + $0x450] ss:$12 sps:$4 sm:$0xff]  }
 0xa16   : > { %17330 = vmatprep.mubr.msk.bf16.mxu1 %vm7315_vm6, %v20757_v57  ;;  %7820 = vmatprep.subr.bf16.mxu0 %v18390_v24  ;;  %v18457_v24 = vld [vmem:[#allocation7 + $0x470] ss:$12 sps:$4 sm:$0xff]  }
 0xa19   : > { %7821 = vmatpush1.bf16.msra.mxu0 %v18388_v31  ;;  %v18458_v31 = vld [vmem:[#allocation7 + $0x468] ss:$12 sps:$4 sm:$0xff]  }
 0xa1a   : > { %7822 = vmatprep.subr.bf16.mxu0 %v18393_v53  ;;  %v18461_v53 = vld [vmem:[#allocation7 + $0x3b0] ss:$12 sps:$4 sm:$0xff]  }
 0xa1d   : > { %7823 = vmatpush1.bf16.msra.mxu0 %v18391_v63  ;;  %17331 = vmatmul.mubr.msk.bf16.vlgmr.msra.gmra.mrb[148].mxu1 %vm7315_vm6, %v6782_v40  ;;  %v18462_v63 = vld [vmem:[#allocation7 + $0x488] ss:$12 sps:$4 sm:$0xff]  }
 0xa1e   : > { %8015 = vmatpush1.bf16.msra.mxu1 %v20646_v3  ;;  %7824 = vmatprep.subr.bf16.mxu0 %v18396_v59  ;;  %v18465_v59 = vld [vmem:[#allocation7 + $0x484] ss:$12 sps:$4 sm:$0xff]  }
 0xa1f   : > { %8016 = vmatprep.subr.bf16.mxu1 %v20672_v48  ;;  %8046 = vmatprep.mubr.bf16.mxu1 %v19423_v0 }
 0xa21   : > { %7825 = vmatpush1.bf16.msra.mxu0 %v18394_v15  ;;  %v18463_v15 = vld [vmem:[#allocation7 + $0x480] ss:$12 sps:$4 sm:$0xff]  }
 0xa22   : > { %8017 = vmatpush1.bf16.msra.mxu1 %v20668_v44  ;;  %7826 = vmatprep.subr.bf16.mxu0 %v18399_v50  ;;  %v18467_v50 = vld [vmem:[#allocation7 + $0x4a0] ss:$12 sps:$4 sm:$0xff]  }
 0xa23   : > { %15341 = vmatprep.subr.msk.bf16.mxu1 %vm853_vm1, %v20693_v11 }
 0xa25   : > { %7827 = vmatpush1.bf16.msra.mxu0 %v18397_v23  ;;  %v18470_v23 = vld [vmem:[#allocation7 + $0x49c] ss:$12 sps:$4 sm:$0xff]  }
 0xa26   : > { %8019 = vmatpush1.bf16.msra.mxu1 %v20696_v42  ;;  %7828 = vmatprep.subr.bf16.mxu0 %v18402_v38  ;;  %v18471_v38 = vld [vmem:[#allocation7 + $0x3e0] ss:$12 sps:$4 sm:$0xff]  }
 0xa27   : > { %17334 = vmatprep.subr.bf16.mxu1 %v20663_v36 }
 0xa29   : > { %15342 = vmatmul.mubr.msk.bf16.vlgmr.msra.gmra.mrb[152].mxu1 %vm6662_vm5, %v18403_v20  ;;  %7829 = vmatpush1.bf16.msra.mxu0 %v18400_v32  ;;  %v18468_v32 = vld [vmem:[#allocation7 + $0x498] ss:$12 sps:$4 sm:$0xff]  }
 0xa2a   : > { %17335 = vmatpush3.bf16.msra.mxu1 %v20663_v36  ;;  %8056 = vmatprep.mubr.bf16.mxu1 %v19423_v0 }
 0xa2b   : > { %17336 = vmatprep.subr.bf16.mxu1 %v20686_v46  ;;  %7849 = vmatprep.subr.bf16.mxu0 %v18407_v61  ;;  %v18475_v61 = vld [vmem:[#allocation7 + $0x4b4] ss:$12 sps:$4 sm:$0xff]  }
 0xa2c   : > { %7831 = vmatmul.mubr.bf16.vlgmr.msra.gmra.mrb[152].mxu0 %v20746_v12  ;;  %v18410_v12 = vld [vmem:[#allocation7 + $0x334] ss:$12 sps:$4 sm:$0xff]  }
 0xa2d   : > { %7840 = vmatprep.mubr.bf16.mxu0 %v6781_v33  ;;  %7850 = vmatpush1.bf16.msra.mxu0 %v18405_v14  ;;  %v18452_v33 = vld [vmem:[#allocation7 + $0x458] ss:$12 sps:$4 sm:$0xff]  }
 0xa2e   : > { %17337 = vmatpush3.bf16.msra.mxu1 %v20686_v46  ;;  %8466 = vmatprep.subr.bf16.mxu0 %v18410_v12 }
 0xa2f   : > { %17648 = vmatprep.subr.msk.bf16.mxu1 %vm853_vm1, %v20717_v7 }
 0xa31   : > { %15343 = vmatmul.mubr.msk.bf16.gmra.mrb[156].mxu1 %vm6662_vm5, %v18404_v41 }
 0xa32   : > { %17339 = vmatpush3.bf16.msra.mxu1 %v20731_v47  ;;  %17340 = vmatprep.mubr.msk.bf16.mxu1 %vm6662_vm5, %v18403_v20  ;;  %v20808_v20 = vld [vmem:[#allocation7 + $0x4b8] ss:$12 sps:$4 sm:$0xff]  }
 0xa33   : > { %16727 = vmatprep.subr.bf16.mxu1 %v18432_v19 }
 0xa34   : > { %7841 = vmatmul.mubr.bf16.gmra.mrb[164].mxu0 %v6780_v18  ;;  %v18460_v18 = vld [vmem:[#allocation7 + $0x46c] ss:$12 sps:$4 sm:$0xff]  }
 0xa35   : > { %7881 = vmatprep.mubr.bf16.mxu0 %v19423_v0 }
 0xa39   : > { %17341 = vmatmul.mubr.msk.bf16.vlgmr.msra.gmra.mrb[160].mxu1 %vm6662_vm5, %v18404_v41 }
 0xa3a   : > { %16728 = vmatpush3.bf16.msra.mxu1 %v18436_v30 }
 0xa3b   : > { %16729 = vmatprep.subr.bf16.mxu1 %v18437_v28 }
 0xa3c   : > { %15332 = vmatmul.mubr.msk.bf16.vlgmr.msra.gmra.mrb[152].mxu0 %vm7315_vm6, %v20757_v57  ;;  %v18422_v57 = vld [vmem:[#allocation7 + $0x394] ss:$12 sps:$4 sm:$0xff]  }
 0xa3d   : > { %7891 = vmatprep.mubr.bf16.mxu0 %v19423_v0  ;;  %8467 = vmatpush1.bf16.msra.mxu0 %v18408_v43 }
 0xa3e   : > { %8468 = vmatprep.subr.bf16.mxu0 %v18413_v22  ;;  %16730 = vmatpush3.bf16.msra.mxu1 %v18441_v45 }
 0xa3f   : > { %16731 = vmatprep.subr.bf16.mxu1 %v18442_v55 }
 0xa41   : > { %8469 = vmatpush1.bf16.msra.mxu0 %v18411_v39 }
 0xa42   : > { %8470 = vmatprep.subr.bf16.mxu0 %v18416_v4  ;;  %16732 = vmatpush3.bf16.msra.mxu1 %v18446_v21 }
 0xa43   : > { %16733 = vmatprep.subr.bf16.mxu1 %v18447_v37 }
 0xa44   : > { %15333 = vmatmul.mubr.msk.bf16.gmra.mrb[168].mxu0 %vm7315_vm6, %v6782_v40  ;;  %v18466_v40 = vld [vmem:[#allocation7 + $0x3c8] ss:$12 sps:$4 sm:$0xff]  }
 0xa45   : > { %8471 = vmatpush1.bf16.msra.mxu0 %v18414_v27 }
 0xa46   : > { %8472 = vmatprep.subr.bf16.mxu0 %v18419_v29  ;;  %16734 = vmatpush3.bf16.msra.mxu1 %v18451_v13 }
 0xa47   : > { %16735 = vmatprep.subr.bf16.mxu1 %v18452_v33 }
 0xa49   : > { %8473 = vmatpush1.bf16.msra.mxu0 %v18417_v5 }
 0xa4a   : > { %8474 = vmatprep.subr.bf16.mxu0 %v18422_v57  ;;  %16736 = vmatpush3.bf16.msra.mxu1 %v18456_v6 }
 0xa4b   : > { %16737 = vmatprep.subr.bf16.mxu1 %v18457_v24 }
 0xa4d   : > { %8475 = vmatpush1.bf16.msra.mxu0 %v18420_v10 }
 0xa4e   : > { %8476 = vmatprep.subr.bf16.mxu0 %v18425_v52  ;;  %16738 = vmatpush3.bf16.msra.mxu1 %v18461_v53 }
 0xa4f   : > { %16739 = vmatprep.subr.bf16.mxu1 %v18462_v63 }
 0xa51   : > { %8477 = vmatpush1.bf16.msra.mxu0 %v18423_v54 }
 0xa52   : > { %8478 = vmatprep.subr.bf16.mxu0 %v18428_v17  ;;  %16740 = vmatpush3.bf16.msra.mxu1 %v18466_v40 }
 0xa53   : > { %16741 = vmatprep.subr.bf16.mxu1 %v18467_v50 }
 0xa55   : > { %8479 = vmatpush1.bf16.msra.mxu0 %v18426_v34 }
 0xa56   : > { %8480 = vmatprep.subr.bf16.mxu0 %v18431_v25  ;;  %16742 = vmatpush3.bf16.msra.mxu1 %v18471_v38 }
 0xa57   : > { %17344 = vmatprep.subr.bf16.mxu1 %v20808_v20 }
 0xa59   : > { %8481 = vmatpush1.bf16.msra.mxu0 %v18429_v62 }
 0xa5a   : > { %8482 = vmatprep.subr.bf16.mxu0 %v18435_v16 }
 0xa5d   : > { %8483 = vmatpush1.bf16.msra.mxu0 %v18433_v58 }
 0xa5e   : > { %8484 = vmatprep.subr.bf16.mxu0 %v18440_v26 }
 0xa61   : > { %8485 = vmatpush1.bf16.msra.mxu0 %v18438_v9 }
 0xa62   : > { %8486 = vmatprep.subr.bf16.mxu0 %v18445_v8 }
 0xa65   : > { %8487 = vmatpush1.bf16.msra.mxu0 %v18443_v49 }
 0xa66   : > { %8488 = vmatprep.subr.bf16.mxu0 %v18450_v56 }
 0xa69   : > { %8489 = vmatpush1.bf16.msra.mxu0 %v18448_v2 }
 0xa6a   : > { %8490 = vmatprep.subr.bf16.mxu0 %v18455_v35 }
 0xa6d   : > { %8491 = vmatpush1.bf16.msra.mxu0 %v18453_v60 }
 0xa6e   : > { %8492 = vmatprep.subr.bf16.mxu0 %v18460_v18 }
 0xa71   : > { %8493 = vmatpush1.bf16.msra.mxu0 %v18458_v31 }
 0xa72   : > { %8494 = vmatprep.subr.bf16.mxu0 %v18465_v59 }
 0xa75   : > { %8495 = vmatpush1.bf16.msra.mxu0 %v18463_v15 }
 0xa76   : > { %8496 = vmatprep.subr.bf16.mxu0 %v18470_v23 }
 0xa79   : > { %8497 = vmatpush1.bf16.msra.mxu0 %v18468_v32 }
 0xa7a   : > { %8517 = vmatprep.subr.bf16.mxu0 %v18475_v61 }
 0xaa4   : > { %v16676_v14 = vpop.f32.mrb[128].mxu1 }
 0xaa5   : > { %v16677_v41 = vpop.f32.mrb[129].mxu1 }
 0xaa6   : > { %v16678_v12 = vadd.f32 %v16677_v41, %v16676_v14  ;;  %v16679_v43 = vpop.f32.mrb[130].mxu1 }
 0xaa7   : > { %v16680_v22 = vpop.f32.mrb[131].mxu1 }
 0xaa8   : > { %v16681_v39 = vadd.f32 %v16680_v22, %v16679_v43  ;;  %v18473_v22 = vld [vmem:[#allocation7 + $0x4b0] ss:$12 sps:$4 sm:$0xff]  }
 0xaac   : > { %v7366_v27 = vpop.f32.mrb[156].mxu0  ;;  %v16682_v4 = vpop.f32.mrb[132].mxu1 }
 0xaad   : > { %v7368_v29 = vpop.f32.mrb[157].mxu0  ;;  %v16683_v5 = vpop.f32.mrb[133].mxu1 }
 0xaae   : > { %v16684_v57 = vadd.f32 %v16683_v5, %v16682_v4  ;;  %v7370_v10 = vpop.f32.mrb[158].mxu0  ;;  %v16685_v52 = vpop.f32.mrb[134].mxu1 }
 0xaaf   : > { %v7371_v54 = vpop.f32.mrb[159].mxu0  ;;  %v16686_v17 = vpop.f32.mrb[135].mxu1 }
 0xac0   : > { %v17326_v34 = vpop.f32.mrb[136].mxu1 }
 0xac1   : > { %v7515_v25 = vadd.f32 %v17326_v34, %v16684_v57  ;;  %v7506_v62 = vpop.f32.mrb[137].mxu1 }
 0xac2   : > { %v7507_v19 = vadd.f32 %v16678_v12, %v7506_v62  ;;  %v17327_v16 = vpop.f32.mrb[138].mxu1 }
 0xac3   : > { %v7509_v30 = vpop.f32.mrb[139].mxu1 }
 0xac4   : > { %v7510_v58 = vadd.f32 %v16681_v39, %v7509_v30  ;;  %v18480_v39 = vld [vmem:[#allocation7 + $0x4cc] ss:$12 sps:$4 sm:$0xff]  }
 0xac7   : > { %v7417_v28 = vpop.f32.mrb[160].mxu0 }
 0xac8   : > { %v7418_v26 = vadd.f32 %v7417_v28, %v7366_v27  ;;  %v7419_v9 = vpop.f32.mrb[161].mxu0  ;;  %v18478_v28 = vld [vmem:[#allocation7 + $0x4c8] ss:$12 sps:$4 sm:$0xff]  }
 0xac9   : > { %v7420_v45 = vadd.f32 %v7419_v9, %v7368_v29  ;;  %v7421_v55 = vpop.f32.mrb[162].mxu0  ;;  %v18481_v9 = vld [vmem:[#allocation7 + $0x4e0] ss:$12 sps:$4 sm:$0xff]  }
 0xaca   : > { %v7422_v8 = vpop.f32.mrb[163].mxu0  ;;  %v18486_v55 = vld [vmem:[#allocation7 + $0x4fc] ss:$12 sps:$4 sm:$0xff]  }
 0xae0   : > { %v16707_v21 = vpop.f32.mrb[140].mxu1 }
 0xae1   : > { %v16708_v49 = vpop.f32.mrb[141].mxu1 }
 0xae2   : > { %v16709_v37 = vadd.f32 %v16708_v49, %v16707_v21  ;;  %v16710_v56 = vpop.f32.mrb[142].mxu1 }
 0xae3   : > { %v16711_v13 = vpop.f32.mrb[143].mxu1 }
 0xae4   : > { %v16712_v2 = vadd.f32 %v16711_v13, %v16710_v56  ;;  %v7935_v33 = vadd.f32 %v16709_v37, %v7507_v19  ;;  %v18476_v56 = vld [vmem:[%s21987_s8 + $0x24] sm:$0xff]   ;;  %v18492_v13 = vld [vmem:[#allocation7 + $0x52c] ss:$12 sps:$4 sm:$0xff]  }
 0xae6   : > { %v7938_v35 = vadd.f32 %v16712_v2, %v7510_v58  ;;  %v18490_v2 = vld [vmem:[#allocation7 + $0x528] ss:$12 sps:$4 sm:$0xff]  }
 0xae8   : > { %v16713_v6 = vpop.f32.mrb[144].mxu1 }
 0xae9   : > { %v16714_v60 = vpop.f32.mrb[145].mxu1 }
 0xaea   : > { %v16715_v24 = vadd.f32 %v16714_v60, %v16713_v6  ;;  %v16716_v18 = vpop.f32.mrb[146].mxu1  ;;  %v18496_v6 = vld [vmem:[#allocation7 + $0x558] ss:$12 sps:$4 sm:$0xff]   ;;  %v18501_v60 = vld [vmem:[#allocation7 + $0x574] ss:$12 sps:$4 sm:$0xff]  }
 0xaeb   : > { %v16717_v31 = vpop.f32.mrb[147].mxu1  ;;  %v18502_v18 = vld [vmem:[#allocation7 + $0x588] ss:$12 sps:$4 sm:$0xff]  }
 0xaec   : > { %v7943_v53 = vadd.f32 %v16715_v24, %v7515_v25  ;;  %v18499_v24 = vld [vmem:[#allocation7 + $0x570] ss:$12 sps:$4 sm:$0xff]  }
 0xaed   : > { %v18506_v31 = vld [vmem:[#allocation7 + $0x4d0] ss:$12 sps:$4 sm:$0xff]  }
 0xaf0   : > { %v17332_v63 = vpop.f32.mrb[148].mxu1 }
 0xaf1   : > { %v20811_v59 = vadd.f32 %v17332_v63, %v7943_v53  ;;  %v7982_v40 = vpop.f32.mrb[149].mxu1  ;;  %v18509_v53 = vld [vmem:[#allocation7 + $0x5a4] ss:$12 sps:$4 sm:$0xff]   ;;  %v18510_v63 = vld [vmem:[#allocation7 + $0x5a8] ss:$12 sps:$4 sm:$0xff]  }
 0xaf2   : > { %v20813_v15 = vadd.f32 %v7982_v40, %v7935_v33  ;;  %v17333_v50 = vpop.f32.mrb[150].mxu1  ;;  %v18495_v33 = vld [vmem:[#allocation7 + $0x544] ss:$12 sps:$4 sm:$0xff]   ;;  %v18511_v40 = vld [vmem:[#allocation7 + $0x4e8] ss:$12 sps:$4 sm:$0xff]  }
 0xaf3   : > { %v7985_v23 = vpop.f32.mrb[151].mxu1  ;;  %v18514_v50 = vld [vmem:[#allocation7 + $0x5bc] ss:$12 sps:$4 sm:$0xff]  }
 0xaf4   : > { %v20815_v38 = vadd.f32 %v7985_v23, %v7938_v35  ;;  %v18493_v35 = vld [vmem:[#allocation7 + $0x540] ss:$12 sps:$4 sm:$0xff]  }
 0xaf5   : > { %v18515_v23 = vld [vmem:[#allocation7 + $0x5c0] ss:$12 sps:$4 sm:$0xff]  }
 0xafc   : > { %v8048_v32 = vpop.f32.mrb[152].mxu1 }
 0xafd   : > { %v8050_v61 = vpop.f32.mrb[153].mxu1 }
 0xafe   : > { %v8052_v14 = vpop.f32.mrb[154].mxu1 }
 0xaff   : > { %v8113_v41 = vpack.c.bf16 %v8052_v14, %v8048_v32  ;;  %v8054_v12 = vpop.f32.mrb[155].mxu1  ;;  %v18512_v32 = vld [vmem:[#allocation7 + $0x5b8] ss:$12 sps:$4 sm:$0xff]   ;;  %v18519_v14 = vld [vmem:[#allocation7 + $0x5d4] ss:$12 sps:$4 sm:$0xff]  }
 0xb00   : > { %v8114_v43 = vpack.c.bf16 %v8054_v12, %v8050_v61  ;;  %v18516_v61 = vld [vmem:[#allocation7 + $0x500] ss:$12 sps:$4 sm:$0xff]   ;;  %v18517_v12 = vld [vmem:[#allocation7 + $0x5d0] ss:$12 sps:$4 sm:$0xff]  }
 0xb02   : > { %8498 = vmatprep.mubr.bf16.mxu0 %v8114_v43  ;;  %8600 = vmatprep.mubr.bf16.mxu1 %v8114_v43  ;;  %v18521_v43 = vld [vmem:[#allocation7 + $0x518] ss:$12 sps:$4 sm:$0xff]  }
 0xb03   : > { %8499 = vmatmul.mubr.bf16.vlgmr.msra.gmra.mrb[152].mxu0 %v8113_v41  ;;  %8601 = vmatmul.mubr.bf16.vlgmr.msra.gmra.mrb[164].mxu1 %v8113_v41  ;;  %v18520_v41 = vld [vmem:[#allocation7 + $0x5d8] ss:$12 sps:$4 sm:$0xff]  }
 0xb04   : > { %17345 = vmatpush3.bf16.msra.mxu1 %v20808_v20  ;;  %v8058_v27 = vpop.f32.mrb[156].mxu1  ;;  %8518 = vmatpush1.bf16.msra.mxu0 %v18473_v22  ;;  %v18524_v22 = vld [vmem:[#allocation7 + $0x5ec] ss:$12 sps:$4 sm:$0xff]  }
 0xb05   : > { %8691 = vmatprep.subr.bf16.mxu1 %v20651_v51  ;;  %v8060_v4 = vpop.f32.mrb[157].mxu1  ;;  %9143 = vmatprep.subr.bf16.mxu0 %v18480_v39  ;;  %v8116_v17 = vpack.c.bf16 %v8058_v27, %v8058_v27  ;;  %v18525_v39 = vld [vmem:[#allocation7 + $0x5f0] ss:$12 sps:$4 sm:$0xff]   ;;  %v18522_v27 = vld [vmem:[#allocation7 + $0x5e8] ss:$12 sps:$4 sm:$0xff]  }
 0xb06   : > { %v8117_v29 = vpack.c.bf16 %v8060_v4, %v8060_v4  ;;  %v8062_v5 = vpop.f32.mrb[158].mxu1  ;;  %v18526_v4 = vld [vmem:[#allocation7 + $0x530] ss:$12 sps:$4 sm:$0xff]  }
 0xb07   : > { %v8063_v57 = vpop.f32.mrb[159].mxu1  ;;  %v7842_v10 = vpop.f32.mrb[164].mxu0  ;;  %v18530_v5 = vld [vmem:[#allocation7 + $0x608] ss:$12 sps:$4 sm:$0xff]  }
 0xb08   : > { %v7843_v52 = vadd.f32 %v7842_v10, %v7418_v26  ;;  %8508 = vmatprep.mubr.bf16.mxu0 %v8117_v29  ;;  %8608 = vmatprep.mubr.bf16.mxu1 %v8117_v29  ;;  %v7844_v54 = vpop.f32.mrb[165].mxu0  ;;  %v18483_v26 = vld [vmem:[#allocation7 + $0x4e4] ss:$12 sps:$4 sm:$0xff]   ;;  %v18527_v57 = vld [vmem:[#allocation7 + $0x600] ss:$12 sps:$4 sm:$0xff]  }
 0xb09   : > { %v7845_v34 = vadd.f32 %v7844_v54, %v7420_v45  ;;  %v7846_v25 = vpop.f32.mrb[166].mxu0  ;;  %v18529_v29 = vld [vmem:[#allocation7 + $0x604] ss:$12 sps:$4 sm:$0xff]   ;;  %v18531_v10 = vld [vmem:[#allocation7 + $0x548] ss:$12 sps:$4 sm:$0xff]  }
 0xb0a   : > { %v7847_v62 = vpop.f32.mrb[167].mxu0  ;;  %v18535_v54 = vld [vmem:[#allocation7 + $0x620] ss:$12 sps:$4 sm:$0xff]  }
 0xb0b   : > { %8509 = vmatmul.mubr.bf16.gmra.mrb[172].mxu0 %v8116_v17  ;;  %8609 = vmatmul.mubr.bf16.gmra.mrb[168].mxu1 %v8116_v17  ;;  %v18532_v17 = vld [vmem:[#allocation7 + $0x618] ss:$12 sps:$4 sm:$0xff]   ;;  %v18539_v25 = vld [vmem:[#allocation7 + $0x634] ss:$12 sps:$4 sm:$0xff]  }
 0xb0c   : > { %v17342_v20 = vpop.f32.mrb[160].mxu1  ;;  %8549 = vmatprep.mubr.bf16.mxu0 %v19423_v0  ;;  %v18540_v62 = vld [vmem:[#allocation7 + $0x638] ss:$12 sps:$4 sm:$0xff]  }
 0xb0d   : > { %v8099_v51 = vpop.f32.mrb[161].mxu1  ;;  %v8118_v58 = vpack.c.bf16 %v17342_v20, %v17342_v20  ;;  %v18537_v20 = vld [vmem:[#allocation7 + $0x630] ss:$12 sps:$4 sm:$0xff]  }
 0xb0e   : > { %v17343_v19 = vpop.f32.mrb[162].mxu1 }
 0xb0f   : > { %v8102_v16 = vpop.f32.mrb[163].mxu1  ;;  %v18544_v19 = vld [vmem:[#allocation7 + $0x64c] ss:$12 sps:$4 sm:$0xff]  }
 0xb10   : > { %v8115_v30 = vpack.c.bf16 %v8102_v16, %v8099_v51  ;;  %v18541_v51 = vld [vmem:[#allocation7 + $0x578] ss:$12 sps:$4 sm:$0xff]   ;;  %v18545_v16 = vld [vmem:[#allocation7 + $0x650] ss:$12 sps:$4 sm:$0xff]  }
 0xb12   : > { %17346 = vmatprep.mubr.msk.bf16.mxu1 %vm7315_vm6, %v8115_v30 }
 0xb13   : > { %15397 = vmatmul.mubr.msk.bf16.vlgmr.msra.gmra.mrb[152].mxu0 %vm7315_vm6, %v8115_v30  ;;  %17347 = vmatmul.mubr.msk.bf16.vlgmr.msra.gmra.mrb[172].mxu1 %vm7315_vm6, %v8118_v58 }
 0xb14   : > { %8692 = vmatpush1.bf16.msra.mxu1 %v20646_v3  ;;  %8559 = vmatprep.mubr.bf16.mxu0 %v19423_v0 }
 0xb15   : > { %8693 = vmatprep.subr.bf16.mxu1 %v20672_v48  ;;  %8723 = vmatprep.mubr.bf16.mxu1 %v19423_v0  ;;  %v18484_v48 = vld [vmem:[#allocation7 + $0x4f8] ss:$12 sps:$4 sm:$0xff]  }
 0xb16   : > { %9144 = vmatpush1.bf16.msra.mxu0 %v18478_v28 }
 0xb17   : > { %v7893_v45 = vpop.f32.mrb[168].mxu0  ;;  %9145 = vmatprep.subr.bf16.mxu0 %v18483_v26 }
 0xb18   : > { %8694 = vmatpush1.bf16.msra.mxu1 %v20668_v44  ;;  %v20828_v8 = vadd.f32 %v7893_v45, %v7843_v52  ;;  %v7895_v21 = vpop.f32.mrb[169].mxu0  ;;  %v18489_v44 = vld [vmem:[#allocation7 + $0x514] ss:$12 sps:$4 sm:$0xff]   ;;  %v18534_v52 = vld [vmem:[#allocation7 + $0x61c] ss:$12 sps:$4 sm:$0xff]  }
 0xb19   : > { %15406 = vmatprep.subr.msk.bf16.mxu1 %vm853_vm1, %v20693_v11  ;;  %v20832_v3 = vadd.f32 %v7895_v21, %v7845_v34  ;;  %v7897_v49 = vpop.f32.mrb[170].mxu0  ;;  %v18487_v11 = vld [vmem:[#allocation7 + $0x510] ss:$12 sps:$4 sm:$0xff]   ;;  %v18536_v34 = vld [vmem:[#allocation7 + $0x560] ss:$12 sps:$4 sm:$0xff]  }
 0xb1a   : > { %v7898_v37 = vpop.f32.mrb[171].mxu0  ;;  %9146 = vmatpush1.bf16.msra.mxu0 %v18481_v9 }
 0xb1b   : > { %15398 = vmatmul.mubr.msk.bf16.gmra.mrb[176].mxu0 %vm7315_vm6, %v8118_v58  ;;  %9147 = vmatprep.subr.bf16.mxu0 %v18486_v55 }
 0xb1c   : > { %8696 = vmatpush1.bf16.msra.mxu1 %v20696_v42  ;;  %v18477_v42 = vld [vmem:[%s21987_s8 + $0x2c] ss:$0 sps:$4 sm:$0x11]  }
 0xb1d   : > { %17350 = vmatprep.subr.bf16.mxu1 %v20663_v36 }
 0xb1e   : > { %9148 = vmatpush1.bf16.msra.mxu0 %v18484_v48 }
 0xb1f   : > { %15407 = vmatmul.mubr.msk.bf16.vlgmr.msra.gmra.mrb[176].mxu1 %vm6662_vm5, %v18476_v56  ;;  %9149 = vmatprep.subr.bf16.mxu0 %v18489_v44 }
 0xb20   : > { %17351 = vmatpush3.bf16.msra.mxu1 %v20663_v36  ;;  %8733 = vmatprep.mubr.bf16.mxu1 %v19423_v0  ;;  %v18498_v36 = vld [vmem:[#allocation7 + $0x55c] ss:$12 sps:$4 sm:$0xff]  }
 0xb21   : > { %17352 = vmatprep.subr.bf16.mxu1 %v20686_v46 }
 0xb22   : > { %9150 = vmatpush1.bf16.msra.mxu0 %v18487_v11 }
 0xb23   : > { %9151 = vmatprep.subr.bf16.mxu0 %v18492_v13 }
 0xb24   : > { %17353 = vmatpush3.bf16.msra.mxu1 %v20686_v46  ;;  %v18504_v46 = vld [vmem:[#allocation7 + $0x58c] ss:$12 sps:$4 sm:$0xff]  }
 0xb25   : > { %17649 = vmatprep.subr.msk.bf16.mxu1 %vm853_vm1, %v20717_v7  ;;  %v18505_v7 = vld [vmem:[#allocation7 + $0x590] ss:$12 sps:$4 sm:$0xff]  }
 0xb26   : > { %9152 = vmatpush1.bf16.msra.mxu0 %v18490_v2 }
 0xb27   : > { %15408 = vmatmul.mubr.msk.bf16.gmra.mrb[180].mxu1 %vm6662_vm5, %v18477_v42  ;;  %9153 = vmatprep.subr.bf16.mxu0 %v18495_v33 }
 0xb28   : > { %17355 = vmatpush3.bf16.msra.mxu1 %v20731_v47  ;;  %17356 = vmatprep.mubr.msk.bf16.mxu1 %vm6662_vm5, %v18476_v56  ;;  %v18507_v47 = vld [vmem:[#allocation7 + $0x5a0] ss:$12 sps:$4 sm:$0xff]  }
 0xb29   : > { %16763 = vmatprep.subr.bf16.mxu1 %v18505_v7 }
 0xb2a   : > { %9154 = vmatpush1.bf16.msra.mxu0 %v18493_v35 }
 0xb2b   : > { %9155 = vmatprep.subr.bf16.mxu0 %v18498_v36 }
 0xb2e   : > { %9156 = vmatpush1.bf16.msra.mxu0 %v18496_v6 }
 0xb2f   : > { %17357 = vmatmul.mubr.msk.bf16.vlgmr.msra.gmra.mrb[184].mxu1 %vm6662_vm5, %v18477_v42  ;;  %9157 = vmatprep.subr.bf16.mxu0 %v18501_v60 }
 0xb30   : > { %16764 = vmatpush3.bf16.msra.mxu1 %v18506_v31 }
 0xb31   : > { %16765 = vmatprep.subr.bf16.mxu1 %v18510_v63 }
 0xb32   : > { %9158 = vmatpush1.bf16.msra.mxu0 %v18499_v24 }
 0xb33   : > { %9159 = vmatprep.subr.bf16.mxu0 %v18504_v46 }
 0xb34   : > { %16766 = vmatpush3.bf16.msra.mxu1 %v18511_v40 }
 0xb35   : > { %16767 = vmatprep.subr.bf16.mxu1 %v18515_v23 }
 0xb36   : > { %9160 = vmatpush1.bf16.msra.mxu0 %v18502_v18 }
 0xb37   : > { %9161 = vmatprep.subr.bf16.mxu0 %v18509_v53 }
 0xb38   : > { %16768 = vmatpush3.bf16.msra.mxu1 %v18516_v61 }
 0xb39   : > { %16769 = vmatprep.subr.bf16.mxu1 %v18520_v41 }
 0xb3a   : > { %9162 = vmatpush1.bf16.msra.mxu0 %v18507_v47 }
 0xb3b   : > { %9163 = vmatprep.subr.bf16.mxu0 %v18514_v50 }
 0xb3c   : > { %16770 = vmatpush3.bf16.msra.mxu1 %v18521_v43 }
 0xb3d   : > { %16771 = vmatprep.subr.bf16.mxu1 %v18525_v39 }
 0xb3e   : > { %9164 = vmatpush1.bf16.msra.mxu0 %v18512_v32 }
 0xb3f   : > { %9165 = vmatprep.subr.bf16.mxu0 %v18519_v14 }
 0xb40   : > { %16772 = vmatpush3.bf16.msra.mxu1 %v18526_v4 }
 0xb41   : > { %16773 = vmatprep.subr.bf16.mxu1 %v18530_v5 }
 0xb42   : > { %9166 = vmatpush1.bf16.msra.mxu0 %v18517_v12 }
 0xb43   : > { %9167 = vmatprep.subr.bf16.mxu0 %v18524_v22 }
 0xb44   : > { %16774 = vmatpush3.bf16.msra.mxu1 %v18531_v10 }
 0xb45   : > { %16775 = vmatprep.subr.bf16.mxu1 %v18535_v54  ;;  %v18576_v54 = vld [vmem:[%s21989_s10 + $0x1b8] ss:$12 sps:$4 sm:$0xff]  }
 0xb46   : > { %9168 = vmatpush1.bf16.msra.mxu0 %v18522_v27 }
 0xb47   : > { %9169 = vmatprep.subr.bf16.mxu0 %v18529_v29 }
 0xb48   : > { %16776 = vmatpush3.bf16.msra.mxu1 %v18536_v34  ;;  %v18581_v34 = vld [vmem:[%s21989_s10 + $0x1d0] ss:$12 sps:$4 sm:$0xff]  }
 0xb49   : > { %16777 = vmatprep.subr.bf16.mxu1 %v18540_v62  ;;  %v18586_v62 = vld [vmem:[%s21989_s10 + $0x1e8] ss:$12 sps:$4 sm:$0xff]  }
 0xb4a   : > { %9170 = vmatpush1.bf16.msra.mxu0 %v18527_v57 }
 0xb4b   : > { %9171 = vmatprep.subr.bf16.mxu0 %v18534_v52  ;;  %v18572_v52 = vld [vmem:[%s21989_s10 + $0x278] ss:$12 sps:$4 sm:$0xff]  }
 0xb4c   : > { %16778 = vmatpush3.bf16.msra.mxu1 %v18541_v51 }
 0xb4d   : > { %17360 = vmatprep.subr.bf16.mxu1 %v18545_v16 }
 0xb4e   : > { %9172 = vmatpush1.bf16.msra.mxu0 %v18532_v17  ;;  %v18577_v17 = vld [vmem:[%s21989_s10 + $0x290] ss:$12 sps:$4 sm:$0xff]  }
 0xb4f   : > { %9173 = vmatprep.subr.bf16.mxu0 %v18539_v25  ;;  %v18582_v25 = vld [vmem:[%s21989_s10 + $0x2a8] ss:$12 sps:$4 sm:$0xff]  }
 0xb52   : > { %9174 = vmatpush1.bf16.msra.mxu0 %v18537_v20 }
 0xb53   : > { %9194 = vmatprep.subr.bf16.mxu0 %v18544_v19 }
 0xbd6   : > { %v16743_v30 = vpop.f32.mrb[164].mxu1 }
 0xbd7   : > { %v16744_v58 = vpop.f32.mrb[165].mxu1 }
 0xbd8   : > { %v16745_v28 = vadd.f32 %v16744_v58, %v16743_v30  ;;  %v16746_v26 = vpop.f32.mrb[166].mxu1 }
 0xbd9   : > { %v16747_v9 = vpop.f32.mrb[167].mxu1 }
 0xbda   : > { %v16748_v45 = vadd.f32 %v16747_v9, %v16746_v26 }
 0xbde   : > { %v8510_v55 = vpop.f32.mrb[172].mxu0  ;;  %v16749_v21 = vpop.f32.mrb[168].mxu1 }
 0xbdf   : > { %v8512_v49 = vpop.f32.mrb[173].mxu0  ;;  %v16750_v37 = vpop.f32.mrb[169].mxu1 }
 0xbe0   : > { %v16751_v48 = vadd.f32 %v16750_v37, %v16749_v21  ;;  %v8514_v56 = vpop.f32.mrb[174].mxu0  ;;  %v16752_v44 = vpop.f32.mrb[170].mxu1 }
 0xbe1   : > { %v8515_v11 = vpop.f32.mrb[175].mxu0  ;;  %v16753_v13 = vpop.f32.mrb[171].mxu1  ;;  %v9350_v56 = vld [vmem:[#allocation9] sm:$0xff]  ;;  %v9351_v44 = vld [vmem:[#allocation9 + $0x8] sm:$0xff] }
 0xbe6   : > { %v17348_v2 = vpop.f32.mrb[172].mxu1 }
 0xbe7   : > { %v8659_v42 = vadd.f32 %v17348_v2, %v16751_v48  ;;  %v8650_v33 = vpop.f32.mrb[173].mxu1  ;;  %v9353_v2 = vld [vmem:[#allocation9 + $0x18] sm:$0xff] }
 0xbe8   : > { %v8651_v35 = vadd.f32 %v16745_v28, %v8650_v33  ;;  %v17349_v36 = vpop.f32.mrb[174].mxu1 }
 0xbe9   : > { %v20855_v6 = vadd.f32 %v8659_v42, %v20811_v59  ;;  %v8653_v60 = vpop.f32.mrb[175].mxu1 }
 0xbea   : > { %v20858_v24 = vadd.f32 %v8651_v35, %v20813_v15  ;;  %v8654_v46 = vadd.f32 %v16748_v45, %v8653_v60  ;;  %v9354_v60 = vld [vmem:[#allocation9 + $0x20] sm:$0xff] }
 0xbec   : > { %v20861_v7 = vadd.f32 %v8654_v46, %v20815_v38  ;;  %v18542_v38 = vld [vmem:[#allocation7 + $0x648] ss:$12 sps:$4 sm:$0xff]  }
 0xbee   : > { %v8561_v18 = vpop.f32.mrb[176].mxu0 }
 0xbef   : > { %v8562_v31 = vadd.f32 %v8561_v18, %v8510_v55  ;;  %v8563_v47 = vpop.f32.mrb[177].mxu0 }
 0xbf0   : > { %v8564_v53 = vadd.f32 %v8563_v47, %v8512_v49  ;;  %v8565_v63 = vpop.f32.mrb[178].mxu0 }
 0xbf1   : > { %v20864_v40 = vadd.f32 %v8562_v31, %v20828_v8  ;;  %v8566_v50 = vpop.f32.mrb[179].mxu0 }
 0xbf2   : > { %v20867_v59 = vadd.f32 %v8564_v53, %v20832_v3  ;;  %v8725_v23 = vpop.f32.mrb[176].mxu1  ;;  %v9352_v50 = vld [vmem:[#allocation9 + $0x10] sm:$0xff] }
 0xbf3   : > { %v8727_v32 = vpop.f32.mrb[177].mxu1 }
 0xbf4   : > { %v8729_v15 = vpop.f32.mrb[178].mxu1 }
 0xbf5   : > { %v8790_v61 = vpack.c.bf16 %v8729_v15, %v8725_v23  ;;  %v8731_v14 = vpop.f32.mrb[179].mxu1 }
 0xbf6   : > { %v8791_v41 = vpack.c.bf16 %v8731_v14, %v8727_v32 }
 0xbf8   : > { %9175 = vmatprep.mubr.bf16.mxu0 %v8791_v41  ;;  %9277 = vmatprep.mubr.bf16.mxu1 %v8791_v41 }
 0xbf9   : > { %9176 = vmatmul.mubr.bf16.vlgmr.msra.gmra.mrb[152].mxu0 %v8790_v61  ;;  %9278 = vmatmul.mubr.bf16.vlgmr.msra.gmra.mrb[188].mxu1 %v8790_v61 }
 0xbfa   : > { %v8735_v12 = vpop.f32.mrb[180].mxu1  ;;  %9195 = vmatpush1.bf16.msra.mxu0 %v18542_v38  ;;  %17361 = vmatpush3.bf16.msra.mxu1 %v18545_v16 }
 0xbfb   : > { %v8737_v8 = vpop.f32.mrb[181].mxu1  ;;  %v8793_v3 = vpack.c.bf16 %v8735_v12, %v8735_v12  ;;  %16800 = vmatprep.subr.bf16.mxu0 %v18572_v52 }
 0xbfc   : > { %v8794_v43 = vpack.c.bf16 %v8737_v8, %v8737_v8  ;;  %v8739_v22 = vpop.f32.mrb[182].mxu1  ;;  %v9355_v8 = vld [vmem:[#allocation9 + $0x28] sm:$0xff] }
 0xbfd   : > { %v8740_v39 = vpop.f32.mrb[183].mxu1 }
 0xbfe   : > { %9185 = vmatprep.mubr.bf16.mxu0 %v8794_v43  ;;  %9285 = vmatprep.mubr.bf16.mxu1 %v8794_v43 }
 0xc01   : > { %9186 = vmatmul.mubr.bf16.gmra.mrb[180].mxu0 %v8793_v3  ;;  %9286 = vmatmul.mubr.bf16.gmra.mrb[192].mxu1 %v8793_v3 }
 0xc02   : > { %v17358_v27 = vpop.f32.mrb[184].mxu1  ;;  %9226 = vmatprep.mubr.bf16.mxu0 %v19423_v0 }
 0xc03   : > { %v8776_v4 = vpop.f32.mrb[185].mxu1  ;;  %v8795_v10 = vpack.c.bf16 %v17358_v27, %v17358_v27 }
 0xc04   : > { %v17359_v29 = vpop.f32.mrb[186].mxu1 }
 0xc05   : > { %v8779_v5 = vpop.f32.mrb[187].mxu1 }
 0xc06   : > { %v8792_v57 = vpack.c.bf16 %v8779_v5, %v8776_v4 }
 0xc08   : > { %17362 = vmatprep.mubr.msk.bf16.mxu1 %vm7315_vm6, %v8792_v57 }
 0xc09   : > { %15462 = vmatmul.mubr.msk.bf16.vlgmr.msra.gmra.mrb[152].mxu0 %vm7315_vm6, %v8792_v57  ;;  %17363 = vmatmul.mubr.msk.bf16.vlgmr.msra.gmra.mrb[196].mxu1 %vm7315_vm6, %v8795_v10 }
 0xc0a   : > { %9236 = vmatprep.mubr.bf16.mxu0 %v19423_v0  ;;  %9444 = vmatprep.mubr.bf16.mxu1 %v19423_v0 }
 0xc0b   : > { %16801 = vmatpush3.bf16.msra.mxu0 %v18576_v54 }
 0xc0c   : > { %16802 = vmatprep.subr.bf16.mxu0 %v18577_v17 }
 0xc0f   : > { %16803 = vmatpush3.bf16.msra.mxu0 %v18581_v34  ;;  %v9356_v34 = vld [vmem:[#allocation9 + $0x30] sm:$0x3] }
 0xc10   : > { %16804 = vmatprep.subr.bf16.mxu0 %v18582_v25 }
 0xc11   : > { %15463 = vmatmul.mubr.msk.bf16.gmra.mrb[184].mxu0 %vm7315_vm6, %v8795_v10 }
 0xc13   : > { %16805 = vmatpush3.bf16.msra.mxu0 %v18586_v62 }
 0xccc   : > { %v16779_v20 = vpop.f32.mrb[188].mxu1 }
 0xccd   : > { %v16780_v51 = vpop.f32.mrb[189].mxu1 }
 0xcce   : > { %v16781_v19 = vadd.f32 %v16780_v51, %v16779_v20  ;;  %v16782_v16 = vpop.f32.mrb[190].mxu1  ;;  %v9358_v20 = vld [vmem:[#allocation9 + $0x40] sm:$0x3]  ;;  %v9357_v51 = vld [vmem:[#allocation9 + $0x38] sm:$0x3] }
 0xccf   : > { %v16783_v30 = vpop.f32.mrb[191].mxu1 }
 0xcd0   : > { %v16784_v58 = vadd.f32 %v16783_v30, %v16782_v16 }
 0xcd4   : > { %v9187_v28 = vpop.f32.mrb[180].mxu0  ;;  %v16785_v26 = vpop.f32.mrb[192].mxu1 }
 0xcd5   : > { %v9189_v9 = vpop.f32.mrb[181].mxu0  ;;  %v16786_v45 = vpop.f32.mrb[193].mxu1 }
 0xcd6   : > { %v16787_v55 = vadd.f32 %v16786_v45, %v16785_v26  ;;  %v9191_v21 = vpop.f32.mrb[182].mxu0  ;;  %v16788_v49 = vpop.f32.mrb[194].mxu1 }
 0xcd7   : > { %v9192_v37 = vpop.f32.mrb[183].mxu0  ;;  %v16789_v48 = vpop.f32.mrb[195].mxu1 }
 0xcdc   : > { %v9228_v11 = vpop.f32.mrb[152].mxu0  ;;  %v17364_v13 = vpop.f32.mrb[196].mxu1 }
 0xcdd   : > { %v9359_v42 = vadd.f32 %v9350_v56, %v9228_v11  ;;  %v9336_v33 = vadd.f32 %v17364_v13, %v16787_v55  ;;  %v9230_v35 = vpop.f32.mrb[153].mxu0  ;;  %v9327_v36 = vpop.f32.mrb[197].mxu1 }
 0xcde   : > { %v9360_v46 = vadd.f32 %v9351_v44, %v9230_v35  ;;  %v9328_v18 = vadd.f32 %v16781_v19, %v9327_v36  ;;  %v9232_v31 = vpop.f32.mrb[154].mxu0  ;;  %v17365_v47 = vpop.f32.mrb[198].mxu1  ;;  %v18548_v35 = vld [vmem:[%s21989_s10 + $0x1b0] ss:$12 sps:$4 sm:$0xff]   ;;  %v18553_v36 = vld [vmem:[%s21989_s10 + $0x1cc] ss:$12 sps:$4 sm:$0xff]  }
 0xcdf   : > { %v9368_v53 = vmul.f32 0.2, %v9359_v42  ;;  %v9349_v63 = vadd.f32 %v9336_v33, %v20855_v6  ;;  %v9362_v23 = vadd.f32 %v9353_v2, %v9232_v31  ;;  %v9234_v32 = vpop.f32.mrb[155].mxu0  ;;  %v9330_v15 = vpop.f32.mrb[199].mxu1  ;;  %v18550_v33 = vld [vmem:[%s21989_s10 + $0x1b4] ss:$12 sps:$4 sm:$0xff]  }
 0xce0   : > { %v9369_v61 = vmul.f32 0.2, %v9360_v46  ;;  %v9343_v14 = vadd.f32 %v9328_v18, %v20858_v24  ;;  %v9363_v41 = vadd.f32 %v9354_v60, %v9234_v32  ;;  %v9331_v38 = vadd.f32 %v16784_v58, %v9330_v15  ;;  %v18551_v60 = vld [vmem:[%s21989_s10 + $0x1c8] ss:$12 sps:$4 sm:$0xff]   ;;  %v18554_v18 = vld [vmem:[%s21989_s10 + $0x1e0] ss:$12 sps:$4 sm:$0xff]  }
 0xce1   : > { %v9371_v12 = vmul.f32 0.2, %v9362_v23  ;;  %v9377_v3 = vmax.f32 %v9359_v42, %v9368_v53  ;;  %v18547_v42 = vld [vmem:[%s21990_s11 + $0x8] sm:$0x1f]   ;;  %v18557_v47 = vld [vmem:[%s21989_s10 + $0x1f8] ss:$12 sps:$4 sm:$0xff]  }
 0xce2   : > { %v9361_v43 = vadd.f32 %v9352_v50, %v9343_v14  ;;  %v9372_v22 = vmul.f32 0.2, %v9363_v41  ;;  %v9346_v39 = vadd.f32 %v9331_v38, %v20861_v7  ;;  %v9378_v4 = vmax.f32 %v9360_v46, %v9369_v61  ;;  %v18556_v46 = vld [vmem:[%s21989_s10 + $0x1e4] ss:$12 sps:$4 sm:$0xff]   ;;  %v18559_v31 = vld [vmem:[%s21989_s10 + $0x1fc] ss:$12 sps:$4 sm:$0xff]  }
 0xce3   : > { %v9380_v27 = vmax.f32 %v9362_v23, %v9371_v12  ;;  %v18562_v53 = vld [vmem:[%s21989_s10 + $0x214] ss:$12 sps:$4 sm:$0xff]   ;;  %v18565_v50 = vld [vmem:[%s21989_s10 + $0x22c] ss:$12 sps:$4 sm:$0xff]   ;;  %v18568_v32 = vld [vmem:[%s21989_s10 + $0x244] ss:$12 sps:$4 sm:$0xff]  }
 0xce4   : > { %v9370_v29 = vmul.f32 0.2, %v9361_v43  ;;  %v9381_v6 = vmax.f32 %v9363_v41, %v9372_v22  ;;  %v9364_v5 = vadd.f32 %v9355_v8, %v9346_v39  ;;  %v9238_v57 = vpop.f32.mrb[184].mxu0  ;;  %v18563_v23 = vld [vmem:[%s21989_s10 + $0x228] ss:$12 sps:$4 sm:$0xff]  }
 0xce5   : > { %v20897_v10 = vpack.c.bf16 %v9380_v27, %v9377_v3  ;;  %v9239_v52 = vadd.f32 %v9238_v57, %v9187_v28  ;;  %v9240_v54 = vpop.f32.mrb[185].mxu0  ;;  %v9367_v28 = vadd.f32 %v9358_v20, %v9349_v63  ;;  %v18560_v63 = vld [vmem:[%s21989_s10 + $0x210] ss:$12 sps:$4 sm:$0xff]   ;;  %v18566_v15 = vld [vmem:[%s21989_s10 + $0x240] ss:$12 sps:$4 sm:$0xff]  }
 0xce6   : > { %v20899_v24 = vpack.c.bf16 %v9381_v6, %v9378_v4  ;;  %v9373_v17 = vmul.f32 0.2, %v9364_v5  ;;  %v9241_v25 = vadd.f32 %v9240_v54, %v9189_v9  ;;  %v9242_v62 = vpop.f32.mrb[186].mxu0  ;;  %v9379_v16 = vmax.f32 %v9361_v43, %v9370_v29  ;;  %v18571_v61 = vld [vmem:[%s21989_s10 + $0x25c] ss:$12 sps:$4 sm:$0xff]  }
 0xce7   : > { %v9347_v7 = vadd.f32 %v9239_v52, %v20864_v40  ;;  %v9243_v19 = vpop.f32.mrb[187].mxu0  ;;  %v9376_v37 = vmul.f32 0.2, %v9367_v28  ;;  %v18569_v14 = vld [vmem:[%s21989_s10 + $0x258] ss:$12 sps:$4 sm:$0xff]  }
 0xce8   : > { %v9382_v30 = vmax.f32 %v9364_v5, %v9373_v17  ;;  %v9348_v58 = vadd.f32 %v9241_v25, %v20867_v59  ;;  %9412 = vmatprep.subr.bf16.mxu1 %v20899_v24  ;;  %v18546_v59 = vld [vmem:[%s21990_s11] sm:$0x1f]   ;;  %v18573_v38 = vld [vmem:[%s21989_s10 + $0x270] ss:$12 sps:$4 sm:$0xff]   ;;  %v18580_v12 = vld [vmem:[%s21989_s10 + $0x28c] ss:$12 sps:$4 sm:$0xff]  }
 0xce9   : > { %v9365_v26 = vadd.f32 %v9356_v34, %v9347_v7  ;;  %9413 = vmatpush1.bf16.msra.mxu1 %v20897_v10  ;;  %v9385_v11 = vmax.f32 %v9367_v28, %v9376_v37  ;;  %v18575_v41 = vld [vmem:[%s21989_s10 + $0x274] ss:$12 sps:$4 sm:$0xff]   ;;  %v18585_v43 = vld [vmem:[%s21989_s10 + $0x2a4] ss:$12 sps:$4 sm:$0xff]   ;;  %v18590_v3 = vld [vmem:[%s21989_s10 + $0x2bc] ss:$12 sps:$4 sm:$0xff]  }
 0xcea   : > { %v9366_v45 = vadd.f32 %v9357_v51, %v9348_v58  ;;  %v20905_v55 = vpack.c.bf16 %v9382_v30, %v9379_v16  ;;  %v18578_v8 = vld [vmem:[%s21989_s10 + $0x288] ss:$12 sps:$4 sm:$0xff]   ;;  %v18583_v22 = vld [vmem:[%s21989_s10 + $0x2a0] ss:$12 sps:$4 sm:$0xff]   ;;  %v18588_v4 = vld [vmem:[%s21989_s10 + $0x2b8] ss:$12 sps:$4 sm:$0xff]  }
 0xceb   : > { %v9374_v9 = vmul.f32 0.2, %v9365_v26  ;;  %v9391_v13 = vpack.c.bf16 %v9385_v11, %v9385_v11  ;;  %v18587_v39 = vld [vmem:[%s21989_s10 + $0x2c0] ss:$12 sps:$4 sm:$0xff]   ;;  %v18592_v29 = vld [vmem:[%s21989_s10 + $0x2d8] ss:$12 sps:$4 sm:$0xff]  }
 0xcec   : > { %v9375_v21 = vmul.f32 0.2, %v9366_v45  ;;  %v18591_v27 = vld [vmem:[%s21989_s10 + $0x200] ss:$12 sps:$4 sm:$0xff]   ;;  %16806 = vmatprep.subr.bf16.mxu0 %v18587_v39  ;;  %v18593_v6 = vld [vmem:[%s21989_s10 + $0x2d0] ss:$12 sps:$4 sm:$0xff]  }
 0xced   : > { %v9383_v49 = vmax.f32 %v9365_v26, %v9374_v9  ;;  %v20925_v2 = vsel %vm853_vm1, %v9391_v13, 0  ;;  %16807 = vmatpush3.bf16.msra.mxu0 %v18591_v27  ;;  %v18595_v5 = vld [vmem:[%s21989_s10 + $0x2d4] ss:$12 sps:$4 sm:$0xff]   ;;  %v18596_v57 = vld [vmem:[%s21989_s10 + $0x218] ss:$12 sps:$4 sm:$0xff]  }
 0xcee   : > { %v9384_v40 = vmax.f32 %v9366_v45, %v9375_v21  ;;  %16808 = vmatprep.subr.bf16.mxu0 %v18592_v29  ;;  %v18597_v52 = vld [vmem:[%s21989_s10 + $0x2f0] ss:$12 sps:$4 sm:$0xff]   ;;  %v18600_v54 = vld [vmem:[%s21989_s10 + $0x2ec] ss:$12 sps:$4 sm:$0xff]   ;;  %v18598_v34 = vld [vmem:[%s21989_s10 + $0x2e8] ss:$12 sps:$4 sm:$0xff]  }
 0xcef   : > { %v9389_v48 = vpack.c.bf16 %v9383_v49, %v9383_v49  ;;  %v18601_v17 = vld [vmem:[%s21989_s10 + $0x230] ss:$12 sps:$4 sm:$0xff]   ;;  %v18602_v25 = vld [vmem:[%s21989_s10 + $0x308] ss:$12 sps:$4 sm:$0xff]   ;;  %v18603_v20 = vld [vmem:[%s21989_s10 + $0x300] ss:$12 sps:$4 sm:$0xff]  }
 0xcf0   : > { %v20907_v56 = vpack.c.bf16 %v9384_v40, %v9384_v40  ;;  %v18605_v62 = vld [vmem:[%s21989_s10 + $0x304] ss:$12 sps:$4 sm:$0xff]   ;;  %v18606_v7 = vld [vmem:[%s21989_s10 + $0x248] ss:$12 sps:$4 sm:$0xff]   ;;  %v18607_v51 = vld [vmem:[%s21989_s10 + $0x320] ss:$12 sps:$4 sm:$0xff]  }
 0xcf1   : > { %v20910_v44 = vsel %vm853_vm1, %v9389_v48, 0  ;;  %16809 = vmatpush3.bf16.msra.mxu0 %v18596_v57  ;;  %v18610_v19 = vld [vmem:[%s21989_s10 + $0x31c] ss:$12 sps:$4 sm:$0xff]   ;;  %v18611_v16 = vld [vmem:[%s21989_s10 + $0x260] ss:$12 sps:$4 sm:$0xff]  }
 0xcf2   : > { %15467 = vmatprep.subr.msk.bf16.mxu1 %vm853_vm1, %v20907_v56  ;;  %16810 = vmatprep.subr.bf16.mxu0 %v18597_v52  ;;  %v18608_v30 = vld [vmem:[%s21989_s10 + $0x318] ss:$12 sps:$4 sm:$0xff]   ;;  %v18615_v58 = vld [vmem:[%s21989_s10 + $0x334] ss:$12 sps:$4 sm:$0xff]   ;;  %v18634_v29 = vld [vmem:[%s21989_s10 + $0x30] ss:$12 sps:$4 sm:$0xff]  }
 0xcf3   : > { %9415 = vmatpush1.bf16.msra.mxu1 %v20910_v44  ;;  %v18629_v39 = vld [vmem:[%s21989_s10 + $0x18] ss:$12 sps:$4 sm:$0xff]   ;;  %v18636_v27 = vld [vmem:[%s21989_s10 + $0x34] ss:$12 sps:$4 sm:$0xff]  }
 0xcf4   : > { %17366 = vmatprep.subr.bf16.mxu1 %v19424_v1  ;;  %v18642_v57 = vld [vmem:[%s21989_s10 + $0xf8] ss:$12 sps:$4 sm:$0xff]   ;;  %v18639_v52 = vld [vmem:[%s21989_s10 + $0x48] ss:$12 sps:$4 sm:$0xff]  }
 0xcf5   : > { %16811 = vmatpush3.bf16.msra.mxu0 %v18601_v17  ;;  %v18646_v17 = vld [vmem:[%s21989_s10 + $0x64] ss:$12 sps:$4 sm:$0xff]  }
 0xcf6   : > { %15468 = vmatmul.mubr.msk.bf16.vlgmr.msra.gmra.mrb[200].mxu1 %vm9399_vm7, %v18546_v59  ;;  %16812 = vmatprep.subr.bf16.mxu0 %v18602_v25  ;;  %v18644_v25 = vld [vmem:[%s21989_s10 + $0x60] ss:$12 sps:$4 sm:$0xff]  }
 0xcf7   : > { %17367 = vmatpush3.bf16.msra.mxu1 %v20905_v55  ;;  %17370 = vmatprep.mubr.msk.bf16.mxu1 %vm19425_vm0, %v19424_v1 }
 0xcf8   : > { %17368 = vmatprep.subr.bf16.mxu1 %v19424_v1 }
 0xcf9   : > { %16813 = vmatpush3.bf16.msra.mxu0 %v18606_v7  ;;  %v18652_v7 = vld [vmem:[%s21989_s10 + $0x128] ss:$12 sps:$4 sm:$0xff]  }
 0xcfa   : > { %16814 = vmatprep.subr.bf16.mxu0 %v18607_v51  ;;  %v18649_v51 = vld [vmem:[%s21989_s10 + $0x78] ss:$12 sps:$4 sm:$0xff]  }
 0xcfb   : > { %17369 = vmatpush3.bf16.msra.mxu1 %v20925_v2 }
 0xcfc   : > { %9582 = vmatprep.subr.bf16.mxu1 %v20899_v24 }
 0xcfd   : > { %16815 = vmatpush3.bf16.msra.mxu0 %v18611_v16  ;;  %v18656_v16 = vld [vmem:[%s21989_s10 + $0x94] ss:$12 sps:$4 sm:$0xff]  }
 0xcfe   : > { %17371 = vmatmul.mubr.msk.bf16.vlgmr.msra.gmra.mrb[204].mxu1 %vm9399_vm7, %v18546_v59  ;;  %17382 = vmatprep.subr.bf16.mxu0 %v19424_v1 }
 0xcff   : > { %9583 = vmatpush1.bf16.msra.mxu1 %v20897_v10  ;;  %9614 = vmatprep.mubr.bf16.mxu1 %v19423_v0 }
 0xd00   : > { %15473 = vmatprep.subr.msk.bf16.mxu1 %vm853_vm1, %v20907_v56 }
 0xd03   : > { %9585 = vmatpush1.bf16.msra.mxu1 %v20910_v44 }
 0xd04   : > { %17374 = vmatprep.subr.bf16.mxu1 %v19424_v1 }
 0xd06   : > { %15474 = vmatmul.mubr.msk.bf16.vlgmr.msra.gmra.mrb[208].mxu1 %vm9399_vm7, %v18547_v42 }
 0xd07   : > { %17375 = vmatpush3.bf16.msra.mxu1 %v20905_v55  ;;  %17378 = vmatprep.mubr.msk.bf16.mxu1 %vm19425_vm0, %v19424_v1 }
 0xd08   : > { %17376 = vmatprep.subr.bf16.mxu1 %v19424_v1 }
 0xd0b   : > { %17377 = vmatpush3.bf16.msra.mxu1 %v20925_v2 }
 0xd0c   : > { %10034 = vmatprep.subr.bf16.mxu1 %v18550_v33 }
 0xd0e   : > { %17379 = vmatmul.mubr.msk.bf16.vlgmr.msra.gmra.mrb[212].mxu1 %vm9399_vm7, %v18547_v42 }
 0xd0f   : > { %10035 = vmatpush1.bf16.msra.mxu1 %v18548_v35 }
 0xd10   : > { %10036 = vmatprep.subr.bf16.mxu1 %v18553_v36 }
 0xd13   : > { %10037 = vmatpush1.bf16.msra.mxu1 %v18551_v60 }
 0xd14   : > { %10038 = vmatprep.subr.bf16.mxu1 %v18556_v46  ;;  %v18612_v46 = vld [vmem:[%s21989_s10 + $0x338] ss:$12 sps:$4 sm:$0xff]  }
 0xd17   : > { %10039 = vmatpush1.bf16.msra.mxu1 %v18554_v18  ;;  %v18613_v18 = vld [vmem:[%s21989_s10 + $0x330] ss:$12 sps:$4 sm:$0xff]  }
 0xd18   : > { %10040 = vmatprep.subr.bf16.mxu1 %v18559_v31  ;;  %v18619_v31 = vld [vmem:[%s21989_s10 + $0x34c] ss:$12 sps:$4 sm:$0xff]  }
 0xd1b   : > { %10041 = vmatpush1.bf16.msra.mxu1 %v18557_v47 }
 0xd1c   : > { %10042 = vmatprep.subr.bf16.mxu1 %v18562_v53  ;;  %v18616_v53 = vld [vmem:[%s21989_s10 + $0x350] ss:$12 sps:$4 sm:$0xff]  }
 0xd1f   : > { %10043 = vmatpush1.bf16.msra.mxu1 %v18560_v63  ;;  %v18617_v63 = vld [vmem:[%s21989_s10 + $0x348] ss:$12 sps:$4 sm:$0xff]  }
 0xd20   : > { %10044 = vmatprep.subr.bf16.mxu1 %v18565_v50 }
 0xd23   : > { %10045 = vmatpush1.bf16.msra.mxu1 %v18563_v23  ;;  %v18622_v23 = vld [vmem:[%s21989_s10 + $0x184] ss:$12 sps:$4 sm:$0xff]  }
 0xd24   : > { %10046 = vmatprep.subr.bf16.mxu1 %v18568_v32  ;;  %v18625_v32 = vld [vmem:[%s21989_s10 + $0x4] ss:$12 sps:$4 sm:$0xff]  }
 0xd27   : > { %10047 = vmatpush1.bf16.msra.mxu1 %v18566_v15 }
 0xd28   : > { %10048 = vmatprep.subr.bf16.mxu1 %v18571_v61 }
 0xd2b   : > { %10049 = vmatpush1.bf16.msra.mxu1 %v18569_v14 }
 0xd2c   : > { %10050 = vmatprep.subr.bf16.mxu1 %v18575_v41  ;;  %v18620_v41 = vld [vmem:[%s21989_s10 + $0x180] ss:$12 sps:$4 sm:$0xff]  }
 0xd2f   : > { %10051 = vmatpush1.bf16.msra.mxu1 %v18573_v38  ;;  %v18628_v38 = vld [vmem:[%s21989_s10 + $0x19c] ss:$12 sps:$4 sm:$0xff]  }
 0xd30   : > { %10052 = vmatprep.subr.bf16.mxu1 %v18580_v12  ;;  %v18623_v12 = vld [vmem:[%s21989_s10] ss:$12 sps:$4 sm:$0xff]  }
 0xd33   : > { %10053 = vmatpush1.bf16.msra.mxu1 %v18578_v8  ;;  %v18626_v8 = vld [vmem:[%s21989_s10 + $0x198] ss:$12 sps:$4 sm:$0xff]  }
 0xd34   : > { %10054 = vmatprep.subr.bf16.mxu1 %v18585_v43  ;;  %v18631_v43 = vld [vmem:[%s21989_s10 + $0x1c] ss:$12 sps:$4 sm:$0xff]  }
 0xd37   : > { %10055 = vmatpush1.bf16.msra.mxu1 %v18583_v22  ;;  %v18632_v22 = vld [vmem:[%s21989_s10 + $0xc8] ss:$12 sps:$4 sm:$0xff]  }
 0xd38   : > { %10056 = vmatprep.subr.bf16.mxu1 %v18590_v3  ;;  %v18633_v3 = vld [vmem:[%s21989_s10 + $0x8] ss:$12 sps:$4 sm:$0xff]  }
 0xd3b   : > { %10057 = vmatpush1.bf16.msra.mxu1 %v18588_v4  ;;  %v18637_v4 = vld [vmem:[%s21989_s10 + $0xe0] ss:$12 sps:$4 sm:$0xff]  }
 0xd3c   : > { %10058 = vmatprep.subr.bf16.mxu1 %v18595_v5  ;;  %v18641_v5 = vld [vmem:[%s21989_s10 + $0x4c] ss:$12 sps:$4 sm:$0xff]  }
 0xd3f   : > { %10059 = vmatpush1.bf16.msra.mxu1 %v18593_v6  ;;  %v18638_v6 = vld [vmem:[%s21989_s10 + $0x20] ss:$12 sps:$4 sm:$0xff]  }
 0xd40   : > { %10060 = vmatprep.subr.bf16.mxu1 %v18600_v54  ;;  %v18643_v54 = vld [vmem:[%s21989_s10 + $0x38] ss:$12 sps:$4 sm:$0xff]  }
 0xd43   : > { %10061 = vmatpush1.bf16.msra.mxu1 %v18598_v34  ;;  %v18647_v34 = vld [vmem:[%s21989_s10 + $0x110] ss:$12 sps:$4 sm:$0xff]  }
 0xd44   : > { %10062 = vmatprep.subr.bf16.mxu1 %v18605_v62  ;;  %v18648_v62 = vld [vmem:[%s21989_s10 + $0x50] ss:$12 sps:$4 sm:$0xff]  }
 0xd47   : > { %10063 = vmatpush1.bf16.msra.mxu1 %v18603_v20  ;;  %v18651_v20 = vld [vmem:[%s21989_s10 + $0x7c] ss:$12 sps:$4 sm:$0xff]  }
 0xd48   : > { %10064 = vmatprep.subr.bf16.mxu1 %v18610_v19  ;;  %v18653_v19 = vld [vmem:[%s21989_s10 + $0x68] ss:$12 sps:$4 sm:$0xff]  }
 0xd4b   : > { %10065 = vmatpush1.bf16.msra.mxu1 %v18608_v30  ;;  %v18657_v30 = vld [vmem:[%s21989_s10 + $0x140] ss:$12 sps:$4 sm:$0xff]  }
 0xd4c   : > { %10077 = vmatprep.subr.bf16.mxu1 %v18615_v58  ;;  %v18654_v58 = vld [vmem:[%s21989_s10 + $0x90] ss:$12 sps:$4 sm:$0xff]  }
 0xdc9   : > { %v9446_v26 = vpop.f32.mrb[200].mxu1 }
 0xdca   : > { %v9448_v28 = vpop.f32.mrb[201].mxu1 }
 0xdcb   : > { %v9450_v45 = vpop.f32.mrb[202].mxu1 }
 0xdcc   : > { %v21076_v9 = vpack.c.bf16 %v9450_v45, %v9446_v26  ;;  %v9452_v21 = vpop.f32.mrb[203].mxu1  ;;  %v18658_v26 = vld [vmem:[%s21989_s10 + $0x80] ss:$12 sps:$4 sm:$0xff]   ;;  %v18662_v45 = vld [vmem:[%s21989_s10 + $0x158] ss:$12 sps:$4 sm:$0xff]  }
 0xdcd   : > { %v21078_v49 = vpack.c.bf16 %v9452_v21, %v9448_v28  ;;  %v18661_v28 = vld [vmem:[%s21989_s10 + $0xac] ss:$12 sps:$4 sm:$0xff]   ;;  %v18659_v21 = vld [vmem:[%s21989_s10 + $0xa8] ss:$12 sps:$4 sm:$0xff]  }
 0xdd1   : > { %v9489_v37 = vpop.f32.mrb[204].mxu1 }
 0xdd2   : > { %v17372_v40 = vpop.f32.mrb[205].mxu1 }
 0xdd3   : > { %v9492_v48 = vpop.f32.mrb[206].mxu1  ;;  %v18667_v40 = vld [vmem:[%s21989_s10 + $0x170] ss:$12 sps:$4 sm:$0xff]  }
 0xdd4   : > { %v21080_v59 = vpack.c.bf16 %v9492_v48, %v9489_v37  ;;  %v17373_v11 = vpop.f32.mrb[207].mxu1  ;;  %v18666_v37 = vld [vmem:[%s21989_s10 + $0xc4] ss:$12 sps:$4 sm:$0xff]   ;;  %v18664_v48 = vld [vmem:[%s21989_s10 + $0xc0] ss:$12 sps:$4 sm:$0xff]  }
 0xdd5   : > { %v18668_v11 = vld [vmem:[%s21989_s10 + $0xb0] ss:$12 sps:$4 sm:$0xff]  }
 0xdd9   : > { %v9616_v13 = vpop.f32.mrb[208].mxu1 }
 0xdda   : > { %v9618_v42 = vpop.f32.mrb[209].mxu1 }
 0xddb   : > { %v9620_v33 = vpop.f32.mrb[210].mxu1 }
 0xddc   : > { %v9666_v35 = vpack.c.bf16 %v9620_v33, %v9616_v13  ;;  %v9622_v36 = vpop.f32.mrb[211].mxu1  ;;  %v18671_v13 = vld [vmem:[%s21989_s10 + $0xdc] ss:$12 sps:$4 sm:$0xff]  }
 0xddd   : > { %v9667_v60 = vpack.c.bf16 %v9622_v36, %v9618_v42  ;;  %v18669_v42 = vld [vmem:[%s21989_s10 + $0xd8] ss:$12 sps:$4 sm:$0xff]   ;;  %v18672_v33 = vld [vmem:[%s21989_s10 + $0x188] ss:$12 sps:$4 sm:$0xff]   ;;  %v18673_v36 = vld [vmem:[%s21989_s10 + $0xf0] ss:$12 sps:$4 sm:$0xff]  }
 0xddf   : > { %10066 = vmatprep.mubr.bf16.mxu1 %v9667_v60  ;;  %10152 = vmatprep.mubr.bf16.mxu0 %v9667_v60  ;;  %v18676_v60 = vld [vmem:[%s21989_s10 + $0x1a0] ss:$12 sps:$4 sm:$0xff]  }
 0xde0   : > { %10067 = vmatmul.mubr.bf16.vlgmr.msra.gmra.mrb[216].mxu1 %v9666_v35  ;;  %10153 = vmatmul.mubr.bf16.vlgmr.msra.gmra.mrb[188].mxu0 %v9666_v35  ;;  %v18675_v35 = vld [vmem:[%s21989_s10 + $0xf4] ss:$12 sps:$4 sm:$0xff]  }
 0xde1   : > { %17383 = vmatpush3.bf16.msra.mxu0 %v18612_v46  ;;  %v9659_v47 = vpop.f32.mrb[212].mxu1  ;;  %10078 = vmatpush1.bf16.msra.mxu1 %v18613_v18  ;;  %v18679_v46 = vld [vmem:[%s21989_s10 + $0x10c] ss:$12 sps:$4 sm:$0xff]   ;;  %v18677_v18 = vld [vmem:[%s21989_s10 + $0x108] ss:$12 sps:$4 sm:$0xff]  }
 0xde2   : > { %v17380_v50 = vpop.f32.mrb[213].mxu1  ;;  %17384 = vmatprep.subr.bf16.mxu0 %v19424_v1  ;;  %10079 = vmatprep.subr.bf16.mxu1 %v18619_v31  ;;  %v18682_v31 = vld [vmem:[%s21989_s10 + $0x124] ss:$12 sps:$4 sm:$0xff]  }
 0xde3   : > { %v9662_v15 = vpop.f32.mrb[214].mxu1  ;;  %17386 = vmatprep.mubr.msk.bf16.mxu0 %vm19425_vm0, %v19424_v1  ;;  %10109 = vmatprep.mubr.bf16.mxu1 %v19423_v0  ;;  %v18689_v50 = vld [vmem:[%s21989_s10 + $0x154] ss:$12 sps:$4 sm:$0xff]  }
 0xde4   : > { %v9668_v61 = vpack.c.bf16 %v9662_v15, %v9659_v47  ;;  %v17381_v14 = vpop.f32.mrb[215].mxu1  ;;  %v18680_v47 = vld [vmem:[%s21989_s10 + $0x120] ss:$12 sps:$4 sm:$0xff]   ;;  %v18690_v15 = vld [vmem:[%s21989_s10 + $0x168] ss:$12 sps:$4 sm:$0xff]  }
 0xde5   : > { %17385 = vmatpush3.bf16.msra.mxu0 %v18616_v53  ;;  %10080 = vmatpush1.bf16.msra.mxu1 %v18617_v63  ;;  %v18685_v53 = vld [vmem:[%s21989_s10 + $0x13c] ss:$12 sps:$4 sm:$0xff]   ;;  %v18683_v63 = vld [vmem:[%s21989_s10 + $0x138] ss:$12 sps:$4 sm:$0xff]  }
 0xde6   : > { %10536 = vmatprep.subr.bf16.mxu0 %v18622_v23  ;;  %10493 = vmatprep.subr.bf16.mxu1 %v18625_v32  ;;  %v18687_v23 = vld [vmem:[%s21989_s10 + $0x150] ss:$12 sps:$4 sm:$0xff]   ;;  %v18692_v32 = vld [vmem:[%s21989_s10 + $0x16c] ss:$12 sps:$4 sm:$0xff]  }
 0xde7   : > { %v18695_v14 = vld [vmem:[%s21989_s10 + $0x364] ss:$12 sps:$4 sm:$0xff]  }
 0xde8   : > { %17387 = vmatmul.mubr.msk.bf16.vlgmr.msra.gmra.mrb[192].mxu0 %vm10030_vm8, %v9668_v61 }
 0xde9   : > { %10537 = vmatpush1.bf16.msra.mxu0 %v18620_v41  ;;  %10568 = vmatprep.mubr.bf16.mxu0 %v19423_v0  ;;  %v18698_v41 = vld [vmem:[%s21989_s10 + $0x37c] ss:$12 sps:$4 sm:$0xff]  }
 0xdea   : > { %10538 = vmatprep.subr.bf16.mxu0 %v18628_v38  ;;  %v18696_v38 = vld [vmem:[%s21989_s10 + $0x378] ss:$12 sps:$4 sm:$0xff]  }
 0xdec   : > { %15602 = vmatmul.mubr.msk.bf16.vlgmr.msra.gmra.mrb[216].mxu1 %vm10030_vm8, %v9668_v61  ;;  %v18693_v61 = vld [vmem:[%s21989_s10 + $0x360] ss:$12 sps:$4 sm:$0xff]  }
 0xded   : > { %10494 = vmatpush1.bf16.msra.mxu1 %v18623_v12  ;;  %10539 = vmatpush1.bf16.msra.mxu0 %v18626_v8  ;;  %v18699_v12 = vld [vmem:[%s21989_s10 + $0x390] ss:$12 sps:$4 sm:$0xff]   ;;  %v18704_v8 = vld [vmem:[%s21989_s10 + $0x3ac] ss:$12 sps:$4 sm:$0xff]  }
 0xdee   : > { %10525 = vmatprep.mubr.bf16.mxu1 %v21078_v49  ;;  %10495 = vmatprep.subr.bf16.mxu1 %v18631_v43  ;;  %v18702_v43 = vld [vmem:[%s21989_s10 + $0x3a8] ss:$12 sps:$4 sm:$0xff]  }
 0xdef   : > { %16825 = vmatprep.subr.bf16.mxu0 %v18632_v22  ;;  %v18707_v22 = vld [vmem:[%s21989_s10 + $0x3c4] ss:$12 sps:$4 sm:$0xff]  }
 0xdf0   : > { %15658 = vmatmul.mubr.msk.bf16.vlgmr.msra.gmra.mrb[196].mxu0 %vm10030_vm8, %v21080_v59 }
 0xdf1   : > { %10496 = vmatpush1.bf16.msra.mxu1 %v18629_v39  ;;  %16826 = vmatpush3.bf16.msra.mxu0 %v18633_v3  ;;  %v18705_v39 = vld [vmem:[%s21989_s10 + $0x3c0] ss:$12 sps:$4 sm:$0xff]   ;;  %v18710_v3 = vld [vmem:[%s21989_s10 + $0x3dc] ss:$12 sps:$4 sm:$0xff]  }
 0xdf2   : > { %10611 = vmatprep.mubr.bf16.mxu0 %v21078_v49  ;;  %10497 = vmatprep.subr.bf16.mxu1 %v18636_v27  ;;  %v18663_v49 = vld [vmem:[%s21989_s10 + $0x98] ss:$12 sps:$4 sm:$0xff]   ;;  %v18717_v27 = vld [vmem:[%s21989_s10 + $0x428] ss:$12 sps:$4 sm:$0xff]  }
 0xdf3   : > { %16827 = vmatprep.subr.bf16.mxu0 %v18637_v4  ;;  %v18721_v4 = vld [vmem:[%s21989_s10 + $0x368] ss:$12 sps:$4 sm:$0xff]  }
 0xdf5   : > { %10498 = vmatpush1.bf16.msra.mxu1 %v18634_v29  ;;  %16828 = vmatpush3.bf16.msra.mxu0 %v18638_v6  ;;  %v18722_v29 = vld [vmem:[%s21989_s10 + $0x440] ss:$12 sps:$4 sm:$0xff]   ;;  %v18708_v6 = vld [vmem:[%s21989_s10 + $0x3d8] ss:$12 sps:$4 sm:$0xff]  }
 0xdf6   : > { %10499 = vmatprep.subr.bf16.mxu1 %v18641_v5  ;;  %16829 = vmatprep.subr.bf16.mxu0 %v18642_v57  ;;  %v18726_v5 = vld [vmem:[%s21989_s10 + $0x380] ss:$12 sps:$4 sm:$0xff]  }
 0xdf7   : > { %v18713_v57 = vld [vmem:[%s21989_s10 + $0x3f4] ss:$12 sps:$4 sm:$0xff]  }
 0xdf9   : > { %10500 = vmatpush1.bf16.msra.mxu1 %v18639_v52  ;;  %16830 = vmatpush3.bf16.msra.mxu0 %v18643_v54  ;;  %v18727_v52 = vld [vmem:[%s21989_s10 + $0x458] ss:$12 sps:$4 sm:$0xff]   ;;  %v18711_v54 = vld [vmem:[%s21989_s10 + $0x3f0] ss:$12 sps:$4 sm:$0xff]  }
 0xdfa   : > { %10501 = vmatprep.subr.bf16.mxu1 %v18646_v17  ;;  %16831 = vmatprep.subr.bf16.mxu0 %v18647_v34  ;;  %v18731_v17 = vld [vmem:[%s21989_s10 + $0x398] ss:$12 sps:$4 sm:$0xff]  }
 0xdfb   : > { %v18716_v34 = vld [vmem:[%s21989_s10 + $0x40c] ss:$12 sps:$4 sm:$0xff]  }
 0xdfd   : > { %10502 = vmatpush1.bf16.msra.mxu1 %v18644_v25  ;;  %16832 = vmatpush3.bf16.msra.mxu0 %v18648_v62  ;;  %v18714_v25 = vld [vmem:[%s21989_s10 + $0x408] ss:$12 sps:$4 sm:$0xff]   ;;  %v18720_v62 = vld [vmem:[%s21989_s10 + $0x424] ss:$12 sps:$4 sm:$0xff]  }
 0xdfe   : > { %10503 = vmatprep.subr.bf16.mxu1 %v18651_v20  ;;  %16833 = vmatprep.subr.bf16.mxu0 %v18652_v7  ;;  %v18718_v20 = vld [vmem:[%s21989_s10 + $0x420] ss:$12 sps:$4 sm:$0xff]   ;;  %v18725_v7 = vld [vmem:[%s21989_s10 + $0x43c] ss:$12 sps:$4 sm:$0xff]  }
 0xe01   : > { %10504 = vmatpush1.bf16.msra.mxu1 %v18649_v51  ;;  %16834 = vmatpush3.bf16.msra.mxu0 %v18653_v19  ;;  %v18723_v51 = vld [vmem:[%s21989_s10 + $0x438] ss:$12 sps:$4 sm:$0xff]   ;;  %v18730_v19 = vld [vmem:[%s21989_s10 + $0x454] ss:$12 sps:$4 sm:$0xff]  }
 0xe02   : > { %10505 = vmatprep.subr.bf16.mxu1 %v18656_v16  ;;  %16835 = vmatprep.subr.bf16.mxu0 %v18657_v30  ;;  %v18728_v16 = vld [vmem:[%s21989_s10 + $0x450] ss:$12 sps:$4 sm:$0xff]  }
 0xe03   : > { %v18732_v30 = vld [vmem:[%s21989_s10 + $0x470] ss:$12 sps:$4 sm:$0xff]  }
 0xe05   : > { %10506 = vmatpush1.bf16.msra.mxu1 %v18654_v58  ;;  %16836 = vmatpush3.bf16.msra.mxu0 %v18658_v26  ;;  %v18735_v58 = vld [vmem:[%s21989_s10 + $0x46c] ss:$12 sps:$4 sm:$0xff]   ;;  %v18736_v26 = vld [vmem:[%s21989_s10 + $0x3b0] ss:$12 sps:$4 sm:$0xff]  }
 0xe06   : > { %10507 = vmatprep.subr.bf16.mxu1 %v18661_v28  ;;  %16837 = vmatprep.subr.bf16.mxu0 %v18662_v45  ;;  %v18733_v28 = vld [vmem:[%s21989_s10 + $0x468] ss:$12 sps:$4 sm:$0xff]  }
 0xe07   : > { %v18737_v45 = vld [vmem:[%s21989_s10 + $0x488] ss:$12 sps:$4 sm:$0xff]  }
 0xe09   : > { %10508 = vmatpush1.bf16.msra.mxu1 %v18659_v21  ;;  %16838 = vmatpush3.bf16.msra.mxu0 %v18663_v49  ;;  %v18738_v21 = vld [vmem:[%s21989_s10 + $0x480] ss:$12 sps:$4 sm:$0xff]   ;;  %v18740_v49 = vld [vmem:[%s21989_s10 + $0x484] ss:$12 sps:$4 sm:$0xff]  }
 0xe0a   : > { %10509 = vmatprep.subr.bf16.mxu1 %v18666_v37  ;;  %16839 = vmatprep.subr.bf16.mxu0 %v18667_v40  ;;  %v18741_v37 = vld [vmem:[%s21989_s10 + $0x3c8] ss:$12 sps:$4 sm:$0xff]   ;;  %v18742_v40 = vld [vmem:[%s21989_s10 + $0x4a0] ss:$12 sps:$4 sm:$0xff]  }
 0xe0d   : > { %10510 = vmatpush1.bf16.msra.mxu1 %v18664_v48  ;;  %16840 = vmatpush3.bf16.msra.mxu0 %v18668_v11  ;;  %v18745_v48 = vld [vmem:[%s21989_s10 + $0x49c] ss:$12 sps:$4 sm:$0xff]   ;;  %v18746_v11 = vld [vmem:[%s21989_s10 + $0x3e0] ss:$12 sps:$4 sm:$0xff]  }
 0xe0e   : > { %10511 = vmatprep.subr.bf16.mxu1 %v18671_v13  ;;  %17390 = vmatprep.subr.bf16.mxu0 %v19424_v1  ;;  %v18743_v13 = vld [vmem:[%s21989_s10 + $0x498] ss:$12 sps:$4 sm:$0xff]  }
 0xe10   : > { %10612 = vmatmul.mubr.bf16.vlgmr.msra.gmra.mrb[200].mxu0 %v21076_v9 }
 0xe11   : > { %10512 = vmatpush1.bf16.msra.mxu1 %v18669_v42  ;;  %17391 = vmatpush3.bf16.msra.mxu0 %v18672_v33  ;;  %v18747_v42 = vld [vmem:[%s21989_s10 + $0x4b8] ss:$12 sps:$4 sm:$0xff]   ;;  %v18750_v33 = vld [vmem:[%s21989_s10 + $0x4b4] ss:$12 sps:$4 sm:$0xff]  }
 0xe12   : > { %10513 = vmatprep.subr.bf16.mxu1 %v18675_v35  ;;  %17392 = vmatprep.subr.bf16.mxu0 %v19424_v1  ;;  %v18748_v35 = vld [vmem:[%s21989_s10 + $0x4b0] ss:$12 sps:$4 sm:$0xff]  }
 0xe13   : > { %17394 = vmatprep.mubr.msk.bf16.mxu0 %vm19425_vm0, %v19424_v1 }
 0xe15   : > { %10514 = vmatpush1.bf16.msra.mxu1 %v18673_v36  ;;  %17393 = vmatpush3.bf16.msra.mxu0 %v18676_v60  ;;  %v18751_v36 = vld [vmem:[%s21989_s10 + $0x3f8] ss:$12 sps:$4 sm:$0xff]   ;;  %v18752_v60 = vld [vmem:[%s21989_s10 + $0x4d0] ss:$12 sps:$4 sm:$0xff]  }
 0xe16   : > { %10672 = vmatprep.subr.bf16.mxu0 %v20899_v24  ;;  %10515 = vmatprep.subr.bf16.mxu1 %v18679_v46  ;;  %v18755_v46 = vld [vmem:[%s21989_s10 + $0x4cc] ss:$12 sps:$4 sm:$0xff]  }
 0xe18   : > { %17395 = vmatmul.mubr.msk.bf16.vlgmr.msra.gmra.mrb[204].mxu0 %vm10030_vm8, %v21080_v59  ;;  %v18686_v59 = vld [vmem:[%s21990_s11 + $0x10] sm:$0x1f]  }
 0xe19   : > { %10516 = vmatpush1.bf16.msra.mxu1 %v18677_v18  ;;  %10673 = vmatpush1.bf16.msra.mxu0 %v20897_v10  ;;  %v18756_v18 = vld [vmem:[%s21989_s10 + $0x410] ss:$12 sps:$4 sm:$0xff]  }
 0xe1a   : > { %15663 = vmatprep.subr.msk.bf16.mxu0 %vm853_vm1, %v20907_v56  ;;  %10517 = vmatprep.subr.bf16.mxu1 %v18682_v31  ;;  %v18753_v31 = vld [vmem:[%s21989_s10 + $0x4c8] ss:$12 sps:$4 sm:$0xff]  }
 0xe1b   : > { %10704 = vmatprep.mubr.bf16.mxu0 %v19423_v0 }
 0xe1d   : > { %10518 = vmatpush1.bf16.msra.mxu1 %v18680_v47  ;;  %10675 = vmatpush1.bf16.msra.mxu0 %v20910_v44  ;;  %v18760_v47 = vld [vmem:[%s21989_s10 + $0x4e4] ss:$12 sps:$4 sm:$0xff]  }
 0xe1e   : > { %10519 = vmatprep.subr.bf16.mxu1 %v18685_v53  ;;  %17398 = vmatprep.subr.bf16.mxu0 %v19424_v1 }
 0xe20   : > { %15664 = vmatmul.mubr.msk.bf16.vlgmr.msra.gmra.mrb[208].mxu0 %vm9399_vm7, %v18686_v59 }
 0xe21   : > { %10520 = vmatpush1.bf16.msra.mxu1 %v18683_v63  ;;  %17399 = vmatpush3.bf16.msra.mxu0 %v20905_v55 }
 0xe22   : > { %10521 = vmatprep.subr.bf16.mxu1 %v18689_v50  ;;  %17400 = vmatprep.subr.bf16.mxu0 %v19424_v1 }
 0xe23   : > { %17402 = vmatprep.mubr.msk.bf16.mxu0 %vm19425_vm0, %v19424_v1 }
 0xe25   : > { %10522 = vmatpush1.bf16.msra.mxu1 %v18687_v23  ;;  %17401 = vmatpush3.bf16.msra.mxu0 %v20925_v2 }
 0xe26   : > { %10523 = vmatprep.subr.bf16.mxu1 %v18692_v32  ;;  %16853 = vmatprep.subr.bf16.mxu0 %v18717_v27 }
 0xe28   : > { %17403 = vmatmul.mubr.msk.bf16.vlgmr.msra.gmra.mrb[212].mxu0 %vm9399_vm7, %v18686_v59 }
 0xe29   : > { %10524 = vmatpush1.bf16.msra.mxu1 %v18690_v15  ;;  %16854 = vmatpush3.bf16.msra.mxu0 %v18721_v4 }
 0xe2a   : > { %11123 = vmatprep.subr.bf16.mxu1 %v18695_v14  ;;  %16855 = vmatprep.subr.bf16.mxu0 %v18722_v29 }
 0xe2c   : > { %10526 = vmatmul.mubr.bf16.vlgmr.msra.gmra.mrb[216].mxu1 %v21076_v9  ;;  %v18701_v9 = vld [vmem:[%s21989_s10 + $0x394] ss:$12 sps:$4 sm:$0xff]  }
 0xe2d   : > { %11124 = vmatpush1.bf16.msra.mxu1 %v18693_v61  ;;  %16856 = vmatpush3.bf16.msra.mxu0 %v18726_v5 }
 0xe2e   : > { %11125 = vmatprep.subr.bf16.mxu1 %v18698_v41  ;;  %16857 = vmatprep.subr.bf16.mxu0 %v18727_v52 }
 0xe31   : > { %11126 = vmatpush1.bf16.msra.mxu1 %v18696_v38  ;;  %16858 = vmatpush3.bf16.msra.mxu0 %v18731_v17 }
 0xe32   : > { %11127 = vmatprep.subr.bf16.mxu1 %v18701_v9  ;;  %16859 = vmatprep.subr.bf16.mxu0 %v18732_v30 }
 0xe35   : > { %11128 = vmatpush1.bf16.msra.mxu1 %v18699_v12  ;;  %16860 = vmatpush3.bf16.msra.mxu0 %v18736_v26  ;;  %v18758_v26 = vld [vmem:[%s21989_s10 + $0x4e0] ss:$12 sps:$4 sm:$0xff]  }
 0xe36   : > { %11129 = vmatprep.subr.bf16.mxu1 %v18704_v8  ;;  %16861 = vmatprep.subr.bf16.mxu0 %v18737_v45 }
 0xe39   : > { %11130 = vmatpush1.bf16.msra.mxu1 %v18702_v43  ;;  %16862 = vmatpush3.bf16.msra.mxu0 %v18741_v37 }
 0xe3a   : > { %11131 = vmatprep.subr.bf16.mxu1 %v18707_v22  ;;  %16863 = vmatprep.subr.bf16.mxu0 %v18742_v40  ;;  %v18768_v40 = vld [vmem:[%s21989_s10 + $0x514] ss:$12 sps:$4 sm:$0xff]  }
 0xe3d   : > { %11132 = vmatpush1.bf16.msra.mxu1 %v18705_v39  ;;  %16864 = vmatpush3.bf16.msra.mxu0 %v18746_v11 }
 0xe3e   : > { %11133 = vmatprep.subr.bf16.mxu1 %v18710_v3  ;;  %16865 = vmatprep.subr.bf16.mxu0 %v18747_v42 }
 0xe41   : > { %11134 = vmatpush1.bf16.msra.mxu1 %v18708_v6  ;;  %16866 = vmatpush3.bf16.msra.mxu0 %v18751_v36 }
 0xe42   : > { %11135 = vmatprep.subr.bf16.mxu1 %v18713_v57  ;;  %16867 = vmatprep.subr.bf16.mxu0 %v18752_v60 }
 0xe45   : > { %11136 = vmatpush1.bf16.msra.mxu1 %v18711_v54  ;;  %16868 = vmatpush3.bf16.msra.mxu0 %v18756_v18 }
 0xe46   : > { %11137 = vmatprep.subr.bf16.mxu1 %v18716_v34  ;;  %17406 = vmatprep.subr.bf16.mxu0 %v19424_v1 }
 0xe49   : > { %11138 = vmatpush1.bf16.msra.mxu1 %v18714_v25 }
 0xe4a   : > { %11139 = vmatprep.subr.bf16.mxu1 %v18720_v62 }
 0xe4d   : > { %11140 = vmatpush1.bf16.msra.mxu1 %v18718_v20 }
 0xe4e   : > { %11141 = vmatprep.subr.bf16.mxu1 %v18725_v7 }
 0xe51   : > { %11142 = vmatpush1.bf16.msra.mxu1 %v18723_v51 }
 0xe52   : > { %11143 = vmatprep.subr.bf16.mxu1 %v18730_v19 }
 0xe55   : > { %11144 = vmatpush1.bf16.msra.mxu1 %v18728_v16 }
 0xe56   : > { %11145 = vmatprep.subr.bf16.mxu1 %v18735_v58  ;;  %v18757_v58 = vld [vmem:[%s21989_s10 + $0x4e8] ss:$12 sps:$4 sm:$0xff]  }
 0xe59   : > { %11146 = vmatpush1.bf16.msra.mxu1 %v18733_v28  ;;  %v18764_v28 = vld [vmem:[%s21989_s10 + $0x4fc] ss:$12 sps:$4 sm:$0xff]  }
 0xe5a   : > { %11147 = vmatprep.subr.bf16.mxu1 %v18740_v49  ;;  %v18762_v49 = vld [vmem:[%s21989_s10 + $0x4f8] ss:$12 sps:$4 sm:$0xff]  }
 0xe5d   : > { %11148 = vmatpush1.bf16.msra.mxu1 %v18738_v21  ;;  %v18761_v21 = vld [vmem:[%s21989_s10 + $0x500] ss:$12 sps:$4 sm:$0xff]  }
 0xe5e   : > { %11149 = vmatprep.subr.bf16.mxu1 %v18745_v48 }
 0xe61   : > { %11150 = vmatpush1.bf16.msra.mxu1 %v18743_v13 }
 0xe62   : > { %11151 = vmatprep.subr.bf16.mxu1 %v18750_v33 }
 0xe65   : > { %11152 = vmatpush1.bf16.msra.mxu1 %v18748_v35 }
 0xe66   : > { %11153 = vmatprep.subr.bf16.mxu1 %v18755_v46 }
 0xe69   : > { %11154 = vmatpush1.bf16.msra.mxu1 %v18753_v31 }
 0xe6a   : > { %11166 = vmatprep.subr.bf16.mxu1 %v18760_v47  ;;  %v18771_v47 = vld [vmem:[%s21989_s10 + $0x52c] ss:$12 sps:$4 sm:$0xff]  }
 0xeb3   : > { %v16816_v53 = vpop.f32.mrb[188].mxu0 }
 0xeb4   : > { %v16817_v59 = vpop.f32.mrb[189].mxu0 }
 0xeb5   : > { %v16818_v63 = vadd.f32 %v16817_v59, %v16816_v53  ;;  %v16819_v50 = vpop.f32.mrb[190].mxu0  ;;  %v18765_v53 = vld [vmem:[%s21990_s11 + $0x18] sm:$0x1f]  }
 0xeb6   : > { %v16820_v23 = vpop.f32.mrb[191].mxu0  ;;  %v18793_v59 = vld [vmem:[%s21989_s10 + $0x5d8] ss:$12 sps:$4 sm:$0xff]  }
 0xeb7   : > { %v16821_v32 = vadd.f32 %v16820_v23, %v16819_v50  ;;  %v18775_v50 = vld [vmem:[%s21989_s10 + $0x558] ss:$12 sps:$4 sm:$0xff]   ;;  %v18798_v23 = vld [vmem:[%s21989_s10 + $0x5f0] ss:$12 sps:$4 sm:$0xff]  }
 0xebb   : > { %v10195_v15 = vpop.f32.mrb[192].mxu0 }
 0xebc   : > { %v10196_v61 = vadd.f32 %v16818_v63, %v10195_v15  ;;  %v17388_v14 = vpop.f32.mrb[193].mxu0  ;;  %v18777_v63 = vld [vmem:[%s21989_s10 + $0x55c] ss:$12 sps:$4 sm:$0xff]  }
 0xebd   : > { %v10198_v41 = vpop.f32.mrb[194].mxu0  ;;  %v18778_v15 = vld [vmem:[%s21989_s10 + $0x570] ss:$12 sps:$4 sm:$0xff]   ;;  %v18783_v14 = vld [vmem:[%s21989_s10 + $0x58c] ss:$12 sps:$4 sm:$0xff]  }
 0xebe   : > { %v10199_v38 = vadd.f32 %v16821_v32, %v10198_v41  ;;  %v17389_v9 = vpop.f32.mrb[195].mxu0  ;;  %v18780_v32 = vld [vmem:[%s21989_s10 + $0x574] ss:$12 sps:$4 sm:$0xff]  }
 0xebf   : > { %v18781_v41 = vld [vmem:[%s21989_s10 + $0x588] ss:$12 sps:$4 sm:$0xff]   ;;  %v18784_v9 = vld [vmem:[%s21989_s10 + $0x5a0] ss:$12 sps:$4 sm:$0xff]  }
 0xec3   : > { %v10570_v12 = vpop.f32.mrb[196].mxu0 }
 0xec4   : > { %v10572_v8 = vpop.f32.mrb[197].mxu0 }
 0xec5   : > { %v10574_v43 = vpop.f32.mrb[198].mxu0 }
 0xec6   : > { %v10576_v22 = vpop.f32.mrb[199].mxu0 }
 0xee3   : > { %v16841_v39 = vpop.f32.mrb[200].mxu0 }
 0xee4   : > { %v16842_v3 = vpop.f32.mrb[201].mxu0 }
 0xee5   : > { %v16843_v27 = vadd.f32 %v16842_v3, %v16841_v39  ;;  %v16844_v4 = vpop.f32.mrb[202].mxu0  ;;  %v18797_v39 = vld [vmem:[%s21989_s10 + $0x5ec] ss:$12 sps:$4 sm:$0xff]   ;;  %v18795_v3 = vld [vmem:[%s21989_s10 + $0x5e8] ss:$12 sps:$4 sm:$0xff]  }
 0xee6   : > { %v16845_v29 = vpop.f32.mrb[203].mxu0 }
 0xee7   : > { %v16846_v6 = vadd.f32 %v16845_v29, %v16844_v4  ;;  %v10614_v5 = vadd.f32 %v16843_v27, %v10196_v61  ;;  %v18803_v61 = vld [vmem:[%s21989_s10 + $0x608] ss:$12 sps:$4 sm:$0xff]   ;;  %v18802_v27 = vld [vmem:[%s21989_s10 + $0x604] ss:$12 sps:$4 sm:$0xff]   ;;  %v18800_v4 = vld [vmem:[%s21989_s10 + $0x600] ss:$12 sps:$4 sm:$0xff]  }
 0xee8   : > { %v18804_v29 = vld [vmem:[%s21989_s10 + $0x548] ss:$12 sps:$4 sm:$0xff]  }
 0xee9   : > { %v10617_v57 = vadd.f32 %v16846_v6, %v10199_v38  ;;  %v18786_v38 = vld [vmem:[%s21989_s10 + $0x5a4] ss:$12 sps:$4 sm:$0xff]   ;;  %v18807_v6 = vld [vmem:[%s21989_s10 + $0x61c] ss:$12 sps:$4 sm:$0xff]  }
 0xeeb   : > { %v10654_v52 = vpop.f32.mrb[204].mxu0 }
 0xeec   : > { %v21443_v54 = vadd.f32 %v10654_v52, %v10614_v5  ;;  %v17396_v17 = vpop.f32.mrb[205].mxu0  ;;  %v18808_v5 = vld [vmem:[%s21989_s10 + $0x620] ss:$12 sps:$4 sm:$0xff]  }
 0xeed   : > { %v10657_v34 = vpop.f32.mrb[206].mxu0  ;;  %v18809_v52 = vld [vmem:[%s21989_s10 + $0x560] ss:$12 sps:$4 sm:$0xff]  }
 0xeee   : > { %v21445_v25 = vadd.f32 %v10657_v34, %v10617_v57  ;;  %v17397_v62 = vpop.f32.mrb[207].mxu0  ;;  %v18805_v57 = vld [vmem:[%s21989_s10 + $0x618] ss:$12 sps:$4 sm:$0xff]   ;;  %v18812_v17 = vld [vmem:[%s21989_s10 + $0x634] ss:$12 sps:$4 sm:$0xff]  }
 0xeef   : > { %v18813_v34 = vld [vmem:[%s21989_s10 + $0x638] ss:$12 sps:$4 sm:$0xff]   ;;  %v18810_v62 = vld [vmem:[%s21989_s10 + $0x630] ss:$12 sps:$4 sm:$0xff]  }
 0xef3   : > { %v10706_v20 = vpop.f32.mrb[208].mxu0 }
 0xef4   : > { %v10708_v7 = vpop.f32.mrb[209].mxu0 }
 0xef5   : > { %v10710_v51 = vpop.f32.mrb[210].mxu0 }
 0xef6   : > { %v10756_v19 = vpack.c.bf16 %v10710_v51, %v10706_v20  ;;  %v10712_v16 = vpop.f32.mrb[211].mxu0  ;;  %v18814_v20 = vld [vmem:[%s21989_s10 + $0x578] ss:$12 sps:$4 sm:$0xff]   ;;  %v18818_v51 = vld [vmem:[%s21989_s10 + $0x650] ss:$12 sps:$4 sm:$0xff]  }
 0xef7   : > { %v10757_v30 = vpack.c.bf16 %v10712_v16, %v10708_v7  ;;  %v18817_v7 = vld [vmem:[%s21989_s10 + $0x64c] ss:$12 sps:$4 sm:$0xff]   ;;  %v18819_v16 = vld [vmem:[%s21989_s10 + $0x590] ss:$12 sps:$4 sm:$0xff]  }
 0xef9   : > { %11155 = vmatprep.mubr.bf16.mxu1 %v10757_v30  ;;  %11241 = vmatprep.mubr.bf16.mxu0 %v10757_v30  ;;  %v18820_v30 = vld [vmem:[%s21989_s10 + $0x660] ss:$12 sps:$4 sm:$0xff]  }
 0xefa   : > { %11156 = vmatmul.mubr.bf16.vlgmr.msra.gmra.mrb[220].mxu1 %v10756_v19  ;;  %11242 = vmatmul.mubr.bf16.vlgmr.msra.gmra.mrb[216].mxu0 %v10756_v19  ;;  %v18815_v19 = vld [vmem:[%s21989_s10 + $0x648] ss:$12 sps:$4 sm:$0xff]  }
 0xefb   : > { %17407 = vmatpush3.bf16.msra.mxu0 %v18757_v58  ;;  %v10749_v45 = vpop.f32.mrb[212].mxu0  ;;  %11167 = vmatpush1.bf16.msra.mxu1 %v18758_v26  ;;  %v18822_v58 = vld [vmem:[%s21989_s10 + $0x664] ss:$12 sps:$4 sm:$0xff]   ;;  %v18823_v26 = vld [vmem:[%s21989_s10 + $0x668] ss:$12 sps:$4 sm:$0xff]  }
 0xefc   : > { %v17404_v37 = vpop.f32.mrb[213].mxu0  ;;  %17408 = vmatprep.subr.bf16.mxu0 %v19424_v1  ;;  %17410 = vmatprep.mubr.msk.bf16.mxu0 %vm19425_vm0, %v19424_v1 }
 0xefd   : > { %v10752_v48 = vpop.f32.mrb[214].mxu0  ;;  %11168 = vmatprep.subr.bf16.mxu1 %v18764_v28  ;;  %11198 = vmatprep.mubr.bf16.mxu1 %v19423_v0  ;;  %v18824_v28 = vld [vmem:[%s21989_s10 + $0x5a8] ss:$12 sps:$4 sm:$0xff]   ;;  %v18829_v37 = vld [vmem:[%s21989_s10 + $0x5c0] ss:$12 sps:$4 sm:$0xff]  }
 0xefe   : > { %v10758_v11 = vpack.c.bf16 %v10752_v48, %v10749_v45  ;;  %v17405_v13 = vpop.f32.mrb[215].mxu0  ;;  %v18827_v45 = vld [vmem:[%s21989_s10 + $0x67c] ss:$12 sps:$4 sm:$0xff]  }
 0xeff   : > { %17409 = vmatpush3.bf16.msra.mxu0 %v18761_v21  ;;  %v10527_v42 = vpop.f32.mrb[216].mxu1  ;;  %11169 = vmatpush1.bf16.msra.mxu1 %v18762_v49  ;;  %v18828_v21 = vld [vmem:[%s21989_s10 + $0x680] ss:$12 sps:$4 sm:$0xff]   ;;  %v18825_v49 = vld [vmem:[%s21989_s10 + $0x678] ss:$12 sps:$4 sm:$0xff]  }
 0xf00   : > { %v21469_v33 = vadd.f32 %v10570_v12, %v10527_v42  ;;  %11308 = vmatprep.subr.bf16.mxu0 %v20899_v24  ;;  %v10529_v35 = vpop.f32.mrb[217].mxu1  ;;  %11759 = vmatprep.subr.bf16.mxu1 %v18768_v40  ;;  %v18766_v24 = vld [vmem:[%s21989_s10 + $0x510] ss:$12 sps:$4 sm:$0xff]   ;;  %v18833_v40 = vld [vmem:[%s21989_s10 + $0x694] ss:$12 sps:$4 sm:$0xff]  }
 0xf01   : > { %v21472_v36 = vadd.f32 %v10572_v8, %v10529_v35  ;;  %v10531_v60 = vpop.f32.mrb[218].mxu1  ;;  %v18789_v12 = vld [vmem:[%s21989_s10 + $0x5bc] ss:$12 sps:$4 sm:$0xff]   ;;  %v18787_v8 = vld [vmem:[%s21989_s10 + $0x5b8] ss:$12 sps:$4 sm:$0xff]  }
 0xf02   : > { %v21474_v46 = vadd.f32 %v10574_v43, %v10531_v60  ;;  %v10533_v18 = vpop.f32.mrb[219].mxu1  ;;  %17411 = vmatmul.mubr.msk.bf16.vlgmr.msra.gmra.mrb[220].mxu0 %vm10030_vm8, %v10758_v11  ;;  %v18792_v43 = vld [vmem:[%s21989_s10 + $0x5d4] ss:$12 sps:$4 sm:$0xff]  }
 0xf03   : > { %v21477_v31 = vadd.f32 %v10576_v22, %v10533_v18  ;;  %11309 = vmatpush1.bf16.msra.mxu0 %v20897_v10  ;;  %11340 = vmatprep.mubr.bf16.mxu0 %v19423_v0  ;;  %v18769_v10 = vld [vmem:[%s21989_s10 + $0x528] ss:$12 sps:$4 sm:$0xff]   ;;  %v18790_v22 = vld [vmem:[%s21989_s10 + $0x5d0] ss:$12 sps:$4 sm:$0xff]  }
 0xf04   : > { %15797 = vmatprep.subr.msk.bf16.mxu0 %vm853_vm1, %v20907_v56  ;;  %v18774_v56 = vld [vmem:[%s21989_s10 + $0x544] ss:$12 sps:$4 sm:$0xff]  }
 0xf06   : > { %15792 = vmatmul.mubr.msk.bf16.vlgmr.msra.gmra.mrb[220].mxu1 %vm10030_vm8, %v10758_v11 }
 0xf07   : > { %11311 = vmatpush1.bf16.msra.mxu0 %v20910_v44  ;;  %11760 = vmatpush1.bf16.msra.mxu1 %v18766_v24  ;;  %v18772_v44 = vld [vmem:[%s21989_s10 + $0x540] ss:$12 sps:$4 sm:$0xff]  }
 0xf08   : > { %17414 = vmatprep.subr.bf16.mxu0 %v19424_v1  ;;  %11761 = vmatprep.subr.bf16.mxu1 %v18771_v47 }
 0xf0a   : > { %15798 = vmatmul.mubr.msk.bf16.vlgmr.msra.gmra.mrb[224].mxu0 %vm9399_vm7, %v18765_v53 }
 0xf0b   : > { %17415 = vmatpush3.bf16.msra.mxu0 %v20905_v55  ;;  %17418 = vmatprep.mubr.msk.bf16.mxu0 %vm19425_vm0, %v19424_v1  ;;  %v18794_v55 = vld [vmem:[%s21989_s10 + $0x518] ss:$12 sps:$4 sm:$0xff]  }
 0xf0c   : > { %17416 = vmatprep.subr.bf16.mxu0 %v19424_v1  ;;  %11762 = vmatpush1.bf16.msra.mxu1 %v18769_v10 }
 0xf0d   : > { %11763 = vmatprep.subr.bf16.mxu1 %v18774_v56 }
 0xf0f   : > { %17417 = vmatpush3.bf16.msra.mxu0 %v20925_v2  ;;  %v18799_v2 = vld [vmem:[%s21989_s10 + $0x530] ss:$12 sps:$4 sm:$0xff]  }
 0xf10   : > { %11764 = vmatpush1.bf16.msra.mxu1 %v18772_v44  ;;  %16881 = vmatprep.subr.bf16.mxu0 %v18793_v59 }
 0xf11   : > { %11765 = vmatprep.subr.bf16.mxu1 %v18777_v63 }
 0xf12   : > { %17419 = vmatmul.mubr.msk.bf16.vlgmr.msra.gmra.mrb[228].mxu0 %vm9399_vm7, %v18765_v53 }
 0xf13   : > { %16882 = vmatpush3.bf16.msra.mxu0 %v18794_v55 }
 0xf14   : > { %11766 = vmatpush1.bf16.msra.mxu1 %v18775_v50  ;;  %16883 = vmatprep.subr.bf16.mxu0 %v18798_v23 }
 0xf15   : > { %11767 = vmatprep.subr.bf16.mxu1 %v18780_v32 }
 0xf17   : > { %16884 = vmatpush3.bf16.msra.mxu0 %v18799_v2 }
 0xf18   : > { %11768 = vmatpush1.bf16.msra.mxu1 %v18778_v15  ;;  %16885 = vmatprep.subr.bf16.mxu0 %v18803_v61  ;;  %v18830_v15 = vld [vmem:[%s21989_s10 + $0x698] ss:$12 sps:$4 sm:$0xff]   ;;  %v18831_v61 = vld [vmem:[%s21989_s10 + $0x690] ss:$12 sps:$4 sm:$0xff]  }
 0xf19   : > { %11769 = vmatprep.subr.bf16.mxu1 %v18783_v14  ;;  %v18834_v14 = vld [vmem:[%s21989_s10 + $0x6b0] ss:$12 sps:$4 sm:$0xff]  }
 0xf1b   : > { %16886 = vmatpush3.bf16.msra.mxu0 %v18804_v29 }
 0xf1c   : > { %11770 = vmatpush1.bf16.msra.mxu1 %v18781_v41  ;;  %16887 = vmatprep.subr.bf16.mxu0 %v18808_v5  ;;  %v18835_v41 = vld [vmem:[%s21989_s10 + $0x6a8] ss:$12 sps:$4 sm:$0xff]  }
 0xf1d   : > { %11771 = vmatprep.subr.bf16.mxu1 %v18786_v38 }
 0xf1f   : > { %16888 = vmatpush3.bf16.msra.mxu0 %v18809_v52 }
 0xf20   : > { %11772 = vmatpush1.bf16.msra.mxu1 %v18784_v9  ;;  %16889 = vmatprep.subr.bf16.mxu0 %v18813_v34 }
 0xf21   : > { %11773 = vmatprep.subr.bf16.mxu1 %v18789_v12 }
 0xf23   : > { %16890 = vmatpush3.bf16.msra.mxu0 %v18814_v20  ;;  %v11938_v20 = vld [vmem:[#allocation10 + $0x28] sm:$0x3] }
 0xf24   : > { %11774 = vmatpush1.bf16.msra.mxu1 %v18787_v8  ;;  %16891 = vmatprep.subr.bf16.mxu0 %v18818_v51  ;;  %v11933_v51 = vld [vmem:[#allocation10] sm:$0xff] }
 0xf25   : > { %11775 = vmatprep.subr.bf16.mxu1 %v18792_v43 }
 0xf27   : > { %16892 = vmatpush3.bf16.msra.mxu0 %v18819_v16 }
 0xf28   : > { %11776 = vmatpush1.bf16.msra.mxu1 %v18790_v22  ;;  %16893 = vmatprep.subr.bf16.mxu0 %v18823_v26  ;;  %v11934_v26 = vld [vmem:[#allocation10 + $0x8] sm:$0xff] }
 0xf29   : > { %11777 = vmatprep.subr.bf16.mxu1 %v18797_v39 }
 0xf2b   : > { %16894 = vmatpush3.bf16.msra.mxu0 %v18824_v28 }
 0xf2c   : > { %11778 = vmatpush1.bf16.msra.mxu1 %v18795_v3  ;;  %16895 = vmatprep.subr.bf16.mxu0 %v18828_v21  ;;  %v11936_v21 = vld [vmem:[#allocation10 + $0x18] sm:$0x3] }
 0xf2d   : > { %11779 = vmatprep.subr.bf16.mxu1 %v18802_v27 }
 0xf2f   : > { %16896 = vmatpush3.bf16.msra.mxu0 %v18829_v37 }
 0xf30   : > { %11780 = vmatpush1.bf16.msra.mxu1 %v18800_v4  ;;  %17422 = vmatprep.subr.bf16.mxu0 %v19424_v1 }
 0xf31   : > { %11781 = vmatprep.subr.bf16.mxu1 %v18807_v6 }
 0xf34   : > { %11782 = vmatpush1.bf16.msra.mxu1 %v18805_v57  ;;  %v11935_v57 = vld [vmem:[#allocation10 + $0x10] sm:$0xff] }
 0xf35   : > { %11783 = vmatprep.subr.bf16.mxu1 %v18812_v17 }
 0xf38   : > { %11784 = vmatpush1.bf16.msra.mxu1 %v18810_v62 }
 0xf39   : > { %11785 = vmatprep.subr.bf16.mxu1 %v18817_v7 }
 0xf3c   : > { %11786 = vmatpush1.bf16.msra.mxu1 %v18815_v19 }
 0xf3d   : > { %11787 = vmatprep.subr.bf16.mxu1 %v18822_v58 }
 0xf40   : > { %11788 = vmatpush1.bf16.msra.mxu1 %v18820_v30 }
 0xf41   : > { %11789 = vmatprep.subr.bf16.mxu1 %v18827_v45 }
 0xf44   : > { %11790 = vmatpush1.bf16.msra.mxu1 %v18825_v49 }
 0xf45   : > { %11802 = vmatprep.subr.bf16.mxu1 %v18833_v40 }
 0xfcd   : > { %v16869_v48 = vpop.f32.mrb[216].mxu0 }
 0xfce   : > { %v16870_v11 = vpop.f32.mrb[217].mxu0 }
 0xfcf   : > { %v16871_v13 = vadd.f32 %v16870_v11, %v16869_v48  ;;  %v16872_v42 = vpop.f32.mrb[218].mxu0 }
 0xfd0   : > { %v16873_v35 = vpop.f32.mrb[219].mxu0 }
 0xfd1   : > { %v16874_v60 = vadd.f32 %v16873_v35, %v16872_v42 }
 0xfd5   : > { %v11284_v18 = vpop.f32.mrb[220].mxu0 }
 0xfd6   : > { %v11285_v24 = vadd.f32 %v16871_v13, %v11284_v18  ;;  %v17412_v47 = vpop.f32.mrb[221].mxu0  ;;  %v11937_v13 = vld [vmem:[#allocation10 + $0x20] sm:$0x3] }
 0xfd7   : > { %v11287_v53 = vpop.f32.mrb[222].mxu0 }
 0xfd8   : > { %v11293_v10 = vadd.f32 %v11285_v24, %v21443_v54  ;;  %v11288_v56 = vadd.f32 %v16874_v60, %v11287_v53  ;;  %v17413_v44 = vpop.f32.mrb[223].mxu0  ;;  %v18837_v54 = vld [vmem:[%s21989_s10 + $0x6ac] ss:$12 sps:$4 sm:$0xff]  }
 0xfda   : > { %v11296_v59 = vadd.f32 %v11288_v56, %v21445_v25 }
 0xfdd   : > { %v11342_v63 = vpop.f32.mrb[224].mxu0 }
 0xfde   : > { %v11344_v55 = vpop.f32.mrb[225].mxu0 }
 0xfdf   : > { %v11346_v50 = vpop.f32.mrb[226].mxu0 }
 0xfe0   : > { %v11392_v23 = vpack.c.bf16 %v11346_v50, %v11342_v63  ;;  %v11348_v32 = vpop.f32.mrb[227].mxu0 }
 0xfe1   : > { %v11393_v2 = vpack.c.bf16 %v11348_v32, %v11344_v55  ;;  %v11960_v32 = vld [vmem:[%s22041_s24] sm:$0x3] }
 0xfe3   : > { %11791 = vmatprep.mubr.bf16.mxu1 %v11393_v2  ;;  %11877 = vmatprep.mubr.bf16.mxu0 %v11393_v2 }
 0xfe4   : > { %11792 = vmatmul.mubr.bf16.vlgmr.msra.gmra.mrb[220].mxu1 %v11392_v23  ;;  %11878 = vmatmul.mubr.bf16.vlgmr.msra.gmra.mrb[232].mxu0 %v11392_v23 }
 0xfe5   : > { %17423 = vmatpush3.bf16.msra.mxu0 %v18830_v15  ;;  %v11385_v25 = vpop.f32.mrb[228].mxu0  ;;  %11803 = vmatpush1.bf16.msra.mxu1 %v18831_v61  ;;  %v15931_v15 = vld [vmem:[%s22041_s24 + $0x2] sm:$0x3]  ;;  %v18840_v61 = vld [vmem:[#allocation12 + $0x144] ss:$8 sps:$4 sm:$0xff]  }
 0xfe6   : > { %v17420_v38 = vpop.f32.mrb[229].mxu0  ;;  %17424 = vmatprep.subr.bf16.mxu0 %v19424_v1  ;;  %17426 = vmatprep.mubr.msk.bf16.mxu0 %vm19425_vm0, %v19424_v1 }
 0xfe7   : > { %v11388_v9 = vpop.f32.mrb[230].mxu0  ;;  %11804 = vmatprep.subr.bf16.mxu1 %v18837_v54  ;;  %11834 = vmatprep.mubr.bf16.mxu1 %v19423_v0  ;;  %v18838_v54 = vld [vmem:[#allocation12 + $0x140] ss:$8 sps:$4 sm:$0xff]  }
 0xfe8   : > { %v11394_v12 = vpack.c.bf16 %v11388_v9, %v11385_v25  ;;  %v17421_v8 = vpop.f32.mrb[231].mxu0  ;;  %v18843_v25 = vld [vmem:[#allocation12 + $0x154] ss:$8 sps:$4 sm:$0xff]   ;;  %v18844_v38 = vld [vmem:[#allocation12 + $0x160] ss:$8 sps:$4 sm:$0xff]  }
 0xfe9   : > { %17425 = vmatpush3.bf16.msra.mxu0 %v18834_v14  ;;  %11805 = vmatpush1.bf16.msra.mxu1 %v18835_v41  ;;  %v18841_v14 = vld [vmem:[#allocation12 + $0x150] ss:$8 sps:$4 sm:$0xff]   ;;  %v18846_v41 = vld [vmem:[#allocation12 + $0x164] ss:$8 sps:$4 sm:$0xff]   ;;  %v18849_v9 = vld [vmem:[#allocation12 + $0x174] ss:$8 sps:$4 sm:$0xff]  }
 0xfea   : > { %v18852_v8 = vld [vmem:[#allocation12 + $0x184] ss:$8 sps:$4 sm:$0xff]  }
 0xfec   : > { %17427 = vmatmul.mubr.msk.bf16.vlgmr.msra.gmra.mrb[236].mxu0 %vm10030_vm8, %v11394_v12 }
 0xfed   : > { %12007 = vmatprep.mubr.bf16.mxu0 %v19423_v0 }
 0xff0   : > { %15926 = vmatmul.mubr.msk.bf16.vlgmr.msra.gmra.mrb[220].mxu1 %vm10030_vm8, %v11394_v12  ;;  %v18847_v12 = vld [vmem:[#allocation12 + $0x170] ss:$8 sps:$4 sm:$0xff]  }
 0xff1   : > { %12506 = vmatprep.mubr.bf16.mxu1 %v19423_v0 }
0x10b7   : > { %v16897_v43 = vpop.f32.mrb[232].mxu0 }
0x10b8   : > { %v16898_v22 = vpop.f32.mrb[233].mxu0 }
0x10b9   : > { %v16899_v39 = vadd.f32 %v16898_v22, %v16897_v43  ;;  %v16900_v3 = vpop.f32.mrb[234].mxu0  ;;  %v18850_v43 = vld [vmem:[#allocation12 + $0x180] ss:$8 sps:$4 sm:$0xff]   ;;  %v18855_v22 = vld [vmem:[#allocation12 + $0x194] ss:$8 sps:$4 sm:$0xff]  }
0x10ba   : > { %v16901_v27 = vpop.f32.mrb[235].mxu0 }
0x10bb   : > { %v16902_v4 = vadd.f32 %v16901_v27, %v16900_v3  ;;  %v18858_v3 = vld [vmem:[#allocation12 + $0x1a4] ss:$8 sps:$4 sm:$0xff]   ;;  %v18856_v27 = vld [vmem:[#allocation12 + $0x1a0] ss:$8 sps:$4 sm:$0xff]  }
0x10bf   : > { %v11920_v29 = vpop.f32.mrb[236].mxu0 }
0x10c0   : > { %v11921_v6 = vadd.f32 %v16899_v39, %v11920_v29  ;;  %v17428_v5 = vpop.f32.mrb[237].mxu0  ;;  %v18853_v39 = vld [vmem:[#allocation12 + $0x190] ss:$8 sps:$4 sm:$0xff]  }
0x10c1   : > { %v11923_v52 = vpop.f32.mrb[238].mxu0  ;;  %v18859_v29 = vld [vmem:[#allocation12 + $0x1b0] ss:$8 sps:$4 sm:$0xff]   ;;  %v18862_v5 = vld [vmem:[#allocation12 + $0x1c0] ss:$8 sps:$4 sm:$0xff]  }
0x10c2   : > { %v11929_v17 = vadd.f32 %v11921_v6, %v11293_v10  ;;  %v11924_v34 = vadd.f32 %v16902_v4, %v11923_v52  ;;  %v17429_v62 = vpop.f32.mrb[239].mxu0  ;;  %v18861_v4 = vld [vmem:[#allocation12 + $0x1b4] ss:$8 sps:$4 sm:$0xff]   ;;  %v18864_v6 = vld [vmem:[#allocation12 + $0x1c4] ss:$8 sps:$4 sm:$0xff]  }
0x10c3   : > { %v11836_v7 = vpop.f32.mrb[220].mxu1  ;;  %v18865_v52 = vld [vmem:[#allocation12 + $0x1d0] ss:$8 sps:$4 sm:$0xff]   ;;  %v18873_v62 = vld [vmem:[#allocation12 + $0x1f4] ss:$8 sps:$4 sm:$0xff]  }
0x10c4   : > { %v11941_v19 = vadd.f32 %v11935_v57, %v11929_v17  ;;  %v11932_v16 = vadd.f32 %v11924_v34, %v11296_v59  ;;  %v17455_v30 = vadd.f32 %v21469_v33, %v11836_v7  ;;  %v11838_v58 = vpop.f32.mrb[221].mxu1  ;;  %v18867_v57 = vld [vmem:[#allocation12 + $0x1d4] ss:$8 sps:$4 sm:$0xff]   ;;  %v18870_v17 = vld [vmem:[#allocation12 + $0x1e4] ss:$8 sps:$4 sm:$0xff]  }
0x10c5   : > { %v17457_v28 = vadd.f32 %v21472_v36, %v11838_v58  ;;  %v11840_v45 = vpop.f32.mrb[222].mxu1  ;;  %v18868_v34 = vld [vmem:[#allocation12 + $0x1e0] ss:$8 sps:$4 sm:$0xff]  }
0x10c6   : > { %v11947_v49 = vmul.f32 0.2, %v11941_v19  ;;  %v11944_v37 = vadd.f32 %v11938_v20, %v11932_v16  ;;  %v11939_v40 = vadd.f32 %v17455_v30, %v11933_v51  ;;  %v17459_v48 = vadd.f32 %v21474_v46, %v11840_v45  ;;  %v11842_v11 = vpop.f32.mrb[223].mxu1  ;;  %v18871_v20 = vld [vmem:[#allocation12 + $0x1f0] ss:$8 sps:$4 sm:$0xff]  }
0x10c7   : > { %v11940_v42 = vadd.f32 %v17457_v28, %v11934_v26  ;;  %v17461_v35 = vadd.f32 %v21477_v31, %v11842_v11  ;;  %v18874_v7 = vld [vmem:[#allocation12 + $0x200] ss:$8 sps:$4 sm:$0xff]   ;;  %v18876_v51 = vld [vmem:[#allocation12 + $0x204] ss:$8 sps:$4 sm:$0xff]   ;;  %v18877_v16 = vld [vmem:[#allocation12 + $0x210] ss:$8 sps:$4 sm:$0xff]  }
0x10c8   : > { %v11950_v60 = vmul.f32 0.2, %v11944_v37  ;;  %v11945_v18 = vmul.f32 0.2, %v11939_v40  ;;  %v11942_v24 = vadd.f32 %v17459_v48, %v11936_v21  ;;  %v11953_v53 = vmax.f32 %v11941_v19, %v11947_v49  ;;  %v18879_v19 = vld [vmem:[#allocation12 + $0x214] ss:$8 sps:$4 sm:$0xff]  }
0x10c9   : > { %v11946_v33 = vmul.f32 0.2, %v11940_v42  ;;  %v11943_v47 = vadd.f32 %v17461_v35, %v11937_v13  ;;  %v18882_v30 = vld [vmem:[#allocation12 + $0x244] ss:$8 sps:$4 sm:$0xff]   ;;  %v18880_v58 = vld [vmem:[#allocation12 + $0x240] ss:$8 sps:$4 sm:$0xff]  }
0x10ca   : > { %v11956_v10 = vmax.f32 %v11944_v37, %v11950_v60  ;;  %v11948_v36 = vmul.f32 0.2, %v11942_v24  ;;  %v11951_v44 = vmax.f32 %v11939_v40, %v11945_v18  ;;  %12474 = vmatprep.subr.bf16.mxu1 %v18882_v30  ;;  %v18883_v26 = vld [vmem:[#allocation12 + $0x220] ss:$8 sps:$4 sm:$0xff]   ;;  %v18885_v28 = vld [vmem:[#allocation12 + $0x224] ss:$8 sps:$4 sm:$0xff]  }
0x10cb   : > { %v11949_v56 = vmul.f32 0.2, %v11943_v47  ;;  %v11952_v55 = vmax.f32 %v11940_v42, %v11946_v33  ;;  %12475 = vmatpush1.bf16.msra.mxu1 %v18880_v58  ;;  %v18886_v45 = vld [vmem:[#allocation12 + $0x250] ss:$8 sps:$4 sm:$0xff]   ;;  %v18888_v21 = vld [vmem:[#allocation12 + $0x254] ss:$8 sps:$4 sm:$0xff]  }
0x10cc   : > { %v11954_v59 = vmax.f32 %v11942_v24, %v11948_v36  ;;  %v11959_v63 = vpack.c.bf16 %v11956_v10, %v11953_v53  ;;  %12476 = vmatprep.subr.bf16.mxu1 %v18888_v21  ;;  %v18891_v49 = vld [vmem:[#allocation12 + $0x234] ss:$8 sps:$4 sm:$0xff]   ;;  %v18889_v37 = vld [vmem:[#allocation12 + $0x230] ss:$8 sps:$4 sm:$0xff]   ;;  %v18894_v40 = vld [vmem:[#allocation12 + $0x264] ss:$8 sps:$4 sm:$0xff]  }
0x10cd   : > { %v11955_v50 = vmax.f32 %v11943_v47, %v11949_v56  ;;  %v18892_v48 = vld [vmem:[#allocation12 + $0x260] ss:$8 sps:$4 sm:$0xff]   ;;  %v18897_v11 = vld [vmem:[#allocation12 + $0x104] ss:$8 sps:$4 sm:$0xff]   ;;  %v18900_v13 = vld [vmem:[#allocation12 + $0x274] ss:$8 sps:$4 sm:$0xff]  }
0x10ce   : > { %v11957_v46 = vpack.c.bf16 %v11954_v59, %v11951_v44  ;;  %v21684_v2 = vsel %vm11965_vm9, %v11959_v63, 0  ;;  %v18898_v42 = vld [vmem:[#allocation12 + $0x270] ss:$8 sps:$4 sm:$0xff]   ;;  %v18906_v35 = vld [vmem:[#allocation12 + $0x4] ss:$8 sps:$4 sm:$0xff]  }
0x10cf   : > { %v21670_v23 = vpack.c.bf16 %v11955_v50, %v11952_v55  ;;  %12477 = vmatpush1.bf16.msra.mxu1 %v18886_v45  ;;  %v18895_v55 = vld [vmem:[#allocation12 + $0x100] ss:$8 sps:$4 sm:$0xff]   ;;  %v18975_v30 = vld [vmem:[#allocation12 + $0x294] ss:$8 sps:$4 sm:$0xff]   ;;  %v18931_v58 = vld [vmem:[#allocation12 + $0x70] ss:$8 sps:$4 sm:$0xff]  }
0x10d0   : > { %v21673_v31 = vsel %vm11965_vm9, %v11957_v46, 0  ;;  %12478 = vmatprep.subr.bf16.mxu1 %v18894_v40  ;;  %v18978_v45 = vld [vmem:[#allocation12 + $0x2a4] ss:$8 sps:$4 sm:$0xff]   ;;  %v18934_v21 = vld [vmem:[#allocation12 + $0x80] ss:$8 sps:$4 sm:$0xff]  }
0x10d1   : > { %15928 = vmatprep.subr.msk.bf16.mxu0 %vm11965_vm9, %v21670_v23  ;;  %v18981_v40 = vld [vmem:[#allocation12 + $0x2b4] ss:$8 sps:$4 sm:$0xff]  }
0x10d2   : > { %11976 = vmatpush1.bf16.msra.mxu0 %v21673_v31 }
0x10d3   : > { %17430 = vmatprep.subr.bf16.mxu0 %v19424_v1  ;;  %12479 = vmatpush1.bf16.msra.mxu1 %v18892_v48  ;;  %v18937_v48 = vld [vmem:[#allocation12 + $0x90] ss:$8 sps:$4 sm:$0xff]  }
0x10d4   : > { %12480 = vmatprep.subr.bf16.mxu1 %v18900_v13  ;;  %v18979_v13 = vld [vmem:[#allocation12 + $0x2b0] ss:$8 sps:$4 sm:$0xff]  }
0x10d5   : > { %15929 = vmatmul.mubr.msk.bf16.vlgmr.msra.gmra.mrb[240].mxu0 %vm11961_vm10, %v11960_v32 }
0x10d6   : > { %17431 = vmatpush3.bf16.msra.mxu0 %v21684_v2  ;;  %17432 = vmatprep.mubr.msk.bf16.mxu0 %vm19425_vm0, %v19424_v1 }
0x10d7   : > { %15932 = vmatprep.subr.msk.bf16.mxu0 %vm11965_vm9, %v21670_v23  ;;  %12481 = vmatpush1.bf16.msra.mxu1 %v18898_v42  ;;  %v18984_v42 = vld [vmem:[#allocation12 + $0x2c4] ss:$8 sps:$4 sm:$0xff]  }
0x10d8   : > { %12718 = vmatprep.subr.bf16.mxu1 %v18906_v35  ;;  %v18940_v35 = vld [vmem:[#allocation12 + $0xa0] ss:$8 sps:$4 sm:$0xff]  }
0x10dd   : > { %17433 = vmatmul.mubr.msk.bf16.vlgmr.msra.gmra.mrb[244].mxu0 %vm11961_vm10, %v11960_v32  ;;  %v18903_v32 = vld [vmem:[#allocation12 + $0x114] ss:$8 sps:$4 sm:$0xff]  }
0x10de   : > { %12105 = vmatpush1.bf16.msra.mxu0 %v21673_v31  ;;  %12136 = vmatprep.mubr.bf16.mxu0 %v19423_v0 }
0x10df   : > { %17436 = vmatprep.subr.bf16.mxu0 %v19424_v1 }
0x10e5   : > { %15933 = vmatmul.mubr.msk.bf16.vlgmr.msra.gmra.mrb[248].mxu0 %vm11961_vm10, %v15931_v15 }
0x10e6   : > { %17437 = vmatpush3.bf16.msra.mxu0 %v21684_v2  ;;  %17438 = vmatprep.mubr.msk.bf16.mxu0 %vm19425_vm0, %v19424_v1 }
0x10e7   : > { %12433 = vmatprep.subr.bf16.mxu0 %v18840_v61  ;;  %v18909_v61 = vld [vmem:[#allocation12 + $0x124] ss:$8 sps:$4 sm:$0xff]  }
0x10ed   : > { %17439 = vmatmul.mubr.msk.bf16.vlgmr.msra.gmra.mrb[252].mxu0 %vm11961_vm10, %v15931_v15  ;;  %v18901_v15 = vld [vmem:[#allocation12 + $0x110] ss:$8 sps:$4 sm:$0xff]  }
0x10ee   : > { %12434 = vmatpush1.bf16.msra.mxu0 %v18838_v54 }
0x10ef   : > { %12435 = vmatprep.subr.bf16.mxu0 %v18843_v25  ;;  %v18904_v25 = vld [vmem:[#allocation12] ss:$8 sps:$4 sm:$0xff]  }
0x10f2   : > { %12436 = vmatpush1.bf16.msra.mxu0 %v18841_v14 }
0x10f3   : > { %12437 = vmatprep.subr.bf16.mxu0 %v18846_v41  ;;  %v18912_v41 = vld [vmem:[#allocation12 + $0x14] ss:$8 sps:$4 sm:$0xff]  }
0x10f6   : > { %12438 = vmatpush1.bf16.msra.mxu0 %v18844_v38 }
0x10f7   : > { %12439 = vmatprep.subr.bf16.mxu0 %v18849_v9 }
0x10fa   : > { %12440 = vmatpush1.bf16.msra.mxu0 %v18847_v12  ;;  %v18907_v12 = vld [vmem:[#allocation12 + $0x120] ss:$8 sps:$4 sm:$0xff]  }
0x10fb   : > { %12441 = vmatprep.subr.bf16.mxu0 %v18852_v8 }
0x10fe   : > { %12442 = vmatpush1.bf16.msra.mxu0 %v18850_v43  ;;  %v18915_v43 = vld [vmem:[#allocation12 + $0x134] ss:$8 sps:$4 sm:$0xff]  }
0x10ff   : > { %12443 = vmatprep.subr.bf16.mxu0 %v18855_v22 }
0x1102   : > { %12444 = vmatpush1.bf16.msra.mxu0 %v18853_v39  ;;  %v18910_v39 = vld [vmem:[#allocation12 + $0x10] ss:$8 sps:$4 sm:$0xff]  }
0x1103   : > { %12445 = vmatprep.subr.bf16.mxu0 %v18858_v3  ;;  %v18918_v3 = vld [vmem:[#allocation12 + $0x24] ss:$8 sps:$4 sm:$0xff]  }
0x1106   : > { %12446 = vmatpush1.bf16.msra.mxu0 %v18856_v27  ;;  %v18913_v27 = vld [vmem:[#allocation12 + $0x130] ss:$8 sps:$4 sm:$0xff]  }
0x1107   : > { %12447 = vmatprep.subr.bf16.mxu0 %v18861_v4  ;;  %v18916_v4 = vld [vmem:[#allocation12 + $0x20] ss:$8 sps:$4 sm:$0xff]  }
0x110a   : > { %12448 = vmatpush1.bf16.msra.mxu0 %v18859_v29  ;;  %v18921_v29 = vld [vmem:[#allocation12 + $0x34] ss:$8 sps:$4 sm:$0xff]  }
0x110b   : > { %12449 = vmatprep.subr.bf16.mxu0 %v18864_v6 }
0x110e   : > { %12450 = vmatpush1.bf16.msra.mxu0 %v18862_v5  ;;  %v18919_v5 = vld [vmem:[#allocation12 + $0x30] ss:$8 sps:$4 sm:$0xff]  }
0x110f   : > { %12451 = vmatprep.subr.bf16.mxu0 %v18867_v57  ;;  %v18924_v57 = vld [vmem:[#allocation12 + $0x44] ss:$8 sps:$4 sm:$0xff]  }
0x1112   : > { %12452 = vmatpush1.bf16.msra.mxu0 %v18865_v52  ;;  %v18922_v52 = vld [vmem:[#allocation12 + $0x40] ss:$8 sps:$4 sm:$0xff]  }
0x1113   : > { %12453 = vmatprep.subr.bf16.mxu0 %v18870_v17  ;;  %v18927_v17 = vld [vmem:[#allocation12 + $0x54] ss:$8 sps:$4 sm:$0xff]  }
0x1116   : > { %12454 = vmatpush1.bf16.msra.mxu0 %v18868_v34  ;;  %v16017_v34 = vld [vmem:[%s22041_s24 + $0x4] sm:$0x3] }
0x1117   : > { %12455 = vmatprep.subr.bf16.mxu0 %v18873_v62  ;;  %v18972_v62 = vld [vmem:[#allocation12 + $0x284] ss:$8 sps:$4 sm:$0xff]  }
0x111a   : > { %12456 = vmatpush1.bf16.msra.mxu0 %v18871_v20  ;;  %v18925_v20 = vld [vmem:[#allocation12 + $0x50] ss:$8 sps:$4 sm:$0xff]  }
0x111b   : > { %12457 = vmatprep.subr.bf16.mxu0 %v18876_v51  ;;  %v18928_v51 = vld [vmem:[#allocation12 + $0x60] ss:$8 sps:$4 sm:$0xff]  }
0x111e   : > { %12458 = vmatpush1.bf16.msra.mxu0 %v18874_v7  ;;  %v18930_v7 = vld [vmem:[#allocation12 + $0x64] ss:$8 sps:$4 sm:$0xff]  }
0x111f   : > { %12459 = vmatprep.subr.bf16.mxu0 %v18879_v19  ;;  %v18933_v19 = vld [vmem:[#allocation12 + $0x74] ss:$8 sps:$4 sm:$0xff]  }
0x1122   : > { %12460 = vmatpush1.bf16.msra.mxu0 %v18877_v16  ;;  %v18970_v16 = vld [vmem:[#allocation12 + $0x280] ss:$8 sps:$4 sm:$0xff]  }
0x1123   : > { %12461 = vmatprep.subr.bf16.mxu0 %v18885_v28  ;;  %v18973_v28 = vld [vmem:[#allocation12 + $0x290] ss:$8 sps:$4 sm:$0xff]  }
0x1126   : > { %12462 = vmatpush1.bf16.msra.mxu0 %v18883_v26  ;;  %v18936_v26 = vld [vmem:[#allocation12 + $0x84] ss:$8 sps:$4 sm:$0xff]  }
0x1127   : > { %12463 = vmatprep.subr.bf16.mxu0 %v18891_v49  ;;  %v18939_v49 = vld [vmem:[#allocation12 + $0x94] ss:$8 sps:$4 sm:$0xff]  }
0x112a   : > { %12464 = vmatpush1.bf16.msra.mxu0 %v18889_v37  ;;  %v18976_v37 = vld [vmem:[#allocation12 + $0x2a0] ss:$8 sps:$4 sm:$0xff]  }
0x112b   : > { %12759 = vmatprep.subr.bf16.mxu0 %v18897_v11  ;;  %v18942_v11 = vld [vmem:[#allocation12 + $0xa4] ss:$8 sps:$4 sm:$0xff]  }
0x11a8   : > { %v21703_v60 = vpop.f32.mrb[240].mxu0 }
0x11a9   : > { %v12011_v18 = vpop.f32.mrb[241].mxu0 }
0x11aa   : > { %v12013_v24 = vpop.f32.mrb[242].mxu0  ;;  %v12057_v9 = vpack.c.bf16 %v12011_v18, %v12011_v18  ;;  %v18945_v18 = vld [vmem:[#allocation12 + $0xb4] ss:$8 sps:$4 sm:$0xff]  }
0x11ab   : > { %v12014_v33 = vpop.f32.mrb[243].mxu0  ;;  %v18982_v24 = vld [vmem:[#allocation12 + $0x2c0] ss:$8 sps:$4 sm:$0xff]  }
0x11ac   : > { %v18987_v33 = vld [vmem:[#allocation12 + $0x2d4] ss:$8 sps:$4 sm:$0xff]  }
0x11b0   : > { %v12050_v47 = vpop.f32.mrb[244].mxu0 }
0x11b1   : > { %v17434_v53 = vpop.f32.mrb[245].mxu0  ;;  %v12058_v6 = vpack.c.bf16 %v12050_v47, %v12050_v47  ;;  %v18943_v47 = vld [vmem:[#allocation12 + $0xb0] ss:$8 sps:$4 sm:$0xff]  }
0x11b2   : > { %v12053_v10 = vpop.f32.mrb[246].mxu0  ;;  %v18948_v53 = vld [vmem:[#allocation12 + $0xc4] ss:$8 sps:$4 sm:$0xff]  }
0x11b3   : > { %v17435_v36 = vpop.f32.mrb[247].mxu0  ;;  %v18985_v10 = vld [vmem:[#allocation12 + $0x2d0] ss:$8 sps:$4 sm:$0xff]  }
0x11b4   : > { %v18990_v36 = vld [vmem:[#allocation12 + $0x2e4] ss:$8 sps:$4 sm:$0xff]  }
0x11b8   : > { %v12138_v56 = vpop.f32.mrb[248].mxu0 }
0x11b9   : > { %v12140_v44 = vpop.f32.mrb[249].mxu0  ;;  %v12185_v50 = vpack.c.bf16 %v12138_v56, %v12138_v56  ;;  %v18946_v56 = vld [vmem:[#allocation12 + $0xc0] ss:$8 sps:$4 sm:$0xff]  }
0x11ba   : > { %v12186_v59 = vpack.c.bf16 %v12140_v44, %v12140_v44  ;;  %v12142_v63 = vpop.f32.mrb[250].mxu0  ;;  %v18951_v44 = vld [vmem:[#allocation12 + $0xd4] ss:$8 sps:$4 sm:$0xff]  }
0x11bb   : > { %v12143_v46 = vpop.f32.mrb[251].mxu0  ;;  %v18993_v63 = vld [vmem:[#allocation12 + $0x2f4] ss:$8 sps:$4 sm:$0xff]  }
0x11bc   : > { %12465 = vmatprep.mubr.bf16.mxu0 %v12186_v59  ;;  %v18988_v59 = vld [vmem:[#allocation12 + $0x2e0] ss:$8 sps:$4 sm:$0xff]   ;;  %v18991_v46 = vld [vmem:[#allocation12 + $0x2f0] ss:$8 sps:$4 sm:$0xff]  }
0x11bd   : > { %12466 = vmatmul.mubr.bf16.vlgmr.msra.gmra.mrb[0].mxu0 %v12185_v50  ;;  %v18954_v50 = vld [vmem:[#allocation12 + $0xe4] ss:$8 sps:$4 sm:$0xff]  }
0x11be   : > { %12760 = vmatpush1.bf16.msra.mxu0 %v18895_v55  ;;  %12791 = vmatprep.mubr.bf16.mxu0 %v19423_v0  ;;  %v18949_v55 = vld [vmem:[#allocation12 + $0xd0] ss:$8 sps:$4 sm:$0xff]  }
0x11bf   : > { %12761 = vmatprep.subr.bf16.mxu0 %v18903_v32  ;;  %v18996_v32 = vld [vmem:[#allocation12 + $0x304] ss:$8 sps:$4 sm:$0xff]  }
0x11c0   : > { %v12179_v54 = vpop.f32.mrb[252].mxu0 }
0x11c1   : > { %v12187_v14 = vpack.c.bf16 %v12179_v54, %v12179_v54  ;;  %v17440_v38 = vpop.f32.mrb[253].mxu0  ;;  %v18994_v54 = vld [vmem:[#allocation12 + $0x300] ss:$8 sps:$4 sm:$0xff]  }
0x11c2   : > { %12762 = vmatpush1.bf16.msra.mxu0 %v18901_v15  ;;  %v12182_v8 = vpop.f32.mrb[254].mxu0  ;;  %v18952_v15 = vld [vmem:[#allocation12 + $0xe0] ss:$8 sps:$4 sm:$0xff]   ;;  %v12056_v38 = vpack.c.bf16 %v21703_v60, %v21703_v60 }
0x11c3   : > { %15975 = vmatmul.mubr.msk.bf16.vlgmr.msra.gmra.mrb[224].mxu1 %vm12429_vm11, %v12187_v14  ;;  %12763 = vmatprep.subr.bf16.mxu0 %v18909_v61  ;;  %v17441_v22 = vpop.f32.mrb[255].mxu0  ;;  %v18957_v61 = vld [vmem:[#allocation12 + $0xf4] ss:$8 sps:$4 sm:$0xff]   ;;  %v18960_v14 = vld [vmem:[#allocation12 + $0x384] ss:$8 sps:$4 sm:$0xff]  }
0x11c4   : > { %12719 = vmatpush1.bf16.msra.mxu1 %v18904_v25  ;;  %12750 = vmatprep.mubr.bf16.mxu1 %v12057_v9  ;;  %v18955_v25 = vld [vmem:[#allocation12 + $0xf0] ss:$8 sps:$4 sm:$0xff]   ;;  %v18963_v9 = vld [vmem:[#allocation12 + $0x394] ss:$8 sps:$4 sm:$0xff]   ;;  %v18966_v8 = vld [vmem:[#allocation12 + $0x3a4] ss:$8 sps:$4 sm:$0xff]  }
0x11c5   : > { %12720 = vmatprep.subr.bf16.mxu1 %v18912_v41  ;;  %v18958_v41 = vld [vmem:[#allocation12 + $0x380] ss:$8 sps:$4 sm:$0xff]   ;;  %v18969_v22 = vld [vmem:[#allocation12 + $0x3b4] ss:$8 sps:$4 sm:$0xff]  }
0x11c6   : > { %12764 = vmatpush1.bf16.msra.mxu0 %v18907_v12  ;;  %v18961_v12 = vld [vmem:[#allocation12 + $0x390] ss:$8 sps:$4 sm:$0xff]   ;;  %v19000_v60 = vld [vmem:[#allocation12 + $0x320] ss:$8 sps:$4 sm:$0xff]  }
0x11c7   : > { %12765 = vmatprep.subr.bf16.mxu0 %v18915_v43  ;;  %v18964_v43 = vld [vmem:[#allocation12 + $0x3a0] ss:$8 sps:$4 sm:$0xff]  }
0x11c8   : > { %12721 = vmatpush1.bf16.msra.mxu1 %v18910_v39  ;;  %v18967_v39 = vld [vmem:[#allocation12 + $0x3b0] ss:$8 sps:$4 sm:$0xff]  }
0x11c9   : > { %12722 = vmatprep.subr.bf16.mxu1 %v18918_v3  ;;  %v18997_v3 = vld [vmem:[#allocation12 + $0x310] ss:$8 sps:$4 sm:$0xff]  }
0x11ca   : > { %12766 = vmatpush1.bf16.msra.mxu0 %v18913_v27  ;;  %v18999_v27 = vld [vmem:[#allocation12 + $0x314] ss:$8 sps:$4 sm:$0xff]  }
0x11cb   : > { %16018 = vmatprep.subr.msk.bf16.mxu0 %vm11965_vm9, %v21670_v23 }
0x11cc   : > { %12723 = vmatpush1.bf16.msra.mxu1 %v18916_v4  ;;  %v19002_v4 = vld [vmem:[#allocation12 + $0x324] ss:$8 sps:$4 sm:$0xff]  }
0x11cd   : > { %16016 = vmatmul.mubr.msk.bf16.vlgmr.msra.gmra.mrb[4].mxu0 %vm12429_vm11, %v12058_v6  ;;  %12724 = vmatprep.subr.bf16.mxu1 %v18921_v29  ;;  %v19003_v29 = vld [vmem:[#allocation12 + $0x330] ss:$8 sps:$4 sm:$0xff]   ;;  %v19005_v6 = vld [vmem:[#allocation12 + $0x334] ss:$8 sps:$4 sm:$0xff]  }
0x11ce   : > { %12806 = vmatpush1.bf16.msra.mxu0 %v21673_v31  ;;  %12837 = vmatprep.mubr.bf16.mxu0 %v19423_v0 }
0x11cf   : > { %17442 = vmatprep.subr.bf16.mxu0 %v19424_v1 }
0x11d0   : > { %12725 = vmatpush1.bf16.msra.mxu1 %v18919_v5  ;;  %v19008_v5 = vld [vmem:[#allocation12 + $0x344] ss:$8 sps:$4 sm:$0xff]  }
0x11d1   : > { %12726 = vmatprep.subr.bf16.mxu1 %v18924_v57  ;;  %v19006_v57 = vld [vmem:[#allocation12 + $0x340] ss:$8 sps:$4 sm:$0xff]  }
0x11d4   : > { %12727 = vmatpush1.bf16.msra.mxu1 %v18922_v52  ;;  %v19011_v52 = vld [vmem:[#allocation12 + $0x354] ss:$8 sps:$4 sm:$0xff]  }
0x11d5   : > { %16019 = vmatmul.mubr.msk.bf16.vlgmr.msra.gmra.mrb[8].mxu0 %vm11961_vm10, %v16017_v34  ;;  %12728 = vmatprep.subr.bf16.mxu1 %v18927_v17  ;;  %v19009_v17 = vld [vmem:[#allocation12 + $0x350] ss:$8 sps:$4 sm:$0xff]  }
0x11d6   : > { %17443 = vmatpush3.bf16.msra.mxu0 %v21684_v2  ;;  %17444 = vmatprep.mubr.msk.bf16.mxu0 %vm19425_vm0, %v19424_v1 }
0x11d7   : > { %13133 = vmatprep.subr.bf16.mxu0 %v18972_v62  ;;  %v19017_v62 = vld [vmem:[#allocation12 + $0x374] ss:$8 sps:$4 sm:$0xff]  }
0x11d8   : > { %12729 = vmatpush1.bf16.msra.mxu1 %v18925_v20  ;;  %v19015_v20 = vld [vmem:[#allocation12 + $0x370] ss:$8 sps:$4 sm:$0xff]  }
0x11d9   : > { %12730 = vmatprep.subr.bf16.mxu1 %v18930_v7 }
0x11dc   : > { %12731 = vmatpush1.bf16.msra.mxu1 %v18928_v51 }
0x11dd   : > { %17445 = vmatmul.mubr.msk.bf16.vlgmr.msra.gmra.mrb[12].mxu0 %vm11961_vm10, %v16017_v34  ;;  %12732 = vmatprep.subr.bf16.mxu1 %v18933_v19  ;;  %v19012_v34 = vld [vmem:[#allocation12 + $0x360] ss:$8 sps:$4 sm:$0xff]  }
0x11de   : > { %13134 = vmatpush1.bf16.msra.mxu0 %v18970_v16 }
0x11df   : > { %13135 = vmatprep.subr.bf16.mxu0 %v18975_v30 }
0x11e0   : > { %12733 = vmatpush1.bf16.msra.mxu1 %v18931_v58 }
0x11e1   : > { %12734 = vmatprep.subr.bf16.mxu1 %v18936_v26 }
0x11e2   : > { %13136 = vmatpush1.bf16.msra.mxu0 %v18973_v28 }
0x11e3   : > { %13137 = vmatprep.subr.bf16.mxu0 %v18978_v45 }
0x11e4   : > { %12735 = vmatpush1.bf16.msra.mxu1 %v18934_v21 }
0x11e5   : > { %12736 = vmatprep.subr.bf16.mxu1 %v18939_v49 }
0x11e6   : > { %13138 = vmatpush1.bf16.msra.mxu0 %v18976_v37 }
0x11e7   : > { %13139 = vmatprep.subr.bf16.mxu0 %v18981_v40 }
0x11e8   : > { %12737 = vmatpush1.bf16.msra.mxu1 %v18937_v48 }
0x11e9   : > { %12738 = vmatprep.subr.bf16.mxu1 %v18942_v11 }
0x11ea   : > { %13140 = vmatpush1.bf16.msra.mxu0 %v18979_v13 }
0x11eb   : > { %13141 = vmatprep.subr.bf16.mxu0 %v18984_v42 }
0x11ec   : > { %12739 = vmatpush1.bf16.msra.mxu1 %v18940_v35 }
0x11ed   : > { %12740 = vmatprep.subr.bf16.mxu1 %v18945_v18 }
0x11ee   : > { %13142 = vmatpush1.bf16.msra.mxu0 %v18982_v24 }
0x11ef   : > { %13143 = vmatprep.subr.bf16.mxu0 %v18987_v33 }
0x11f0   : > { %12741 = vmatpush1.bf16.msra.mxu1 %v18943_v47 }
0x11f1   : > { %12742 = vmatprep.subr.bf16.mxu1 %v18948_v53 }
0x11f2   : > { %13144 = vmatpush1.bf16.msra.mxu0 %v18985_v10 }
0x11f3   : > { %13145 = vmatprep.subr.bf16.mxu0 %v18990_v36 }
0x11f4   : > { %12743 = vmatpush1.bf16.msra.mxu1 %v18946_v56  ;;  %v16062_v56 = vld [vmem:[%s22041_s24 + $0x6] sm:$0x3] }
0x11f5   : > { %12744 = vmatprep.subr.bf16.mxu1 %v18951_v44  ;;  %v19020_v44 = vld [vmem:[#allocation12 + $0x3c4] ss:$8 sps:$4 sm:$0xff]  }
0x11f6   : > { %13146 = vmatpush1.bf16.msra.mxu0 %v18988_v59  ;;  %v19018_v59 = vld [vmem:[#allocation12 + $0x3c0] ss:$8 sps:$4 sm:$0xff]  }
0x11f7   : > { %13147 = vmatprep.subr.bf16.mxu0 %v18993_v63  ;;  %v19023_v63 = vld [vmem:[#allocation12 + $0x3d4] ss:$8 sps:$4 sm:$0xff]  }
0x11f8   : > { %12745 = vmatpush1.bf16.msra.mxu1 %v18949_v55  ;;  %v19026_v55 = vld [vmem:[#allocation12 + $0x3e4] ss:$8 sps:$4 sm:$0xff]  }
0x11f9   : > { %12746 = vmatprep.subr.bf16.mxu1 %v18954_v50  ;;  %v19024_v50 = vld [vmem:[#allocation12 + $0x3e0] ss:$8 sps:$4 sm:$0xff]  }
0x11fa   : > { %13148 = vmatpush1.bf16.msra.mxu0 %v18991_v46  ;;  %v19029_v46 = vld [vmem:[#allocation12 + $0x3f4] ss:$8 sps:$4 sm:$0xff]  }
0x11fb   : > { %13149 = vmatprep.subr.bf16.mxu0 %v18996_v32  ;;  %v19027_v32 = vld [vmem:[#allocation12 + $0x3f0] ss:$8 sps:$4 sm:$0xff]  }
0x11fc   : > { %12747 = vmatpush1.bf16.msra.mxu1 %v18952_v15  ;;  %v19030_v15 = vld [vmem:[#allocation12 + $0x400] ss:$8 sps:$4 sm:$0xff]  }
0x11fd   : > { %12748 = vmatprep.subr.bf16.mxu1 %v18957_v61  ;;  %v19033_v61 = vld [vmem:[#allocation12 + $0x410] ss:$8 sps:$4 sm:$0xff]  }
0x11fe   : > { %13150 = vmatpush1.bf16.msra.mxu0 %v18994_v54  ;;  %v19038_v54 = vld [vmem:[#allocation12 + $0x424] ss:$8 sps:$4 sm:$0xff]  }
0x11ff   : > { %13151 = vmatprep.subr.bf16.mxu0 %v18999_v27  ;;  %v19044_v27 = vld [vmem:[#allocation12 + $0x444] ss:$8 sps:$4 sm:$0xff]  }
0x1200   : > { %12749 = vmatpush1.bf16.msra.mxu1 %v18955_v25 }
0x1201   : > { %13174 = vmatprep.subr.bf16.mxu1 %v18960_v14 }
0x1202   : > { %13152 = vmatpush1.bf16.msra.mxu0 %v18997_v3  ;;  %v19039_v3 = vld [vmem:[#allocation12 + $0x430] ss:$8 sps:$4 sm:$0xff]  }
0x1203   : > { %12751 = vmatmul.mubr.bf16.vlgmr.msra.gmra.mrb[228].mxu1 %v12056_v38  ;;  %13153 = vmatprep.subr.bf16.mxu0 %v19002_v4  ;;  %v19047_v4 = vld [vmem:[#allocation12 + $0x454] ss:$8 sps:$4 sm:$0xff]  }
0x1204   : > { %13175 = vmatpush1.bf16.msra.mxu1 %v18958_v41  ;;  %13206 = vmatprep.mubr.bf16.mxu1 %v19423_v0 }
0x1205   : > { %13176 = vmatprep.subr.bf16.mxu1 %v18963_v9 }
0x1206   : > { %13154 = vmatpush1.bf16.msra.mxu0 %v19000_v60  ;;  %v19042_v60 = vld [vmem:[#allocation12 + $0x440] ss:$8 sps:$4 sm:$0xff]  }
0x1207   : > { %13155 = vmatprep.subr.bf16.mxu0 %v19005_v6  ;;  %v19050_v6 = vld [vmem:[#allocation12 + $0x464] ss:$8 sps:$4 sm:$0xff]  }
0x1208   : > { %13177 = vmatpush1.bf16.msra.mxu1 %v18961_v12  ;;  %v19036_v12 = vld [vmem:[#allocation12 + $0x420] ss:$8 sps:$4 sm:$0xff]  }
0x1209   : > { %13178 = vmatprep.subr.bf16.mxu1 %v18966_v8 }
0x120a   : > { %13156 = vmatpush1.bf16.msra.mxu0 %v19003_v29  ;;  %v19045_v29 = vld [vmem:[#allocation12 + $0x450] ss:$8 sps:$4 sm:$0xff]  }
0x120b   : > { %13157 = vmatprep.subr.bf16.mxu0 %v19008_v5  ;;  %v19048_v5 = vld [vmem:[#allocation12 + $0x460] ss:$8 sps:$4 sm:$0xff]  }
0x120c   : > { %13179 = vmatpush1.bf16.msra.mxu1 %v18964_v43 }
0x120d   : > { %13180 = vmatprep.subr.bf16.mxu1 %v18969_v22  ;;  %v19041_v22 = vld [vmem:[#allocation12 + $0x434] ss:$8 sps:$4 sm:$0xff]  }
0x120e   : > { %13158 = vmatpush1.bf16.msra.mxu0 %v19006_v57  ;;  %v19053_v57 = vld [vmem:[#allocation12 + $0x474] ss:$8 sps:$4 sm:$0xff]  }
0x120f   : > { %13159 = vmatprep.subr.bf16.mxu0 %v19011_v52  ;;  %v19051_v52 = vld [vmem:[#allocation12 + $0x470] ss:$8 sps:$4 sm:$0xff]  }
0x1210   : > { %13181 = vmatpush1.bf16.msra.mxu1 %v18967_v39 }
0x1211   : > { %16063 = vmatprep.subr.msk.bf16.mxu1 %vm11965_vm9, %v21670_v23  ;;  %v19014_v23 = vld [vmem:[#allocation12 + $0x364] ss:$8 sps:$4 sm:$0xff]  }
0x1212   : > { %13160 = vmatpush1.bf16.msra.mxu0 %v19009_v17  ;;  %v19056_v17 = vld [vmem:[#allocation12 + $0x484] ss:$8 sps:$4 sm:$0xff]  }
0x1213   : > { %13161 = vmatprep.subr.bf16.mxu0 %v19014_v23  ;;  %v19059_v23 = vld [vmem:[#allocation12 + $0x494] ss:$8 sps:$4 sm:$0xff]  }
0x1216   : > { %13162 = vmatpush1.bf16.msra.mxu0 %v19012_v34  ;;  %v19054_v34 = vld [vmem:[#allocation12 + $0x480] ss:$8 sps:$4 sm:$0xff]  }
0x1217   : > { %13163 = vmatprep.subr.bf16.mxu0 %v19017_v62  ;;  %v19057_v62 = vld [vmem:[#allocation12 + $0x490] ss:$8 sps:$4 sm:$0xff]  }
0x121a   : > { %13164 = vmatpush1.bf16.msra.mxu0 %v19015_v20  ;;  %v19062_v20 = vld [vmem:[#allocation12 + $0x4c4] ss:$8 sps:$4 sm:$0xff]  }
0x121b   : > { %13591 = vmatprep.subr.bf16.mxu0 %v19062_v20 }
0x1290   : > { %v12467_v7 = vpop.f32.mrb[0].mxu0 }
0x1291   : > { %v12469_v51 = vpop.f32.mrb[1].mxu0 }
0x1292   : > { %v12471_v19 = vpop.f32.mrb[2].mxu0 }
0x1293   : > { %v12472_v16 = vpop.f32.mrb[3].mxu0  ;;  %v19065_v19 = vld [vmem:[#allocation12 + $0x4a4] ss:$8 sps:$4 sm:$0xff]  }
0x1294   : > { %v19066_v16 = vld [vmem:[#allocation12 + $0x4d0] ss:$8 sps:$4 sm:$0xff]  }
0x1296   : > { %v12508_v30 = vpop.f32.mrb[224].mxu1 }
0x1297   : > { %v12509_v58 = vadd.f32 %v12508_v30, %v12467_v7  ;;  %v12510_v26 = vpop.f32.mrb[225].mxu1  ;;  %v19060_v7 = vld [vmem:[#allocation12 + $0x4c0] ss:$8 sps:$4 sm:$0xff]   ;;  %v19068_v30 = vld [vmem:[#allocation12 + $0x4d4] ss:$8 sps:$4 sm:$0xff]  }
0x1298   : > { %v12511_v28 = vadd.f32 %v12510_v26, %v12469_v51  ;;  %v12512_v45 = vpop.f32.mrb[226].mxu1  ;;  %v19063_v51 = vld [vmem:[#allocation12 + $0x4a0] ss:$8 sps:$4 sm:$0xff]   ;;  %v19069_v26 = vld [vmem:[#allocation12 + $0x4b0] ss:$8 sps:$4 sm:$0xff]  }
0x1299   : > { %v12513_v21 = vpop.f32.mrb[227].mxu1  ;;  %v19072_v45 = vld [vmem:[#allocation12 + $0x4e0] ss:$8 sps:$4 sm:$0xff]  }
0x129a   : > { %v19075_v21 = vld [vmem:[#allocation12 + $0x4f0] ss:$8 sps:$4 sm:$0xff]  }
0x12a0   : > { %v12793_v49 = vpop.f32.mrb[4].mxu0 }
0x12a1   : > { %v12795_v37 = vpop.f32.mrb[5].mxu0 }
0x12a2   : > { %v12797_v40 = vpop.f32.mrb[6].mxu0 }
0x12a3   : > { %v12798_v48 = vpop.f32.mrb[7].mxu0 }
0x12a8   : > { %v12839_v11 = vpop.f32.mrb[8].mxu0 }
0x12a9   : > { %v12841_v13 = vpop.f32.mrb[9].mxu0  ;;  %v12886_v18 = vpack.c.bf16 %v12839_v11, %v12839_v11 }
0x12aa   : > { %v12887_v42 = vpack.c.bf16 %v12841_v13, %v12841_v13  ;;  %v12843_v35 = vpop.f32.mrb[10].mxu0 }
0x12ab   : > { %v12844_v24 = vpop.f32.mrb[11].mxu0 }
0x12ac   : > { %13165 = vmatprep.mubr.bf16.mxu0 %v12887_v42 }
0x12ad   : > { %13166 = vmatmul.mubr.bf16.vlgmr.msra.gmra.mrb[16].mxu0 %v12886_v18 }
0x12ae   : > { %13623 = vmatprep.mubr.bf16.mxu0 %v19423_v0  ;;  %13592 = vmatpush1.bf16.msra.mxu0 %v19060_v7 }
0x12af   : > { %13593 = vmatprep.subr.bf16.mxu0 %v19068_v30 }
0x12b0   : > { %v12880_v33 = vpop.f32.mrb[12].mxu0 }
0x12b1   : > { %v12888_v47 = vpack.c.bf16 %v12880_v33, %v12880_v33  ;;  %v17446_v53 = vpop.f32.mrb[13].mxu0 }
0x12b2   : > { %v12883_v10 = vpop.f32.mrb[14].mxu0  ;;  %13594 = vmatpush1.bf16.msra.mxu0 %v19066_v16 }
0x12b3   : > { %v17447_v36 = vpop.f32.mrb[15].mxu0  ;;  %16061 = vmatmul.mubr.msk.bf16.vlgmr.msra.gmra.mrb[232].mxu1 %vm12429_vm11, %v12888_v47 }
0x12b4   : > { %13223 = vmatpush1.bf16.msra.mxu1 %v21673_v31  ;;  %13254 = vmatprep.mubr.bf16.mxu1 %v19423_v0  ;;  %v19021_v31 = vld [vmem:[#allocation12 + $0x3d0] ss:$8 sps:$4 sm:$0xff]  }
0x12b5   : > { %17448 = vmatprep.subr.bf16.mxu1 %v19424_v1 }
0x12bb   : > { %16064 = vmatmul.mubr.msk.bf16.vlgmr.msra.gmra.mrb[236].mxu1 %vm11961_vm10, %v16062_v56 }
0x12bc   : > { %17449 = vmatpush3.bf16.msra.mxu1 %v21684_v2  ;;  %17450 = vmatprep.mubr.msk.bf16.mxu1 %vm19425_vm0, %v19424_v1  ;;  %v19032_v2 = vld [vmem:[#allocation12 + $0x404] ss:$8 sps:$4 sm:$0xff]   ;;  %v19035_v1 = vld [vmem:[#allocation12 + $0x414] ss:$8 sps:$4 sm:$0xff]  }
0x12bd   : > { %13550 = vmatprep.subr.bf16.mxu1 %v19020_v44 }
0x12c3   : > { %17451 = vmatmul.mubr.msk.bf16.vlgmr.msra.gmra.mrb[240].mxu1 %vm11961_vm10, %v16062_v56 }
0x12c4   : > { %13551 = vmatpush1.bf16.msra.mxu1 %v19018_v59 }
0x12c5   : > { %13552 = vmatprep.subr.bf16.mxu1 %v19023_v63  ;;  %v19079_v63 = vld [vmem:[%s22042_s29] sm:$0xff]  }
0x12c8   : > { %13553 = vmatpush1.bf16.msra.mxu1 %v19021_v31 }
0x12c9   : > { %13554 = vmatprep.subr.bf16.mxu1 %v19026_v55 }
0x12cc   : > { %13555 = vmatpush1.bf16.msra.mxu1 %v19024_v50  ;;  %v19080_v50 = vld [vmem:[%s22042_s29 + $0x48] sm:$0xff]  }
0x12cd   : > { %13556 = vmatprep.subr.bf16.mxu1 %v19029_v46  ;;  %v19081_v46 = vld [vmem:[%s22042_s29 + $0x8] sm:$0xff]  }
0x12d0   : > { %13557 = vmatpush1.bf16.msra.mxu1 %v19027_v32  ;;  %v19082_v32 = vld [vmem:[%s22042_s29 + $0x50] sm:$0xff]  }
0x12d1   : > { %13558 = vmatprep.subr.bf16.mxu1 %v19032_v2 }
0x12d4   : > { %13559 = vmatpush1.bf16.msra.mxu1 %v19030_v15 }
0x12d5   : > { %13560 = vmatprep.subr.bf16.mxu1 %v19035_v1 }
0x12d6   : > { %v12752_v25 = vpop.f32.mrb[228].mxu1 }
0x12d7   : > { %v12753_v14 = vadd.f32 %v12752_v25, %v12509_v58  ;;  %v12754_v41 = vpop.f32.mrb[229].mxu1  ;;  %v19071_v58 = vld [vmem:[#allocation12 + $0x4b4] ss:$8 sps:$4 sm:$0xff]  }
0x12d8   : > { %v12755_v38 = vadd.f32 %v12754_v41, %v12511_v28  ;;  %v12756_v9 = vpop.f32.mrb[230].mxu1  ;;  %13561 = vmatpush1.bf16.msra.mxu1 %v19033_v61  ;;  %v19074_v28 = vld [vmem:[#allocation12 + $0x4e4] ss:$8 sps:$4 sm:$0xff]  }
0x12d9   : > { %v21739_v8 = vadd.f32 %v12793_v49, %v12753_v14  ;;  %v12757_v43 = vpop.f32.mrb[231].mxu1  ;;  %13562 = vmatprep.subr.bf16.mxu1 %v19038_v54  ;;  %13595 = vmatprep.subr.bf16.mxu0 %v19074_v28  ;;  %v19077_v49 = vld [vmem:[#allocation12 + $0x4f4] ss:$8 sps:$4 sm:$0xff]   ;;  %v19084_v14 = vld [vmem:[%s22042_s29 + $0x58] sm:$0xff]   ;;  %v19088_v9 = vld [vmem:[%s22042_s29 + $0x20] sm:$0xff]  }
0x12da   : > { %v21741_v39 = vadd.f32 %v12795_v37, %v12755_v38  ;;  %13596 = vmatpush1.bf16.msra.mxu0 %v19072_v45  ;;  %v19078_v37 = vld [vmem:[%s22042_s29 + $0x40] sm:$0xff]   ;;  %v19083_v54 = vld [vmem:[%s22042_s29 + $0x10] sm:$0xff]   ;;  %v19085_v41 = vld [vmem:[%s22042_s29 + $0x18] sm:$0xff]  }
0x12db   : > { %13597 = vmatprep.subr.bf16.mxu0 %v19077_v49  ;;  %v19086_v38 = vld [vmem:[%s22042_s29 + $0x60] sm:$0xff]   ;;  %v19091_v43 = vld [vmem:[%s22042_s29 + $0x70] sm:$0xff]  }
0x12dc   : > { %13563 = vmatpush1.bf16.msra.mxu1 %v19036_v12  ;;  %v19089_v12 = vld [vmem:[%s22042_s29 + $0x68] sm:$0xff]   ;;  %v13646_v49 = vld [vmem:[%s22043_s25] sm:$0x1] }
0x12dd   : > { %13564 = vmatprep.subr.bf16.mxu1 %v19041_v22  ;;  %v19092_v22 = vld [vmem:[%s22042_s29 + $0x30] sm:$0xff]  }
0x12de   : > { %13598 = vmatpush1.bf16.msra.mxu0 %v19075_v21 }
0x12e0   : > { %13565 = vmatpush1.bf16.msra.mxu1 %v19039_v3  ;;  %v19094_v3 = vld [vmem:[%s22042_s29 + $0x38] sm:$0xff]  }
0x12e1   : > { %13566 = vmatprep.subr.bf16.mxu1 %v19044_v27 }
0x12e4   : > { %13567 = vmatpush1.bf16.msra.mxu1 %v19042_v60 }
0x12e5   : > { %13568 = vmatprep.subr.bf16.mxu1 %v19047_v4 }
0x12e8   : > { %13569 = vmatpush1.bf16.msra.mxu1 %v19045_v29 }
0x12e9   : > { %13570 = vmatprep.subr.bf16.mxu1 %v19050_v6  ;;  %v13634_v6 = vld [vmem:[#allocation13] sm:$0xff] }
0x12ec   : > { %13571 = vmatpush1.bf16.msra.mxu1 %v19048_v5 }
0x12ed   : > { %13572 = vmatprep.subr.bf16.mxu1 %v19053_v57 }
0x12f0   : > { %13573 = vmatpush1.bf16.msra.mxu1 %v19051_v52 }
0x12f1   : > { %13574 = vmatprep.subr.bf16.mxu1 %v19056_v17 }
0x12f4   : > { %13575 = vmatpush1.bf16.msra.mxu1 %v19054_v34  ;;  %v13636_v34 = vcombine.high %v13634_v6, %v13634_v6 }
0x12f5   : > { %13576 = vmatprep.subr.bf16.mxu1 %v19059_v23 }
0x12f8   : > { %13577 = vmatpush1.bf16.msra.mxu1 %v19057_v62 }
0x12f9   : > { %13578 = vmatprep.subr.bf16.mxu1 %v19065_v19 }
0x12fc   : > { %13579 = vmatpush1.bf16.msra.mxu1 %v19063_v51 }
0x12fd   : > { %13580 = vmatprep.subr.bf16.mxu1 %v19071_v58 }
0x1300   : > { %13581 = vmatpush1.bf16.msra.mxu1 %v19069_v26 }
0x1301   : > { %16936 = vmatprep.subr.bf16.mxu1 %v19078_v37  ;;  %v19095_v37 = vld [vmem:[%s22042_s29 + $0xc0] sm:$0xff]  }
0x1380   : > { %v13167_v40 = vpop.f32.mrb[16].mxu0 }
0x1381   : > { %v13169_v48 = vpop.f32.mrb[17].mxu0 }
0x1382   : > { %v13171_v11 = vpop.f32.mrb[18].mxu0 }
0x1383   : > { %v13172_v13 = vpop.f32.mrb[19].mxu0  ;;  %v19097_v11 = vld [vmem:[%s22042_s29 + $0xc8] sm:$0xff]  }
0x1384   : > { %v19098_v13 = vld [vmem:[%s22042_s29 + $0x88] sm:$0xff]  }
0x1386   : > { %v13208_v42 = vpop.f32.mrb[232].mxu1 }
0x1387   : > { %v13209_v35 = vadd.f32 %v13208_v42, %v13167_v40  ;;  %v13210_v18 = vpop.f32.mrb[233].mxu1  ;;  %v16109_v40 = vld [vmem:[%s22043_s25 + $0x1] sm:$0x1]  ;;  %v19099_v42 = vld [vmem:[%s22042_s29 + $0xd0] sm:$0xff]  }
0x1388   : > { %v13211_v24 = vadd.f32 %v13210_v18, %v13169_v48  ;;  %v13212_v33 = vpop.f32.mrb[234].mxu1  ;;  %v19096_v48 = vld [vmem:[%s22042_s29 + $0x80] sm:$0xff]   ;;  %v19101_v18 = vld [vmem:[%s22042_s29 + $0xd8] sm:$0xff]  }
0x1389   : > { %v13215_v47 = vadd.f32 %v13209_v35, %v21739_v8  ;;  %v13213_v53 = vpop.f32.mrb[235].mxu1  ;;  %v19090_v8 = vld [vmem:[%s22042_s29 + $0x28] sm:$0xff]   ;;  %v19100_v35 = vld [vmem:[%s22042_s29 + $0x90] sm:$0xff]   ;;  %v19103_v33 = vld [vmem:[%s22042_s29 + $0xe0] sm:$0xff]  }
0x138a   : > { %v13216_v10 = vadd.f32 %v13211_v24, %v21741_v39  ;;  %v19093_v39 = vld [vmem:[%s22042_s29 + $0x78] sm:$0xff]   ;;  %v19105_v53 = vld [vmem:[%s22042_s29 + $0xe8] sm:$0xff]  }
0x138b   : > { %v19102_v24 = vld [vmem:[%s22042_s29 + $0x98] sm:$0xff]  }
0x138e   : > { %v13256_v36 = vpop.f32.mrb[236].mxu1 }
0x138f   : > { %v13258_v56 = vpop.f32.mrb[237].mxu1  ;;  %v13303_v31 = vpack.c.bf16 %v13256_v36, %v13256_v36  ;;  %v19107_v36 = vld [vmem:[%s22042_s29 + $0xf0] sm:$0xff]  }
0x1390   : > { %v13304_v44 = vpack.c.bf16 %v13258_v56, %v13258_v56  ;;  %v13260_v59 = vpop.f32.mrb[238].mxu1  ;;  %v19108_v56 = vld [vmem:[%s22042_s29 + $0xb0] sm:$0xff]  }
0x1391   : > { %v13261_v55 = vpop.f32.mrb[239].mxu1  ;;  %v19110_v59 = vld [vmem:[%s22042_s29 + $0xb8] sm:$0xff]  }
0x1392   : > { %13582 = vmatprep.mubr.bf16.mxu1 %v13304_v44  ;;  %v19109_v44 = vld [vmem:[%s22042_s29 + $0xf8] sm:$0xff]  }
0x1393   : > { %13583 = vmatmul.mubr.bf16.vlgmr.msra.gmra.mrb[244].mxu1 %v13303_v31 }
0x1394   : > { %16937 = vmatpush3.bf16.msra.mxu1 %v19079_v63 }
0x1395   : > { %16938 = vmatprep.subr.bf16.mxu1 %v19080_v50 }
0x1396   : > { %v13297_v2 = vpop.f32.mrb[240].mxu1 }
0x1397   : > { %v13305_v15 = vpack.c.bf16 %v13297_v2, %v13297_v2  ;;  %v17452_v1 = vpop.f32.mrb[241].mxu1  ;;  %v19113_v2 = vld [vmem:[%s22042_s29 + $0x1c0] sm:$0xff]  }
0x1398   : > { %v13300_v61 = vpop.f32.mrb[242].mxu1  ;;  %16939 = vmatpush3.bf16.msra.mxu1 %v19081_v46 }
0x1399   : > { %v17453_v25 = vpop.f32.mrb[243].mxu1  ;;  %16106 = vmatmul.mubr.msk.bf16.vlgmr.msra.gmra.mrb[20].mxu0 %vm12429_vm11, %v13305_v15  ;;  %16940 = vmatprep.subr.bf16.mxu1 %v19082_v32 }
0x139a   : > { %13690 = vmatprep.mubr.bf16.mxu0 %v19423_v0  ;;  %v16227_v25 = vld [vmem:[%s22043_s25 + $0x3] sm:$0x1] }
0x139c   : > { %16941 = vmatpush3.bf16.msra.mxu1 %v19083_v54 }
0x139d   : > { %16942 = vmatprep.subr.bf16.mxu1 %v19084_v14 }
0x13a0   : > { %16943 = vmatpush3.bf16.msra.mxu1 %v19085_v41 }
0x13a1   : > { %16944 = vmatprep.subr.bf16.mxu1 %v19086_v38  ;;  %v19111_v38 = vld [vmem:[%s22042_s29 + $0x140] sm:$0xff]  }
0x13a4   : > { %16945 = vmatpush3.bf16.msra.mxu1 %v19088_v9  ;;  %v19114_v9 = vld [vmem:[%s22042_s29 + $0x180] sm:$0xff]  }
0x13a5   : > { %16946 = vmatprep.subr.bf16.mxu1 %v19089_v12  ;;  %v19117_v12 = vld [vmem:[%s22042_s29 + $0x1c8] sm:$0xff]  }
0x13a8   : > { %16947 = vmatpush3.bf16.msra.mxu1 %v19090_v8  ;;  %v19118_v8 = vld [vmem:[%s22042_s29 + $0x188] sm:$0xff]  }
0x13a9   : > { %16948 = vmatprep.subr.bf16.mxu1 %v19091_v43  ;;  %v19121_v43 = vld [vmem:[%s22042_s29 + $0x1d0] sm:$0xff]  }
0x13ac   : > { %16949 = vmatpush3.bf16.msra.mxu1 %v19092_v22  ;;  %v16176_v22 = vld [vmem:[%s22043_s25 + $0x2] sm:$0x1] }
0x13ad   : > { %16950 = vmatprep.subr.bf16.mxu1 %v19093_v39  ;;  %v19112_v39 = vld [vmem:[%s22042_s29 + $0x100] sm:$0xff]  }
0x13b0   : > { %16951 = vmatpush3.bf16.msra.mxu1 %v19094_v3  ;;  %v19116_v3 = vld [vmem:[%s22042_s29 + $0x108] sm:$0xff]  }
0x1466   : > { %v13584_v27 = vpop.f32.mrb[244].mxu1 }
0x1467   : > { %v13586_v60 = vpop.f32.mrb[245].mxu1 }
0x1468   : > { %v13588_v4 = vpop.f32.mrb[246].mxu1 }
0x1469   : > { %v13589_v29 = vpop.f32.mrb[247].mxu1  ;;  %v19122_v4 = vld [vmem:[%s22042_s29 + $0x190] sm:$0xff]  }
0x146a   : > { %v19125_v29 = vld [vmem:[%s22042_s29 + $0x1d8] sm:$0xff]  }
0x146c   : > { %v13625_v5 = vpop.f32.mrb[20].mxu0 }
0x146d   : > { %v13626_v57 = vadd.f32 %v13625_v5, %v13584_v27  ;;  %v13627_v52 = vpop.f32.mrb[21].mxu0  ;;  %v19119_v27 = vld [vmem:[%s22042_s29 + $0x150] sm:$0xff]   ;;  %v19123_v5 = vld [vmem:[%s22042_s29 + $0x158] sm:$0xff]  }
0x146e   : > { %v13628_v17 = vadd.f32 %v13627_v52, %v13586_v60  ;;  %v13629_v23 = vpop.f32.mrb[22].mxu0  ;;  %v19120_v60 = vld [vmem:[%s22042_s29 + $0x110] sm:$0xff]   ;;  %v19129_v52 = vld [vmem:[%s22042_s29 + $0x1e0] sm:$0xff]  }
0x146f   : > { %v13632_v62 = vadd.f32 %v13626_v57, %v13215_v47  ;;  %v13630_v20 = vpop.f32.mrb[23].mxu0  ;;  %v19104_v47 = vld [vmem:[%s22042_s29 + $0xa0] sm:$0xff]   ;;  %v19124_v57 = vld [vmem:[%s22042_s29 + $0x118] sm:$0xff]  }
0x1470   : > { %v13633_v7 = vadd.f32 %v13628_v17, %v13216_v10  ;;  %v19106_v10 = vld [vmem:[%s22042_s29 + $0xa8] sm:$0xff]   ;;  %v19130_v17 = vld [vmem:[%s22042_s29 + $0x1a0] sm:$0xff]  }
0x1471   : > { %v13638_v51 = vadd.f32 %v13634_v6, %v13632_v62  ;;  %v19126_v6 = vld [vmem:[%s22042_s29 + $0x198] sm:$0xff]   ;;  %v19128_v23 = vld [vmem:[%s22042_s29 + $0x120] sm:$0xff]   ;;  %v19133_v62 = vld [vmem:[%s22042_s29 + $0x1e8] sm:$0xff]  }
0x1472   : > { %v13639_v19 = vadd.f32 %v13636_v34, %v13633_v7  ;;  %v19127_v34 = vld [vmem:[%s22042_s29 + $0x160] sm:$0xff]   ;;  %v19134_v20 = vld [vmem:[%s22042_s29 + $0x1a8] sm:$0xff]  }
0x1473   : > { %v13640_v16 = vmul.f32 0.2, %v13638_v51  ;;  %v19131_v7 = vld [vmem:[%s22042_s29 + $0x168] sm:$0xff]  }
0x1474   : > { %v13641_v30 = vmul.f32 0.2, %v13639_v19 }
0x1475   : > { %v13642_v58 = vmax.f32 %v13638_v51, %v13640_v16  ;;  %v19132_v51 = vld [vmem:[%s22042_s29 + $0x128] sm:$0xff]   ;;  %v19138_v16 = vld [vmem:[%s22042_s29 + $0x1b0] sm:$0xff]  }
0x1476   : > { %v13643_v26 = vmax.f32 %v13639_v19, %v13641_v30  ;;  %v19137_v19 = vld [vmem:[%s22042_s29 + $0x1f0] sm:$0xff]  }
0x1477   : > { %v13644_v28 = vpack.c.bf16 %v13642_v58, %v13642_v58  ;;  %v19135_v30 = vld [vmem:[%s22042_s29 + $0x170] sm:$0xff]  }
0x1478   : > { %v13645_v45 = vpack.c.bf16 %v13643_v26, %v13643_v26  ;;  %v19136_v58 = vld [vmem:[%s22042_s29 + $0x130] sm:$0xff]   ;;  %v19141_v26 = vld [vmem:[%s22042_s29 + $0x1f8] sm:$0xff]  }
0x1479   : > { %v21796_v21 = vsel %vm13651_vm12, %v13644_v28, 0  ;;  %v19142_v28 = vld [vmem:[%s22042_s29 + $0x1b8] sm:$0xff]  }
0x147a   : > { %16107 = vmatprep.subr.msk.bf16.mxu0 %vm13651_vm12, %v13645_v45  ;;  %16228 = vmatprep.subr.msk.bf16.mxu1 %vm13651_vm12, %v13645_v45 }
0x147b   : > { %13659 = vmatpush1.bf16.msra.mxu0 %v21796_v21 }
0x147c   : > { %16110 = vmatprep.subr.msk.bf16.mxu0 %vm13651_vm12, %v13645_v45 }
0x147e   : > { %16108 = vmatmul.mubr.msk.bf16.vlgmr.msra.gmra.mrb[24].mxu0 %vm13647_vm13, %v13646_v49 }
0x147f   : > { %13739 = vmatpush1.bf16.msra.mxu0 %v21796_v21  ;;  %13770 = vmatprep.mubr.bf16.mxu0 %v19423_v0 }
0x1480   : > { %16914 = vmatprep.subr.bf16.mxu0 %v19095_v37 }
0x1486   : > { %16111 = vmatmul.mubr.msk.bf16.vlgmr.msra.gmra.mrb[28].mxu0 %vm13647_vm13, %v16109_v40 }
0x1487   : > { %16915 = vmatpush3.bf16.msra.mxu0 %v19096_v48 }
0x1488   : > { %16916 = vmatprep.subr.bf16.mxu0 %v19097_v11 }
0x148b   : > { %16917 = vmatpush3.bf16.msra.mxu0 %v19098_v13 }
0x148c   : > { %16918 = vmatprep.subr.bf16.mxu0 %v19099_v42 }
0x148f   : > { %16919 = vmatpush3.bf16.msra.mxu0 %v19100_v35 }
0x1490   : > { %16920 = vmatprep.subr.bf16.mxu0 %v19101_v18 }
0x1493   : > { %16921 = vmatpush3.bf16.msra.mxu0 %v19102_v24 }
0x1494   : > { %16922 = vmatprep.subr.bf16.mxu0 %v19103_v33 }
0x1497   : > { %16923 = vmatpush3.bf16.msra.mxu0 %v19104_v47 }
0x1498   : > { %16924 = vmatprep.subr.bf16.mxu0 %v19105_v53 }
0x149b   : > { %16925 = vmatpush3.bf16.msra.mxu0 %v19106_v10 }
0x149c   : > { %16926 = vmatprep.subr.bf16.mxu0 %v19107_v36 }
0x149f   : > { %16927 = vmatpush3.bf16.msra.mxu0 %v19108_v56 }
0x14a0   : > { %16928 = vmatprep.subr.bf16.mxu0 %v19109_v44 }
0x14a3   : > { %16929 = vmatpush3.bf16.msra.mxu0 %v19110_v59 }
0x14a4   : > { %16177 = vmatprep.subr.msk.bf16.mxu0 %vm13651_vm12, %v13645_v45  ;;  %v19139_v45 = vld [vmem:[%s22042_s29 + $0x178] sm:$0xff]  }
0x1551   : > { %v13692_v63 = vpop.f32.mrb[24].mxu0 }
0x1552   : > { %v13694_v31 = vpop.f32.mrb[25].mxu0  ;;  %v13699_v46 = vpack.c.bf16 %v13692_v63, %v13692_v63 }
0x1553   : > { %v13700_v55 = vpack.c.bf16 %v13694_v31, %v13694_v31  ;;  %v13696_v50 = vpop.f32.mrb[26].mxu0 }
0x1554   : > { %v13697_v32 = vpop.f32.mrb[27].mxu0 }
0x1555   : > { %14078 = vmatprep.mubr.bf16.mxu1 %v13700_v55 }
0x1556   : > { %14079 = vmatmul.mubr.bf16.vlgmr.msra.gmra.mrb[248].mxu1 %v13699_v46 }
0x1557   : > { %14310 = vmatpush1.bf16.msra.mxu1 %v21796_v21  ;;  %14341 = vmatprep.mubr.bf16.mxu1 %v19423_v0 }
0x1558   : > { %16980 = vmatprep.subr.bf16.mxu1 %v19113_v2 }
0x1559   : > { %v13772_v15 = vpop.f32.mrb[28].mxu0 }
0x155a   : > { %v13774_v1 = vpop.f32.mrb[29].mxu0  ;;  %v13779_v14 = vpack.c.bf16 %v13772_v15, %v13772_v15 }
0x155b   : > { %v13780_v61 = vpack.c.bf16 %v13774_v1, %v13774_v1  ;;  %v13776_v54 = vpop.f32.mrb[30].mxu0 }
0x155c   : > { %v13777_v41 = vpop.f32.mrb[31].mxu0 }
0x155d   : > { %13942 = vmatprep.mubr.bf16.mxu0 %v13780_v61 }
0x155e   : > { %13943 = vmatmul.mubr.bf16.vlgmr.msra.gmra.mrb[32].mxu0 %v13779_v14  ;;  %16229 = vmatmul.mubr.msk.bf16.vlgmr.msra.gmra.mrb[252].mxu1 %vm13647_vm13, %v16227_v25 }
0x155f   : > { %14092 = vmatpush1.bf16.msra.mxu0 %v21796_v21  ;;  %14123 = vmatprep.mubr.bf16.mxu0 %v19423_v0  ;;  %v19115_v0 = vld [vmem:[%s22042_s29 + $0x148] sm:$0xff]   ;;  %v19140_v21 = vld [vmem:[%s22042_s29 + $0x138] sm:$0xff]  }
0x1560   : > { %16958 = vmatprep.subr.bf16.mxu0 %v19111_v38  ;;  %16981 = vmatpush3.bf16.msra.mxu1 %v19114_v9 }
0x1561   : > { %16982 = vmatprep.subr.bf16.mxu1 %v19117_v12  ;;  %v14522_v12 = vld [vmem:[%s22044_s14] sm:$0x1] }
0x1564   : > { %16983 = vmatpush3.bf16.msra.mxu1 %v19118_v8 }
0x1565   : > { %16984 = vmatprep.subr.bf16.mxu1 %v19121_v43 }
0x1566   : > { %16178 = vmatmul.mubr.msk.bf16.vlgmr.msra.gmra.mrb[36].mxu0 %vm13647_vm13, %v16176_v22 }
0x1567   : > { %16959 = vmatpush3.bf16.msra.mxu0 %v19112_v39 }
0x1568   : > { %16960 = vmatprep.subr.bf16.mxu0 %v19115_v0  ;;  %16985 = vmatpush3.bf16.msra.mxu1 %v19122_v4 }
0x1569   : > { %16986 = vmatprep.subr.bf16.mxu1 %v19125_v29 }
0x156b   : > { %16961 = vmatpush3.bf16.msra.mxu0 %v19116_v3 }
0x156c   : > { %16962 = vmatprep.subr.bf16.mxu0 %v19119_v27  ;;  %16987 = vmatpush3.bf16.msra.mxu1 %v19126_v6 }
0x156d   : > { %16988 = vmatprep.subr.bf16.mxu1 %v19129_v52 }
0x156f   : > { %16963 = vmatpush3.bf16.msra.mxu0 %v19120_v60 }
0x1570   : > { %16964 = vmatprep.subr.bf16.mxu0 %v19123_v5  ;;  %16989 = vmatpush3.bf16.msra.mxu1 %v19130_v17 }
0x1571   : > { %16990 = vmatprep.subr.bf16.mxu1 %v19133_v62 }
0x1573   : > { %16965 = vmatpush3.bf16.msra.mxu0 %v19124_v57 }
0x1574   : > { %16966 = vmatprep.subr.bf16.mxu0 %v19127_v34  ;;  %16991 = vmatpush3.bf16.msra.mxu1 %v19134_v20 }
0x1575   : > { %16992 = vmatprep.subr.bf16.mxu1 %v19137_v19 }
0x1577   : > { %16967 = vmatpush3.bf16.msra.mxu0 %v19128_v23 }
0x1578   : > { %16968 = vmatprep.subr.bf16.mxu0 %v19131_v7  ;;  %16993 = vmatpush3.bf16.msra.mxu1 %v19138_v16 }
0x1579   : > { %16994 = vmatprep.subr.bf16.mxu1 %v19141_v26 }
0x157b   : > { %16969 = vmatpush3.bf16.msra.mxu0 %v19132_v51 }
0x157c   : > { %16970 = vmatprep.subr.bf16.mxu0 %v19135_v30  ;;  %16995 = vmatpush3.bf16.msra.mxu1 %v19142_v28 }
0x157f   : > { %16971 = vmatpush3.bf16.msra.mxu0 %v19136_v58 }
0x1580   : > { %16972 = vmatprep.subr.bf16.mxu0 %v19139_v45 }
0x1583   : > { %16973 = vmatpush3.bf16.msra.mxu0 %v19140_v21 }
0x1629   : > { %v16952_v49 = vpop.f32.mrb[248].mxu1 }
0x162a   : > { %v16953_v37 = vpop.f32.mrb[249].mxu1 }
0x162b   : > { %v16954_v40 = vadd.f32 %v16953_v37, %v16952_v49  ;;  %v16955_v48 = vpop.f32.mrb[250].mxu1 }
0x162c   : > { %v16956_v11 = vpop.f32.mrb[251].mxu1 }
0x1631   : > { %v16930_v13 = vpop.f32.mrb[32].mxu0  ;;  %v14343_v42 = vpop.f32.mrb[252].mxu1 }
0x1632   : > { %v16931_v35 = vpop.f32.mrb[33].mxu0  ;;  %v14350_v18 = vpack.c.bf16 %v14343_v42, %v14343_v42  ;;  %v14345_v24 = vpop.f32.mrb[253].mxu1 }
0x1633   : > { %v16932_v33 = vadd.f32 %v16931_v35, %v16930_v13  ;;  %v16933_v47 = vpop.f32.mrb[34].mxu0  ;;  %v14351_v53 = vpack.c.bf16 %v14345_v24, %v14345_v24  ;;  %v14347_v10 = vpop.f32.mrb[254].mxu1 }
0x1634   : > { %v16934_v36 = vpop.f32.mrb[35].mxu0  ;;  %v14348_v56 = vpop.f32.mrb[255].mxu1 }
0x1635   : > { %v14081_v44 = vadd.f32 %v16954_v40, %v16932_v33  ;;  %14513 = vmatprep.mubr.bf16.mxu1 %v14351_v53 }
0x1636   : > { %14514 = vmatmul.mubr.bf16.vlgmr.msra.gmra.mrb[0].mxu1 %v14350_v18 }
0x1639   : > { %v14125_v59 = vpop.f32.mrb[36].mxu0 }
0x163a   : > { %v14127_v63 = vpop.f32.mrb[37].mxu0  ;;  %v14132_v50 = vpack.c.bf16 %v14125_v59, %v14125_v59 }
0x163b   : > { %v14133_v31 = vpack.c.bf16 %v14127_v63, %v14127_v63  ;;  %v14129_v55 = vpop.f32.mrb[38].mxu0 }
0x163c   : > { %v14130_v46 = vpop.f32.mrb[39].mxu0 }
0x163d   : > { %14295 = vmatprep.mubr.bf16.mxu0 %v14133_v31 }
0x163e   : > { %14296 = vmatmul.mubr.bf16.vlgmr.msra.gmra.mrb[56].mxu0 %v14132_v50 }
0x1709   : > { %v16996_v32 = vpop.f32.mrb[0].mxu1 }
0x170a   : > { %v16997_v2 = vpop.f32.mrb[1].mxu1 }
0x170b   : > { %v16998_v15 = vadd.f32 %v16997_v2, %v16996_v32  ;;  %v16999_v1 = vpop.f32.mrb[2].mxu1 }
0x170c   : > { %v17000_v61 = vpop.f32.mrb[3].mxu1 }
0x1711   : > { %v16974_v54 = vpop.f32.mrb[56].mxu0 }
0x1712   : > { %v16975_v25 = vpop.f32.mrb[57].mxu0 }
0x1713   : > { %v16976_v14 = vadd.f32 %v16975_v25, %v16974_v54  ;;  %v16977_v41 = vpop.f32.mrb[58].mxu0 }
0x1714   : > { %v16978_v38 = vpop.f32.mrb[59].mxu0 }
0x1715   : > { %v14303_v9 = vadd.f32 %v16976_v14, %v14081_v44 }
0x1717   : > { %v14521_v8 = vadd.f32 %v16998_v15, %v14303_v9 }
0x1719   : > { %v14523_v43 = vadd.f32 %v14522_v12, %v14521_v8 }
0x171b   : > { %14524 = vst [vmem:[%s713_s1] sm:$0x1] %v14523_v43 }
0x171c PF: > { %s22046_s22 = sld [smem:[#allocation20_spill]] }
0x1722   : > { %s34_s0 = sadd.s32 1, %s22046_s22  }
0x1723   : > { %p31_p9 = scmp.ge.s32.totalorder %s34_s0, 4  }
0x1725   :  { %33 = sbr.rel (!%p31_p9) target bundleno = 15 (0xf), region = 193 }
0x172c   :  { %14542 = vsyncpa [#allocation3], 1 }
0x172d   :  { %14544 = vsyncpa [#allocation3 + $0x1], 1 }
0x172e   :  { %14545 = vsyncpa [#allocation5], 1 }
0x172f   :  { %14546 = vsyncpa [#allocation8], 1 }
0x1730   :  { %14547 = vsyncpa [#allocation11], 1 }
0x1731   :  { %14548 = vsyncpa [#allocation14], 1 }

</bundles_post_ra>
